<compile_context>
chip_gen: v7x
topology: tpu7x:2x2x1
jax: 0.10.0
libtpu: 0.0.40
codegen_flags: <defaults>
</compile_context>

<pallas_src>
import functools
import numpy as np
import jax
import jax.numpy as jnp
from jax.experimental import pallas as pl
from jax.experimental.pallas import tpu as pltpu

# ---------------- config (AlphaFold-multimer template embedding) ----------------
NUM_PAIR_CHANNEL = 64
QUERY_NUM_CHANNELS = 2 * NUM_PAIR_CHANNEL          # 128
DGRAM_NUM_BINS, DGRAM_MIN_BIN, DGRAM_MAX_BIN = 39, 3.25, 50.75
NUM_BLOCKS = 2                                     # template_pair_stack.num_block
TRI_MUL_INTERMEDIATE = 64
ATTN_NUM_HEAD = 4
ATTN_HEAD_DIM = NUM_PAIR_CHANNEL // ATTN_NUM_HEAD  # 16
TRANSITION_FACTOR = 2
PAIR_EMB_IN_CHANNELS = (39, 1, 22, 22, 1, 1, 1, 1, QUERY_NUM_CHANNELS)
GEO_FEAT_CHANNELS = 39 + 1 + 22 + 22 + 1 + 1 + 1 + 1   # 88 (everything except query emb)
LN_EPS = 1e-5                                      # torch.nn.LayerNorm default
BF16 = jnp.bfloat16
# TODO(synk): AF2_BF16 env switch of the PyTorch module not ported; activations stay f32
# (matmul operands are cast to bf16 in-kernel with f32 accumulation).

_CP = getattr(pltpu, "CompilerParams", getattr(pltpu, "TPUCompilerParams", None))
_PAR = _CP(dimension_semantics=("parallel",)) if _CP is not None else None


# ---------------------------------- small helpers ----------------------------------
def _row_tile(m, cap=1024):
    """Largest row tile <= cap dividing m (prefer multiples of 128, then 8)."""
    if m <= cap:
        return m
    for step in (128, 8):
        t = (cap // step) * step
        while t >= step:
            if m % t == 0:
                return t
            t -= step
    return m


def _attn_row_tile(r, target_rows=4096):
    bb = max(1, min(r, target_rows // max(r, 1)))
    while r % bb != 0:
        bb -= 1
    return bb


def _chan_tile(inter, r, budget_bytes=20 * 1024 * 1024):
    per_chan = 6 * r * r * 4          # a, b, out blocks, double-buffered, f32
    cb = max(1, min(inter, budget_bytes // per_chan))
    while inter % cb != 0:
        cb -= 1
    return cb


def _blk_rows(tm, *rest):
    zeros = (0,) * len(rest)
    return pl.BlockSpec((tm,) + tuple(rest), lambda i: (i,) + zeros)


def _blk_full(*shape):
    zeros = (0,) * len(shape)
    return pl.BlockSpec(tuple(shape), lambda i: zeros)


def _ln(x, g, b):
    x = x.astype(jnp.float32)
    mu = jnp.mean(x, axis=-1, keepdims=True)
    xc = x - mu
    var = jnp.mean(xc * xc, axis=-1, keepdims=True)
    return xc * jax.lax.rsqrt(var + LN_EPS) * g + b


def _dot(a, b):
    # bf16 MXU matmul, f32 accumulation
    return jax.lax.dot_general(
        a.astype(BF16), b.astype(BF16),
        dimension_numbers=(((a.ndim - 1,), (0,)), ((), ())),
        preferred_element_type=jnp.float32)


# ---------------------------------- Pallas kernels ----------------------------------
def _input_embed_kernel(f_ref, qe_ref, g_ref, b_ref, wf_ref, wq_ref, bias_ref, o_ref):
    # sum of 9 per-feature Linears == geo_feats @ W_geo + LN(query_emb) @ W_qe + sum(b)
    y = _dot(f_ref[...], wf_ref[...])
    y = y + _dot(_ln(qe_ref[...], g_ref[...], b_ref[...]), wq_ref[...]) + bias_ref[...]
    o_ref[...] = y.astype(o_ref.dtype)


def _trimul_in_kernel(x_ref, m_ref, g_ref, b_ref, w_ref, bias_ref, pg_ref, g2_ref, *, inter):
    # LN + fused [projection | gate | gating_linear] matmul; emit the masked, gated
    # projection and the sigmoid output gate in one pass (ln_in never hits HBM).
    xn = _ln(x_ref[...], g_ref[...], b_ref[...])
    y = _dot(xn, w_ref[...]) + bias_ref[...]
    proj = y[:, : 2 * inter]
    gate = y[:, 2 * inter: 4 * inter]
    out_gate = y[:, 4 * inter:]
    pg_ref[...] = (m_ref[...] * proj * jax.nn.sigmoid(gate)).astype(pg_ref.dtype)
    g2_ref[...] = jax.nn.sigmoid(out_gate).astype(g2_ref.dtype)


def _bmm_kernel(a_ref, b_ref, o_ref):
    # per-channel batched matmul on the MXU: out[c] = a[c] @ b[c]
    o_ref[...] = jax.lax.dot_general(
        a_ref[...].astype(BF16), b_ref[...].astype(BF16),
        dimension_numbers=(((2,), (1,)), ((0,), (0,))),
        preferred_element_type=jnp.float32).astype(o_ref.dtype)


def _trimul_out_kernel(t_ref, g2_ref, res_ref, g_ref, b_ref, w_ref, bias_ref, o_ref,
                       *, transposed_in):
    # center LN + output projection + output gate + residual; consumes the triangle
    # product directly in channel-major layout (in-kernel transpose saves an HBM relayout).
    t = t_ref[...]
    if transposed_in:
        t = t.T
    y = _dot(_ln(t, g_ref[...], b_ref[...]), w_ref[...]) + bias_ref[...]
    o_ref[...] = (res_ref[...].astype(jnp.float32) + g2_ref[...] * y).astype(o_ref.dtype)


def _attn_proj_kernel(x_ref, g_ref, b_ref, w_ref, bias_ref, qkvg_ref, nb_ref, *, c4):
    # query_norm + fused [q|k|v|gate|feat_2d] projection: one (64, 260) matmul
    xn = _ln(x_ref[...], g_ref[...], b_ref[...])
    y = _dot(xn, w_ref[...]) + bias_ref[...]
    qkvg_ref[...] = y[:, :c4].astype(qkvg_ref.dtype)
    nb_ref[...] = y[:, c4:].astype(nb_ref.dtype)


def _attn_kernel(x_ref, m_ref, nb_ref, res_ref, wo_ref, bo_ref, o_ref, *, heads, head_dim):
    # row-batched triangle attention: lane-dense (bb, R, 4C) input, in-kernel head split,
    # softmax, gating, output projection and residual all fused.
    c = heads * head_dim
    x = x_ref[...].astype(jnp.float32)                 # (bb, R, 4C)
    mask = m_ref[...][..., 0].astype(jnp.float32)      # (bb, R)
    bias_m = (1e9 * (mask - 1.0))[:, None, :]          # key-dim mask bias
    nb = nb_ref[...].astype(jnp.float32)               # (H, R, R)
    head_out = []
    for h in range(heads):
        lo, hi = h * head_dim, (h + 1) * head_dim
        qh = x[..., lo:hi]                 # q already scaled by head_dim**-0.5 (in W)
        kh = x[..., c + lo: c + hi]
        vh = x[..., 2 * c + lo: 2 * c + hi]
        gh = x[..., 3 * c + lo: 3 * c + hi]
        logits = jax.lax.dot_general(
            qh.astype(BF16), kh.astype(BF16),
            dimension_numbers=(((2,), (2,)), ((0,), (0,))),
            preferred_element_type=jnp.float32)        # (bb, R, R)
        logits = logits + bias_m + nb[h][None, :, :]
        logits = logits - jnp.max(logits, axis=-1, keepdims=True)
        p = jnp.exp(logits)
        p = p / jnp.sum(p, axis=-1, keepdims=True)
        wa = jax.lax.dot_general(
            p.astype(BF16), vh.astype(BF16),
            dimension_numbers=(((2,), (1,)), ((0,), (0,))),
            preferred_element_type=jnp.float32)        # (bb, R, D)
        head_out.append(wa * jax.nn.sigmoid(gh))
    o = jnp.concatenate(head_out, axis=-1)             # (bb, R, C)
    bb_, r_, _ = o.shape
    y = _dot(o.reshape(bb_ * r_, c), wo_ref[...]) + bo_ref[...]
    o_ref[...] = (res_ref[...].astype(jnp.float32) + y.reshape(bb_, r_, c)).astype(o_ref.dtype)


def _transition_kernel(x_ref, g_ref, b_ref, w1_ref, b1_ref, w2_ref, b2_ref, o_ref):
    # LN + 64->128 ReLU + 128->64 + residual, intermediate stays in VMEM
    xn = _ln(x_ref[...], g_ref[...], b_ref[...])
    h = jnp.maximum(_dot(xn, w1_ref[...]) + b1_ref[...], 0.0)
    y = _dot(h, w2_ref[...]) + b2_ref[...]
    o_ref[...] = (x_ref[...].astype(jnp.float32) + y).astype(o_ref.dtype)


def _norm_accum_kernel(x_ref, g_ref, b_ref, acc_ref, o_ref):
    # per-template output LayerNorm fused with the running sum over templates
    o_ref[...] = (acc_ref[...].astype(jnp.float32)
                  + _ln(x_ref[...], g_ref[...], b_ref[...])).astype(o_ref.dtype)


def _relu_linear_kernel(x_ref, w_ref, b_ref, o_ref):
    # final ReLU + output Linear (the 1/num_templates average is folded into W)
    y = _dot(jnp.maximum(x_ref[...].astype(jnp.float32), 0.0), w_ref[...]) + b_ref[...]
    o_ref[...] = y.astype(o_ref.dtype)


# ---------------------------------- module wrappers ----------------------------------
def fused_triangle_multiplication(act, pair_mask, p, *, outgoing):
    """Returns act + FusedTriangleMultiplication(act, pair_mask) (residual fused)."""
    R, _, C = act.shape
    I = TRI_MUL_INTERMEDIATE
    M = R * R
    act2 = act.reshape(M, C)
    tm = _row_tile(M)
    w_cat = jnp.concatenate([p['projection']['w'], p['gate']['w'],
                             p['gating_linear']['w']], axis=1)        # (C, 4I + C)
    b_cat = jnp.concatenate([p['projection']['b'], p['gate']['b'],
                             p['gating_linear']['b']])[None, :]
    ncat = 4 * I + C
    pg, g2 = pl.pallas_call(
        functools.partial(_trimul_in_kernel, inter=I),
        out_shape=(jax.ShapeDtypeStruct((M, 2 * I), act.dtype),
                   jax.ShapeDtypeStruct((M, C), act.dtype)),
        grid=(M // tm,),
        in_specs=[_blk_rows(tm, C), _blk_rows(tm, 1),
                  _blk_full(1, C), _blk_full(1, C),
                  _blk_full(C, ncat), _blk_full(1, ncat)],
        out_specs=(_blk_rows(tm, 2 * I), _blk_rows(tm, C)),
        compiler_params=_PAR,
    )(act2, pair_mask.reshape(M, 1),
      p['left_norm']['g'][None, :], p['left_norm']['b'][None, :], w_cat, b_cat)

    proj3 = pg.reshape(R, R, 2 * I)
    left, right = proj3[..., :I], proj3[..., I:]
    if outgoing:   # 'ikc,jkc->ijc'
        a = jnp.transpose(left, (2, 0, 1))     # a[c,i,k] = left[i,k,c]
        b = jnp.transpose(right, (2, 1, 0))    # b[c,k,j] = right[j,k,c]
    else:          # 'kjc,kic->ijc'
        a = jnp.transpose(right, (2, 1, 0))    # a[c,i,k] = right[k,i,c]
        b = jnp.transpose(left, (2, 0, 1))     # b[c,k,j] = left[k,j,c]
    cb = _chan_tile(I, R)
    tri_cm = pl.pallas_call(
        _bmm_kernel,
        out_shape=jax.ShapeDtypeStruct((I, R, R), act.dtype),
        grid=(I // cb,),
        in_specs=[pl.BlockSpec((cb, R, R), lambda c: (c, 0, 0)),
                  pl.BlockSpec((cb, R, R), lambda c: (c, 0, 0))],
        out_specs=pl.BlockSpec((cb, R, R), lambda c: (c, 0, 0)),
        compiler_params=_PAR,
    )(a, b)                                    # tri_cm[c, i, j] (channel-major)

    tm2 = _row_tile(M)
    use_cm = (tm2 == M) or (tm2 % 128 == 0)
    if use_cm:
        tri_in = tri_cm.reshape(I, M)          # free reshape, stays channel-major
        tri_spec = pl.BlockSpec((I, tm2), lambda i: (0, i))
    else:
        # TODO(synk): fall back to one extra relayout when no 128-aligned tile divides M
        tri_in = jnp.transpose(tri_cm, (1, 2, 0)).reshape(M, I)
        tri_spec = _blk_rows(tm2, I)
    out = pl.pallas_call(
        functools.partial(_trimul_out_kernel, transposed_in=use_cm),
        out_shape=jax.ShapeDtypeStruct((M, C), act.dtype),
        grid=(M // tm2,),
        in_specs=[tri_spec, _blk_rows(tm2, C), _blk_rows(tm2, C),
                  _blk_full(1, I), _blk_full(1, I),
                  _blk_full(I, C), _blk_full(1, C)],
        out_specs=_blk_rows(tm2, C),
        compiler_params=_PAR,
    )(tri_in, g2, act2,
      p['center_norm']['g'][None, :], p['center_norm']['b'][None, :],
      p['output_projection']['w'], p['output_projection']['b'][None, :])
    return out.reshape(R, R, C)


def triangle_attention(act, pair_mask, p, *, per_column):
    """Returns act + TriangleAttention(act, pair_mask) (residual fused)."""
    if per_column:
        act_in = jnp.transpose(act, (1, 0, 2))
        mask_in = pair_mask.T
    else:
        act_in, mask_in = act, pair_mask
    R, _, C = act_in.shape
    H, D = ATTN_NUM_HEAD, ATTN_HEAD_DIM
    M = R * R
    act2 = act_in.reshape(M, C)
    tm = _row_tile(M)
    w_cat = jnp.concatenate([p['q_w'] * (D ** -0.5), p['k_w'], p['v_w'],
                             p['gating_w'], p['feat_2d_w']], axis=1)   # (C, 4C + H)
    b_cat = jnp.concatenate([jnp.zeros((3 * C,), act.dtype), p['gating_b'],
                             jnp.zeros((H,), act.dtype)])[None, :]
    qkvg, nbf = pl.pallas_call(
        functools.partial(_attn_proj_kernel, c4=4 * C),
        out_shape=(jax.ShapeDtypeStruct((M, 4 * C), act.dtype),
                   jax.ShapeDtypeStruct((M, H), act.dtype)),
        grid=(M // tm,),
        in_specs=[_blk_rows(tm, C), _blk_full(1, C), _blk_full(1, C),
                  _blk_full(C, 4 * C + H), _blk_full(1, 4 * C + H)],
        out_specs=(_blk_rows(tm, 4 * C), _blk_rows(tm, H)),
        compiler_params=_PAR,
    )(act2, p['query_norm']['g'][None, :], p['query_norm']['b'][None, :], w_cat, b_cat)

    nb = jnp.transpose(nbf.reshape(R, R, H), (2, 0, 1))    # (H, Q, K), tiny
    bb = _attn_row_tile(R)
    out = pl.pallas_call(
        functools.partial(_attn_kernel, heads=H, head_dim=D),
        out_shape=jax.ShapeDtypeStruct((R, R, C), act.dtype),
        grid=(R // bb,),
        in_specs=[_blk_rows(bb, R, 4 * C), _blk_rows(bb, R, 1), _blk_full(H, R, R),
                  _blk_rows(bb, R, C), _blk_full(C, C), _blk_full(1, C)],
        out_specs=_blk_rows(bb, R, C),
        compiler_params=_PAR,
    )(qkvg.reshape(R, R, 4 * C), mask_in[..., None], nb, act_in,
      p['output_w'], p['output_b'][None, :])
    if per_column:
        out = jnp.transpose(out, (1, 0, 2))
    return out


def pair_transition(act, p):
    """Returns act + Transition(act) (pair mask unused in the multimer Transition)."""
    R, _, C = act.shape
    M = R * R
    Ct = TRANSITION_FACTOR * C
    tm = _row_tile(M)
    out = pl.pallas_call(
        _transition_kernel,
        out_shape=jax.ShapeDtypeStruct((M, C), act.dtype),
        grid=(M // tm,),
        in_specs=[_blk_rows(tm, C), _blk_full(1, C), _blk_full(1, C),
                  _blk_full(C, Ct), _blk_full(1, Ct),
                  _blk_full(Ct, C), _blk_full(1, C)],
        out_specs=_blk_rows(tm, C),
        compiler_params=_PAR,
    )(act.reshape(M, C),
      p['input_norm']['g'][None, :], p['input_norm']['b'][None, :],
      p['transition1']['w'], p['transition1']['b'][None, :],
      p['transition2']['w'], p['transition2']['b'][None, :])
    return out.reshape(R, R, C)


def construct_input(query_embedding, aatype, atom_pos, atom_mask, multichain_mask_2d, params):
    R = aatype.shape[0]
    dtype = query_embedding.dtype
    GLY_ID, N_IDX, CA_IDX, C_IDX, CB_IDX = 7, 0, 1, 2, 3
    is_gly = (aatype == GLY_ID)
    pseudo_beta = jnp.where(is_gly[:, None], atom_pos[:, CA_IDX], atom_pos[:, CB_IDX])
    pseudo_beta_mask = jnp.where(is_gly, atom_mask[:, CA_IDX], atom_mask[:, CB_IDX]).astype(dtype)
    pb_mask_2d = pseudo_beta_mask[:, None] * pseudo_beta_mask[None, :] * multichain_mask_2d
    lower = jnp.square(jnp.linspace(DGRAM_MIN_BIN, DGRAM_MAX_BIN, DGRAM_NUM_BINS))
    upper = jnp.concatenate([lower[1:], jnp.array([1e8], lower.dtype)])
    d2 = jnp.sum(jnp.square(pseudo_beta[:, None] - pseudo_beta[None, :]), axis=-1, keepdims=True)
    dgram = ((d2 > lower) & (d2 < upper)).astype(dtype) * pb_mask_2d[..., None]
    aa1hot = jax.nn.one_hot(aatype, 22, dtype=dtype)
    # backbone rigid frames (Gram-Schmidt on N/CA/C), as in make_backbone_affine
    n_xyz, ca_xyz, c_xyz = atom_pos[:, N_IDX], atom_pos[:, CA_IDX], atom_pos[:, C_IDX]
    backbone_mask = (atom_mask[:, N_IDX] * atom_mask[:, CA_IDX] * atom_mask[:, C_IDX]).astype(dtype)
    eps = 1e-6
    _normalize = lambda v: v * jax.lax.rsqrt(jnp.maximum(jnp.sum(v * v, -1, keepdims=True), eps * eps))
    e0 = _normalize(c_xyz - ca_xyz)
    v1 = n_xyz - ca_xyz
    e1 = _normalize(v1 - jnp.sum(v1 * e0, -1, keepdims=True) * e0)
    e2 = jnp.cross(e0, e1)
    rot = jnp.stack([e0, e1, e2], axis=-1)                 # (R, 3, 3)
    diff = ca_xyz[None, :, :] - ca_xyz[:, None, :]         # t_j - t_i
    rigid_vec = jnp.einsum('iba,ijb->ija', rot, diff)      # R_i^T (t_j - t_i)
    unit_vector = rigid_vec * jax.lax.rsqrt(
        jnp.maximum(jnp.sum(rigid_vec ** 2, -1, keepdims=True), eps * eps))
    bb_mask_2d = backbone_mask[:, None] * backbone_mask[None, :] * multichain_mask_2d
    unit_vector = unit_vector * bb_mask_2d[..., None]
    feats_geo = jnp.concatenate([
        dgram,
        pb_mask_2d[..., None],
        jnp.broadcast_to(aa1hot[None, :, :], (R, R, 22)),
        jnp.broadcast_to(aa1hot[:, None, :], (R, R, 22)),
        unit_vector[..., 0:1], unit_vector[..., 1:2], unit_vector[..., 2:3],
        bb_mask_2d[..., None],
    ], axis=-1).astype(dtype)                              # (R, R, 88)
    M = R * R
    tm = _row_tile(M)
    w_geo = jnp.concatenate([p['w'] for p in params['pair_emb'][:-1]], axis=0)   # (88, 64)
    w_qe = params['pair_emb'][-1]['w']                                           # (128, 64)
    b_all = sum(p['b'] for p in params['pair_emb'])[None, :]
    act = pl.pallas_call(
        _input_embed_kernel,
        out_shape=jax.ShapeDtypeStruct((M, NUM_PAIR_CHANNEL), dtype),
        grid=(M // tm,),
        in_specs=[_blk_rows(tm, GEO_FEAT_CHANNELS), _blk_rows(tm, QUERY_NUM_CHANNELS),
                  _blk_full(1, QUERY_NUM_CHANNELS), _blk_full(1, QUERY_NUM_CHANNELS),
                  _blk_full(GEO_FEAT_CHANNELS, NUM_PAIR_CHANNEL),
                  _blk_full(QUERY_NUM_CHANNELS, NUM_PAIR_CHANNEL),
                  _blk_full(1, NUM_PAIR_CHANNEL)],
        out_specs=_blk_rows(tm, NUM_PAIR_CHANNEL),
        compiler_params=_PAR,
    )(feats_geo.reshape(M, GEO_FEAT_CHANNELS),
      query_embedding.reshape(M, QUERY_NUM_CHANNELS),
      params['query_embedding_norm']['g'][None, :], params['query_embedding_norm']['b'][None, :],
      w_geo, w_qe, b_all)
    return act.reshape(R, R, NUM_PAIR_CHANNEL)


def single_template_embedding_act(params, query_embedding, aatype, atom_pos, atom_mask,
                                  padding_mask_2d, multichain_mask_2d):
    act = construct_input(query_embedding, aatype, atom_pos, atom_mask, multichain_mask_2d, params)
    for blk in params['stack']:
        act = fused_triangle_multiplication(act, padding_mask_2d, blk['tri_mul_out'], outgoing=True)
        act = fused_triangle_multiplication(act, padding_mask_2d, blk['tri_mul_in'], outgoing=False)
        act = triangle_attention(act, padding_mask_2d, blk['attn_start'], per_column=False)
        act = triangle_attention(act, padding_mask_2d, blk['attn_end'], per_column=True)
        act = pair_transition(act, blk['pair_transition'])
    R = act.shape[0]
    return act.reshape(R * R, NUM_PAIR_CHANNEL)    # pre output-LN activations


def _norm_and_accumulate(act2d, acc2d, ln_p):
    M, C = act2d.shape
    tm = _row_tile(M)
    return pl.pallas_call(
        _norm_accum_kernel,
        out_shape=jax.ShapeDtypeStruct((M, C), act2d.dtype),
        grid=(M // tm,),
        in_specs=[_blk_rows(tm, C), _blk_full(1, C), _blk_full(1, C), _blk_rows(tm, C)],
        out_specs=_blk_rows(tm, C),
        input_output_aliases={3: 0},      # accumulate template sum in place
        compiler_params=_PAR,
    )(act2d, ln_p['g'][None, :], ln_p['b'][None, :], acc2d)


def template_embedding_forward(params, query_embedding, template_aatype,
                               template_all_atom_positions, template_all_atom_mask,
                               padding_mask_2d, multichain_mask_2d):
    num_templates = template_aatype.shape[0]
    R = query_embedding.shape[0]
    M = R * R
    summed = jnp.zeros((M, NUM_PAIR_CHANNEL), query_embedding.dtype)
    for i in range(num_templates):
        act2d = single_template_embedding_act(
            params, query_embedding, template_aatype[i],
            template_all_atom_positions[i], template_all_atom_mask[i],
            padding_mask_2d, multichain_mask_2d)
        summed = _norm_and_accumulate(act2d, summed, params['output_layer_norm'])
    # embedding = relu(summed / n) @ W + b == relu(summed) @ (W / n) + b   (n > 0)
    w_avg = params['output_linear']['w'] * (1.0 / num_templates)
    tm = _row_tile(M)
    out = pl.pallas_call(
        _relu_linear_kernel,
        out_shape=jax.ShapeDtypeStruct((M, 2 * NUM_PAIR_CHANNEL), query_embedding.dtype),
        grid=(M // tm,),
        in_specs=[_blk_rows(tm, NUM_PAIR_CHANNEL),
                  _blk_full(NUM_PAIR_CHANNEL, 2 * NUM_PAIR_CHANNEL),
                  _blk_full(1, 2 * NUM_PAIR_CHANNEL)],
        out_specs=_blk_rows(tm, 2 * NUM_PAIR_CHANNEL),
        compiler_params=_PAR,
    )(summed, w_avg, params['output_linear']['b'][None, :])
    return out.reshape(R, R, 2 * NUM_PAIR_CHANNEL)


# ---------------------------------- deterministic parameter init ----------------------
def init_linear(key, din, dout):
    kw, kb = jax.random.split(key)
    return {'w': jax.random.normal(kw, (din, dout), jnp.float32) / np.sqrt(din),
            'b': jax.random.normal(kb, (dout,), jnp.float32) * 0.01}


def init_layernorm(dim):
    return {'g': jnp.ones((dim,), jnp.float32), 'b': jnp.zeros((dim,), jnp.float32)}


def init_attention(key):
    ks = jax.random.split(key, 6)
    c, hd = NUM_PAIR_CHANNEL, ATTN_NUM_HEAD * ATTN_HEAD_DIM
    s = 1.0 / np.sqrt(c)
    return {'query_norm': init_layernorm(c),
            'feat_2d_w': jax.random.normal(ks[0], (c, ATTN_NUM_HEAD), jnp.float32) * s,
            'q_w': jax.random.normal(ks[1], (c, hd), jnp.float32) * s,
            'k_w': jax.random.normal(ks[2], (c, hd), jnp.float32) * s,
            'v_w': jax.random.normal(ks[3], (c, hd), jnp.float32) * s,
            'gating_w': jax.random.normal(ks[4], (c, hd), jnp.float32) * s,
            'gating_b': jnp.ones((hd,), jnp.float32),
            'output_w': jax.random.normal(ks[5], (hd, c), jnp.float32) / np.sqrt(hd),
            'output_b': jnp.zeros((c,), jnp.float32)}


def init_tri_mult(key):
    ks = jax.random.split(key, 4)
    c, it = NUM_PAIR_CHANNEL, TRI_MUL_INTERMEDIATE
    return {'left_norm': init_layernorm(c),
            'projection': init_linear(ks[0], c, 2 * it),
            'gate': init_linear(ks[1], c, 2 * it),
            'center_norm': init_layernorm(it),
            'output_projection': init_linear(ks[2], it, c),
            'gating_linear': init_linear(ks[3], c, c)}


def init_transition(key):
    ks = jax.random.split(key, 2)
    c = NUM_PAIR_CHANNEL
    return {'input_norm': init_layernorm(c),
            'transition1': init_linear(ks[0], c, TRANSITION_FACTOR * c),
            'transition2': init_linear(ks[1], TRANSITION_FACTOR * c, c)}


def init_block(key):
    ks = jax.random.split(key, 5)
    return {'tri_mul_out': init_tri_mult(ks[0]),
            'tri_mul_in': init_tri_mult(ks[1]),
            'attn_start': init_attention(ks[2]),
            'attn_end': init_attention(ks[3]),
            'pair_transition': init_transition(ks[4])}


def init_params(key):
    n_emb = len(PAIR_EMB_IN_CHANNELS)
    ks = jax.random.split(key, 1 + n_emb + NUM_BLOCKS)
    return {'query_embedding_norm': init_layernorm(QUERY_NUM_CHANNELS),
            'output_layer_norm': init_layernorm(NUM_PAIR_CHANNEL),
            'pair_emb': [init_linear(k, cin, NUM_PAIR_CHANNEL)
                         for k, cin in zip(ks[1:1 + n_emb], PAIR_EMB_IN_CHANNELS)],
            'stack': [init_block(k) for k in ks[1 + n_emb:]],
            'output_linear': init_linear(ks[0], NUM_PAIR_CHANNEL, 2 * NUM_PAIR_CHANNEL)}


# ---------------------------------- main ----------------------------------
if __name__ == "__main__":
    key = jax.random.PRNGKey(0)
    k_par, k_qe, k_aa, k_pos, k_mask = jax.random.split(key, 5)
    R = 8
    NUM_TEMPLATES = 2

    params = init_params(k_par)
    query_embedding = jax.random.normal(k_qe, (R, R, QUERY_NUM_CHANNELS), jnp.float32)
    template_aatype = jax.random.randint(k_aa, (NUM_TEMPLATES, R), 0, 21)
    template_all_atom_positions = jax.random.normal(k_pos, (NUM_TEMPLATES, R, 37, 3), jnp.float32) * 5.0
    template_all_atom_mask = (jax.random.uniform(k_mask, (NUM_TEMPLATES, R, 37)) > 0.1).astype(jnp.float32)
    padding_mask_2d = jnp.ones((R, R), jnp.float32)
    chain_id = (jnp.arange(R) >= R // 2).astype(jnp.int32)
    multichain_mask_2d = (chain_id[:, None] == chain_id[None, :]).astype(jnp.float32)

    fwd = jax.jit(template_embedding_forward)
    out = fwd(params, query_embedding, template_aatype, template_all_atom_positions,
              template_all_atom_mask, padding_mask_2d, multichain_mask_2d)
    out = jax.block_until_ready(out)
    assert out.shape == (R, R, 2 * NUM_PAIR_CHANNEL)
    assert bool(jnp.all(jnp.isfinite(out)))
    print("KERNEL_OK")
</pallas_src>

<mosaic_0001>
module attributes {stable_mosaic.version = 11 : i64} {
  func.func @_input_embed_kernel(%arg0: i32, %arg1: memref<64x88xf32, #tpu.memory_space<vmem>>, %arg2: memref<64x128xf32, #tpu.memory_space<vmem>>, %arg3: memref<1x128xf32, #tpu.memory_space<vmem>>, %arg4: memref<1x128xf32, #tpu.memory_space<vmem>>, %arg5: memref<88x64xf32, #tpu.memory_space<vmem>>, %arg6: memref<128x64xf32, #tpu.memory_space<vmem>>, %arg7: memref<1x64xf32, #tpu.memory_space<vmem>>, %arg8: memref<64x64xf32, #tpu.memory_space<vmem>>) attributes {dimension_semantics = [#tpu.dimension_semantics<parallel>], iteration_bounds = array<i64: 1>, scalar_prefetch = 0 : i64, scratch_operands = 0 : i64, tpu.core_type = #tpu.core_type<tc>, window_params = [{transform_indices = @transform_0, window_bounds = array<i64: 64, 88>}, {transform_indices = @transform_1, window_bounds = array<i64: 64, 128>}, {pipeline_mode = #tpu.pipeline_mode<synchronous>, transform_indices = @transform_2, window_bounds = array<i64: 1, 128>}, {pipeline_mode = #tpu.pipeline_mode<synchronous>, transform_indices = @transform_3, window_bounds = array<i64: 1, 128>}, {pipeline_mode = #tpu.pipeline_mode<synchronous>, transform_indices = @transform_4, window_bounds = array<i64: 88, 64>}, {pipeline_mode = #tpu.pipeline_mode<synchronous>, transform_indices = @transform_5, window_bounds = array<i64: 128, 64>}, {pipeline_mode = #tpu.pipeline_mode<synchronous>, transform_indices = @transform_6, window_bounds = array<i64: 1, 64>}, {transform_indices = @transform_7, window_bounds = array<i64: 64, 64>}]} {
    %c0 = arith.constant 0 : index
    %c0_0 = arith.constant 0 : index
    %0 = vector.load %arg1[%c0, %c0_0] : memref<64x88xf32, #tpu.memory_space<vmem>>, vector<64x88xf32>
    %c0_1 = arith.constant 0 : index
    %c0_2 = arith.constant 0 : index
    %1 = vector.load %arg5[%c0_1, %c0_2] : memref<88x64xf32, #tpu.memory_space<vmem>>, vector<88x64xf32>
    %2 = arith.truncf %0 : vector<64x88xf32> to vector<64x88xbf16>
    %3 = arith.truncf %1 : vector<88x64xf32> to vector<88x64xbf16>
    %cst = arith.constant dense<0.000000e+00> : vector<64x64xf32>
    %4 = tpu.matmul %2, %3, %cst {dimension_numbers = #tpu.dot_dimension_numbers<[1], [0], [0], [1], [0, 0, 1, 1], [], []>} : vector<64x88xbf16>, vector<88x64xbf16>, vector<64x64xf32> -> vector<64x64xf32>
    %c0_3 = arith.constant 0 : index
    %c0_4 = arith.constant 0 : index
    %5 = vector.load %arg2[%c0_3, %c0_4] : memref<64x128xf32, #tpu.memory_space<vmem>>, vector<64x128xf32>
    %c0_5 = arith.constant 0 : index
    %c0_6 = arith.constant 0 : index
    %6 = vector.load %arg3[%c0_5, %c0_6] : memref<1x128xf32, #tpu.memory_space<vmem>>, vector<1x128xf32>
    %c0_7 = arith.constant 0 : index
    %c0_8 = arith.constant 0 : index
    %7 = vector.load %arg4[%c0_7, %c0_8] : memref<1x128xf32, #tpu.memory_space<vmem>>, vector<1x128xf32>
    %cst_9 = arith.constant dense<0.000000e+00> : vector<64xf32>
    %8 = vector.multi_reduction <add>, %5, %cst_9 [1] : vector<64x128xf32> to vector<64xf32>
    %9 = vector.shape_cast %8 : vector<64xf32> to vector<64x1xf32>
    %cst_10 = arith.constant 1.280000e+02 : f32
    %10 = vector.broadcast %cst_10 : f32 to vector<64x1xf32>
    %11 = arith.divf %9, %10 : vector<64x1xf32>
    %12 = vector.broadcast %11 : vector<64x1xf32> to vector<64x128xf32>
    %13 = arith.subf %5, %12 : vector<64x128xf32>
    %14 = arith.mulf %13, %13 : vector<64x128xf32>
    %cst_11 = arith.constant dense<0.000000e+00> : vector<64xf32>
    %15 = vector.multi_reduction <add>, %14, %cst_11 [1] : vector<64x128xf32> to vector<64xf32>
    %16 = vector.shape_cast %15 : vector<64xf32> to vector<64x1xf32>
    %cst_12 = arith.constant 1.280000e+02 : f32
    %17 = vector.broadcast %cst_12 : f32 to vector<64x1xf32>
    %18 = arith.divf %16, %17 : vector<64x1xf32>
    %cst_13 = arith.constant 9.99999974E-6 : f32
    %19 = vector.broadcast %cst_13 : f32 to vector<64x1xf32>
    %20 = arith.addf %18, %19 : vector<64x1xf32>
    %21 = math.rsqrt %20 : vector<64x1xf32>
    %22 = vector.broadcast %21 : vector<64x1xf32> to vector<64x128xf32>
    %23 = arith.mulf %13, %22 : vector<64x128xf32>
    %24 = vector.broadcast %6 : vector<1x128xf32> to vector<64x128xf32>
    %25 = arith.mulf %23, %24 : vector<64x128xf32>
    %26 = vector.broadcast %7 : vector<1x128xf32> to vector<64x128xf32>
    %27 = arith.addf %25, %26 : vector<64x128xf32>
    %c0_14 = arith.constant 0 : index
    %c0_15 = arith.constant 0 : index
    %28 = vector.load %arg6[%c0_14, %c0_15] : memref<128x64xf32, #tpu.memory_space<vmem>>, vector<128x64xf32>
    %29 = arith.truncf %27 : vector<64x128xf32> to vector<64x128xbf16>
    %30 = arith.truncf %28 : vector<128x64xf32> to vector<128x64xbf16>
    %cst_16 = arith.constant dense<0.000000e+00> : vector<64x64xf32>
    %31 = tpu.matmul %29, %30, %cst_16 {dimension_numbers = #tpu.dot_dimension_numbers<[1], [0], [0], [1], [0, 0, 1, 1], [], []>} : vector<64x128xbf16>, vector<128x64xbf16>, vector<64x64xf32> -> vector<64x64xf32>
    %32 = arith.addf %4, %31 : vector<64x64xf32>
    %c0_17 = arith.constant 0 : index
    %c0_18 = arith.constant 0 : index
    %33 = vector.load %arg7[%c0_17, %c0_18] : memref<1x64xf32, #tpu.memory_space<vmem>>, vector<1x64xf32>
    %34 = vector.broadcast %33 : vector<1x64xf32> to vector<64x64xf32>
    %35 = arith.addf %32, %34 : vector<64x64xf32>
    %c0_19 = arith.constant 0 : index
    %c0_20 = arith.constant 0 : index
    %36 = vector.load %arg8[%c0_19, %c0_20] : memref<64x64xf32, #tpu.memory_space<vmem>>, vector<64x64xf32>
    tpu.vector_store %arg8[%c0_19, %c0_20], %35 {strides = array<i32>} : memref<64x64xf32, #tpu.memory_space<vmem>>, vector<64x64xf32>,
    return
  }
  func.func @transform_0(%arg0: i32) -> (i32, i32) {
    %c0_i32 = arith.constant 0 : i32
    %c0_i32_0 = arith.constant 0 : i32
    return %arg0, %c0_i32 : i32, i32
  }
  func.func @transform_1(%arg0: i32) -> (i32, i32) {
    %c0_i32 = arith.constant 0 : i32
    %c0_i32_0 = arith.constant 0 : i32
    return %arg0, %c0_i32 : i32, i32
  }
  func.func @transform_2(%arg0: i32) -> (i32, i32) {
    %c0_i32 = arith.constant 0 : i32
    %c0_i32_0 = arith.constant 0 : i32
    %c0_i32_1 = arith.constant 0 : i32
    return %c0_i32, %c0_i32_0 : i32, i32
  }
  func.func @transform_3(%arg0: i32) -> (i32, i32) {
    %c0_i32 = arith.constant 0 : i32
    %c0_i32_0 = arith.constant 0 : i32
    %c0_i32_1 = arith.constant 0 : i32
    return %c0_i32, %c0_i32_0 : i32, i32
  }
  func.func @transform_4(%arg0: i32) -> (i32, i32) {
    %c0_i32 = arith.constant 0 : i32
    %c0_i32_0 = arith.constant 0 : i32
    %c0_i32_1 = arith.constant 0 : i32
    return %c0_i32, %c0_i32_0 : i32, i32
  }
  func.func @transform_5(%arg0: i32) -> (i32, i32) {
    %c0_i32 = arith.constant 0 : i32
    %c0_i32_0 = arith.constant 0 : i32
    %c0_i32_1 = arith.constant 0 : i32
    return %c0_i32, %c0_i32_0 : i32, i32
  }
  func.func @transform_6(%arg0: i32) -> (i32, i32) {
    %c0_i32 = arith.constant 0 : i32
    %c0_i32_0 = arith.constant 0 : i32
    %c0_i32_1 = arith.constant 0 : i32
    return %c0_i32, %c0_i32_0 : i32, i32
  }
  func.func @transform_7(%arg0: i32) -> (i32, i32) {
    %c0_i32 = arith.constant 0 : i32
    %c0_i32_0 = arith.constant 0 : i32
    return %arg0, %c0_i32 : i32, i32
  }
}

module attributes {stable_mosaic.version = 11 : i64} {
  func.func @_trimul_in_kernel(%arg0: i32, %arg1: memref<64x64xf32, #tpu.memory_space<vmem>>, %arg2: memref<64x1xf32, #tpu.memory_space<vmem>>, %arg3: memref<1x64xf32, #tpu.memory_space<vmem>>, %arg4: memref<1x64xf32, #tpu.memory_space<vmem>>, %arg5: memref<64x320xf32, #tpu.memory_space<vmem>>, %arg6: memref<1x320xf32, #tpu.memory_space<vmem>>, %arg7: memref<64x128xf32, #tpu.memory_space<vmem>>, %arg8: memref<64x64xf32, #tpu.memory_space<vmem>>) attributes {dimension_semantics = [#tpu.dimension_semantics<parallel>], iteration_bounds = array<i64: 1>, scalar_prefetch = 0 : i64, scratch_operands = 0 : i64, tpu.core_type = #tpu.core_type<tc>, window_params = [{transform_indices = @transform_0, window_bounds = array<i64: 64, 64>}, {transform_indices = @transform_1, window_bounds = array<i64: 64, 1>}, {pipeline_mode = #tpu.pipeline_mode<synchronous>, transform_indices = @transform_2, window_bounds = array<i64: 1, 64>}, {pipeline_mode = #tpu.pipeline_mode<synchronous>, transform_indices = @transform_3, window_bounds = array<i64: 1, 64>}, {pipeline_mode = #tpu.pipeline_mode<synchronous>, transform_indices = @transform_4, window_bounds = array<i64: 64, 320>}, {pipeline_mode = #tpu.pipeline_mode<synchronous>, transform_indices = @transform_5, window_bounds = array<i64: 1, 320>}, {transform_indices = @transform_6, window_bounds = array<i64: 64, 128>}, {transform_indices = @transform_7, window_bounds = array<i64: 64, 64>}]} {
    %c0 = arith.constant 0 : index
    %c0_0 = arith.constant 0 : index
    %0 = vector.load %arg1[%c0, %c0_0] : memref<64x64xf32, #tpu.memory_space<vmem>>, vector<64x64xf32>
    %c0_1 = arith.constant 0 : index
    %c0_2 = arith.constant 0 : index
    %1 = vector.load %arg3[%c0_1, %c0_2] : memref<1x64xf32, #tpu.memory_space<vmem>>, vector<1x64xf32>
    %c0_3 = arith.constant 0 : index
    %c0_4 = arith.constant 0 : index
    %2 = vector.load %arg4[%c0_3, %c0_4] : memref<1x64xf32, #tpu.memory_space<vmem>>, vector<1x64xf32>
    %cst = arith.constant dense<0.000000e+00> : vector<64xf32>
    %3 = vector.multi_reduction <add>, %0, %cst [1] : vector<64x64xf32> to vector<64xf32>
    %4 = vector.shape_cast %3 : vector<64xf32> to vector<64x1xf32>
    %cst_5 = arith.constant 6.400000e+01 : f32
    %5 = vector.broadcast %cst_5 : f32 to vector<64x1xf32>
    %6 = arith.divf %4, %5 : vector<64x1xf32>
    %7 = vector.broadcast %6 : vector<64x1xf32> to vector<64x64xf32>
    %8 = arith.subf %0, %7 : vector<64x64xf32>
    %9 = arith.mulf %8, %8 : vector<64x64xf32>
    %cst_6 = arith.constant dense<0.000000e+00> : vector<64xf32>
    %10 = vector.multi_reduction <add>, %9, %cst_6 [1] : vector<64x64xf32> to vector<64xf32>
    %11 = vector.shape_cast %10 : vector<64xf32> to vector<64x1xf32>
    %cst_7 = arith.constant 6.400000e+01 : f32
    %12 = vector.broadcast %cst_7 : f32 to vector<64x1xf32>
    %13 = arith.divf %11, %12 : vector<64x1xf32>
    %cst_8 = arith.constant 9.99999974E-6 : f32
    %14 = vector.broadcast %cst_8 : f32 to vector<64x1xf32>
    %15 = arith.addf %13, %14 : vector<64x1xf32>
    %16 = math.rsqrt %15 : vector<64x1xf32>
    %17 = vector.broadcast %16 : vector<64x1xf32> to vector<64x64xf32>
    %18 = arith.mulf %8, %17 : vector<64x64xf32>
    %19 = vector.broadcast %1 : vector<1x64xf32> to vector<64x64xf32>
    %20 = arith.mulf %18, %19 : vector<64x64xf32>
    %21 = vector.broadcast %2 : vector<1x64xf32> to vector<64x64xf32>
    %22 = arith.addf %20, %21 : vector<64x64xf32>
    %c0_9 = arith.constant 0 : index
    %c0_10 = arith.constant 0 : index
    %23 = vector.load %arg5[%c0_9, %c0_10] : memref<64x320xf32, #tpu.memory_space<vmem>>, vector<64x320xf32>
    %24 = arith.truncf %22 : vector<64x64xf32> to vector<64x64xbf16>
    %25 = arith.truncf %23 : vector<64x320xf32> to vector<64x320xbf16>
    %cst_11 = arith.constant dense<0.000000e+00> : vector<64x320xf32>
    %26 = tpu.matmul %24, %25, %cst_11 {dimension_numbers = #tpu.dot_dimension_numbers<[1], [0], [0], [1], [0, 0, 1, 1], [], []>} : vector<64x64xbf16>, vector<64x320xbf16>, vector<64x320xf32> -> vector<64x320xf32>
    %c0_12 = arith.constant 0 : index
    %c0_13 = arith.constant 0 : index
    %27 = vector.load %arg6[%c0_12, %c0_13] : memref<1x320xf32, #tpu.memory_space<vmem>>, vector<1x320xf32>
    %28 = vector.broadcast %27 : vector<1x320xf32> to vector<64x320xf32>
    %29 = arith.addf %26, %28 : vector<64x320xf32>
    %30 = vector.extract_strided_slice %29 {offsets = [0, 0], sizes = [64, 128], strides = [1, 1]} : vector<64x320xf32> to vector<64x128xf32>
    %31 = vector.extract_strided_slice %29 {offsets = [0, 128], sizes = [64, 128], strides = [1, 1]} : vector<64x320xf32> to vector<64x128xf32>
    %32 = vector.extract_strided_slice %29 {offsets = [0, 256], sizes = [64, 64], strides = [1, 1]} : vector<64x320xf32> to vector<64x64xf32>
    %c0_14 = arith.constant 0 : index
    %c0_15 = arith.constant 0 : index
    %33 = vector.load %arg2[%c0_14, %c0_15] : memref<64x1xf32, #tpu.memory_space<vmem>>, vector<64x1xf32>
    %34 = vector.broadcast %33 : vector<64x1xf32> to vector<64x128xf32>
    %35 = arith.mulf %34, %30 : vector<64x128xf32>
    %36 = arith.negf %31 : vector<64x128xf32>
    %37 = math.exp %36 : vector<64x128xf32>
    %cst_16 = arith.constant 1.000000e+00 : f32
    %38 = vector.broadcast %cst_16 : f32 to vector<64x128xf32>
    %39 = arith.addf %38, %37 : vector<64x128xf32>
    %40 = arith.divf %38, %39 : vector<64x128xf32>
    %41 = arith.mulf %35, %40 : vector<64x128xf32>
    %c0_17 = arith.constant 0 : index
    %c0_18 = arith.constant 0 : index
    %42 = vector.load %arg7[%c0_17, %c0_18] : memref<64x128xf32, #tpu.memory_space<vmem>>, vector<64x128xf32>
    tpu.vector_store %arg7[%c0_17, %c0_18], %41 {strides = array<i32>} : memref<64x128xf32, #tpu.memory_space<vmem>>, vector<64x128xf32>,
    %43 = arith.negf %32 : vector<64x64xf32>
    %44 = math.exp %43 : vector<64x64xf32>
    %cst_19 = arith.constant 1.000000e+00 : f32
    %45 = vector.broadcast %cst_19 : f32 to vector<64x64xf32>
    %46 = arith.addf %45, %44 : vector<64x64xf32>
    %47 = arith.divf %45, %46 : vector<64x64xf32>
    %c0_20 = arith.constant 0 : index
    %c0_21 = arith.constant 0 : index
    %48 = vector.load %arg8[%c0_20, %c0_21] : memref<64x64xf32, #tpu.memory_space<vmem>>, vector<64x64xf32>
    tpu.vector_store %arg8[%c0_20, %c0_21], %47 {strides = array<i32>} : memref<64x64xf32, #tpu.memory_space<vmem>>, vector<64x64xf32>,
    return
  }
  func.func @transform_0(%arg0: i32) -> (i32, i32) {
    %c0_i32 = arith.constant 0 : i32
    %c0_i32_0 = arith.constant 0 : i32
    return %arg0, %c0_i32 : i32, i32
  }
  func.func @transform_1(%arg0: i32) -> (i32, i32) {
    %c0_i32 = arith.constant 0 : i32
    %c0_i32_0 = arith.constant 0 : i32
    return %arg0, %c0_i32 : i32, i32
  }
  func.func @transform_2(%arg0: i32) -> (i32, i32) {
    %c0_i32 = arith.constant 0 : i32
    %c0_i32_0 = arith.constant 0 : i32
    %c0_i32_1 = arith.constant 0 : i32
    return %c0_i32, %c0_i32_0 : i32, i32
  }
  func.func @transform_3(%arg0: i32) -> (i32, i32) {
    %c0_i32 = arith.constant 0 : i32
    %c0_i32_0 = arith.constant 0 : i32
    %c0_i32_1 = arith.constant 0 : i32
    return %c0_i32, %c0_i32_0 : i32, i32
  }
  func.func @transform_4(%arg0: i32) -> (i32, i32) {
    %c0_i32 = arith.constant 0 : i32
    %c0_i32_0 = arith.constant 0 : i32
    %c0_i32_1 = arith.constant 0 : i32
    return %c0_i32, %c0_i32_0 : i32, i32
  }
  func.func @transform_5(%arg0: i32) -> (i32, i32) {
    %c0_i32 = arith.constant 0 : i32
    %c0_i32_0 = arith.constant 0 : i32
    %c0_i32_1 = arith.constant 0 : i32
    return %c0_i32, %c0_i32_0 : i32, i32
  }
  func.func @transform_6(%arg0: i32) -> (i32, i32) {
    %c0_i32 = arith.constant 0 : i32
    %c0_i32_0 = arith.constant 0 : i32
    return %arg0, %c0_i32 : i32, i32
  }
  func.func @transform_7(%arg0: i32) -> (i32, i32) {
    %c0_i32 = arith.constant 0 : i32
    %c0_i32_0 = arith.constant 0 : i32
    return %arg0, %c0_i32 : i32, i32
  }
}

module attributes {stable_mosaic.version = 11 : i64} {
  func.func @_bmm_kernel(%arg0: i32, %arg1: memref<64x8x8xf32, #tpu.memory_space<vmem>>, %arg2: memref<64x8x8xf32, #tpu.memory_space<vmem>>, %arg3: memref<64x8x8xf32, #tpu.memory_space<vmem>>) attributes {dimension_semantics = [#tpu.dimension_semantics<parallel>], iteration_bounds = array<i64: 1>, scalar_prefetch = 0 : i64, scratch_operands = 0 : i64, tpu.core_type = #tpu.core_type<tc>, window_params = [{transform_indices = @transform_0, window_bounds = array<i64: 64, 8, 8>}, {transform_indices = @transform_1, window_bounds = array<i64: 64, 8, 8>}, {transform_indices = @transform_2, window_bounds = array<i64: 64, 8, 8>}]} {
    %c0 = arith.constant 0 : index
    %c0_0 = arith.constant 0 : index
    %c0_1 = arith.constant 0 : index
    %0 = vector.load %arg1[%c0, %c0_0, %c0_1] : memref<64x8x8xf32, #tpu.memory_space<vmem>>, vector<64x8x8xf32>
    %1 = arith.truncf %0 : vector<64x8x8xf32> to vector<64x8x8xbf16>
    %c0_2 = arith.constant 0 : index
    %c0_3 = arith.constant 0 : index
    %c0_4 = arith.constant 0 : index
    %2 = vector.load %arg2[%c0_2, %c0_3, %c0_4] : memref<64x8x8xf32, #tpu.memory_space<vmem>>, vector<64x8x8xf32>
    %3 = arith.truncf %2 : vector<64x8x8xf32> to vector<64x8x8xbf16>
    %cst = arith.constant dense<0.000000e+00> : vector<64x8x8xf32>
    %4 = tpu.matmul %1, %3, %cst {dimension_numbers = #tpu.dot_dimension_numbers<[2], [1], [1], [2], [0, 0, 0, 1, 1, 2], [0], [0]>} : vector<64x8x8xbf16>, vector<64x8x8xbf16>, vector<64x8x8xf32> -> vector<64x8x8xf32>
    %c0_5 = arith.constant 0 : index
    %c0_6 = arith.constant 0 : index
    %c0_7 = arith.constant 0 : index
    %5 = vector.load %arg3[%c0_5, %c0_6, %c0_7] : memref<64x8x8xf32, #tpu.memory_space<vmem>>, vector<64x8x8xf32>
    tpu.vector_store %arg3[%c0_5, %c0_6, %c0_7], %4 {strides = array<i32>} : memref<64x8x8xf32, #tpu.memory_space<vmem>>, vector<64x8x8xf32>,
    return
  }
  func.func @transform_0(%arg0: i32) -> (i32, i32, i32) {
    %c0_i32 = arith.constant 0 : i32
    %c0_i32_0 = arith.constant 0 : i32
    %c0_i32_1 = arith.constant 0 : i32
    return %arg0, %c0_i32, %c0_i32_0 : i32, i32, i32
  }
  func.func @transform_1(%arg0: i32) -> (i32, i32, i32) {
    %c0_i32 = arith.constant 0 : i32
    %c0_i32_0 = arith.constant 0 : i32
    %c0_i32_1 = arith.constant 0 : i32
    return %arg0, %c0_i32, %c0_i32_0 : i32, i32, i32
  }
  func.func @transform_2(%arg0: i32) -> (i32, i32, i32) {
    %c0_i32 = arith.constant 0 : i32
    %c0_i32_0 = arith.constant 0 : i32
    %c0_i32_1 = arith.constant 0 : i32
    return %arg0, %c0_i32, %c0_i32_0 : i32, i32, i32
  }
}

module attributes {stable_mosaic.version = 11 : i64} {
  func.func @_trimul_out_kernel(%arg0: i32, %arg1: memref<64x64xf32, #tpu.memory_space<vmem>>, %arg2: memref<64x64xf32, #tpu.memory_space<vmem>>, %arg3: memref<64x64xf32, #tpu.memory_space<vmem>>, %arg4: memref<1x64xf32, #tpu.memory_space<vmem>>, %arg5: memref<1x64xf32, #tpu.memory_space<vmem>>, %arg6: memref<64x64xf32, #tpu.memory_space<vmem>>, %arg7: memref<1x64xf32, #tpu.memory_space<vmem>>, %arg8: memref<64x64xf32, #tpu.memory_space<vmem>>) attributes {dimension_semantics = [#tpu.dimension_semantics<parallel>], iteration_bounds = array<i64: 1>, scalar_prefetch = 0 : i64, scratch_operands = 0 : i64, tpu.core_type = #tpu.core_type<tc>, window_params = [{transform_indices = @transform_0, window_bounds = array<i64: 64, 64>}, {transform_indices = @transform_1, window_bounds = array<i64: 64, 64>}, {transform_indices = @transform_2, window_bounds = array<i64: 64, 64>}, {pipeline_mode = #tpu.pipeline_mode<synchronous>, transform_indices = @transform_3, window_bounds = array<i64: 1, 64>}, {pipeline_mode = #tpu.pipeline_mode<synchronous>, transform_indices = @transform_4, window_bounds = array<i64: 1, 64>}, {pipeline_mode = #tpu.pipeline_mode<synchronous>, transform_indices = @transform_5, window_bounds = array<i64: 64, 64>}, {pipeline_mode = #tpu.pipeline_mode<synchronous>, transform_indices = @transform_6, window_bounds = array<i64: 1, 64>}, {transform_indices = @transform_7, window_bounds = array<i64: 64, 64>}]} {
    %c0 = arith.constant 0 : index
    %c0_0 = arith.constant 0 : index
    %0 = vector.load %arg1[%c0, %c0_0] : memref<64x64xf32, #tpu.memory_space<vmem>>, vector<64x64xf32>
    %1 = tpu.transpose %0, [1, 0] : vector<64x64xf32> -> vector<64x64xf32>
    %c0_1 = arith.constant 0 : index
    %c0_2 = arith.constant 0 : index
    %2 = vector.load %arg4[%c0_1, %c0_2] : memref<1x64xf32, #tpu.memory_space<vmem>>, vector<1x64xf32>
    %c0_3 = arith.constant 0 : index
    %c0_4 = arith.constant 0 : index
    %3 = vector.load %arg5[%c0_3, %c0_4] : memref<1x64xf32, #tpu.memory_space<vmem>>, vector<1x64xf32>
    %cst = arith.constant dense<0.000000e+00> : vector<64xf32>
    %4 = vector.multi_reduction <add>, %1, %cst [1] : vector<64x64xf32> to vector<64xf32>
    %5 = vector.shape_cast %4 : vector<64xf32> to vector<64x1xf32>
    %cst_5 = arith.constant 6.400000e+01 : f32
    %6 = vector.broadcast %cst_5 : f32 to vector<64x1xf32>
    %7 = arith.divf %5, %6 : vector<64x1xf32>
    %8 = vector.broadcast %7 : vector<64x1xf32> to vector<64x64xf32>
    %9 = arith.subf %1, %8 : vector<64x64xf32>
    %10 = arith.mulf %9, %9 : vector<64x64xf32>
    %cst_6 = arith.constant dense<0.000000e+00> : vector<64xf32>
    %11 = vector.multi_reduction <add>, %10, %cst_6 [1] : vector<64x64xf32> to vector<64xf32>
    %12 = vector.shape_cast %11 : vector<64xf32> to vector<64x1xf32>
    %cst_7 = arith.constant 6.400000e+01 : f32
    %13 = vector.broadcast %cst_7 : f32 to vector<64x1xf32>
    %14 = arith.divf %12, %13 : vector<64x1xf32>
    %cst_8 = arith.constant 9.99999974E-6 : f32
    %15 = vector.broadcast %cst_8 : f32 to vector<64x1xf32>
    %16 = arith.addf %14, %15 : vector<64x1xf32>
    %17 = math.rsqrt %16 : vector<64x1xf32>
    %18 = vector.broadcast %17 : vector<64x1xf32> to vector<64x64xf32>
    %19 = arith.mulf %9, %18 : vector<64x64xf32>
    %20 = vector.broadcast %2 : vector<1x64xf32> to vector<64x64xf32>
    %21 = arith.mulf %19, %20 : vector<64x64xf32>
    %22 = vector.broadcast %3 : vector<1x64xf32> to vector<64x64xf32>
    %23 = arith.addf %21, %22 : vector<64x64xf32>
    %c0_9 = arith.constant 0 : index
    %c0_10 = arith.constant 0 : index
    %24 = vector.load %arg6[%c0_9, %c0_10] : memref<64x64xf32, #tpu.memory_space<vmem>>, vector<64x64xf32>
    %25 = arith.truncf %23 : vector<64x64xf32> to vector<64x64xbf16>
    %26 = arith.truncf %24 : vector<64x64xf32> to vector<64x64xbf16>
    %cst_11 = arith.constant dense<0.000000e+00> : vector<64x64xf32>
    %27 = tpu.matmul %25, %26, %cst_11 {dimension_numbers = #tpu.dot_dimension_numbers<[1], [0], [0], [1], [0, 0, 1, 1], [], []>} : vector<64x64xbf16>, vector<64x64xbf16>, vector<64x64xf32> -> vector<64x64xf32>
    %c0_12 = arith.constant 0 : index
    %c0_13 = arith.constant 0 : index
    %28 = vector.load %arg7[%c0_12, %c0_13] : memref<1x64xf32, #tpu.memory_space<vmem>>, vector<1x64xf32>
    %29 = vector.broadcast %28 : vector<1x64xf32> to vector<64x64xf32>
    %30 = arith.addf %27, %29 : vector<64x64xf32>
    %c0_14 = arith.constant 0 : index
    %c0_15 = arith.constant 0 : index
    %31 = vector.load %arg3[%c0_14, %c0_15] : memref<64x64xf32, #tpu.memory_space<vmem>>, vector<64x64xf32>
    %c0_16 = arith.constant 0 : index
    %c0_17 = arith.constant 0 : index
    %32 = vector.load %arg2[%c0_16, %c0_17] : memref<64x64xf32, #tpu.memory_space<vmem>>, vector<64x64xf32>
    %33 = arith.mulf %32, %30 : vector<64x64xf32>
    %34 = arith.addf %31, %33 : vector<64x64xf32>
    %c0_18 = arith.constant 0 : index
    %c0_19 = arith.constant 0 : index
    %35 = vector.load %arg8[%c0_18, %c0_19] : memref<64x64xf32, #tpu.memory_space<vmem>>, vector<64x64xf32>
    tpu.vector_store %arg8[%c0_18, %c0_19], %34 {strides = array<i32>} : memref<64x64xf32, #tpu.memory_space<vmem>>, vector<64x64xf32>,
    return
  }
  func.func @transform_0(%arg0: i32) -> (i32, i32) {
    %c0_i32 = arith.constant 0 : i32
    %c0_i32_0 = arith.constant 0 : i32
    return %c0_i32, %arg0 : i32, i32
  }
  func.func @transform_1(%arg0: i32) -> (i32, i32) {
    %c0_i32 = arith.constant 0 : i32
    %c0_i32_0 = arith.constant 0 : i32
    return %arg0, %c0_i32 : i32, i32
  }
  func.func @transform_2(%arg0: i32) -> (i32, i32) {
    %c0_i32 = arith.constant 0 : i32
    %c0_i32_0 = arith.constant 0 : i32
    return %arg0, %c0_i32 : i32, i32
  }
  func.func @transform_3(%arg0: i32) -> (i32, i32) {
    %c0_i32 = arith.constant 0 : i32
    %c0_i32_0 = arith.constant 0 : i32
    %c0_i32_1 = arith.constant 0 : i32
    return %c0_i32, %c0_i32_0 : i32, i32
  }
  func.func @transform_4(%arg0: i32) -> (i32, i32) {
    %c0_i32 = arith.constant 0 : i32
    %c0_i32_0 = arith.constant 0 : i32
    %c0_i32_1 = arith.constant 0 : i32
    return %c0_i32, %c0_i32_0 : i32, i32
  }
  func.func @transform_5(%arg0: i32) -> (i32, i32) {
    %c0_i32 = arith.constant 0 : i32
    %c0_i32_0 = arith.constant 0 : i32
    %c0_i32_1 = arith.constant 0 : i32
    return %c0_i32, %c0_i32_0 : i32, i32
  }
  func.func @transform_6(%arg0: i32) -> (i32, i32) {
    %c0_i32 = arith.constant 0 : i32
    %c0_i32_0 = arith.constant 0 : i32
    %c0_i32_1 = arith.constant 0 : i32
    return %c0_i32, %c0_i32_0 : i32, i32
  }
  func.func @transform_7(%arg0: i32) -> (i32, i32) {
    %c0_i32 = arith.constant 0 : i32
    %c0_i32_0 = arith.constant 0 : i32
    return %arg0, %c0_i32 : i32, i32
  }
}

module attributes {stable_mosaic.version = 11 : i64} {
  func.func @_attn_proj_kernel(%arg0: i32, %arg1: memref<64x64xf32, #tpu.memory_space<vmem>>, %arg2: memref<1x64xf32, #tpu.memory_space<vmem>>, %arg3: memref<1x64xf32, #tpu.memory_space<vmem>>, %arg4: memref<64x260xf32, #tpu.memory_space<vmem>>, %arg5: memref<1x260xf32, #tpu.memory_space<vmem>>, %arg6: memref<64x256xf32, #tpu.memory_space<vmem>>, %arg7: memref<64x4xf32, #tpu.memory_space<vmem>>) attributes {dimension_semantics = [#tpu.dimension_semantics<parallel>], iteration_bounds = array<i64: 1>, scalar_prefetch = 0 : i64, scratch_operands = 0 : i64, tpu.core_type = #tpu.core_type<tc>, window_params = [{transform_indices = @transform_0, window_bounds = array<i64: 64, 64>}, {pipeline_mode = #tpu.pipeline_mode<synchronous>, transform_indices = @transform_1, window_bounds = array<i64: 1, 64>}, {pipeline_mode = #tpu.pipeline_mode<synchronous>, transform_indices = @transform_2, window_bounds = array<i64: 1, 64>}, {pipeline_mode = #tpu.pipeline_mode<synchronous>, transform_indices = @transform_3, window_bounds = array<i64: 64, 260>}, {pipeline_mode = #tpu.pipeline_mode<synchronous>, transform_indices = @transform_4, window_bounds = array<i64: 1, 260>}, {transform_indices = @transform_5, window_bounds = array<i64: 64, 256>}, {transform_indices = @transform_6, window_bounds = array<i64: 64, 4>}]} {
    %c0 = arith.constant 0 : index
    %c0_0 = arith.constant 0 : index
    %0 = vector.load %arg1[%c0, %c0_0] : memref<64x64xf32, #tpu.memory_space<vmem>>, vector<64x64xf32>
    %c0_1 = arith.constant 0 : index
    %c0_2 = arith.constant 0 : index
    %1 = vector.load %arg2[%c0_1, %c0_2] : memref<1x64xf32, #tpu.memory_space<vmem>>, vector<1x64xf32>
    %c0_3 = arith.constant 0 : index
    %c0_4 = arith.constant 0 : index
    %2 = vector.load %arg3[%c0_3, %c0_4] : memref<1x64xf32, #tpu.memory_space<vmem>>, vector<1x64xf32>
    %cst = arith.constant dense<0.000000e+00> : vector<64xf32>
    %3 = vector.multi_reduction <add>, %0, %cst [1] : vector<64x64xf32> to vector<64xf32>
    %4 = vector.shape_cast %3 : vector<64xf32> to vector<64x1xf32>
    %cst_5 = arith.constant 6.400000e+01 : f32
    %5 = vector.broadcast %cst_5 : f32 to vector<64x1xf32>
    %6 = arith.divf %4, %5 : vector<64x1xf32>
    %7 = vector.broadcast %6 : vector<64x1xf32> to vector<64x64xf32>
    %8 = arith.subf %0, %7 : vector<64x64xf32>
    %9 = arith.mulf %8, %8 : vector<64x64xf32>
    %cst_6 = arith.constant dense<0.000000e+00> : vector<64xf32>
    %10 = vector.multi_reduction <add>, %9, %cst_6 [1] : vector<64x64xf32> to vector<64xf32>
    %11 = vector.shape_cast %10 : vector<64xf32> to vector<64x1xf32>
    %cst_7 = arith.constant 6.400000e+01 : f32
    %12 = vector.broadcast %cst_7 : f32 to vector<64x1xf32>
    %13 = arith.divf %11, %12 : vector<64x1xf32>
    %cst_8 = arith.constant 9.99999974E-6 : f32
    %14 = vector.broadcast %cst_8 : f32 to vector<64x1xf32>
    %15 = arith.addf %13, %14 : vector<64x1xf32>
    %16 = math.rsqrt %15 : vector<64x1xf32>
    %17 = vector.broadcast %16 : vector<64x1xf32> to vector<64x64xf32>
    %18 = arith.mulf %8, %17 : vector<64x64xf32>
    %19 = vector.broadcast %1 : vector<1x64xf32> to vector<64x64xf32>
    %20 = arith.mulf %18, %19 : vector<64x64xf32>
    %21 = vector.broadcast %2 : vector<1x64xf32> to vector<64x64xf32>
    %22 = arith.addf %20, %21 : vector<64x64xf32>
    %c0_9 = arith.constant 0 : index
    %c0_10 = arith.constant 0 : index
    %23 = vector.load %arg4[%c0_9, %c0_10] : memref<64x260xf32, #tpu.memory_space<vmem>>, vector<64x260xf32>
    %24 = arith.truncf %22 : vector<64x64xf32> to vector<64x64xbf16>
    %25 = arith.truncf %23 : vector<64x260xf32> to vector<64x260xbf16>
    %cst_11 = arith.constant dense<0.000000e+00> : vector<64x260xf32>
    %26 = tpu.matmul %24, %25, %cst_11 {dimension_numbers = #tpu.dot_dimension_numbers<[1], [0], [0], [1], [0, 0, 1, 1], [], []>} : vector<64x64xbf16>, vector<64x260xbf16>, vector<64x260xf32> -> vector<64x260xf32>
    %c0_12 = arith.constant 0 : index
    %c0_13 = arith.constant 0 : index
    %27 = vector.load %arg5[%c0_12, %c0_13] : memref<1x260xf32, #tpu.memory_space<vmem>>, vector<1x260xf32>
    %28 = vector.broadcast %27 : vector<1x260xf32> to vector<64x260xf32>
    %29 = arith.addf %26, %28 : vector<64x260xf32>
    %30 = vector.extract_strided_slice %29 {offsets = [0, 0], sizes = [64, 256], strides = [1, 1]} : vector<64x260xf32> to vector<64x256xf32>
    %c0_14 = arith.constant 0 : index
    %c0_15 = arith.constant 0 : index
    %31 = vector.load %arg6[%c0_14, %c0_15] : memref<64x256xf32, #tpu.memory_space<vmem>>, vector<64x256xf32>
    tpu.vector_store %arg6[%c0_14, %c0_15], %30 {strides = array<i32>} : memref<64x256xf32, #tpu.memory_space<vmem>>, vector<64x256xf32>,
    %32 = vector.extract_strided_slice %29 {offsets = [0, 256], sizes = [64, 4], strides = [1, 1]} : vector<64x260xf32> to vector<64x4xf32>
    %c0_16 = arith.constant 0 : index
    %c0_17 = arith.constant 0 : index
    %33 = vector.load %arg7[%c0_16, %c0_17] : memref<64x4xf32, #tpu.memory_space<vmem>>, vector<64x4xf32>
    tpu.vector_store %arg7[%c0_16, %c0_17], %32 {strides = array<i32>} : memref<64x4xf32, #tpu.memory_space<vmem>>, vector<64x4xf32>,
    return
  }
  func.func @transform_0(%arg0: i32) -> (i32, i32) {
    %c0_i32 = arith.constant 0 : i32
    %c0_i32_0 = arith.constant 0 : i32
    return %arg0, %c0_i32 : i32, i32
  }
  func.func @transform_1(%arg0: i32) -> (i32, i32) {
    %c0_i32 = arith.constant 0 : i32
    %c0_i32_0 = arith.constant 0 : i32
    %c0_i32_1 = arith.constant 0 : i32
    return %c0_i32, %c0_i32_0 : i32, i32
  }
  func.func @transform_2(%arg0: i32) -> (i32, i32) {
    %c0_i32 = arith.constant 0 : i32
    %c0_i32_0 = arith.constant 0 : i32
    %c0_i32_1 = arith.constant 0 : i32
    return %c0_i32, %c0_i32_0 : i32, i32
  }
  func.func @transform_3(%arg0: i32) -> (i32, i32) {
    %c0_i32 = arith.constant 0 : i32
    %c0_i32_0 = arith.constant 0 : i32
    %c0_i32_1 = arith.constant 0 : i32
    return %c0_i32, %c0_i32_0 : i32, i32
  }
  func.func @transform_4(%arg0: i32) -> (i32, i32) {
    %c0_i32 = arith.constant 0 : i32
    %c0_i32_0 = arith.constant 0 : i32
    %c0_i32_1 = arith.constant 0 : i32
    return %c0_i32, %c0_i32_0 : i32, i32
  }
  func.func @transform_5(%arg0: i32) -> (i32, i32) {
    %c0_i32 = arith.constant 0 : i32
    %c0_i32_0 = arith.constant 0 : i32
    return %arg0, %c0_i32 : i32, i32
  }
  func.func @transform_6(%arg0: i32) -> (i32, i32) {
    %c0_i32 = arith.constant 0 : i32
    %c0_i32_0 = arith.constant 0 : i32
    return %arg0, %c0_i32 : i32, i32
  }
}

module attributes {stable_mosaic.version = 11 : i64} {
  func.func @_transition_kernel(%arg0: i32, %arg1: memref<64x64xf32, #tpu.memory_space<vmem>>, %arg2: memref<1x64xf32, #tpu.memory_space<vmem>>, %arg3: memref<1x64xf32, #tpu.memory_space<vmem>>, %arg4: memref<64x128xf32, #tpu.memory_space<vmem>>, %arg5: memref<1x128xf32, #tpu.memory_space<vmem>>, %arg6: memref<128x64xf32, #tpu.memory_space<vmem>>, %arg7: memref<1x64xf32, #tpu.memory_space<vmem>>, %arg8: memref<64x64xf32, #tpu.memory_space<vmem>>) attributes {dimension_semantics = [#tpu.dimension_semantics<parallel>], iteration_bounds = array<i64: 1>, scalar_prefetch = 0 : i64, scratch_operands = 0 : i64, tpu.core_type = #tpu.core_type<tc>, window_params = [{transform_indices = @transform_0, window_bounds = array<i64: 64, 64>}, {pipeline_mode = #tpu.pipeline_mode<synchronous>, transform_indices = @transform_1, window_bounds = array<i64: 1, 64>}, {pipeline_mode = #tpu.pipeline_mode<synchronous>, transform_indices = @transform_2, window_bounds = array<i64: 1, 64>}, {pipeline_mode = #tpu.pipeline_mode<synchronous>, transform_indices = @transform_3, window_bounds = array<i64: 64, 128>}, {pipeline_mode = #tpu.pipeline_mode<synchronous>, transform_indices = @transform_4, window_bounds = array<i64: 1, 128>}, {pipeline_mode = #tpu.pipeline_mode<synchronous>, transform_indices = @transform_5, window_bounds = array<i64: 128, 64>}, {pipeline_mode = #tpu.pipeline_mode<synchronous>, transform_indices = @transform_6, window_bounds = array<i64: 1, 64>}, {transform_indices = @transform_7, window_bounds = array<i64: 64, 64>}]} {
    %c0 = arith.constant 0 : index
    %c0_0 = arith.constant 0 : index
    %0 = vector.load %arg1[%c0, %c0_0] : memref<64x64xf32, #tpu.memory_space<vmem>>, vector<64x64xf32>
    %c0_1 = arith.constant 0 : index
    %c0_2 = arith.constant 0 : index
    %1 = vector.load %arg2[%c0_1, %c0_2] : memref<1x64xf32, #tpu.memory_space<vmem>>, vector<1x64xf32>
    %c0_3 = arith.constant 0 : index
    %c0_4 = arith.constant 0 : index
    %2 = vector.load %arg3[%c0_3, %c0_4] : memref<1x64xf32, #tpu.memory_space<vmem>>, vector<1x64xf32>
    %cst = arith.constant dense<0.000000e+00> : vector<64xf32>
    %3 = vector.multi_reduction <add>, %0, %cst [1] : vector<64x64xf32> to vector<64xf32>
    %4 = vector.shape_cast %3 : vector<64xf32> to vector<64x1xf32>
    %cst_5 = arith.constant 6.400000e+01 : f32
    %5 = vector.broadcast %cst_5 : f32 to vector<64x1xf32>
    %6 = arith.divf %4, %5 : vector<64x1xf32>
    %7 = vector.broadcast %6 : vector<64x1xf32> to vector<64x64xf32>
    %8 = arith.subf %0, %7 : vector<64x64xf32>
    %9 = arith.mulf %8, %8 : vector<64x64xf32>
    %cst_6 = arith.constant dense<0.000000e+00> : vector<64xf32>
    %10 = vector.multi_reduction <add>, %9, %cst_6 [1] : vector<64x64xf32> to vector<64xf32>
    %11 = vector.shape_cast %10 : vector<64xf32> to vector<64x1xf32>
    %cst_7 = arith.constant 6.400000e+01 : f32
    %12 = vector.broadcast %cst_7 : f32 to vector<64x1xf32>
    %13 = arith.divf %11, %12 : vector<64x1xf32>
    %cst_8 = arith.constant 9.99999974E-6 : f32
    %14 = vector.broadcast %cst_8 : f32 to vector<64x1xf32>
    %15 = arith.addf %13, %14 : vector<64x1xf32>
    %16 = math.rsqrt %15 : vector<64x1xf32>
    %17 = vector.broadcast %16 : vector<64x1xf32> to vector<64x64xf32>
    %18 = arith.mulf %8, %17 : vector<64x64xf32>
    %19 = vector.broadcast %1 : vector<1x64xf32> to vector<64x64xf32>
    %20 = arith.mulf %18, %19 : vector<64x64xf32>
    %21 = vector.broadcast %2 : vector<1x64xf32> to vector<64x64xf32>
    %22 = arith.addf %20, %21 : vector<64x64xf32>
    %c0_9 = arith.constant 0 : index
    %c0_10 = arith.constant 0 : index
    %23 = vector.load %arg4[%c0_9, %c0_10] : memref<64x128xf32, #tpu.memory_space<vmem>>, vector<64x128xf32>
    %24 = arith.truncf %22 : vector<64x64xf32> to vector<64x64xbf16>
    %25 = arith.truncf %23 : vector<64x128xf32> to vector<64x128xbf16>
    %cst_11 = arith.constant dense<0.000000e+00> : vector<64x128xf32>
    %26 = tpu.matmul %24, %25, %cst_11 {dimension_numbers = #tpu.dot_dimension_numbers<[1], [0], [0], [1], [0, 0, 1, 1], [], []>} : vector<64x64xbf16>, vector<64x128xbf16>, vector<64x128xf32> -> vector<64x128xf32>
    %c0_12 = arith.constant 0 : index
    %c0_13 = arith.constant 0 : index
    %27 = vector.load %arg5[%c0_12, %c0_13] : memref<1x128xf32, #tpu.memory_space<vmem>>, vector<1x128xf32>
    %28 = vector.broadcast %27 : vector<1x128xf32> to vector<64x128xf32>
    %29 = arith.addf %26, %28 : vector<64x128xf32>
    %cst_14 = arith.constant 0.000000e+00 : f32
    %30 = vector.broadcast %cst_14 : f32 to vector<64x128xf32>
    %31 = arith.maximumf %29, %30 : vector<64x128xf32>
    %c0_15 = arith.constant 0 : index
    %c0_16 = arith.constant 0 : index
    %32 = vector.load %arg6[%c0_15, %c0_16] : memref<128x64xf32, #tpu.memory_space<vmem>>, vector<128x64xf32>
    %33 = arith.truncf %31 : vector<64x128xf32> to vector<64x128xbf16>
    %34 = arith.truncf %32 : vector<128x64xf32> to vector<128x64xbf16>
    %cst_17 = arith.constant dense<0.000000e+00> : vector<64x64xf32>
    %35 = tpu.matmul %33, %34, %cst_17 {dimension_numbers = #tpu.dot_dimension_numbers<[1], [0], [0], [1], [0, 0, 1, 1], [], []>} : vector<64x128xbf16>, vector<128x64xbf16>, vector<64x64xf32> -> vector<64x64xf32>
    %c0_18 = arith.constant 0 : index
    %c0_19 = arith.constant 0 : index
    %36 = vector.load %arg7[%c0_18, %c0_19] : memref<1x64xf32, #tpu.memory_space<vmem>>, vector<1x64xf32>
    %37 = vector.broadcast %36 : vector<1x64xf32> to vector<64x64xf32>
    %38 = arith.addf %35, %37 : vector<64x64xf32>
    %c0_20 = arith.constant 0 : index
    %c0_21 = arith.constant 0 : index
    %39 = vector.load %arg1[%c0_20, %c0_21] : memref<64x64xf32, #tpu.memory_space<vmem>>, vector<64x64xf32>
    %40 = arith.addf %39, %38 : vector<64x64xf32>
    %c0_22 = arith.constant 0 : index
    %c0_23 = arith.constant 0 : index
    %41 = vector.load %arg8[%c0_22, %c0_23] : memref<64x64xf32, #tpu.memory_space<vmem>>, vector<64x64xf32>
    tpu.vector_store %arg8[%c0_22, %c0_23], %40 {strides = array<i32>} : memref<64x64xf32, #tpu.memory_space<vmem>>, vector<64x64xf32>,
    return
  }
  func.func @transform_0(%arg0: i32) -> (i32, i32) {
    %c0_i32 = arith.constant 0 : i32
    %c0_i32_0 = arith.constant 0 : i32
    return %arg0, %c0_i32 : i32, i32
  }
  func.func @transform_1(%arg0: i32) -> (i32, i32) {
    %c0_i32 = arith.constant 0 : i32
    %c0_i32_0 = arith.constant 0 : i32
    %c0_i32_1 = arith.constant 0 : i32
    return %c0_i32, %c0_i32_0 : i32, i32
  }
  func.func @transform_2(%arg0: i32) -> (i32, i32) {
    %c0_i32 = arith.constant 0 : i32
    %c0_i32_0 = arith.constant 0 : i32
    %c0_i32_1 = arith.constant 0 : i32
    return %c0_i32, %c0_i32_0 : i32, i32
  }
  func.func @transform_3(%arg0: i32) -> (i32, i32) {
    %c0_i32 = arith.constant 0 : i32
    %c0_i32_0 = arith.constant 0 : i32
    %c0_i32_1 = arith.constant 0 : i32
    return %c0_i32, %c0_i32_0 : i32, i32
  }
  func.func @transform_4(%arg0: i32) -> (i32, i32) {
    %c0_i32 = arith.constant 0 : i32
    %c0_i32_0 = arith.constant 0 : i32
    %c0_i32_1 = arith.constant 0 : i32
    return %c0_i32, %c0_i32_0 : i32, i32
  }
  func.func @transform_5(%arg0: i32) -> (i32, i32) {
    %c0_i32 = arith.constant 0 : i32
    %c0_i32_0 = arith.constant 0 : i32
    %c0_i32_1 = arith.constant 0 : i32
    return %c0_i32, %c0_i32_0 : i32, i32
  }
  func.func @transform_6(%arg0: i32) -> (i32, i32) {
    %c0_i32 = arith.constant 0 : i32
    %c0_i32_0 = arith.constant 0 : i32
    %c0_i32_1 = arith.constant 0 : i32
    return %c0_i32, %c0_i32_0 : i32, i32
  }
  func.func @transform_7(%arg0: i32) -> (i32, i32) {
    %c0_i32 = arith.constant 0 : i32
    %c0_i32_0 = arith.constant 0 : i32
    return %arg0, %c0_i32 : i32, i32
  }
}

module attributes {stable_mosaic.version = 11 : i64} {
  func.func @_attn_kernel(%arg0: i32, %arg1: memref<8x8x256xf32, #tpu.memory_space<vmem>>, %arg2: memref<8x8x1xf32, #tpu.memory_space<vmem>>, %arg3: memref<4x8x8xf32, #tpu.memory_space<vmem>>, %arg4: memref<8x8x64xf32, #tpu.memory_space<vmem>>, %arg5: memref<64x64xf32, #tpu.memory_space<vmem>>, %arg6: memref<1x64xf32, #tpu.memory_space<vmem>>, %arg7: memref<8x8x64xf32, #tpu.memory_space<vmem>>) attributes {dimension_semantics = [#tpu.dimension_semantics<parallel>], iteration_bounds = array<i64: 1>, scalar_prefetch = 0 : i64, scratch_operands = 0 : i64, tpu.core_type = #tpu.core_type<tc>, window_params = [{transform_indices = @transform_0, window_bounds = array<i64: 8, 8, 256>}, {transform_indices = @transform_1, window_bounds = array<i64: 8, 8, 1>}, {pipeline_mode = #tpu.pipeline_mode<synchronous>, transform_indices = @transform_2, window_bounds = array<i64: 4, 8, 8>}, {transform_indices = @transform_3, window_bounds = array<i64: 8, 8, 64>}, {pipeline_mode = #tpu.pipeline_mode<synchronous>, transform_indices = @transform_4, window_bounds = array<i64: 64, 64>}, {pipeline_mode = #tpu.pipeline_mode<synchronous>, transform_indices = @transform_5, window_bounds = array<i64: 1, 64>}, {transform_indices = @transform_6, window_bounds = array<i64: 8, 8, 64>}]} {
    %c0 = arith.constant 0 : index
    %c0_0 = arith.constant 0 : index
    %c0_1 = arith.constant 0 : index
    %0 = vector.load %arg1[%c0, %c0_0, %c0_1] : memref<8x8x256xf32, #tpu.memory_space<vmem>>, vector<8x8x256xf32>
    %c0_2 = arith.constant 0 : index
    %c0_3 = arith.constant 0 : index
    %c0_4 = arith.constant 0 : index
    %1 = vector.load %arg2[%c0_2, %c0_3, %c0_4] : memref<8x8x1xf32, #tpu.memory_space<vmem>>, vector<8x8x1xf32>
    %2 = vector.shape_cast %1 : vector<8x8x1xf32> to vector<8x8xf32>
    %cst = arith.constant 1.000000e+00 : f32
    %3 = vector.broadcast %cst : f32 to vector<8x8xf32>
    %4 = arith.subf %2, %3 : vector<8x8xf32>
    %cst_5 = arith.constant 1.000000e+09 : f32
    %5 = vector.broadcast %cst_5 : f32 to vector<8x8xf32>
    %6 = arith.mulf %5, %4 : vector<8x8xf32>
    %7 = vector.shape_cast %6 : vector<8x8xf32> to vector<8x1x8xf32>
    %c0_6 = arith.constant 0 : index
    %c0_7 = arith.constant 0 : index
    %c0_8 = arith.constant 0 : index
    %8 = vector.load %arg3[%c0_6, %c0_7, %c0_8] : memref<4x8x8xf32, #tpu.memory_space<vmem>>, vector<4x8x8xf32>
    %9 = vector.extract_strided_slice %0 {offsets = [0, 0, 0], sizes = [8, 8, 16], strides = [1, 1, 1]} : vector<8x8x256xf32> to vector<8x8x16xf32>
    %10 = vector.extract_strided_slice %0 {offsets = [0, 0, 64], sizes = [8, 8, 16], strides = [1, 1, 1]} : vector<8x8x256xf32> to vector<8x8x16xf32>
    %11 = vector.extract_strided_slice %0 {offsets = [0, 0, 128], sizes = [8, 8, 16], strides = [1, 1, 1]} : vector<8x8x256xf32> to vector<8x8x16xf32>
    %12 = vector.extract_strided_slice %0 {offsets = [0, 0, 192], sizes = [8, 8, 16], strides = [1, 1, 1]} : vector<8x8x256xf32> to vector<8x8x16xf32>
    %13 = arith.truncf %9 : vector<8x8x16xf32> to vector<8x8x16xbf16>
    %14 = arith.truncf %10 : vector<8x8x16xf32> to vector<8x8x16xbf16>
    %cst_9 = arith.constant dense<0.000000e+00> : vector<8x8x8xf32>
    %15 = tpu.matmul %13, %14, %cst_9 {dimension_numbers = #tpu.dot_dimension_numbers<[2], [2], [1], [1], [0, 0, 0, 1, 1, 1], [0], [0]>} : vector<8x8x16xbf16>, vector<8x8x16xbf16>, vector<8x8x8xf32> -> vector<8x8x8xf32>
    %16 = vector.broadcast %7 : vector<8x1x8xf32> to vector<8x8x8xf32>
    %17 = arith.addf %15, %16 : vector<8x8x8xf32>
    %18 = vector.extract_strided_slice %8 {offsets = [0, 0, 0], sizes = [1, 8, 8], strides = [1, 1, 1]} : vector<4x8x8xf32> to vector<1x8x8xf32>
    %19 = vector.shape_cast %18 : vector<1x8x8xf32> to vector<8x8xf32>
    %20 = vector.shape_cast %19 : vector<8x8xf32> to vector<1x8x8xf32>
    %21 = vector.broadcast %20 : vector<1x8x8xf32> to vector<8x8x8xf32>
    %22 = arith.addf %17, %21 : vector<8x8x8xf32>
    %cst_10 = arith.constant dense<0xFF800000> : vector<8x8xf32>
    %23 = vector.multi_reduction <maximumf>, %22, %cst_10 [2] : vector<8x8x8xf32> to vector<8x8xf32>
    %24 = vector.shape_cast %23 : vector<8x8xf32> to vector<8x8x1xf32>
    %25 = vector.broadcast %24 : vector<8x8x1xf32> to vector<8x8x8xf32>
    %26 = arith.subf %22, %25 : vector<8x8x8xf32>
    %27 = math.exp %26 : vector<8x8x8xf32>
    %cst_11 = arith.constant dense<0.000000e+00> : vector<8x8xf32>
    %28 = vector.multi_reduction <add>, %27, %cst_11 [2] : vector<8x8x8xf32> to vector<8x8xf32>
    %29 = vector.shape_cast %28 : vector<8x8xf32> to vector<8x8x1xf32>
    %30 = vector.broadcast %29 : vector<8x8x1xf32> to vector<8x8x8xf32>
    %31 = arith.divf %27, %30 : vector<8x8x8xf32>
    %32 = arith.truncf %31 : vector<8x8x8xf32> to vector<8x8x8xbf16>
    %33 = arith.truncf %11 : vector<8x8x16xf32> to vector<8x8x16xbf16>
    %cst_12 = arith.constant dense<0.000000e+00> : vector<8x8x16xf32>
    %34 = tpu.matmul %32, %33, %cst_12 {dimension_numbers = #tpu.dot_dimension_numbers<[2], [1], [1], [2], [0, 0, 0, 1, 1, 2], [0], [0]>} : vector<8x8x8xbf16>, vector<8x8x16xbf16>, vector<8x8x16xf32> -> vector<8x8x16xf32>
    %35 = arith.negf %12 : vector<8x8x16xf32>
    %36 = math.exp %35 : vector<8x8x16xf32>
    %cst_13 = arith.constant 1.000000e+00 : f32
    %37 = vector.broadcast %cst_13 : f32 to vector<8x8x16xf32>
    %38 = arith.addf %37, %36 : vector<8x8x16xf32>
    %39 = arith.divf %37, %38 : vector<8x8x16xf32>
    %40 = arith.mulf %34, %39 : vector<8x8x16xf32>
    %41 = vector.extract_strided_slice %0 {offsets = [0, 0, 16], sizes = [8, 8, 16], strides = [1, 1, 1]} : vector<8x8x256xf32> to vector<8x8x16xf32>
    %42 = vector.extract_strided_slice %0 {offsets = [0, 0, 80], sizes = [8, 8, 16], strides = [1, 1, 1]} : vector<8x8x256xf32> to vector<8x8x16xf32>
    %43 = vector.extract_strided_slice %0 {offsets = [0, 0, 144], sizes = [8, 8, 16], strides = [1, 1, 1]} : vector<8x8x256xf32> to vector<8x8x16xf32>
    %44 = vector.extract_strided_slice %0 {offsets = [0, 0, 208], sizes = [8, 8, 16], strides = [1, 1, 1]} : vector<8x8x256xf32> to vector<8x8x16xf32>
    %45 = arith.truncf %41 : vector<8x8x16xf32> to vector<8x8x16xbf16>
    %46 = arith.truncf %42 : vector<8x8x16xf32> to vector<8x8x16xbf16>
    %cst_14 = arith.constant dense<0.000000e+00> : vector<8x8x8xf32>
    %47 = tpu.matmul %45, %46, %cst_14 {dimension_numbers = #tpu.dot_dimension_numbers<[2], [2], [1], [1], [0, 0, 0, 1, 1, 1], [0], [0]>} : vector<8x8x16xbf16>, vector<8x8x16xbf16>, vector<8x8x8xf32> -> vector<8x8x8xf32>
    %48 = vector.broadcast %7 : vector<8x1x8xf32> to vector<8x8x8xf32>
    %49 = arith.addf %47, %48 : vector<8x8x8xf32>
    %50 = vector.extract_strided_slice %8 {offsets = [1, 0, 0], sizes = [1, 8, 8], strides = [1, 1, 1]} : vector<4x8x8xf32> to vector<1x8x8xf32>
    %51 = vector.shape_cast %50 : vector<1x8x8xf32> to vector<8x8xf32>
    %52 = vector.shape_cast %51 : vector<8x8xf32> to vector<1x8x8xf32>
    %53 = vector.broadcast %52 : vector<1x8x8xf32> to vector<8x8x8xf32>
    %54 = arith.addf %49, %53 : vector<8x8x8xf32>
    %cst_15 = arith.constant dense<0xFF800000> : vector<8x8xf32>
    %55 = vector.multi_reduction <maximumf>, %54, %cst_15 [2] : vector<8x8x8xf32> to vector<8x8xf32>
    %56 = vector.shape_cast %55 : vector<8x8xf32> to vector<8x8x1xf32>
    %57 = vector.broadcast %56 : vector<8x8x1xf32> to vector<8x8x8xf32>
    %58 = arith.subf %54, %57 : vector<8x8x8xf32>
    %59 = math.exp %58 : vector<8x8x8xf32>
    %cst_16 = arith.constant dense<0.000000e+00> : vector<8x8xf32>
    %60 = vector.multi_reduction <add>, %59, %cst_16 [2] : vector<8x8x8xf32> to vector<8x8xf32>
    %61 = vector.shape_cast %60 : vector<8x8xf32> to vector<8x8x1xf32>
    %62 = vector.broadcast %61 : vector<8x8x1xf32> to vector<8x8x8xf32>
    %63 = arith.divf %59, %62 : vector<8x8x8xf32>
    %64 = arith.truncf %63 : vector<8x8x8xf32> to vector<8x8x8xbf16>
    %65 = arith.truncf %43 : vector<8x8x16xf32> to vector<8x8x16xbf16>
    %cst_17 = arith.constant dense<0.000000e+00> : vector<8x8x16xf32>
    %66 = tpu.matmul %64, %65, %cst_17 {dimension_numbers = #tpu.dot_dimension_numbers<[2], [1], [1], [2], [0, 0, 0, 1, 1, 2], [0], [0]>} : vector<8x8x8xbf16>, vector<8x8x16xbf16>, vector<8x8x16xf32> -> vector<8x8x16xf32>
    %67 = arith.negf %44 : vector<8x8x16xf32>
    %68 = math.exp %67 : vector<8x8x16xf32>
    %cst_18 = arith.constant 1.000000e+00 : f32
    %69 = vector.broadcast %cst_18 : f32 to vector<8x8x16xf32>
    %70 = arith.addf %69, %68 : vector<8x8x16xf32>
    %71 = arith.divf %69, %70 : vector<8x8x16xf32>
    %72 = arith.mulf %66, %71 : vector<8x8x16xf32>
    %73 = vector.extract_strided_slice %0 {offsets = [0, 0, 32], sizes = [8, 8, 16], strides = [1, 1, 1]} : vector<8x8x256xf32> to vector<8x8x16xf32>
    %74 = vector.extract_strided_slice %0 {offsets = [0, 0, 96], sizes = [8, 8, 16], strides = [1, 1, 1]} : vector<8x8x256xf32> to vector<8x8x16xf32>
    %75 = vector.extract_strided_slice %0 {offsets = [0, 0, 160], sizes = [8, 8, 16], strides = [1, 1, 1]} : vector<8x8x256xf32> to vector<8x8x16xf32>
    %76 = vector.extract_strided_slice %0 {offsets = [0, 0, 224], sizes = [8, 8, 16], strides = [1, 1, 1]} : vector<8x8x256xf32> to vector<8x8x16xf32>
    %77 = arith.truncf %73 : vector<8x8x16xf32> to vector<8x8x16xbf16>
    %78 = arith.truncf %74 : vector<8x8x16xf32> to vector<8x8x16xbf16>
    %cst_19 = arith.constant dense<0.000000e+00> : vector<8x8x8xf32>
    %79 = tpu.matmul %77, %78, %cst_19 {dimension_numbers = #tpu.dot_dimension_numbers<[2], [2], [1], [1], [0, 0, 0, 1, 1, 1], [0], [0]>} : vector<8x8x16xbf16>, vector<8x8x16xbf16>, vector<8x8x8xf32> -> vector<8x8x8xf32>
    %80 = vector.broadcast %7 : vector<8x1x8xf32> to vector<8x8x8xf32>
    %81 = arith.addf %79, %80 : vector<8x8x8xf32>
    %82 = vector.extract_strided_slice %8 {offsets = [2, 0, 0], sizes = [1, 8, 8], strides = [1, 1, 1]} : vector<4x8x8xf32> to vector<1x8x8xf32>
    %83 = vector.shape_cast %82 : vector<1x8x8xf32> to vector<8x8xf32>
    %84 = vector.shape_cast %83 : vector<8x8xf32> to vector<1x8x8xf32>
    %85 = vector.broadcast %84 : vector<1x8x8xf32> to vector<8x8x8xf32>
    %86 = arith.addf %81, %85 : vector<8x8x8xf32>
    %cst_20 = arith.constant dense<0xFF800000> : vector<8x8xf32>
    %87 = vector.multi_reduction <maximumf>, %86, %cst_20 [2] : vector<8x8x8xf32> to vector<8x8xf32>
    %88 = vector.shape_cast %87 : vector<8x8xf32> to vector<8x8x1xf32>
    %89 = vector.broadcast %88 : vector<8x8x1xf32> to vector<8x8x8xf32>
    %90 = arith.subf %86, %89 : vector<8x8x8xf32>
    %91 = math.exp %90 : vector<8x8x8xf32>
    %cst_21 = arith.constant dense<0.000000e+00> : vector<8x8xf32>
    %92 = vector.multi_reduction <add>, %91, %cst_21 [2] : vector<8x8x8xf32> to vector<8x8xf32>
    %93 = vector.shape_cast %92 : vector<8x8xf32> to vector<8x8x1xf32>
    %94 = vector.broadcast %93 : vector<8x8x1xf32> to vector<8x8x8xf32>
    %95 = arith.divf %91, %94 : vector<8x8x8xf32>
    %96 = arith.truncf %95 : vector<8x8x8xf32> to vector<8x8x8xbf16>
    %97 = arith.truncf %75 : vector<8x8x16xf32> to vector<8x8x16xbf16>
    %cst_22 = arith.constant dense<0.000000e+00> : vector<8x8x16xf32>
    %98 = tpu.matmul %96, %97, %cst_22 {dimension_numbers = #tpu.dot_dimension_numbers<[2], [1], [1], [2], [0, 0, 0, 1, 1, 2], [0], [0]>} : vector<8x8x8xbf16>, vector<8x8x16xbf16>, vector<8x8x16xf32> -> vector<8x8x16xf32>
    %99 = arith.negf %76 : vector<8x8x16xf32>
    %100 = math.exp %99 : vector<8x8x16xf32>
    %cst_23 = arith.constant 1.000000e+00 : f32
    %101 = vector.broadcast %cst_23 : f32 to vector<8x8x16xf32>
    %102 = arith.addf %101, %100 : vector<8x8x16xf32>
    %103 = arith.divf %101, %102 : vector<8x8x16xf32>
    %104 = arith.mulf %98, %103 : vector<8x8x16xf32>
    %105 = vector.extract_strided_slice %0 {offsets = [0, 0, 48], sizes = [8, 8, 16], strides = [1, 1, 1]} : vector<8x8x256xf32> to vector<8x8x16xf32>
    %106 = vector.extract_strided_slice %0 {offsets = [0, 0, 112], sizes = [8, 8, 16], strides = [1, 1, 1]} : vector<8x8x256xf32> to vector<8x8x16xf32>
    %107 = vector.extract_strided_slice %0 {offsets = [0, 0, 176], sizes = [8, 8, 16], strides = [1, 1, 1]} : vector<8x8x256xf32> to vector<8x8x16xf32>
    %108 = vector.extract_strided_slice %0 {offsets = [0, 0, 240], sizes = [8, 8, 16], strides = [1, 1, 1]} : vector<8x8x256xf32> to vector<8x8x16xf32>
    %109 = arith.truncf %105 : vector<8x8x16xf32> to vector<8x8x16xbf16>
    %110 = arith.truncf %106 : vector<8x8x16xf32> to vector<8x8x16xbf16>
    %cst_24 = arith.constant dense<0.000000e+00> : vector<8x8x8xf32>
    %111 = tpu.matmul %109, %110, %cst_24 {dimension_numbers = #tpu.dot_dimension_numbers<[2], [2], [1], [1], [0, 0, 0, 1, 1, 1], [0], [0]>} : vector<8x8x16xbf16>, vector<8x8x16xbf16>, vector<8x8x8xf32> -> vector<8x8x8xf32>
    %112 = vector.broadcast %7 : vector<8x1x8xf32> to vector<8x8x8xf32>
    %113 = arith.addf %111, %112 : vector<8x8x8xf32>
    %114 = vector.extract_strided_slice %8 {offsets = [3, 0, 0], sizes = [1, 8, 8], strides = [1, 1, 1]} : vector<4x8x8xf32> to vector<1x8x8xf32>
    %115 = vector.shape_cast %114 : vector<1x8x8xf32> to vector<8x8xf32>
    %116 = vector.shape_cast %115 : vector<8x8xf32> to vector<1x8x8xf32>
    %117 = vector.broadcast %116 : vector<1x8x8xf32> to vector<8x8x8xf32>
    %118 = arith.addf %113, %117 : vector<8x8x8xf32>
    %cst_25 = arith.constant dense<0xFF800000> : vector<8x8xf32>
    %119 = vector.multi_reduction <maximumf>, %118, %cst_25 [2] : vector<8x8x8xf32> to vector<8x8xf32>
    %120 = vector.shape_cast %119 : vector<8x8xf32> to vector<8x8x1xf32>
    %121 = vector.broadcast %120 : vector<8x8x1xf32> to vector<8x8x8xf32>
    %122 = arith.subf %118, %121 : vector<8x8x8xf32>
    %123 = math.exp %122 : vector<8x8x8xf32>
    %cst_26 = arith.constant dense<0.000000e+00> : vector<8x8xf32>
    %124 = vector.multi_reduction <add>, %123, %cst_26 [2] : vector<8x8x8xf32> to vector<8x8xf32>
    %125 = vector.shape_cast %124 : vector<8x8xf32> to vector<8x8x1xf32>
    %126 = vector.broadcast %125 : vector<8x8x1xf32> to vector<8x8x8xf32>
    %127 = arith.divf %123, %126 : vector<8x8x8xf32>
    %128 = arith.truncf %127 : vector<8x8x8xf32> to vector<8x8x8xbf16>
    %129 = arith.truncf %107 : vector<8x8x16xf32> to vector<8x8x16xbf16>
    %cst_27 = arith.constant dense<0.000000e+00> : vector<8x8x16xf32>
    %130 = tpu.matmul %128, %129, %cst_27 {dimension_numbers = #tpu.dot_dimension_numbers<[2], [1], [1], [2], [0, 0, 0, 1, 1, 2], [0], [0]>} : vector<8x8x8xbf16>, vector<8x8x16xbf16>, vector<8x8x16xf32> -> vector<8x8x16xf32>
    %131 = arith.negf %108 : vector<8x8x16xf32>
    %132 = math.exp %131 : vector<8x8x16xf32>
    %cst_28 = arith.constant 1.000000e+00 : f32
    %133 = vector.broadcast %cst_28 : f32 to vector<8x8x16xf32>
    %134 = arith.addf %133, %132 : vector<8x8x16xf32>
    %135 = arith.divf %133, %134 : vector<8x8x16xf32>
    %136 = arith.mulf %130, %135 : vector<8x8x16xf32>
    %137 = tpu.concatenate %40, %72, %104, %136 in 2 : vector<8x8x16xf32>, vector<8x8x16xf32>, vector<8x8x16xf32>, vector<8x8x16xf32> -> vector<8x8x64xf32>
    %138 = vector.shape_cast %137 : vector<8x8x64xf32> to vector<64x64xf32>
    %c0_29 = arith.constant 0 : index
    %c0_30 = arith.constant 0 : index
    %139 = vector.load %arg5[%c0_29, %c0_30] : memref<64x64xf32, #tpu.memory_space<vmem>>, vector<64x64xf32>
    %140 = arith.truncf %138 : vector<64x64xf32> to vector<64x64xbf16>
    %141 = arith.truncf %139 : vector<64x64xf32> to vector<64x64xbf16>
    %cst_31 = arith.constant dense<0.000000e+00> : vector<64x64xf32>
    %142 = tpu.matmul %140, %141, %cst_31 {dimension_numbers = #tpu.dot_dimension_numbers<[1], [0], [0], [1], [0, 0, 1, 1], [], []>} : vector<64x64xbf16>, vector<64x64xbf16>, vector<64x64xf32> -> vector<64x64xf32>
    %c0_32 = arith.constant 0 : index
    %c0_33 = arith.constant 0 : index
    %143 = vector.load %arg6[%c0_32, %c0_33] : memref<1x64xf32, #tpu.memory_space<vmem>>, vector<1x64xf32>
    %144 = vector.broadcast %143 : vector<1x64xf32> to vector<64x64xf32>
    %145 = arith.addf %142, %144 : vector<64x64xf32>
    %c0_34 = arith.constant 0 : index
    %c0_35 = arith.constant 0 : index
    %c0_36 = arith.constant 0 : index
    %146 = vector.load %arg4[%c0_34, %c0_35, %c0_36] : memref<8x8x64xf32, #tpu.memory_space<vmem>>, vector<8x8x64xf32>
    %147 = vector.shape_cast %145 : vector<64x64xf32> to vector<8x8x64xf32>
    %148 = arith.addf %146, %147 : vector<8x8x64xf32>
    %c0_37 = arith.constant 0 : index
    %c0_38 = arith.constant 0 : index
    %c0_39 = arith.constant 0 : index
    %149 = vector.load %arg7[%c0_37, %c0_38, %c0_39] : memref<8x8x64xf32, #tpu.memory_space<vmem>>, vector<8x8x64xf32>
    tpu.vector_store %arg7[%c0_37, %c0_38, %c0_39], %148 {strides = array<i32>} : memref<8x8x64xf32, #tpu.memory_space<vmem>>, vector<8x8x64xf32>,
    return
  }
  func.func @transform_0(%arg0: i32) -> (i32, i32, i32) {
    %c0_i32 = arith.constant 0 : i32
    %c0_i32_0 = arith.constant 0 : i32
    %c0_i32_1 = arith.constant 0 : i32
    return %arg0, %c0_i32, %c0_i32_0 : i32, i32, i32
  }
  func.func @transform_1(%arg0: i32) -> (i32, i32, i32) {
    %c0_i32 = arith.constant 0 : i32
    %c0_i32_0 = arith.constant 0 : i32
    %c0_i32_1 = arith.constant 0 : i32
    return %arg0, %c0_i32, %c0_i32_0 : i32, i32, i32
  }
  func.func @transform_2(%arg0: i32) -> (i32, i32, i32) {
    %c0_i32 = arith.constant 0 : i32
    %c0_i32_0 = arith.constant 0 : i32
    %c0_i32_1 = arith.constant 0 : i32
    %c0_i32_2 = arith.constant 0 : i32
    return %c0_i32, %c0_i32_0, %c0_i32_1 : i32, i32, i32
  }
  func.func @transform_3(%arg0: i32) -> (i32, i32, i32) {
    %c0_i32 = arith.constant 0 : i32
    %c0_i32_0 = arith.constant 0 : i32
    %c0_i32_1 = arith.constant 0 : i32
    return %arg0, %c0_i32, %c0_i32_0 : i32, i32, i32
  }
  func.func @transform_4(%arg0: i32) -> (i32, i32) {
    %c0_i32 = arith.constant 0 : i32
    %c0_i32_0 = arith.constant 0 : i32
    %c0_i32_1 = arith.constant 0 : i32
    return %c0_i32, %c0_i32_0 : i32, i32
  }
  func.func @transform_5(%arg0: i32) -> (i32, i32) {
    %c0_i32 = arith.constant 0 : i32
    %c0_i32_0 = arith.constant 0 : i32
    %c0_i32_1 = arith.constant 0 : i32
    return %c0_i32, %c0_i32_0 : i32, i32
  }
  func.func @transform_6(%arg0: i32) -> (i32, i32, i32) {
    %c0_i32 = arith.constant 0 : i32
    %c0_i32_0 = arith.constant 0 : i32
    %c0_i32_1 = arith.constant 0 : i32
    return %arg0, %c0_i32, %c0_i32_0 : i32, i32, i32
  }
}

module attributes {stable_mosaic.version = 11 : i64} {
  func.func @_norm_accum_kernel(%arg0: i32, %arg1: memref<64x64xf32, #tpu.memory_space<vmem>>, %arg2: memref<1x64xf32, #tpu.memory_space<vmem>>, %arg3: memref<1x64xf32, #tpu.memory_space<vmem>>, %arg4: memref<64x64xf32, #tpu.memory_space<vmem>>, %arg5: memref<64x64xf32, #tpu.memory_space<vmem>>) attributes {dimension_semantics = [#tpu.dimension_semantics<parallel>], iteration_bounds = array<i64: 1>, scalar_prefetch = 0 : i64, scratch_operands = 0 : i64, tpu.core_type = #tpu.core_type<tc>, window_params = [{transform_indices = @transform_0, window_bounds = array<i64: 64, 64>}, {pipeline_mode = #tpu.pipeline_mode<synchronous>, transform_indices = @transform_1, window_bounds = array<i64: 1, 64>}, {pipeline_mode = #tpu.pipeline_mode<synchronous>, transform_indices = @transform_2, window_bounds = array<i64: 1, 64>}, {transform_indices = @transform_3, window_bounds = array<i64: 64, 64>}, {transform_indices = @transform_4, window_bounds = array<i64: 64, 64>}]} {
    %c0 = arith.constant 0 : index
    %c0_0 = arith.constant 0 : index
    %0 = vector.load %arg4[%c0, %c0_0] : memref<64x64xf32, #tpu.memory_space<vmem>>, vector<64x64xf32>
    %c0_1 = arith.constant 0 : index
    %c0_2 = arith.constant 0 : index
    %1 = vector.load %arg1[%c0_1, %c0_2] : memref<64x64xf32, #tpu.memory_space<vmem>>, vector<64x64xf32>
    %c0_3 = arith.constant 0 : index
    %c0_4 = arith.constant 0 : index
    %2 = vector.load %arg2[%c0_3, %c0_4] : memref<1x64xf32, #tpu.memory_space<vmem>>, vector<1x64xf32>
    %c0_5 = arith.constant 0 : index
    %c0_6 = arith.constant 0 : index
    %3 = vector.load %arg3[%c0_5, %c0_6] : memref<1x64xf32, #tpu.memory_space<vmem>>, vector<1x64xf32>
    %cst = arith.constant dense<0.000000e+00> : vector<64xf32>
    %4 = vector.multi_reduction <add>, %1, %cst [1] : vector<64x64xf32> to vector<64xf32>
    %5 = vector.shape_cast %4 : vector<64xf32> to vector<64x1xf32>
    %cst_7 = arith.constant 6.400000e+01 : f32
    %6 = vector.broadcast %cst_7 : f32 to vector<64x1xf32>
    %7 = arith.divf %5, %6 : vector<64x1xf32>
    %8 = vector.broadcast %7 : vector<64x1xf32> to vector<64x64xf32>
    %9 = arith.subf %1, %8 : vector<64x64xf32>
    %10 = arith.mulf %9, %9 : vector<64x64xf32>
    %cst_8 = arith.constant dense<0.000000e+00> : vector<64xf32>
    %11 = vector.multi_reduction <add>, %10, %cst_8 [1] : vector<64x64xf32> to vector<64xf32>
    %12 = vector.shape_cast %11 : vector<64xf32> to vector<64x1xf32>
    %cst_9 = arith.constant 6.400000e+01 : f32
    %13 = vector.broadcast %cst_9 : f32 to vector<64x1xf32>
    %14 = arith.divf %12, %13 : vector<64x1xf32>
    %cst_10 = arith.constant 9.99999974E-6 : f32
    %15 = vector.broadcast %cst_10 : f32 to vector<64x1xf32>
    %16 = arith.addf %14, %15 : vector<64x1xf32>
    %17 = math.rsqrt %16 : vector<64x1xf32>
    %18 = vector.broadcast %17 : vector<64x1xf32> to vector<64x64xf32>
    %19 = arith.mulf %9, %18 : vector<64x64xf32>
    %20 = vector.broadcast %2 : vector<1x64xf32> to vector<64x64xf32>
    %21 = arith.mulf %19, %20 : vector<64x64xf32>
    %22 = vector.broadcast %3 : vector<1x64xf32> to vector<64x64xf32>
    %23 = arith.addf %21, %22 : vector<64x64xf32>
    %24 = arith.addf %0, %23 : vector<64x64xf32>
    %c0_11 = arith.constant 0 : index
    %c0_12 = arith.constant 0 : index
    %25 = vector.load %arg5[%c0_11, %c0_12] : memref<64x64xf32, #tpu.memory_space<vmem>>, vector<64x64xf32>
    tpu.vector_store %arg5[%c0_11, %c0_12], %24 {strides = array<i32>} : memref<64x64xf32, #tpu.memory_space<vmem>>, vector<64x64xf32>,
    return
  }
  func.func @transform_0(%arg0: i32) -> (i32, i32) {
    %c0_i32 = arith.constant 0 : i32
    %c0_i32_0 = arith.constant 0 : i32
    return %arg0, %c0_i32 : i32, i32
  }
  func.func @transform_1(%arg0: i32) -> (i32, i32) {
    %c0_i32 = arith.constant 0 : i32
    %c0_i32_0 = arith.constant 0 : i32
    %c0_i32_1 = arith.constant 0 : i32
    return %c0_i32, %c0_i32_0 : i32, i32
  }
  func.func @transform_2(%arg0: i32) -> (i32, i32) {
    %c0_i32 = arith.constant 0 : i32
    %c0_i32_0 = arith.constant 0 : i32
    %c0_i32_1 = arith.constant 0 : i32
    return %c0_i32, %c0_i32_0 : i32, i32
  }
  func.func @transform_3(%arg0: i32) -> (i32, i32) {
    %c0_i32 = arith.constant 0 : i32
    %c0_i32_0 = arith.constant 0 : i32
    return %arg0, %c0_i32 : i32, i32
  }
  func.func @transform_4(%arg0: i32) -> (i32, i32) {
    %c0_i32 = arith.constant 0 : i32
    %c0_i32_0 = arith.constant 0 : i32
    return %arg0, %c0_i32 : i32, i32
  }
}

module attributes {stable_mosaic.version = 11 : i64} {
  func.func @_relu_linear_kernel(%arg0: i32, %arg1: memref<64x64xf32, #tpu.memory_space<vmem>>, %arg2: memref<64x128xf32, #tpu.memory_space<vmem>>, %arg3: memref<1x128xf32, #tpu.memory_space<vmem>>, %arg4: memref<64x128xf32, #tpu.memory_space<vmem>>) attributes {dimension_semantics = [#tpu.dimension_semantics<parallel>], iteration_bounds = array<i64: 1>, scalar_prefetch = 0 : i64, scratch_operands = 0 : i64, tpu.core_type = #tpu.core_type<tc>, window_params = [{transform_indices = @transform_0, window_bounds = array<i64: 64, 64>}, {pipeline_mode = #tpu.pipeline_mode<synchronous>, transform_indices = @transform_1, window_bounds = array<i64: 64, 128>}, {pipeline_mode = #tpu.pipeline_mode<synchronous>, transform_indices = @transform_2, window_bounds = array<i64: 1, 128>}, {transform_indices = @transform_3, window_bounds = array<i64: 64, 128>}]} {
    %c0 = arith.constant 0 : index
    %c0_0 = arith.constant 0 : index
    %0 = vector.load %arg1[%c0, %c0_0] : memref<64x64xf32, #tpu.memory_space<vmem>>, vector<64x64xf32>
    %cst = arith.constant 0.000000e+00 : f32
    %1 = vector.broadcast %cst : f32 to vector<64x64xf32>
    %2 = arith.maximumf %0, %1 : vector<64x64xf32>
    %c0_1 = arith.constant 0 : index
    %c0_2 = arith.constant 0 : index
    %3 = vector.load %arg2[%c0_1, %c0_2] : memref<64x128xf32, #tpu.memory_space<vmem>>, vector<64x128xf32>
    %4 = arith.truncf %2 : vector<64x64xf32> to vector<64x64xbf16>
    %5 = arith.truncf %3 : vector<64x128xf32> to vector<64x128xbf16>
    %cst_3 = arith.constant dense<0.000000e+00> : vector<64x128xf32>
    %6 = tpu.matmul %4, %5, %cst_3 {dimension_numbers = #tpu.dot_dimension_numbers<[1], [0], [0], [1], [0, 0, 1, 1], [], []>} : vector<64x64xbf16>, vector<64x128xbf16>, vector<64x128xf32> -> vector<64x128xf32>
    %c0_4 = arith.constant 0 : index
    %c0_5 = arith.constant 0 : index
    %7 = vector.load %arg3[%c0_4, %c0_5] : memref<1x128xf32, #tpu.memory_space<vmem>>, vector<1x128xf32>
    %8 = vector.broadcast %7 : vector<1x128xf32> to vector<64x128xf32>
    %9 = arith.addf %6, %8 : vector<64x128xf32>
    %c0_6 = arith.constant 0 : index
    %c0_7 = arith.constant 0 : index
    %10 = vector.load %arg4[%c0_6, %c0_7] : memref<64x128xf32, #tpu.memory_space<vmem>>, vector<64x128xf32>
    tpu.vector_store %arg4[%c0_6, %c0_7], %9 {strides = array<i32>} : memref<64x128xf32, #tpu.memory_space<vmem>>, vector<64x128xf32>,
    return
  }
  func.func @transform_0(%arg0: i32) -> (i32, i32) {
    %c0_i32 = arith.constant 0 : i32
    %c0_i32_0 = arith.constant 0 : i32
    return %arg0, %c0_i32 : i32, i32
  }
  func.func @transform_1(%arg0: i32) -> (i32, i32) {
    %c0_i32 = arith.constant 0 : i32
    %c0_i32_0 = arith.constant 0 : i32
    %c0_i32_1 = arith.constant 0 : i32
    return %c0_i32, %c0_i32_0 : i32, i32
  }
  func.func @transform_2(%arg0: i32) -> (i32, i32) {
    %c0_i32 = arith.constant 0 : i32
    %c0_i32_0 = arith.constant 0 : i32
    %c0_i32_1 = arith.constant 0 : i32
    return %c0_i32, %c0_i32_0 : i32, i32
  }
  func.func @transform_3(%arg0: i32) -> (i32, i32) {
    %c0_i32 = arith.constant 0 : i32
    %c0_i32_0 = arith.constant 0 : i32
    return %arg0, %c0_i32 : i32, i32
  }
}

</mosaic_0001>

<bundles_post_ra>
// kernel: template_embedding_forward.50
= control target key start
LH: loop header
LB: loop body
LE: loop exit
PB: predicated region body
PF: predicated region fallthrough
CT: control target
= control target key end

     0   :  { %vm36_vm0 = vcmask 523264   ;;  %s1039_s0 = inlined_call_operand.vmem [shape: f32[64,64], index: 0, kind: input, shape index: {}]   ;;  %s1040_s4 = inlined_call_operand.vmem [shape: f32[64,320], index: 4, kind: input, shape index: {}]   ;;  %s1041_s1 = inlined_call_operand.vmem [shape: f32[64,1], index: 1, kind: input, shape index: {}]   ;;  %s1042_s2 = inlined_call_operand.vmem [shape: f32[1,64], index: 2, kind: input, shape index: {}]   ;;  %s1043_s3 = inlined_call_operand.vmem [shape: f32[1,64], index: 3, kind: input, shape index: {}]   ;;  %s1044_s5 = inlined_call_operand.vmem [shape: f32[1,320], index: 5, kind: input, shape index: {}]   ;;  %s1045_s6 = inlined_call_operand.vmem [shape: f32[64,128], index: 6, kind: output, shape index: {0}]   ;;  %s1046_s7 = inlined_call_operand.vmem [shape: f32[64,64], index: 7, kind: output, shape index: {1}]  }
   0x1   :  { %v26_v0 = vld [vmem:[%s1039_s0] sm:$0xff]  ;;  %v28_v1 = vld [vmem:[%s1039_s0 + $0x10] sm:$0xff]  ;;  %v27_v2 = vld [vmem:[%s1039_s0 + $0x8] sm:$0xff] }
   0x2   :  { %v37_v3 = vsel %vm36_vm0, %v26_v0, 0.0  ;;  %v43_v4 = vsel %vm36_vm0, %v28_v1, 0.0  ;;  %v29_v5 = vld [vmem:[%s1039_s0 + $0x18] sm:$0xff]  ;;  %v40_v6 = vsel %vm36_vm0, %v27_v2, 0.0  ;;  %v30_v8 = vld [vmem:[%s1039_s0 + $0x20] sm:$0xff]  ;;  %v31_v9 = vld [vmem:[%s1039_s0 + $0x28] sm:$0xff] }
   0x3   :  { %38 = vadd.xlane.f32.xlu0 %v37_v3  ;;  %44 = vadd.xlane.f32.xlu1 %v43_v4  ;;  %v46_v7 = vsel %vm36_vm0, %v29_v5, 0.0  ;;  %v49_v10 = vsel %vm36_vm0, %v30_v8, 0.0  ;;  %v52_v11 = vsel %vm36_vm0, %v31_v9, 0.0  ;;  %v32_v12 = vld [vmem:[%s1039_s0 + $0x30] sm:$0xff]  ;;  %v33_v13 = vld [vmem:[%s1039_s0 + $0x38] sm:$0xff]  ;;  %v171_v56 = vld [vmem:[%s1040_s4 + $0x8] sm:$0xff] }
   0x4   :  { %v55_v14 = vsel %vm36_vm0, %v32_v12, 0.0  ;;  %v58_v15 = vsel %vm36_vm0, %v33_v13, 0.0  ;;  %v174_v57 = vld [vmem:[%s1040_s4 + $0x20] sm:$0xff]  ;;  %v173_v60 = vld [vmem:[%s1040_s4 + $0x18] sm:$0xff]  ;;  %v180_v63 = vld [vmem:[%s1040_s4 + $0x50] sm:$0xff] }
   0x5   :  { %v199_v58 = vpack.c.bf16 %v174_v57, %v171_v56  ;;  %v170_v59 = vld [vmem:[%s1040_s4] sm:$0xff]  ;;  %v177_v62 = vld [vmem:[%s1040_s4 + $0x38] sm:$0xff]  ;;  %v176_v3 = vld [vmem:[%s1040_s4 + $0x30] sm:$0xff] }
   0x6   :  { %v198_v61 = vpack.c.bf16 %v173_v60, %v170_v59  ;;  %v179_v4 = vld [vmem:[%s1040_s4 + $0x48] sm:$0xff] }
   0x7   :  { %41 = vadd.xlane.f32.xlu0 %v40_v6  ;;  %47 = vadd.xlane.f32.xlu1 %v46_v7  ;;  %v201_v6 = vpack.c.bf16 %v179_v4, %v176_v3  ;;  %v183_v7 = vld [vmem:[%s1040_s4 + $0x68] sm:$0xff] }
   0x8   :  { %239 = vmatprep.subr.bf16.mxu0 %v199_v58 }
   0x9   :  { %240 = vmatpush1.bf16.msra.mxu0 %v198_v61 }
   0xb   :  { %50 = vadd.xlane.f32.xlu0 %v49_v10  ;;  %53 = vadd.xlane.f32.xlu1 %v52_v11  ;;  %v181_v11 = vld [vmem:[%s1040_s4 + $0x58] sm:$0xff] }
   0xf   :  { %56 = vadd.xlane.f32.xlu0 %v55_v14  ;;  %59 = vadd.xlane.f32.xlu1 %v58_v15 }
  0x90   :  { %v39_v16 = vpop.xlane.xlu0 %38  ;;  %v45_v17 = vpop.xlane.xlu1 %44 }
  0x91   :  { %v62_v18 = vmul.f32 0.015625, %v39_v16  ;;  %v64_v19 = vmul.f32 0.015625, %v45_v17  ;;  %v189_v16 = vld [vmem:[%s1040_s4 + $0x98] sm:$0xff]  ;;  %v192_v17 = vld [vmem:[%s1040_s4 + $0xb0] sm:$0xff] }
  0x93   :  { %v767_v20 = vsub.f32 %v26_v0, %v62_v18  ;;  %v769_v21 = vsub.f32 %v28_v1, %v64_v19  ;;  %v172_v0 = vld [vmem:[%s1040_s4 + $0x10] sm:$0xff]  ;;  %v202_v1 = vpack.c.bf16 %v180_v63, %v177_v62  ;;  %v208_v19 = vpack.c.bf16 %v192_v17, %v189_v16 }
  0x94   :  { %v42_v22 = vpop.xlane.xlu0 %41  ;;  %v48_v23 = vpop.xlane.xlu1 %47  ;;  %v184_v18 = vld [vmem:[%s1040_s4 + $0x70] sm:$0xff] }
  0x95   :  { %v63_v24 = vmul.f32 0.015625, %v42_v22  ;;  %v65_v25 = vmul.f32 0.015625, %v48_v23  ;;  %v78_v26 = vmul.f32 %v767_v20, %v767_v20  ;;  %v80_v27 = vmul.f32 %v769_v21, %v769_v21  ;;  %241 = vmatprep.subr.bf16.mxu0 %v202_v1  ;;  %v187_v22 = vld [vmem:[%s1040_s4 + $0x88] sm:$0xff]  ;;  %v188_v23 = vld [vmem:[%s1040_s4 + $0x90] sm:$0xff] }
  0x96   :  { %242 = vmatpush1.bf16.msra.mxu0 %v201_v6  ;;  %v561_v6 = vld [vmem:[%s1042_s2] ss:$0 sm:$0xff] }
  0x97   :  { %v775_v28 = vsub.f32 %v27_v2, %v63_v24  ;;  %v777_v29 = vsub.f32 %v29_v5, %v65_v25  ;;  %v86_v30 = vsel %vm36_vm0, %v78_v26, 0.0  ;;  %v92_v33 = vsel %vm36_vm0, %v80_v27, 0.0  ;;  %v175_v2 = vld [vmem:[%s1040_s4 + $0x28] sm:$0xff]  ;;  %v190_v27 = vld [vmem:[%s1040_s4 + $0xa0] sm:$0xff] }
  0x98   :  { %87 = vadd.xlane.f32.xlu0 %v86_v30  ;;  %v51_v31 = vpop.xlane.xlu0 %50  ;;  %v54_v32 = vpop.xlane.xlu1 %53  ;;  %v200_v5 = vpack.c.bf16 %v175_v2, %v172_v0  ;;  %v191_v24 = vld [vmem:[%s1040_s4 + $0xa8] sm:$0xff]  ;;  %v206_v25 = vpack.c.bf16 %v187_v22, %v184_v18  ;;  %v193_v30 = vld [vmem:[%s1040_s4 + $0xb8] sm:$0xff] }
  0x99   :  { %v66_v34 = vmul.f32 0.015625, %v51_v31  ;;  %v67_v35 = vmul.f32 0.015625, %v54_v32  ;;  %v79_v36 = vmul.f32 %v775_v28, %v775_v28  ;;  %v81_v37 = vmul.f32 %v777_v29, %v777_v29 }
  0x9a   :  { %595 = vmatprep.subr.bf16.mxu1 %v200_v5  ;;  %v207_v26 = vpack.c.bf16 %v191_v24, %v188_v23  ;;  %v209_v31 = vpack.c.bf16 %v193_v30, %v190_v27  ;;  %v694_v32 = vmov 0  }
  0x9b   :  { %v785_v38 = vsub.f32 %v30_v8, %v66_v34  ;;  %v787_v39 = vsub.f32 %v31_v9, %v67_v35  ;;  %v89_v40 = vsel %vm36_vm0, %v79_v36, 0.0  ;;  %v95_v43 = vsel %vm36_vm0, %v81_v37, 0.0  ;;  %v186_v8 = vld [vmem:[%s1040_s4 + $0x80] sm:$0xff]  ;;  %596 = vmatpush3.bf16.msra.mxu1 %v200_v5  ;;  %271 = vmatprep.mubr.bf16.mxu0 %v694_v32  ;;  %v378_v34 = vld [vmem:[%s1041_s1 + $0x8] sm:$0xff]  ;;  %v379_v35 = vld [vmem:[%s1041_s1 + $0x10] sm:$0xff] }
  0x9c   :  { %93 = vadd.xlane.f32.xlu0 %v92_v33  ;;  %90 = vadd.xlane.f32.xlu1 %v89_v40  ;;  %v57_v41 = vpop.xlane.xlu0 %56  ;;  %v60_v42 = vpop.xlane.xlu1 %59  ;;  %v178_v9 = vld [vmem:[%s1040_s4 + $0x40] sm:$0xff]  ;;  %v205_v10 = vpack.c.bf16 %v186_v8, %v183_v7  ;;  %v380_v36 = vld [vmem:[%s1041_s1 + $0x18] sm:$0xff]  ;;  %v382_v40 = vld [vmem:[%s1041_s1 + $0x28] sm:$0xff] }
  0x9d   :  { %v68_v44 = vmul.f32 0.015625, %v57_v41  ;;  %v69_v45 = vmul.f32 0.015625, %v60_v42  ;;  %v82_v46 = vmul.f32 %v785_v38, %v785_v38  ;;  %v83_v47 = vmul.f32 %v787_v39, %v787_v39  ;;  %612 = vset.pattern.permute.xlu0 %v694_v32  ;;  %613 = vset.pattern.permute.xlu1 %v694_v32  ;;  %v377_v33 = vld [vmem:[%s1041_s1] sm:$0xff]  ;;  %v383_v41 = vld [vmem:[%s1041_s1 + $0x30] sm:$0xff]  ;;  %v384_v42 = vld [vmem:[%s1041_s1 + $0x38] sm:$0xff] }
  0x9e   :  { %v203_v14 = vpack.c.bf16 %v181_v11, %v178_v9  ;;  %243 = vmatprep.subr.bf16.mxu0 %v205_v10  ;;  %v381_v37 = vld [vmem:[%s1041_s1 + $0x20] sm:$0xff] }
  0x9f   :  { %v795_v48 = vsub.f32 %v32_v12, %v68_v44  ;;  %v797_v49 = vsub.f32 %v33_v13, %v69_v45  ;;  %v98_v50 = vsel %vm36_vm0, %v82_v46, 0.0  ;;  %v101_v51 = vsel %vm36_vm0, %v83_v47, 0.0  ;;  %v182_v12 = vld [vmem:[%s1040_s4 + $0x60] sm:$0xff]  ;;  %v185_v13 = vld [vmem:[%s1040_s4 + $0x78] sm:$0xff] }
  0xa0   :  { %96 = vadd.xlane.f32.xlu1 %v95_v43  ;;  %99 = vadd.xlane.f32.xlu0 %v98_v50  ;;  %v204_v15 = vpack.c.bf16 %v185_v13, %v182_v12 }
  0xa1   :  { %v84_v52 = vmul.f32 %v795_v48, %v795_v48  ;;  %v85_v53 = vmul.f32 %v797_v49, %v797_v49  ;;  %597 = vmatprep.subr.bf16.mxu1 %v203_v14 }
  0xa2   :  { %244 = vmatpush1.bf16.msra.mxu0 %v204_v15  ;;  %598 = vmatpush3.bf16.msra.mxu1 %v203_v14 }
  0xa3   :  { %v104_v54 = vsel %vm36_vm0, %v84_v52, 0.0  ;;  %v107_v55 = vsel %vm36_vm0, %v85_v53, 0.0  ;;  %245 = vmatprep.subr.bf16.mxu0 %v208_v19  ;;  %599 = vmatprep.subr.bf16.mxu1 %v206_v25 }
  0xa4   :  { %102 = vadd.xlane.f32.xlu1 %v101_v51  ;;  %105 = vadd.xlane.f32.xlu0 %v104_v54 }
  0xa6   :  { %246 = vmatpush1.bf16.msra.mxu0 %v207_v26  ;;  %600 = vmatpush3.bf16.msra.mxu1 %v206_v25 }
  0xa7   :  { %601 = vmatprep.subr.bf16.mxu1 %v209_v31 }
  0xa8   :  { %108 = vadd.xlane.f32.xlu1 %v107_v55 }
  0xaa   :  { %602 = vmatpush3.bf16.msra.mxu1 %v209_v31 }
  0xb9   :  { %392 = vperm.xlu1 %613, %v378_v34  }
  0xba   :  { %387 = vperm.xlu0 %612, %v377_v33  }
  0xbd   :  { %397 = vperm.xlu1 %613, %v379_v35  }
  0xc1   :  { %402 = vperm.xlu1 %613, %v380_v36  }
  0xc5   :  { %407 = vperm.xlu1 %613, %v381_v37  }
  0xc9   :  { %412 = vperm.xlu1 %613, %v382_v40  }
  0xcd   :  { %417 = vperm.xlu1 %613, %v383_v41  }
  0xd1   :  { %422 = vperm.xlu1 %613, %v384_v42  }
 0x125   :  { %v88_v43 = vpop.xlane.xlu0 %87 }
 0x126   :  { %v110_v44 = vmul.f32 0.015625, %v88_v43 }
 0x128   :  { %v118_v45 = vadd.f32 1e-05, %v110_v44 }
 0x129   :  { %v91_v46 = vpop.xlane.xlu1 %90  ;;  %v94_v47 = vpop.xlane.xlu0 %93 }
 0x12a   :  { %614 = vrsqrt.f32 %v118_v45  ;;  %v111_v50 = vmul.f32 0.015625, %v91_v46  ;;  %v112_v51 = vmul.f32 0.015625, %v94_v47  ;;  %v210_v45 = vld [vmem:[%s1044_s5] sm:$0x7] }
 0x12c   :  { %v119_v52 = vadd.f32 1e-05, %v111_v50  ;;  %v120_v53 = vadd.f32 1e-05, %v112_v51 }
 0x12d   :  { %v97_v54 = vpop.xlane.xlu1 %96  ;;  %v100_v55 = vpop.xlane.xlu0 %99 }
 0x12e   :  { %616 = vrsqrt.f32 %v119_v52  ;;  %v113_v56 = vmul.f32 0.015625, %v97_v54  ;;  %v114_v57 = vmul.f32 0.015625, %v100_v55 }
 0x12f   :  { %618 = vrsqrt.f32 %v120_v53 }
 0x130   :  { %v121_v58 = vadd.f32 1e-05, %v113_v56  ;;  %v122_v59 = vadd.f32 1e-05, %v114_v57 }
 0x131   :  { %v103_v60 = vpop.xlane.xlu1 %102  ;;  %v106_v61 = vpop.xlane.xlu0 %105 }
 0x132   :  { %620 = vrsqrt.f32 %v121_v58  ;;  %v115_v62 = vmul.f32 0.015625, %v103_v60  ;;  %v116_v63 = vmul.f32 0.015625, %v106_v61 }
 0x133   :  { %622 = vrsqrt.f32 %v122_v59 }
 0x134   :  { %v615_v0 = vpop.eup %614  ;;  %v123_v1 = vadd.f32 1e-05, %v115_v62  ;;  %v124_v2 = vadd.f32 1e-05, %v116_v63 }
 0x135   :  { %v134_v3 = vmul.f32 %v615_v0, %v767_v20  ;;  %v109_v4 = vpop.xlane.xlu1 %108  ;;  %v562_v20 = vld [vmem:[%s1043_s3] ss:$0 sm:$0xff] }
 0x136   :  { %624 = vrsqrt.f32 %v123_v1  ;;  %v117_v5 = vmul.f32 0.015625, %v109_v4 }
 0x137   :  { %626 = vrsqrt.f32 %v124_v2  ;;  %v148_v11 = vmul.f32 %v561_v6, %v134_v3 }
 0x138   :  { %v617_v7 = vpop.eup %616  ;;  %v125_v8 = vadd.f32 1e-05, %v117_v5 }
 0x139   :  { %v619_v9 = vpop.eup %618  ;;  %v135_v10 = vmul.f32 %v617_v7, %v775_v28  ;;  %v162_v18 = vadd.f32 %v562_v20, %v148_v11 }
 0x13a   :  { %v136_v12 = vmul.f32 %v619_v9, %v769_v21  ;;  %628 = vrsqrt.f32 %v125_v8 }
 0x13b   :  { %v149_v13 = vmul.f32 %v561_v6, %v135_v10 }
 0x13c   :  { %v621_v14 = vpop.eup %620  ;;  %v150_v15 = vmul.f32 %v561_v6, %v136_v12 }
 0x13d   :  { %v623_v16 = vpop.eup %622  ;;  %v137_v17 = vmul.f32 %v621_v14, %v777_v29  ;;  %v163_v19 = vadd.f32 %v562_v20, %v149_v13 }
 0x13e   :  { %v138_v22 = vmul.f32 %v623_v16, %v785_v38  ;;  %v164_v25 = vadd.f32 %v562_v20, %v150_v15 }
 0x13f   :  { %v194_v23 = vpack.c.bf16 %v163_v19, %v162_v18  ;;  %v151_v28 = vmul.f32 %v561_v6, %v137_v17 }
 0x140   :  { %v625_v24 = vpop.eup %624  ;;  %v152_v30 = vmul.f32 %v561_v6, %v138_v22 }
 0x141   :  { %v627_v21 = vpop.eup %626  ;;  %v139_v26 = vmul.f32 %v625_v24, %v787_v39  ;;  %563 = vmatmul.mubr.msk.bf16.vlgmr.msra.gmra.mrb[0].mxu0 %vm36_vm0, %v194_v23  ;;  %603 = vmatprep.mubr.msk.bf16.mxu1 %vm36_vm0, %v194_v23  ;;  %v165_v27 = vadd.f32 %v562_v20, %v151_v28 }
 0x142   :  { %v140_v31 = vmul.f32 %v627_v21, %v795_v48  ;;  %281 = vmatprep.mubr.bf16.mxu0 %v694_v32  ;;  %v166_v35 = vadd.f32 %v562_v20, %v152_v30 }
 0x143   :  { %v195_v29 = vpack.c.bf16 %v165_v27, %v164_v25  ;;  %v153_v33 = vmul.f32 %v561_v6, %v139_v26 }
 0x144   :  { %v629_v38 = vpop.eup %628  ;;  %v154_v39 = vmul.f32 %v561_v6, %v140_v31  ;;  %v393_v31 = vpop.permute.xlu1 %392 }
 0x145   :  { %v141_v34 = vmul.f32 %v629_v38, %v797_v49  ;;  %604 = vmatmul.mubr.msk.bf16.vlgmr.msra.gmra.mrb[0].mxu1 %vm36_vm0, %v195_v29  ;;  %v167_v36 = vadd.f32 %v562_v20, %v153_v33  ;;  %v212_v49 = vlaneseq }
 0x146   :  { %v168_v41 = vadd.f32 %v562_v20, %v154_v39 }
 0x147   :  { %v196_v37 = vpack.c.bf16 %v167_v36, %v166_v35  ;;  %v155_v40 = vmul.f32 %v561_v6, %v141_v34  ;;  %v931_v43 = vshrl.u32 %v212_v49, 7 }
 0x149   :  { %564 = vmatmul.mubr.msk.bf16.gmra.mrb[4].mxu0 %vm36_vm0, %v195_v29  ;;  %607 = vmatprep.mubr.msk.bf16.mxu1 %vm36_vm0, %v196_v37  ;;  %v169_v48 = vadd.f32 %v562_v20, %v155_v40  ;;  %v218_v44 = vsub.s32 1, %v931_v43  ;;  %v222_v46 = vsub.s32 2, %v931_v43  ;;  %v214_v18 = vsub.s32 0, %v931_v43 }
 0x14a   :  { %291 = vmatprep.mubr.bf16.mxu0 %v694_v32 }
 0x14b   :  { %v197_v42 = vpack.c.bf16 %v169_v48, %v168_v41  ;;  %v938_v47 = vrot.slane %v210_v45, %v218_v44  ;;  %v223_v52 = vrot.slane %v210_v45, %v222_v46  ;;  %v957_v34 = vrot.slane %v210_v45, %v214_v18  ;;  %v388_v45 = vpop.permute.xlu0 %387 }
 0x14d   :  { %608 = vmatmul.mubr.msk.bf16.gmra.mrb[4].mxu1 %vm36_vm0, %v197_v42 }
 0x151   :  { %565 = vmatmul.mubr.msk.bf16.gmra.mrb[8].mxu0 %vm36_vm0, %v196_v37 }
 0x152   :  { %301 = vmatprep.mubr.bf16.mxu0 %v694_v32 }
 0x159   :  { %566 = vmatmul.mubr.msk.bf16.gmra.mrb[12].mxu0 %vm36_vm0, %v197_v42 }
 0x214   :  { %v940_v50 = vpop.f32.mrb[0].mxu0 }
 0x215   :  { %v275_v51 = vpop.f32.mrb[1].mxu0  ;;  %v274_v44 = vadd.f32 %v940_v50, %v957_v34 }
 0x216   :  { %v276_v32 = vadd.f32 %v275_v51, %v938_v47  ;;  %v943_v53 = vpop.f32.mrb[2].mxu0 }
 0x217   :  { %v279_v54 = vpop.f32.mrb[3].mxu0 }
 0x218   :  { %v571_v55 = vmul.f32 -1.442695, %v276_v32  ;;  %v280_v56 = vadd.f32 %v279_v54, %v938_v47  ;;  %v605_v57 = vpop.f32.mrb[0].mxu1 }
 0x219   :  { %v355_v58 = vadd.f32 %v605_v57, %v223_v52  ;;  %v346_v59 = vpop.f32.mrb[1].mxu1 }
 0x21a   :  { %630 = vpow2.f32 %v571_v55  ;;  %v572_v60 = vmul.f32 -1.442695, %v280_v56  ;;  %v347_v61 = vadd.f32 %v346_v59, %v223_v52  ;;  %v606_v62 = vpop.f32.mrb[2].mxu1  ;;  %v278_v59 = vadd.f32 %v943_v53, %v957_v34 }
 0x21b   :  { %v581_v63 = vmul.f32 -1.442695, %v355_v58  ;;  %v358_v0 = vadd.f32 %v606_v62, %v223_v52  ;;  %v349_v1 = vpop.f32.mrb[3].mxu1  ;;  %v425_v62 = vmul.f32 %v388_v45, %v274_v44 }
 0x21c   :  { %632 = vpow2.f32 %v572_v60  ;;  %v579_v2 = vmul.f32 -1.442695, %v347_v61  ;;  %v350_v3 = vadd.f32 %v349_v1, %v223_v52  ;;  %v946_v4 = vpop.f32.mrb[4].mxu0 }
 0x21d   :  { %634 = vpow2.f32 %v581_v63  ;;  %v582_v5 = vmul.f32 -1.442695, %v358_v0  ;;  %v285_v6 = vpop.f32.mrb[5].mxu0 }
 0x21e   :  { %636 = vpow2.f32 %v579_v2  ;;  %v580_v7 = vmul.f32 -1.442695, %v350_v3  ;;  %v286_v8 = vadd.f32 %v285_v6, %v938_v47  ;;  %v949_v9 = vpop.f32.mrb[6].mxu0 }
 0x21f   :  { %638 = vpow2.f32 %v582_v5  ;;  %v289_v10 = vpop.f32.mrb[7].mxu0 }
 0x220   :  { %640 = vpow2.f32 %v580_v7  ;;  %v573_v11 = vmul.f32 -1.442695, %v286_v8  ;;  %v290_v12 = vadd.f32 %v289_v10, %v938_v47  ;;  %v609_v20 = vpop.f32.mrb[4].mxu1  ;;  %v426_v10 = vmul.f32 %v393_v31, %v278_v59 }
 0x221   :  { %v371_v13 = vadd.f32 %v609_v20, %v223_v52  ;;  %v362_v14 = vpop.f32.mrb[5].mxu1 }
 0x222   :  { %642 = vpow2.f32 %v573_v11  ;;  %v574_v15 = vmul.f32 -1.442695, %v290_v12  ;;  %v363_v16 = vadd.f32 %v362_v14, %v223_v52  ;;  %v610_v17 = vpop.f32.mrb[6].mxu1 }
 0x223   :  { %v585_v19 = vmul.f32 -1.442695, %v371_v13  ;;  %v374_v22 = vadd.f32 %v610_v17, %v223_v52  ;;  %v365_v23 = vpop.f32.mrb[7].mxu1 }
 0x224   :  { %v631_v28 = vpop.eup %630  ;;  %644 = vpow2.f32 %v574_v15  ;;  %v583_v24 = vmul.f32 -1.442695, %v363_v16  ;;  %v953_v25 = vpop.f32.mrb[8].mxu0  ;;  %v366_v29 = vadd.f32 %v365_v23, %v223_v52 }
 0x225   :  { %v457_v21 = vadd.f32 1.0, %v631_v28  ;;  %646 = vpow2.f32 %v585_v19  ;;  %v586_v26 = vmul.f32 -1.442695, %v374_v22  ;;  %v295_v27 = vpop.f32.mrb[9].mxu0  ;;  %v398_v52 = vpop.permute.xlu1 %397 }
 0x226   :  { %v633_v30 = vpop.eup %632  ;;  %648 = vpow2.f32 %v583_v24  ;;  %v955_v33 = vpop.f32.mrb[10].mxu0  ;;  %v296_v40 = vadd.f32 %v295_v27, %v938_v47  ;;  %v584_v43 = vmul.f32 -1.442695, %v366_v29 }
 0x227   :  { %v635_v38 = vpop.eup %634  ;;  %650 = vrcp.f32 %v457_v21  ;;  %v458_v35 = vadd.f32 1.0, %v633_v30  ;;  %v299_v36 = vpop.f32.mrb[11].mxu0 }
 0x228   :  { %v637_v39 = vpop.eup %636  ;;  %v523_v37 = vadd.f32 1.0, %v635_v38  ;;  %652 = vpow2.f32 %v586_v26  ;;  %v575_v32 = vmul.f32 -1.442695, %v296_v40  ;;  %v300_v54 = vadd.f32 %v299_v36, %v938_v47 }
 0x229   :  { %v639_v41 = vpop.eup %638  ;;  %654 = vrcp.f32 %v458_v35  ;;  %v521_v48 = vadd.f32 1.0, %v637_v39  ;;  %v403_v11 = vpop.permute.xlu1 %402 }
 0x22a   :  { %v641_v42 = vpop.eup %640  ;;  %656 = vrcp.f32 %v523_v37  ;;  %v524_v49 = vadd.f32 1.0, %v639_v41  ;;  %v576_v3 = vmul.f32 -1.442695, %v300_v54 }
 0x22b   :  { %658 = vrcp.f32 %v521_v48  ;;  %v522_v46 = vadd.f32 1.0, %v641_v42 }
 0x22c   :  { %v643_v51 = vpop.eup %642  ;;  %660 = vrcp.f32 %v524_v49  ;;  %v963_v55 = vpop.f32.mrb[12].mxu0  ;;  %v294_v49 = vadd.f32 %v953_v25, %v957_v34 }
 0x22d   :  { %662 = vrcp.f32 %v522_v46  ;;  %v459_v56 = vadd.f32 1.0, %v643_v51  ;;  %v305_v57 = vpop.f32.mrb[13].mxu0  ;;  %v408_v28 = vpop.permute.xlu1 %407  ;;  %v298_v51 = vadd.f32 %v955_v33, %v957_v34  ;;  %v304_v54 = vadd.f32 %v963_v55, %v957_v34 }
 0x22e   :  { %v645_v58 = vpop.eup %644  ;;  %664 = vpow2.f32 %v584_v43  ;;  %v306_v50 = vadd.f32 %v305_v57, %v938_v47  ;;  %v968_v60 = vpop.f32.mrb[14].mxu0  ;;  %v429_v46 = vmul.f32 %v408_v28, %v294_v49 }
 0x22f   :  { %v647_v61 = vpop.eup %646  ;;  %666 = vrcp.f32 %v459_v56  ;;  %v460_v63 = vadd.f32 1.0, %v645_v58  ;;  %v309_v0 = vpop.f32.mrb[15].mxu0  ;;  %v308_v25 = vadd.f32 %v968_v60, %v957_v34 }
 0x230   :  { %v649_v1 = vpop.eup %648  ;;  %v527_v2 = vadd.f32 1.0, %v647_v61  ;;  %668 = vpow2.f32 %v575_v32  ;;  %v310_v5 = vadd.f32 %v309_v0, %v938_v47  ;;  %v577_v12 = vmul.f32 -1.442695, %v306_v50 }
 0x231   :  { %v651_v6 = vpop.eup %650  ;;  %670 = vrcp.f32 %v460_v63  ;;  %v525_v7 = vadd.f32 1.0, %v649_v1  ;;  %v284_v47 = vadd.f32 %v946_v4, %v957_v34  ;;  %v288_v4 = vadd.f32 %v949_v9, %v957_v34  ;;  %v413_v39 = vpop.permute.xlu1 %412 }
 0x232   :  { %v653_v53 = vpop.eup %652  ;;  %v481_v8 = vmul.f32 %v651_v6, %v425_v62  ;;  %672 = vrcp.f32 %v527_v2  ;;  %v578_v14 = vmul.f32 -1.442695, %v310_v5  ;;  %v430_v56 = vmul.f32 %v413_v39, %v298_v51 }
 0x233   :  { %v655_v20 = vpop.eup %654  ;;  %674 = vrcp.f32 %v525_v7  ;;  %v528_v13 = vadd.f32 1.0, %v653_v53  ;;  %v427_v23 = vmul.f32 %v398_v52, %v284_v47  ;;  %v428_v27 = vmul.f32 %v403_v11, %v288_v4 }
 0x234   :  { %v657_v15 = vpop.eup %656  ;;  %489 = vst [vmem:[%s1045_s6] sm:$0xff] %v481_v8  ;;  %v482_v16 = vmul.f32 %v655_v20, %v426_v10  ;;  %676 = vpow2.f32 %v576_v3 }
 0x235   :  { %v659_v17 = vpop.eup %658  ;;  %547 = vst.msk [vmem:[%s1046_s7 + $0x10] sm:$0xff] %vm36_vm0, %v657_v15  ;;  %678 = vrcp.f32 %v528_v13  ;;  %v418_v44 = vpop.permute.xlu1 %417 }
 0x236   :  { %v661_v18 = vpop.eup %660  ;;  %490 = vst [vmem:[%s1045_s6 + $0x8] sm:$0xff] %v482_v16  ;;  %545 = vst.msk [vmem:[%s1046_s7] sm:$0xff] %vm36_vm0, %v659_v17  ;;  %680 = vpow2.f32 %v577_v12  ;;  %v431_v50 = vmul.f32 %v418_v44, %v304_v54 }
 0x237   :  { %v663_v19 = vpop.eup %662  ;;  %548 = vst.msk [vmem:[%s1046_s7 + $0x18] sm:$0xff] %vm36_vm0, %v661_v18  ;;  %682 = vpow2.f32 %v578_v14 }
 0x238   :  { %v665_v22 = vpop.eup %664  ;;  %546 = vst.msk [vmem:[%s1046_s7 + $0x8] sm:$0xff] %vm36_vm0, %v663_v19 }
 0x239   :  { %v667_v24 = vpop.eup %666  ;;  %v526_v21 = vadd.f32 1.0, %v665_v22  ;;  %v423_v57 = vpop.permute.xlu1 %422 }
 0x23a   :  { %v669_v26 = vpop.eup %668  ;;  %v483_v9 = vmul.f32 %v667_v24, %v427_v23  ;;  %v432_v62 = vmul.f32 %v423_v57, %v308_v25 }
 0x23b   :  { %v671_v30 = vpop.eup %670  ;;  %684 = vrcp.f32 %v526_v21  ;;  %v461_v31 = vadd.f32 1.0, %v669_v26 }
 0x23c   :  { %v673_v29 = vpop.eup %672  ;;  %491 = vst [vmem:[%s1045_s6 + $0x10] sm:$0xff] %v483_v9  ;;  %v484_v38 = vmul.f32 %v671_v30, %v428_v27 }
 0x23d   :  { %v675_v35 = vpop.eup %674  ;;  %551 = vst.msk [vmem:[%s1046_s7 + $0x30] sm:$0xff] %vm36_vm0, %v673_v29  ;;  %686 = vrcp.f32 %v461_v31 }
 0x23e   :  { %v677_v36 = vpop.eup %676  ;;  %492 = vst [vmem:[%s1045_s6 + $0x18] sm:$0xff] %v484_v38  ;;  %549 = vst.msk [vmem:[%s1046_s7 + $0x20] sm:$0xff] %vm36_vm0, %v675_v35 }
 0x23f   :  { %v679_v37 = vpop.eup %678  ;;  %v462_v40 = vadd.f32 1.0, %v677_v36 }
 0x240   :  { %v681_v41 = vpop.eup %680  ;;  %552 = vst.msk [vmem:[%s1046_s7 + $0x38] sm:$0xff] %vm36_vm0, %v679_v37 }
 0x241   :  { %v683_v48 = vpop.eup %682  ;;  %688 = vrcp.f32 %v462_v40  ;;  %v463_v42 = vadd.f32 1.0, %v681_v41 }
 0x242   :  { %v464_v43 = vadd.f32 1.0, %v683_v48 }
 0x243   :  { %690 = vrcp.f32 %v463_v42 }
 0x244   :  { %692 = vrcp.f32 %v464_v43 }
 0x245   :  { %v685_v45 = vpop.eup %684 }
 0x246   :  { %550 = vst.msk [vmem:[%s1046_s7 + $0x28] sm:$0xff] %vm36_vm0, %v685_v45 }
 0x247   :  { %v687_v52 = vpop.eup %686 }
 0x248   :  { %v485_v32 = vmul.f32 %v687_v52, %v429_v46 }
 0x24a   :  { %493 = vst [vmem:[%s1045_s6 + $0x20] sm:$0xff] %v485_v32 }
 0x24b   :  { %v689_v58 = vpop.eup %688 }
 0x24c   :  { %v486_v59 = vmul.f32 %v689_v58, %v430_v56 }
 0x24d   :  { %v691_v61 = vpop.eup %690 }
 0x24e   :  { %v693_v33 = vpop.eup %692  ;;  %494 = vst [vmem:[%s1045_s6 + $0x28] sm:$0xff] %v486_v59  ;;  %v487_v55 = vmul.f32 %v691_v61, %v431_v50 }
 0x24f   :  { %v488_v63 = vmul.f32 %v693_v33, %v432_v62 }
 0x250   :  { %495 = vst [vmem:[%s1045_s6 + $0x30] sm:$0xff] %v487_v55 }
 0x251   :  { %496 = vst [vmem:[%s1045_s6 + $0x38] sm:$0xff] %v488_v63 }

// kernel: template_embedding_forward.49
= control target key start
LH: loop header
LB: loop body
LE: loop exit
PB: predicated region body
PF: predicated region fallthrough
CT: control target
= control target key end

     0   :  { %vm289_vm0 = vcmask 1043456   ;;  %vm276_vm1 = vcmask 719872   ;;  %vm373_vm2 = vcmask 523264   ;;  %s734_s1 = inlined_call_operand.vmem [shape: f32[64,128], index: 1, kind: input, shape index: {}]   ;;  %s735_s5 = inlined_call_operand.vmem [shape: f32[128,64], index: 5, kind: input, shape index: {}]   ;;  %s736_s4 = inlined_call_operand.vmem [shape: f32[88,64], index: 4, kind: input, shape index: {}]   ;;  %s737_s0 = inlined_call_operand.vmem [shape: f32[64,88], index: 0, kind: input, shape index: {}]   ;;  %s738_s2 = inlined_call_operand.vmem [shape: f32[1,128], index: 2, kind: input, shape index: {}]   ;;  %s739_s3 = inlined_call_operand.vmem [shape: f32[1,128], index: 3, kind: input, shape index: {}]   ;;  %s740_s6 = inlined_call_operand.vmem [shape: f32[1,64], index: 6, kind: input, shape index: {}]   ;;  %s741_s7 = inlined_call_operand.vmem [shape: f32[64,64], index: 7, kind: output, shape index: {}]  }
   0x1   :  { %v56_v0 = vld [vmem:[%s734_s1] sm:$0xff]  ;;  %v58_v1 = vld [vmem:[%s734_s1 + $0x10] sm:$0xff]  ;;  %v57_v2 = vld [vmem:[%s734_s1 + $0x8] sm:$0xff] }
   0x2   :  { %66 = vadd.xlane.f32.xlu0 %v56_v0  ;;  %70 = vadd.xlane.f32.xlu1 %v58_v1  ;;  %v59_v3 = vld [vmem:[%s734_s1 + $0x18] sm:$0xff]  ;;  %v60_v4 = vld [vmem:[%s734_s1 + $0x20] sm:$0xff]  ;;  %v61_v5 = vld [vmem:[%s734_s1 + $0x28] sm:$0xff] }
   0x3   :  { %v62_v6 = vld [vmem:[%s734_s1 + $0x30] sm:$0xff]  ;;  %v63_v7 = vld [vmem:[%s734_s1 + $0x38] sm:$0xff]  ;;  %v183_v8 = vld [vmem:[%s735_s5] sm:$0xff] }
   0x4   :  { %v184_v9 = vld [vmem:[%s735_s5 + $0x8] sm:$0xff]  ;;  %v185_v43 = vld [vmem:[%s735_s5 + $0x10] sm:$0xff]  ;;  %v186_v44 = vld [vmem:[%s735_s5 + $0x18] sm:$0xff] }
   0x5   :  { %v203_v10 = vpack.c.bf16 %v184_v9, %v183_v8  ;;  %v204_v45 = vpack.c.bf16 %v186_v44, %v185_v43  ;;  %v35_v46 = vld [vmem:[%s736_s4] sm:$0xff]  ;;  %v36_v47 = vld [vmem:[%s736_s4 + $0x8] sm:$0xff]  ;;  %v37_v52 = vld [vmem:[%s736_s4 + $0x10] sm:$0xff] }
   0x6   :  { %68 = vadd.xlane.f32.xlu0 %v57_v2  ;;  %72 = vadd.xlane.f32.xlu1 %v59_v3  ;;  %v50_v48 = vpack.c.bf16 %v36_v47, %v35_v46  ;;  %v187_v49 = vld [vmem:[%s735_s5 + $0x20] sm:$0xff]  ;;  %v188_v50 = vld [vmem:[%s735_s5 + $0x28] sm:$0xff]  ;;  %v38_v53 = vld [vmem:[%s736_s4 + $0x18] sm:$0xff] }
   0x7   :  { %415 = vmatprep.subr.bf16.mxu1 %v203_v10  ;;  %v205_v51 = vpack.c.bf16 %v188_v50, %v187_v49  ;;  %v51_v54 = vpack.c.bf16 %v38_v53, %v37_v52  ;;  %v189_v55 = vld [vmem:[%s735_s5 + $0x30] sm:$0xff]  ;;  %v190_v56 = vld [vmem:[%s735_s5 + $0x38] sm:$0xff]  ;;  %v39_v58 = vld [vmem:[%s736_s4 + $0x20] sm:$0xff] }
   0x8   :  { %416 = vmatpush3.bf16.msra.mxu1 %v203_v10  ;;  %439 = vmatprep.subr.bf16.mxu0 %v50_v48  ;;  %v206_v57 = vpack.c.bf16 %v190_v56, %v189_v55  ;;  %v40_v59 = vld [vmem:[%s736_s4 + $0x28] sm:$0xff]  ;;  %v191_v61 = vld [vmem:[%s735_s5 + $0x40] sm:$0xff] }
   0x9   :  { %417 = vmatprep.subr.bf16.mxu1 %v204_v45  ;;  %440 = vmatpush3.bf16.msra.mxu0 %v50_v48  ;;  %v52_v60 = vpack.c.bf16 %v40_v59, %v39_v58  ;;  %v192_v62 = vld [vmem:[%s735_s5 + $0x48] sm:$0xff]  ;;  %v195_v9 = vld [vmem:[%s735_s5 + $0x60] sm:$0xff] }
   0xa   :  { %74 = vadd.xlane.f32.xlu0 %v60_v4  ;;  %76 = vadd.xlane.f32.xlu1 %v61_v5  ;;  %v207_v63 = vpack.c.bf16 %v192_v62, %v191_v61  ;;  %v196_v10 = vld [vmem:[%s735_s5 + $0x68] sm:$0xff] }
   0xb   :  { %441 = vmatprep.subr.bf16.mxu0 %v51_v54 }
   0xc   :  { %418 = vmatpush3.bf16.msra.mxu1 %v204_v45 }
   0xd   :  { %419 = vmatprep.subr.bf16.mxu1 %v205_v51  ;;  %442 = vmatpush3.bf16.msra.mxu0 %v51_v54 }
   0xe   :  { %78 = vadd.xlane.f32.xlu0 %v62_v6  ;;  %80 = vadd.xlane.f32.xlu1 %v63_v7 }
   0xf   :  { %443 = vmatprep.subr.bf16.mxu0 %v52_v60 }
  0x10   :  { %420 = vmatpush3.bf16.msra.mxu1 %v205_v51 }
  0x11   :  { %421 = vmatprep.subr.bf16.mxu1 %v206_v57  ;;  %444 = vmatpush3.bf16.msra.mxu0 %v52_v60 }
  0x14   :  { %422 = vmatpush3.bf16.msra.mxu1 %v206_v57 }
  0x15   :  { %423 = vmatprep.subr.bf16.mxu1 %v207_v63 }
  0x18   :  { %424 = vmatpush3.bf16.msra.mxu1 %v207_v63  ;;  %v386_v63 = vld [vmem:[%s738_s2] ss:$0 sm:$0xff] }
  0x8f   :  { %v67_v11 = vpop.xlane.xlu0 %66  ;;  %v71_v12 = vpop.xlane.xlu1 %70 }
  0x90   :  { %v83_v13 = vmul.f32 0.0078125, %v67_v11  ;;  %v85_v14 = vmul.f32 0.0078125, %v71_v12  ;;  %v45_v11 = vld [vmem:[%s736_s4 + $0x50] sm:$0xff]  ;;  %v209_v12 = vpack.c.bf16 %v196_v10, %v195_v9 }
  0x92   :  { %v554_v15 = vsub.f32 %v56_v0, %v83_v13  ;;  %v556_v16 = vsub.f32 %v58_v1, %v85_v14  ;;  %v41_v0 = vld [vmem:[%s736_s4 + $0x30] sm:$0xff]  ;;  %v42_v1 = vld [vmem:[%s736_s4 + $0x38] sm:$0xff]  ;;  %v55_v13 = vpack.c.bf16 %v45_v11, %v45_v11 }
  0x93   :  { %v69_v17 = vpop.xlane.xlu0 %68  ;;  %v73_v18 = vpop.xlane.xlu1 %72  ;;  %v197_v14 = vld [vmem:[%s735_s5 + $0x70] sm:$0xff] }
  0x94   :  { %v84_v19 = vmul.f32 0.0078125, %v69_v17  ;;  %v99_v20 = vmul.f32 %v554_v15, %v554_v15  ;;  %v86_v21 = vmul.f32 0.0078125, %v73_v18  ;;  %v101_v24 = vmul.f32 %v556_v16, %v556_v16  ;;  %v198_v17 = vld [vmem:[%s735_s5 + $0x78] sm:$0xff] }
  0x95   :  { %v210_v18 = vpack.c.bf16 %v198_v17, %v197_v14 }
  0x96   :  { %v560_v22 = vsub.f32 %v57_v2, %v84_v19  ;;  %107 = vadd.xlane.f32.xlu0 %v99_v20  ;;  %v562_v23 = vsub.f32 %v59_v3, %v86_v21  ;;  %v53_v2 = vpack.c.bf16 %v42_v1, %v41_v0  ;;  %v193_v3 = vld [vmem:[%s735_s5 + $0x50] sm:$0xff]  ;;  %v291_v19 = vsel %vm289_vm0, %v55_v13, 0  ;;  %v27_v20 = vld [vmem:[%s737_s0] sm:$0xff]  ;;  %v28_v21 = vld [vmem:[%s737_s0 + $0x8] sm:$0xff] }
  0x97   :  { %v75_v25 = vpop.xlane.xlu0 %74  ;;  %v77_v26 = vpop.xlane.xlu1 %76 }
  0x98   :  { %v87_v27 = vmul.f32 0.0078125, %v75_v25  ;;  %v100_v28 = vmul.f32 %v560_v22, %v560_v22  ;;  %v88_v29 = vmul.f32 0.0078125, %v77_v26  ;;  %v102_v32 = vmul.f32 %v562_v23, %v562_v23  ;;  %445 = vmatprep.subr.bf16.mxu0 %v53_v2  ;;  %v29_v25 = vld [vmem:[%s737_s0 + $0x10] sm:$0xff]  ;;  %v30_v26 = vld [vmem:[%s737_s0 + $0x18] sm:$0xff] }
  0x99   :  { %446 = vmatpush3.bf16.msra.mxu0 %v53_v2 }
  0x9a   :  { %v568_v30 = vsub.f32 %v60_v4, %v87_v27  ;;  %111 = vadd.xlane.f32.xlu0 %v101_v24  ;;  %109 = vadd.xlane.f32.xlu1 %v100_v28  ;;  %v570_v31 = vsub.f32 %v61_v5, %v88_v29  ;;  %v194_v4 = vld [vmem:[%s735_s5 + $0x58] sm:$0xff]  ;;  %v46_v24 = vpack.c.bf16 %v28_v21, %v27_v20  ;;  %v31_v28 = vld [vmem:[%s737_s0 + $0x20] sm:$0xff]  ;;  %v32_v29 = vld [vmem:[%s737_s0 + $0x28] sm:$0xff] }
  0x9b   :  { %v79_v33 = vpop.xlane.xlu0 %78  ;;  %v81_v34 = vpop.xlane.xlu1 %80  ;;  %v208_v5 = vpack.c.bf16 %v194_v4, %v193_v3  ;;  %v47_v27 = vpack.c.bf16 %v30_v26, %v29_v25 }
  0x9c   :  { %v89_v35 = vmul.f32 0.0078125, %v79_v33  ;;  %v103_v36 = vmul.f32 %v568_v30, %v568_v30  ;;  %v90_v37 = vmul.f32 0.0078125, %v81_v34  ;;  %v104_v40 = vmul.f32 %v570_v31, %v570_v31  ;;  %451 = vmatprep.mubr.msk.bf16.mxu0 %vm276_vm1, %v46_v24  ;;  %v33_v33 = vld [vmem:[%s737_s0 + $0x30] sm:$0xff]  ;;  %v34_v34 = vld [vmem:[%s737_s0 + $0x38] sm:$0xff] }
  0x9d   :  { %425 = vmatprep.subr.bf16.mxu1 %v208_v5 }
  0x9e   :  { %v576_v38 = vsub.f32 %v62_v6, %v89_v35  ;;  %113 = vadd.xlane.f32.xlu1 %v102_v32  ;;  %115 = vadd.xlane.f32.xlu0 %v103_v36  ;;  %v578_v39 = vsub.f32 %v63_v7, %v90_v37  ;;  %v43_v6 = vld [vmem:[%s736_s4 + $0x40] sm:$0xff]  ;;  %v44_v7 = vld [vmem:[%s736_s4 + $0x48] sm:$0xff]  ;;  %v48_v32 = vpack.c.bf16 %v32_v29, %v31_v28 }
  0x9f   :  { %v54_v8 = vpack.c.bf16 %v44_v7, %v43_v6  ;;  %426 = vmatpush3.bf16.msra.mxu1 %v208_v5  ;;  %v49_v35 = vpack.c.bf16 %v34_v34, %v33_v33  ;;  %v387_v5 = vld [vmem:[%s739_s3] ss:$0 sm:$0xff] }
  0xa0   :  { %v105_v41 = vmul.f32 %v576_v38, %v576_v38  ;;  %v106_v42 = vmul.f32 %v578_v39, %v578_v39  ;;  %427 = vmatprep.subr.bf16.mxu1 %v209_v12 }
  0xa1   :  { %447 = vmatprep.subr.bf16.mxu0 %v54_v8 }
  0xa2   :  { %117 = vadd.xlane.f32.xlu1 %v104_v40  ;;  %119 = vadd.xlane.f32.xlu0 %v105_v41 }
  0xa3   :  { %448 = vmatpush3.bf16.msra.mxu0 %v54_v8  ;;  %428 = vmatpush3.bf16.msra.mxu1 %v209_v12 }
  0xa4   :  { %467 = vmatprep.subr.msk.bf16.mxu0 %vm289_vm0, %v55_v13  ;;  %429 = vmatprep.subr.bf16.mxu1 %v210_v18 }
  0xa6   :  { %121 = vadd.xlane.f32.xlu1 %v106_v42 }
  0xa7   :  { %450 = vmatpush3.bf16.msra.mxu0 %v291_v19  ;;  %430 = vmatpush3.bf16.msra.mxu1 %v210_v18 }
  0xaa   :  { %452 = vmatmul.mubr.msk.bf16.vlgmr.msra.gmra.mrb[0].mxu0 %vm276_vm1, %v47_v27 }
  0xab   :  { %455 = vmatprep.mubr.msk.bf16.mxu0 %vm276_vm1, %v48_v32 }
  0xb2   :  { %456 = vmatmul.mubr.msk.bf16.gmra.mrb[4].mxu0 %vm276_vm1, %v49_v35 }
 0x123   :  { %v108_v36 = vpop.xlane.xlu0 %107 }
 0x124   :  { %v123_v37 = vmul.f32 0.0078125, %v108_v36 }
 0x126   :  { %v131_v40 = vadd.f32 1e-05, %v123_v37 }
 0x127   :  { %v110_v41 = vpop.xlane.xlu1 %109  ;;  %v112_v42 = vpop.xlane.xlu0 %111 }
 0x128   :  { %468 = vrsqrt.f32 %v131_v40  ;;  %v124_v43 = vmul.f32 0.0078125, %v110_v41  ;;  %v125_v44 = vmul.f32 0.0078125, %v112_v42 }
 0x12a   :  { %v132_v45 = vadd.f32 1e-05, %v124_v43  ;;  %v133_v46 = vadd.f32 1e-05, %v125_v44 }
 0x12b   :  { %v114_v47 = vpop.xlane.xlu1 %113  ;;  %v116_v48 = vpop.xlane.xlu0 %115 }
 0x12c   :  { %470 = vrsqrt.f32 %v132_v45  ;;  %v126_v49 = vmul.f32 0.0078125, %v114_v47  ;;  %v127_v50 = vmul.f32 0.0078125, %v116_v48 }
 0x12d   :  { %472 = vrsqrt.f32 %v133_v46 }
 0x12e   :  { %v134_v51 = vadd.f32 1e-05, %v126_v49  ;;  %v135_v52 = vadd.f32 1e-05, %v127_v50 }
 0x12f   :  { %v118_v53 = vpop.xlane.xlu1 %117  ;;  %v120_v54 = vpop.xlane.xlu0 %119 }
 0x130   :  { %474 = vrsqrt.f32 %v134_v51  ;;  %v128_v55 = vmul.f32 0.0078125, %v118_v53  ;;  %v129_v56 = vmul.f32 0.0078125, %v120_v54 }
 0x131   :  { %476 = vrsqrt.f32 %v135_v52 }
 0x132   :  { %v469_v57 = vpop.eup %468  ;;  %v136_v58 = vadd.f32 1e-05, %v128_v55  ;;  %v137_v59 = vadd.f32 1e-05, %v129_v56 }
 0x133   :  { %v122_v60 = vpop.xlane.xlu1 %121  ;;  %v147_v61 = vmul.f32 %v469_v57, %v554_v15 }
 0x134   :  { %478 = vrsqrt.f32 %v136_v58  ;;  %v130_v62 = vmul.f32 0.0078125, %v122_v60 }
 0x135   :  { %480 = vrsqrt.f32 %v137_v59  ;;  %v161_v4 = vmul.f32 %v386_v63, %v147_v61 }
 0x136   :  { %v471_v0 = vpop.eup %470  ;;  %v138_v1 = vadd.f32 1e-05, %v130_v62 }
 0x137   :  { %v473_v2 = vpop.eup %472  ;;  %v148_v3 = vmul.f32 %v471_v0, %v560_v22  ;;  %v175_v9 = vadd.f32 %v387_v5, %v161_v4 }
 0x138   :  { %482 = vrsqrt.f32 %v138_v1  ;;  %v149_v15 = vmul.f32 %v473_v2, %v556_v16 }
 0x139   :  { %v162_v6 = vmul.f32 %v386_v63, %v148_v3 }
 0x13a   :  { %v475_v7 = vpop.eup %474  ;;  %v163_v12 = vmul.f32 %v386_v63, %v149_v15 }
 0x13b   :  { %v477_v8 = vpop.eup %476  ;;  %v176_v10 = vadd.f32 %v387_v5, %v162_v6  ;;  %v150_v11 = vmul.f32 %v475_v7, %v562_v23 }
 0x13c   :  { %v151_v13 = vmul.f32 %v477_v8, %v568_v30  ;;  %v177_v19 = vadd.f32 %v387_v5, %v163_v12 }
 0x13d   :  { %v199_v14 = vpack.c.bf16 %v176_v10, %v175_v9  ;;  %v164_v22 = vmul.f32 %v386_v63, %v150_v11 }
 0x13e   :  { %v479_v17 = vpop.eup %478  ;;  %v165_v16 = vmul.f32 %v386_v63, %v151_v13 }
 0x13f   :  { %v481_v18 = vpop.eup %480  ;;  %431 = vmatprep.mubr.bf16.mxu1 %v199_v14  ;;  %v178_v20 = vadd.f32 %v387_v5, %v164_v22  ;;  %v152_v21 = vmul.f32 %v479_v17, %v570_v31 }
 0x140   :  { %v153_v24 = vmul.f32 %v481_v18, %v576_v38  ;;  %v179_v23 = vadd.f32 %v387_v5, %v165_v16 }
 0x141   :  { %v200_v25 = vpack.c.bf16 %v178_v20, %v177_v19  ;;  %v166_v26 = vmul.f32 %v386_v63, %v152_v21 }
 0x142   :  { %v483_v27 = vpop.eup %482  ;;  %v167_v29 = vmul.f32 %v386_v63, %v153_v24 }
 0x143   :  { %432 = vmatmul.mubr.bf16.vlgmr.msra.gmra.mrb[0].mxu1 %v200_v25  ;;  %v180_v28 = vadd.f32 %v387_v5, %v166_v26  ;;  %v154_v30 = vmul.f32 %v483_v27, %v578_v39  ;;  %v392_v39 = vld [vmem:[%s740_s6] ss:$0 sm:$0xff] }
 0x144   :  { %v181_v34 = vadd.f32 %v387_v5, %v167_v29 }
 0x145   :  { %v201_v32 = vpack.c.bf16 %v180_v28, %v179_v23  ;;  %v168_v33 = vmul.f32 %v386_v63, %v154_v30 }
 0x147   :  { %435 = vmatprep.mubr.bf16.mxu1 %v201_v32  ;;  %v182_v35 = vadd.f32 %v387_v5, %v168_v33 }
 0x149   :  { %v202_v36 = vpack.c.bf16 %v182_v35, %v181_v34 }
 0x14b   :  { %436 = vmatmul.mubr.bf16.gmra.mrb[4].mxu1 %v202_v36 }
 0x17d   :  { %v453_v31 = vpop.f32.mrb[0].mxu0 }
 0x17e   :  { %v327_v37 = vpop.f32.mrb[1].mxu0 }
 0x17f   :  { %v454_v40 = vpop.f32.mrb[2].mxu0 }
 0x180   :  { %v330_v38 = vpop.f32.mrb[3].mxu0 }
 0x185   :  { %v457_v41 = vpop.f32.mrb[4].mxu0 }
 0x186   :  { %v343_v42 = vpop.f32.mrb[5].mxu0 }
 0x187   :  { %v458_v43 = vpop.f32.mrb[6].mxu0 }
 0x188   :  { %v346_v44 = vpop.f32.mrb[7].mxu0 }
 0x216   :  { %v433_v45 = vpop.f32.mrb[0].mxu1 }
 0x217   :  { %v336_v46 = vadd.f32 %v453_v31, %v433_v45  ;;  %v245_v47 = vpop.f32.mrb[1].mxu1 }
 0x218   :  { %v328_v48 = vadd.f32 %v327_v37, %v245_v47  ;;  %v434_v49 = vpop.f32.mrb[2].mxu1 }
 0x219   :  { %v367_v50 = vadd.f32 %v392_v39, %v336_v46  ;;  %v339_v51 = vadd.f32 %v454_v40, %v434_v49  ;;  %v248_v52 = vpop.f32.mrb[3].mxu1 }
 0x21a   :  { %v365_v53 = vadd.f32 %v392_v39, %v328_v48  ;;  %v331_v54 = vadd.f32 %v330_v38, %v248_v52 }
 0x21b   :  { %376 = vst.msk [vmem:[%s741_s7 + $0x10] sm:$0xff] %vm373_vm2, %v367_v50  ;;  %v368_v55 = vadd.f32 %v392_v39, %v339_v51 }
 0x21c   :  { %374 = vst.msk [vmem:[%s741_s7] sm:$0xff] %vm373_vm2, %v365_v53  ;;  %v366_v56 = vadd.f32 %v392_v39, %v331_v54 }
 0x21d   :  { %377 = vst.msk [vmem:[%s741_s7 + $0x18] sm:$0xff] %vm373_vm2, %v368_v55 }
 0x21e   :  { %375 = vst.msk [vmem:[%s741_s7 + $0x8] sm:$0xff] %vm373_vm2, %v366_v56  ;;  %v437_v57 = vpop.f32.mrb[4].mxu1 }
 0x21f   :  { %v352_v58 = vadd.f32 %v457_v41, %v437_v57  ;;  %v261_v59 = vpop.f32.mrb[5].mxu1 }
 0x220   :  { %v344_v60 = vadd.f32 %v343_v42, %v261_v59  ;;  %v438_v61 = vpop.f32.mrb[6].mxu1 }
 0x221   :  { %v371_v62 = vadd.f32 %v392_v39, %v352_v58  ;;  %v355_v63 = vadd.f32 %v458_v43, %v438_v61  ;;  %v264_v0 = vpop.f32.mrb[7].mxu1 }
 0x222   :  { %v369_v1 = vadd.f32 %v392_v39, %v344_v60  ;;  %v347_v2 = vadd.f32 %v346_v44, %v264_v0 }
 0x223   :  { %380 = vst.msk [vmem:[%s741_s7 + $0x30] sm:$0xff] %vm373_vm2, %v371_v62  ;;  %v372_v3 = vadd.f32 %v392_v39, %v355_v63 }
 0x224   :  { %378 = vst.msk [vmem:[%s741_s7 + $0x20] sm:$0xff] %vm373_vm2, %v369_v1  ;;  %v370_v4 = vadd.f32 %v392_v39, %v347_v2 }
 0x225   :  { %381 = vst.msk [vmem:[%s741_s7 + $0x38] sm:$0xff] %vm373_vm2, %v372_v3 }
 0x226   :  { %379 = vst.msk [vmem:[%s741_s7 + $0x28] sm:$0xff] %vm373_vm2, %v370_v4 }

// kernel: template_embedding_forward.52
= control target key start
LH: loop header
LB: loop body
LE: loop exit
PB: predicated region body
PF: predicated region fallthrough
CT: control target
= control target key end

     0   :  { %vm69_vm0 = vcmask 523264   ;;  %s640_s0 = inlined_call_operand.vmem [shape: f32[64,64], index: 0, kind: input, shape index: {}]   ;;  %s641_s5 = inlined_call_operand.vmem [shape: f32[64,64], index: 5, kind: input, shape index: {}]   ;;  %s642_s3 = inlined_call_operand.vmem [shape: f32[1,64], index: 3, kind: input, shape index: {}]   ;;  %s643_s4 = inlined_call_operand.vmem [shape: f32[1,64], index: 4, kind: input, shape index: {}]   ;;  %s644_s6 = inlined_call_operand.vmem [shape: f32[1,64], index: 6, kind: input, shape index: {}]   ;;  %s645_s1 = inlined_call_operand.vmem [shape: f32[64,64], index: 1, kind: input, shape index: {}]   ;;  %s646_s2 = inlined_call_operand.vmem [shape: f32[64,64], index: 2, kind: input, shape index: {}]   ;;  %s647_s7 = inlined_call_operand.vmem [shape: f32[64,64], index: 7, kind: output, shape index: {}]  }
   0x1   :  { %v27_v0 = vld [vmem:[%s640_s0] sm:$0xff]  ;;  %v28_v1 = vld [vmem:[%s640_s0 + $0x8] sm:$0xff]  ;;  %v29_v2 = vld [vmem:[%s640_s0 + $0x10] sm:$0xff] }
   0x2   :  { %35 = vxpose.xlu0.b32.start [1/8] (short) (narrow) %v27_v0, 64  ;;  %v30_v3 = vld [vmem:[%s640_s0 + $0x18] sm:$0xff]  ;;  %v31_v4 = vld [vmem:[%s640_s0 + $0x20] sm:$0xff]  ;;  %v32_v5 = vld [vmem:[%s640_s0 + $0x28] sm:$0xff] }
   0x3   :  { %v33_v6 = vld [vmem:[%s640_s0 + $0x30] sm:$0xff]  ;;  %v34_v7 = vld [vmem:[%s640_s0 + $0x38] sm:$0xff]  ;;  %v203_v0 = vld [vmem:[%s641_s5] sm:$0xff] }
   0x6   :  { %36 = vxpose.xlu0.b32.cont [2/8] (short) (narrow) %v28_v1, 64  ;;  %v204_v1 = vld [vmem:[%s641_s5 + $0x8] sm:$0xff] }
   0xa   :  { %37 = vxpose.xlu0.b32.cont [3/8] (short) (narrow) %v29_v2, 64  ;;  %v215_v2 = vpack.c.bf16 %v204_v1, %v203_v0 }
   0xc   :  { %362 = vmatprep.subr.bf16.mxu0 %v215_v2  ;;  %378 = vmatprep.subr.bf16.mxu1 %v215_v2 }
   0xd   :  { %363 = vmatpush3.bf16.msra.mxu0 %v215_v2  ;;  %382 = vmatpush3.bf16.msra.mxu1 %v215_v2 }
   0xe   :  { %38 = vxpose.xlu0.b32.cont [4/8] (short) (narrow) %v30_v3, 64  ;;  %v205_v3 = vld [vmem:[%s641_s5 + $0x10] sm:$0xff] }
  0x12   :  { %39 = vxpose.xlu0.b32.cont [5/8] (short) (narrow) %v31_v4, 64  ;;  %v206_v4 = vld [vmem:[%s641_s5 + $0x18] sm:$0xff] }
  0x16   :  { %40 = vxpose.xlu0.b32.cont [6/8] (short) (narrow) %v32_v5, 64  ;;  %v216_v5 = vpack.c.bf16 %v206_v4, %v205_v3 }
  0x18   :  { %364 = vmatprep.subr.bf16.mxu0 %v216_v5  ;;  %379 = vmatprep.subr.bf16.mxu1 %v216_v5 }
  0x19   :  { %365 = vmatpush3.bf16.msra.mxu0 %v216_v5  ;;  %383 = vmatpush3.bf16.msra.mxu1 %v216_v5 }
  0x1a   :  { %41 = vxpose.xlu0.b32.cont [7/8] (short) (narrow) %v33_v6, 64  ;;  %v207_v6 = vld [vmem:[%s641_s5 + $0x20] sm:$0xff] }
  0x1e   :  { %42 = vxpose.xlu0.b32.end [8/8] (short) (narrow) %v34_v7, 64  ;;  %v208_v7 = vld [vmem:[%s641_s5 + $0x28] sm:$0xff] }
  0x82   :  { %v51_v8 = vpop.trf.xlu0 }
  0x83   :  { %v70_v9 = vsel %vm69_vm0, %v51_v8, 0.0 }
  0x84   :  { %71 = vadd.xlane.f32.xlu1 %v70_v9  ;;  %v209_v9 = vld [vmem:[%s641_s5 + $0x30] sm:$0xff] }
  0x86   :  { %v52_v10 = vpop.trf.xlu0 }
  0x87   :  { %v73_v11 = vsel %vm69_vm0, %v52_v10, 0.0 }
  0x88   :  { %74 = vadd.xlane.f32.xlu1 %v73_v11 }
  0x8a   :  { %v53_v12 = vpop.trf.xlu0 }
  0x8b   :  { %v76_v13 = vsel %vm69_vm0, %v53_v12, 0.0 }
  0x8c   :  { %77 = vadd.xlane.f32.xlu1 %v76_v13 }
  0x8e   :  { %v54_v14 = vpop.trf.xlu0 }
  0x8f   :  { %v79_v15 = vsel %vm69_vm0, %v54_v14, 0.0 }
  0x90   :  { %80 = vadd.xlane.f32.xlu1 %v79_v15 }
  0x92   :  { %v55_v16 = vpop.trf.xlu0 }
  0x93   :  { %v82_v17 = vsel %vm69_vm0, %v55_v16, 0.0 }
  0x94   :  { %83 = vadd.xlane.f32.xlu1 %v82_v17 }
  0x96   :  { %v56_v18 = vpop.trf.xlu0 }
  0x97   :  { %v85_v19 = vsel %vm69_vm0, %v56_v18, 0.0 }
  0x98   :  { %86 = vadd.xlane.f32.xlu1 %v85_v19 }
  0x9a   :  { %v57_v20 = vpop.trf.xlu0 }
  0x9b   :  { %v88_v21 = vsel %vm69_vm0, %v57_v20, 0.0 }
  0x9c   :  { %89 = vadd.xlane.f32.xlu1 %v88_v21 }
  0x9e   :  { %v58_v22 = vpop.trf.xlu0 }
  0x9f   :  { %v91_v23 = vsel %vm69_vm0, %v58_v22, 0.0 }
  0xa0   :  { %92 = vadd.xlane.f32.xlu1 %v91_v23 }
 0x111   :  { %v72_v24 = vpop.xlane.xlu1 %71 }
 0x112   :  { %v95_v25 = vmul.f32 0.015625, %v72_v24 }
 0x114   :  { %v475_v26 = vsub.f32 %v51_v8, %v95_v25  ;;  %v217_v8 = vpack.c.bf16 %v208_v7, %v207_v6 }
 0x115   :  { %v75_v27 = vpop.xlane.xlu1 %74 }
 0x116   :  { %v96_v28 = vmul.f32 0.015625, %v75_v27  ;;  %v111_v29 = vmul.f32 %v475_v26, %v475_v26  ;;  %366 = vmatprep.subr.bf16.mxu0 %v217_v8  ;;  %380 = vmatprep.subr.bf16.mxu1 %v217_v8 }
 0x117   :  { %367 = vmatpush3.bf16.msra.mxu0 %v217_v8  ;;  %384 = vmatpush3.bf16.msra.mxu1 %v217_v8 }
 0x118   :  { %v479_v30 = vsub.f32 %v52_v10, %v96_v28  ;;  %v119_v31 = vsel %vm69_vm0, %v111_v29, 0.0  ;;  %v210_v10 = vld [vmem:[%s641_s5 + $0x38] sm:$0xff]  ;;  %v347_v29 = vld [vmem:[%s642_s3] ss:$0 sm:$0xff] }
 0x119   :  { %120 = vadd.xlane.f32.xlu0 %v119_v31  ;;  %v78_v32 = vpop.xlane.xlu1 %77  ;;  %v218_v11 = vpack.c.bf16 %v210_v10, %v209_v9 }
 0x11a   :  { %v97_v33 = vmul.f32 0.015625, %v78_v32  ;;  %v112_v34 = vmul.f32 %v479_v30, %v479_v30 }
 0x11b   :  { %368 = vmatprep.subr.bf16.mxu0 %v218_v11  ;;  %381 = vmatprep.subr.bf16.mxu1 %v218_v11 }
 0x11c   :  { %v484_v35 = vsub.f32 %v53_v12, %v97_v33  ;;  %v122_v36 = vsel %vm69_vm0, %v112_v34, 0.0  ;;  %369 = vmatpush3.bf16.msra.mxu0 %v218_v11  ;;  %385 = vmatpush3.bf16.msra.mxu1 %v218_v11 }
 0x11d   :  { %v81_v37 = vpop.xlane.xlu1 %80  ;;  %123 = vadd.xlane.f32.xlu1 %v122_v36 }
 0x11e   :  { %v98_v38 = vmul.f32 0.015625, %v81_v37  ;;  %v113_v39 = vmul.f32 %v484_v35, %v484_v35 }
 0x120   :  { %v489_v40 = vsub.f32 %v54_v14, %v98_v38  ;;  %v125_v41 = vsel %vm69_vm0, %v113_v39, 0.0  ;;  %v348_v38 = vld [vmem:[%s643_s4] ss:$0 sm:$0xff] }
 0x121   :  { %v84_v42 = vpop.xlane.xlu1 %83  ;;  %126 = vadd.xlane.f32.xlu1 %v125_v41 }
 0x122   :  { %v99_v43 = vmul.f32 0.015625, %v84_v42  ;;  %v114_v44 = vmul.f32 %v489_v40, %v489_v40 }
 0x124   :  { %v494_v45 = vsub.f32 %v55_v16, %v99_v43  ;;  %v128_v46 = vsel %vm69_vm0, %v114_v44, 0.0 }
 0x125   :  { %v87_v47 = vpop.xlane.xlu1 %86  ;;  %129 = vadd.xlane.f32.xlu1 %v128_v46 }
 0x126   :  { %v100_v48 = vmul.f32 0.015625, %v87_v47  ;;  %v115_v49 = vmul.f32 %v494_v45, %v494_v45 }
 0x128   :  { %v499_v50 = vsub.f32 %v56_v18, %v100_v48  ;;  %v131_v51 = vsel %vm69_vm0, %v115_v49, 0.0 }
 0x129   :  { %v90_v52 = vpop.xlane.xlu1 %89  ;;  %132 = vadd.xlane.f32.xlu1 %v131_v51 }
 0x12a   :  { %v101_v53 = vmul.f32 0.015625, %v90_v52  ;;  %v116_v54 = vmul.f32 %v499_v50, %v499_v50 }
 0x12c   :  { %v504_v55 = vsub.f32 %v57_v20, %v101_v53  ;;  %v134_v56 = vsel %vm69_vm0, %v116_v54, 0.0 }
 0x12d   :  { %135 = vadd.xlane.f32.xlu1 %v134_v56  ;;  %v93_v57 = vpop.xlane.xlu1 %92 }
 0x12e   :  { %v102_v58 = vmul.f32 0.015625, %v93_v57  ;;  %v117_v59 = vmul.f32 %v504_v55, %v504_v55 }
 0x130   :  { %v509_v60 = vsub.f32 %v58_v22, %v102_v58  ;;  %v137_v61 = vsel %vm69_vm0, %v117_v59, 0.0 }
 0x131   :  { %138 = vadd.xlane.f32.xlu1 %v137_v61 }
 0x132   :  { %v118_v62 = vmul.f32 %v509_v60, %v509_v60 }
 0x134   :  { %v140_v63 = vsel %vm69_vm0, %v118_v62, 0.0 }
 0x135   :  { %141 = vadd.xlane.f32.xlu1 %v140_v63 }
 0x1a6   :  { %v121_v12 = vpop.xlane.xlu0 %120 }
 0x1a7   :  { %v143_v13 = vmul.f32 0.015625, %v121_v12 }
 0x1a9   :  { %v151_v14 = vadd.f32 1e-05, %v143_v13  ;;  %v313_v13 = vld [vmem:[%s645_s1 + $0x10] sm:$0xff] }
 0x1aa   :  { %v124_v15 = vpop.xlane.xlu1 %123 }
 0x1ab   :  { %387 = vrsqrt.f32 %v151_v14  ;;  %v144_v16 = vmul.f32 0.015625, %v124_v15  ;;  %v311_v15 = vld [vmem:[%s645_s1] sm:$0xff] }
 0x1ad   :  { %v152_v17 = vadd.f32 1e-05, %v144_v16  ;;  %v305_v16 = vld [vmem:[%s646_s2 + $0x10] sm:$0xff] }
 0x1ae   :  { %v127_v18 = vpop.xlane.xlu1 %126 }
 0x1af   :  { %389 = vrsqrt.f32 %v152_v17  ;;  %v145_v19 = vmul.f32 0.015625, %v127_v18 }
 0x1b1   :  { %v153_v20 = vadd.f32 1e-05, %v145_v19  ;;  %v314_v19 = vld [vmem:[%s645_s1 + $0x18] sm:$0xff] }
 0x1b2   :  { %v130_v21 = vpop.xlane.xlu1 %129 }
 0x1b3   :  { %391 = vrsqrt.f32 %v153_v20  ;;  %v146_v22 = vmul.f32 0.015625, %v130_v21  ;;  %v303_v21 = vld [vmem:[%s646_s2] sm:$0xff] }
 0x1b5   :  { %v388_v23 = vpop.eup %387  ;;  %v154_v24 = vadd.f32 1e-05, %v146_v22 }
 0x1b6   :  { %v133_v25 = vpop.xlane.xlu1 %132  ;;  %v167_v27 = vmul.f32 %v388_v23, %v475_v26 }
 0x1b7   :  { %393 = vrsqrt.f32 %v154_v24  ;;  %v147_v28 = vmul.f32 0.015625, %v133_v25  ;;  %v312_v24 = vld [vmem:[%s645_s1 + $0x8] sm:$0xff] }
 0x1b8   :  { %v181_v36 = vmul.f32 %v347_v29, %v167_v27  ;;  %v306_v27 = vld [vmem:[%s646_s2 + $0x18] sm:$0xff] }
 0x1b9   :  { %v390_v31 = vpop.eup %389  ;;  %v155_v32 = vadd.f32 1e-05, %v147_v28 }
 0x1ba   :  { %v136_v33 = vpop.xlane.xlu1 %135  ;;  %v168_v34 = vmul.f32 %v390_v31, %v479_v30  ;;  %v195_v44 = vadd.f32 %v348_v38, %v181_v36 }
 0x1bb   :  { %395 = vrsqrt.f32 %v155_v32  ;;  %v148_v37 = vmul.f32 0.015625, %v136_v33  ;;  %v304_v32 = vld [vmem:[%s646_s2 + $0x8] sm:$0xff] }
 0x1bc   :  { %v182_v39 = vmul.f32 %v347_v29, %v168_v34 }
 0x1bd   :  { %v392_v26 = vpop.eup %391  ;;  %v156_v41 = vadd.f32 1e-05, %v148_v37 }
 0x1be   :  { %v169_v42 = vmul.f32 %v392_v26, %v484_v35  ;;  %v139_v43 = vpop.xlane.xlu1 %138  ;;  %v196_v46 = vadd.f32 %v348_v38, %v182_v39  ;;  %v317_v39 = vld [vmem:[%s645_s1 + $0x30] sm:$0xff] }
 0x1bf   :  { %397 = vrsqrt.f32 %v156_v41  ;;  %v149_v47 = vmul.f32 0.015625, %v139_v43  ;;  %v309_v43 = vld [vmem:[%s646_s2 + $0x30] sm:$0xff] }
 0x1c0   :  { %v211_v48 = vpack.c.bf16 %v196_v46, %v195_v44  ;;  %v183_v53 = vmul.f32 %v347_v29, %v169_v42  ;;  %v315_v42 = vld [vmem:[%s645_s1 + $0x20] sm:$0xff] }
 0x1c1   :  { %v394_v49 = vpop.eup %393  ;;  %v157_v30 = vadd.f32 1e-05, %v149_v47  ;;  %v318_v47 = vld [vmem:[%s645_s1 + $0x38] sm:$0xff] }
 0x1c2   :  { %v170_v51 = vmul.f32 %v394_v49, %v489_v40  ;;  %v142_v52 = vpop.xlane.xlu1 %141  ;;  %370 = vmatprep.mubr.msk.bf16.mxu0 %vm69_vm0, %v211_v48  ;;  %v197_v35 = vadd.f32 %v348_v38, %v183_v53  ;;  %v307_v49 = vld [vmem:[%s646_s2 + $0x20] sm:$0xff] }
 0x1c3   :  { %399 = vrsqrt.f32 %v157_v30  ;;  %v150_v54 = vmul.f32 0.015625, %v142_v52  ;;  %v316_v52 = vld [vmem:[%s645_s1 + $0x28] sm:$0xff] }
 0x1c4   :  { %v184_v56 = vmul.f32 %v347_v29, %v170_v51 }
 0x1c5   :  { %v396_v57 = vpop.eup %395  ;;  %v158_v58 = vadd.f32 1e-05, %v150_v54  ;;  %v310_v54 = vld [vmem:[%s646_s2 + $0x38] sm:$0xff] }
 0x1c6   :  { %v198_v59 = vadd.f32 %v348_v38, %v184_v56  ;;  %v171_v61 = vmul.f32 %v396_v57, %v494_v45 }
 0x1c7   :  { %401 = vrsqrt.f32 %v158_v58 }
 0x1c8   :  { %v212_v62 = vpack.c.bf16 %v198_v59, %v197_v35  ;;  %v185_v0 = vmul.f32 %v347_v29, %v171_v61  ;;  %v308_v35 = vld [vmem:[%s646_s2 + $0x28] sm:$0xff] }
 0x1c9   :  { %v398_v63 = vpop.eup %397 }
 0x1ca   :  { %371 = vmatmul.mubr.msk.bf16.vlgmr.msra.gmra.mrb[0].mxu0 %vm69_vm0, %v212_v62  ;;  %v172_v40 = vmul.f32 %v398_v63, %v499_v50  ;;  %v199_v4 = vadd.f32 %v348_v38, %v185_v0  ;;  %v349_v50 = vld [vmem:[%s644_s6] ss:$0 sm:$0xff] }
 0x1cc   :  { %v186_v1 = vmul.f32 %v347_v29, %v172_v40 }
 0x1cd   :  { %v400_v2 = vpop.eup %399 }
 0x1ce   :  { %v173_v3 = vmul.f32 %v400_v2, %v504_v55  ;;  %v200_v5 = vadd.f32 %v348_v38, %v186_v1 }
 0x1d0   :  { %v213_v6 = vpack.c.bf16 %v200_v5, %v199_v4  ;;  %v187_v45 = vmul.f32 %v347_v29, %v173_v3 }
 0x1d1   :  { %v402_v7 = vpop.eup %401 }
 0x1d2   :  { %v174_v8 = vmul.f32 %v402_v7, %v509_v60  ;;  %374 = vmatprep.mubr.msk.bf16.mxu1 %vm69_vm0, %v213_v6  ;;  %v201_v10 = vadd.f32 %v348_v38, %v187_v45 }
 0x1d4   :  { %v188_v9 = vmul.f32 %v347_v29, %v174_v8 }
 0x1d6   :  { %v202_v11 = vadd.f32 %v348_v38, %v188_v9 }
 0x1d8   :  { %v214_v12 = vpack.c.bf16 %v202_v11, %v201_v10 }
 0x1da   :  { %375 = vmatmul.mubr.msk.bf16.vlgmr.msra.gmra.mrb[0].mxu1 %vm69_vm0, %v214_v12 }
 0x29d   :  { %v372_v55 = vpop.f32.mrb[0].mxu0 }
 0x29e   :  { %v281_v14 = vadd.f32 %v372_v55, %v349_v50  ;;  %v272_v60 = vpop.f32.mrb[1].mxu0 }
 0x29f   :  { %v273_v17 = vadd.f32 %v349_v50, %v272_v60  ;;  %v373_v18 = vpop.f32.mrb[2].mxu0 }
 0x2a0   :  { %v321_v20 = vmul.f32 %v313_v13, %v281_v14  ;;  %v284_v22 = vadd.f32 %v373_v18, %v349_v50  ;;  %v275_v23 = vpop.f32.mrb[3].mxu0 }
 0x2a1   :  { %v319_v25 = vmul.f32 %v311_v15, %v273_v17  ;;  %v276_v28 = vadd.f32 %v349_v50, %v275_v23 }
 0x2a2   :  { %v329_v29 = vadd.f32 %v321_v20, %v305_v16  ;;  %v322_v31 = vmul.f32 %v314_v19, %v284_v22 }
 0x2a3   :  { %v327_v33 = vadd.f32 %v319_v25, %v303_v21  ;;  %v320_v34 = vmul.f32 %v312_v24, %v276_v28 }
 0x2a4   :  { %337 = vst.msk [vmem:[%s647_s7 + $0x10] sm:$0xff] %vm69_vm0, %v329_v29  ;;  %v330_v36 = vadd.f32 %v322_v31, %v306_v27 }
 0x2a5   :  { %335 = vst.msk [vmem:[%s647_s7] sm:$0xff] %vm69_vm0, %v327_v33  ;;  %v328_v37 = vadd.f32 %v320_v34, %v304_v32 }
 0x2a6   :  { %338 = vst.msk [vmem:[%s647_s7 + $0x18] sm:$0xff] %vm69_vm0, %v330_v36 }
 0x2a7   :  { %336 = vst.msk [vmem:[%s647_s7 + $0x8] sm:$0xff] %vm69_vm0, %v328_v37 }
 0x2ad   :  { %v376_v38 = vpop.f32.mrb[0].mxu1 }
 0x2ae   :  { %v297_v26 = vadd.f32 %v376_v38, %v349_v50  ;;  %v288_v41 = vpop.f32.mrb[1].mxu1 }
 0x2af   :  { %v289_v44 = vadd.f32 %v349_v50, %v288_v41  ;;  %v377_v46 = vpop.f32.mrb[2].mxu1 }
 0x2b0   :  { %v325_v48 = vmul.f32 %v317_v39, %v297_v26  ;;  %v300_v30 = vadd.f32 %v377_v46, %v349_v50  ;;  %v291_v51 = vpop.f32.mrb[3].mxu1 }
 0x2b1   :  { %v323_v53 = vmul.f32 %v315_v42, %v289_v44  ;;  %v292_v56 = vadd.f32 %v349_v50, %v291_v51 }
 0x2b2   :  { %v333_v57 = vadd.f32 %v325_v48, %v309_v43  ;;  %v326_v58 = vmul.f32 %v318_v47, %v300_v30 }
 0x2b3   :  { %v331_v59 = vadd.f32 %v323_v53, %v307_v49  ;;  %v324_v61 = vmul.f32 %v316_v52, %v292_v56 }
 0x2b4   :  { %341 = vst.msk [vmem:[%s647_s7 + $0x30] sm:$0xff] %vm69_vm0, %v333_v57  ;;  %v334_v62 = vadd.f32 %v326_v58, %v310_v54 }
 0x2b5   :  { %339 = vst.msk [vmem:[%s647_s7 + $0x20] sm:$0xff] %vm69_vm0, %v331_v59  ;;  %v332_v63 = vadd.f32 %v324_v61, %v308_v35 }
 0x2b6   :  { %342 = vst.msk [vmem:[%s647_s7 + $0x38] sm:$0xff] %vm69_vm0, %v334_v62 }
 0x2b7   :  { %340 = vst.msk [vmem:[%s647_s7 + $0x28] sm:$0xff] %vm69_vm0, %v332_v63 }

// kernel: template_embedding_forward.51
= control target key start
LH: loop header
LB: loop body
LE: loop exit
PB: predicated region body
PF: predicated region fallthrough
CT: control target
= control target key end

     0   :  { %v3860_v0 = vmov 0.0   ;;  %vm272_vm0 = vcmask 1043456   ;;  %vm3861_vm1 = vmmov 0   ;;  %vm268_vm2 = vcmask 64512   ;;  %s4837_s1 = inlined_call_operand.vmem [shape: f32[64,8,8], index: 1, kind: input, shape index: {}]   ;;  %s4838_s0 = inlined_call_operand.vmem [shape: f32[64,8,8], index: 0, kind: input, shape index: {}]   ;;  %s4839_s2 = inlined_call_operand.vmem [shape: f32[64,8,8], index: 2, kind: output, shape index: {}]  }
   0x1   :  { %3474 = vmatprep.subr.bf16.mxu0 %v3860_v0  ;;  %3480 = vmatprep.subr.bf16.mxu1 %v3860_v0  ;;  %v140_v1 = vld [vmem:[%s4837_s1] sm:$0xff]  ;;  %v141_v2 = vld [vmem:[%s4837_s1 + $0x8] sm:$0xff]  ;;  %v142_v7 = vld [vmem:[%s4837_s1 + $0x10] sm:$0xff] }
   0x2   :  { %v12_v3 = vld [vmem:[%s4838_s0] sm:$0xff]  ;;  %v204_v4 = vpack.c.bf16 %v140_v1, %v140_v1  ;;  %v205_v5 = vpack.c.bf16 %v141_v2, %v141_v2  ;;  %3476 = vmatprep.mubr.msk.bf16.mxu0 %vm3861_vm1, %v3860_v0  ;;  %3482 = vmatprep.mubr.msk.bf16.mxu1 %vm3861_vm1, %v3860_v0  ;;  %v13_v6 = vld [vmem:[%s4838_s0 + $0x8] sm:$0xff]  ;;  %v143_v8 = vld [vmem:[%s4837_s1 + $0x18] sm:$0xff]  ;;  %v206_v9 = vpack.c.bf16 %v142_v7, %v142_v7 }
   0x3   :  { %v207_v10 = vpack.c.bf16 %v143_v8, %v143_v8  ;;  %v76_v13 = vpack.c.bf16 %v12_v3, %v12_v3  ;;  %v77_v14 = vpack.c.bf16 %v13_v6, %v13_v6  ;;  %v144_v17 = vld [vmem:[%s4837_s1 + $0x20] sm:$0xff]  ;;  %v145_v18 = vld [vmem:[%s4837_s1 + $0x28] sm:$0xff]  ;;  %v14_v19 = vld [vmem:[%s4838_s0 + $0x10] sm:$0xff] }
   0x4   :  { %v274_v11 = vsel %vm272_vm0, %v204_v4, 0  ;;  %v320_v12 = vsel %vm272_vm0, %v205_v5, 0  ;;  %v366_v15 = vsel %vm272_vm0, %v206_v9, 0  ;;  %v15_v20 = vld [vmem:[%s4838_s0 + $0x18] sm:$0xff]  ;;  %v208_v21 = vpack.c.bf16 %v144_v17, %v144_v17  ;;  %v146_v27 = vld [vmem:[%s4837_s1 + $0x30] sm:$0xff]  ;;  %v16_v29 = vld [vmem:[%s4838_s0 + $0x20] sm:$0xff] }
   0x5   :  { %3475 = vmatpush3.bf16.msra.mxu0 %v274_v11  ;;  %3481 = vmatpush3.bf16.msra.mxu1 %v320_v12  ;;  %v412_v16 = vsel %vm272_vm0, %v207_v10, 0  ;;  %v209_v22 = vpack.c.bf16 %v145_v18, %v145_v18  ;;  %v78_v23 = vpack.c.bf16 %v14_v19, %v14_v19  ;;  %v79_v24 = vpack.c.bf16 %v15_v20, %v15_v20  ;;  %v147_v28 = vld [vmem:[%s4837_s1 + $0x38] sm:$0xff]  ;;  %v17_v30 = vld [vmem:[%s4838_s0 + $0x28] sm:$0xff]  ;;  %v148_v37 = vld [vmem:[%s4837_s1 + $0x40] sm:$0xff] }
   0x6   :  { %3486 = vmatprep.subr.bf16.mxu0 %v3860_v0  ;;  %3492 = vmatprep.subr.bf16.mxu1 %v3860_v0  ;;  %v458_v25 = vsel %vm272_vm0, %v208_v21, 0  ;;  %v210_v31 = vpack.c.bf16 %v146_v27, %v146_v27  ;;  %v211_v32 = vpack.c.bf16 %v147_v28, %v147_v28  ;;  %v80_v33 = vpack.c.bf16 %v16_v29, %v16_v29  ;;  %v149_v38 = vld [vmem:[%s4837_s1 + $0x48] sm:$0xff]  ;;  %v18_v39 = vld [vmem:[%s4838_s0 + $0x30] sm:$0xff]  ;;  %v19_v40 = vld [vmem:[%s4838_s0 + $0x38] sm:$0xff] }
   0x7   :  { %v504_v26 = vsel %vm272_vm0, %v209_v22, 0  ;;  %v81_v34 = vpack.c.bf16 %v17_v30, %v17_v30  ;;  %v212_v41 = vpack.c.bf16 %v148_v37, %v148_v37  ;;  %v213_v42 = vpack.c.bf16 %v149_v38, %v149_v38  ;;  %v150_v47 = vld [vmem:[%s4837_s1 + $0x50] sm:$0xff]  ;;  %v151_v48 = vld [vmem:[%s4837_s1 + $0x58] sm:$0xff]  ;;  %v20_v49 = vld [vmem:[%s4838_s0 + $0x40] sm:$0xff] }
   0x8   :  { %3477 = vmatmul.mubr.msk.bf16.vlgmr.msra.gmra.mrb[0].mxu0 %vm268_vm2, %v76_v13  ;;  %3483 = vmatmul.mubr.msk.bf16.vlgmr.msra.gmra.mrb[0].mxu1 %vm268_vm2, %v77_v14  ;;  %v550_v35 = vsel %vm272_vm0, %v210_v31, 0  ;;  %v596_v36 = vsel %vm272_vm0, %v211_v32, 0  ;;  %v82_v43 = vpack.c.bf16 %v18_v39, %v18_v39  ;;  %v83_v44 = vpack.c.bf16 %v19_v40, %v19_v40  ;;  %v21_v50 = vld [vmem:[%s4838_s0 + $0x48] sm:$0xff]  ;;  %v152_v57 = vld [vmem:[%s4837_s1 + $0x60] sm:$0xff]  ;;  %v22_v59 = vld [vmem:[%s4838_s0 + $0x50] sm:$0xff] }
   0x9   :  { %3487 = vmatpush3.bf16.msra.mxu0 %v366_v15  ;;  %3493 = vmatpush3.bf16.msra.mxu1 %v412_v16  ;;  %v642_v45 = vsel %vm272_vm0, %v212_v41, 0  ;;  %v688_v46 = vsel %vm272_vm0, %v213_v42, 0  ;;  %v214_v51 = vpack.c.bf16 %v150_v47, %v150_v47  ;;  %v215_v52 = vpack.c.bf16 %v151_v48, %v151_v48  ;;  %v153_v58 = vld [vmem:[%s4837_s1 + $0x68] sm:$0xff]  ;;  %v23_v60 = vld [vmem:[%s4838_s0 + $0x58] sm:$0xff]  ;;  %v154_v4 = vld [vmem:[%s4837_s1 + $0x70] sm:$0xff] }
   0xa   :  { %3488 = vmatprep.mubr.msk.bf16.mxu0 %vm3861_vm1, %v3860_v0  ;;  %3494 = vmatprep.mubr.msk.bf16.mxu1 %vm3861_vm1, %v3860_v0  ;;  %v84_v53 = vpack.c.bf16 %v20_v49, %v20_v49  ;;  %v85_v54 = vpack.c.bf16 %v21_v50, %v21_v50  ;;  %v216_v61 = vpack.c.bf16 %v152_v57, %v152_v57  ;;  %v155_v5 = vld [vmem:[%s4837_s1 + $0x78] sm:$0xff]  ;;  %v24_v6 = vld [vmem:[%s4838_s0 + $0x60] sm:$0xff]  ;;  %v25_v7 = vld [vmem:[%s4838_s0 + $0x68] sm:$0xff] }
   0xb   :  { %3498 = vmatprep.subr.bf16.mxu0 %v3860_v0  ;;  %3504 = vmatprep.subr.bf16.mxu1 %v3860_v0  ;;  %v734_v55 = vsel %vm272_vm0, %v214_v51, 0  ;;  %v780_v56 = vsel %vm272_vm0, %v215_v52, 0  ;;  %v217_v62 = vpack.c.bf16 %v153_v58, %v153_v58  ;;  %v86_v63 = vpack.c.bf16 %v22_v59, %v22_v59  ;;  %v156_v14 = vld [vmem:[%s4837_s1 + $0x80] sm:$0xff]  ;;  %v157_v15 = vld [vmem:[%s4837_s1 + $0x88] sm:$0xff]  ;;  %v26_v16 = vld [vmem:[%s4838_s0 + $0x70] sm:$0xff] }
   0xc   :  { %v87_v1 = vpack.c.bf16 %v23_v60, %v23_v60  ;;  %v826_v2 = vsel %vm272_vm0, %v216_v61, 0  ;;  %v218_v8 = vpack.c.bf16 %v154_v4, %v154_v4  ;;  %v219_v9 = vpack.c.bf16 %v155_v5, %v155_v5  ;;  %v27_v17 = vld [vmem:[%s4838_s0 + $0x78] sm:$0xff]  ;;  %v29_v27 = vld [vmem:[%s4838_s0 + $0x88] sm:$0xff] }
   0xd   :  { %v872_v3 = vsel %vm272_vm0, %v217_v62, 0  ;;  %v88_v10 = vpack.c.bf16 %v24_v6, %v24_v6  ;;  %v89_v11 = vpack.c.bf16 %v25_v7, %v25_v7  ;;  %v220_v18 = vpack.c.bf16 %v156_v14, %v156_v14  ;;  %v31_v37 = vld [vmem:[%s4838_s0 + $0x98] sm:$0xff]  ;;  %v33_v47 = vld [vmem:[%s4838_s0 + $0xa8] sm:$0xff] }
   0xe   :  { %v918_v12 = vsel %vm272_vm0, %v218_v8, 0  ;;  %v964_v13 = vsel %vm272_vm0, %v219_v9, 0  ;;  %v221_v19 = vpack.c.bf16 %v157_v15, %v157_v15  ;;  %v90_v20 = vpack.c.bf16 %v26_v16, %v26_v16  ;;  %v35_v57 = vld [vmem:[%s4838_s0 + $0xb8] sm:$0xff]  ;;  %v37_v4 = vld [vmem:[%s4838_s0 + $0xc8] sm:$0xff] }
   0xf   :  { %v91_v21 = vpack.c.bf16 %v27_v17, %v27_v17  ;;  %v1010_v22 = vsel %vm272_vm0, %v220_v18, 0  ;;  %v93_v31 = vpack.c.bf16 %v29_v27, %v29_v27  ;;  %v95_v41 = vpack.c.bf16 %v31_v37, %v31_v37  ;;  %v39_v14 = vld [vmem:[%s4838_s0 + $0xd8] sm:$0xff] }
  0x10   :  { %3489 = vmatmul.mubr.msk.bf16.vlgmr.msra.gmra.mrb[4].mxu0 %vm268_vm2, %v78_v23  ;;  %3495 = vmatmul.mubr.msk.bf16.vlgmr.msra.gmra.mrb[4].mxu1 %vm268_vm2, %v79_v24  ;;  %v1056_v23 = vsel %vm272_vm0, %v221_v19, 0  ;;  %v158_v24 = vld [vmem:[%s4837_s1 + $0x90] sm:$0xff]  ;;  %v97_v51 = vpack.c.bf16 %v33_v47, %v33_v47  ;;  %v99_v61 = vpack.c.bf16 %v35_v57, %v35_v57  ;;  %v101_v8 = vpack.c.bf16 %v37_v4, %v37_v4 }
  0x11   :  { %3499 = vmatpush3.bf16.msra.mxu0 %v458_v25  ;;  %3505 = vmatpush3.bf16.msra.mxu1 %v504_v26  ;;  %v159_v25 = vld [vmem:[%s4837_s1 + $0x98] sm:$0xff]  ;;  %v28_v26 = vld [vmem:[%s4838_s0 + $0x80] sm:$0xff]  ;;  %v222_v28 = vpack.c.bf16 %v158_v24, %v158_v24  ;;  %v103_v18 = vpack.c.bf16 %v39_v14, %v39_v14  ;;  %v41_v24 = vld [vmem:[%s4838_s0 + $0xe8] sm:$0xff] }
  0x12   :  { %3500 = vmatprep.mubr.msk.bf16.mxu0 %vm3861_vm1, %v3860_v0  ;;  %3506 = vmatprep.mubr.msk.bf16.mxu1 %vm3861_vm1, %v3860_v0  ;;  %v223_v29 = vpack.c.bf16 %v159_v25, %v159_v25  ;;  %v92_v30 = vpack.c.bf16 %v28_v26, %v28_v26 }
  0x13   :  { %3510 = vmatprep.subr.bf16.mxu0 %v3860_v0  ;;  %3516 = vmatprep.subr.bf16.mxu1 %v3860_v0  ;;  %v1102_v32 = vsel %vm272_vm0, %v222_v28, 0  ;;  %v105_v28 = vpack.c.bf16 %v41_v24, %v41_v24 }
  0x18   :  { %3501 = vmatmul.mubr.msk.bf16.vlgmr.msra.gmra.mrb[8].mxu0 %vm268_vm2, %v80_v33  ;;  %3507 = vmatmul.mubr.msk.bf16.vlgmr.msra.gmra.mrb[8].mxu1 %vm268_vm2, %v81_v34  ;;  %v1148_v33 = vsel %vm272_vm0, %v223_v29, 0  ;;  %v160_v34 = vld [vmem:[%s4837_s1 + $0xa0] sm:$0xff] }
  0x19   :  { %3511 = vmatpush3.bf16.msra.mxu0 %v550_v35  ;;  %3517 = vmatpush3.bf16.msra.mxu1 %v596_v36  ;;  %v161_v35 = vld [vmem:[%s4837_s1 + $0xa8] sm:$0xff]  ;;  %v30_v36 = vld [vmem:[%s4838_s0 + $0x90] sm:$0xff]  ;;  %v224_v38 = vpack.c.bf16 %v160_v34, %v160_v34  ;;  %v43_v34 = vld [vmem:[%s4838_s0 + $0xf8] sm:$0xff] }
  0x1a   :  { %3512 = vmatprep.mubr.msk.bf16.mxu0 %vm3861_vm1, %v3860_v0  ;;  %3518 = vmatprep.mubr.msk.bf16.mxu1 %vm3861_vm1, %v3860_v0  ;;  %v225_v39 = vpack.c.bf16 %v161_v35, %v161_v35  ;;  %v94_v40 = vpack.c.bf16 %v30_v36, %v30_v36 }
  0x1b   :  { %3522 = vmatprep.subr.bf16.mxu0 %v3860_v0  ;;  %3528 = vmatprep.subr.bf16.mxu1 %v3860_v0  ;;  %v1194_v42 = vsel %vm272_vm0, %v224_v38, 0  ;;  %v107_v38 = vpack.c.bf16 %v43_v34, %v43_v34 }
  0x20   :  { %3513 = vmatmul.mubr.msk.bf16.vlgmr.msra.gmra.mrb[12].mxu0 %vm268_vm2, %v82_v43  ;;  %3519 = vmatmul.mubr.msk.bf16.vlgmr.msra.gmra.mrb[12].mxu1 %vm268_vm2, %v83_v44  ;;  %v1240_v43 = vsel %vm272_vm0, %v225_v39, 0  ;;  %v162_v44 = vld [vmem:[%s4837_s1 + $0xb0] sm:$0xff] }
  0x21   :  { %3523 = vmatpush3.bf16.msra.mxu0 %v642_v45  ;;  %3529 = vmatpush3.bf16.msra.mxu1 %v688_v46  ;;  %v163_v45 = vld [vmem:[%s4837_s1 + $0xb8] sm:$0xff]  ;;  %v32_v46 = vld [vmem:[%s4838_s0 + $0xa0] sm:$0xff]  ;;  %v226_v48 = vpack.c.bf16 %v162_v44, %v162_v44  ;;  %v45_v44 = vld [vmem:[%s4838_s0 + $0x108] sm:$0xff] }
  0x22   :  { %3524 = vmatprep.mubr.msk.bf16.mxu0 %vm3861_vm1, %v3860_v0  ;;  %3530 = vmatprep.mubr.msk.bf16.mxu1 %vm3861_vm1, %v3860_v0  ;;  %v227_v49 = vpack.c.bf16 %v163_v45, %v163_v45  ;;  %v96_v50 = vpack.c.bf16 %v32_v46, %v32_v46 }
  0x23   :  { %3534 = vmatprep.subr.bf16.mxu0 %v3860_v0  ;;  %3540 = vmatprep.subr.bf16.mxu1 %v3860_v0  ;;  %v1286_v52 = vsel %vm272_vm0, %v226_v48, 0  ;;  %v109_v48 = vpack.c.bf16 %v45_v44, %v45_v44 }
  0x28   :  { %3525 = vmatmul.mubr.msk.bf16.vlgmr.msra.gmra.mrb[16].mxu0 %vm268_vm2, %v84_v53  ;;  %3531 = vmatmul.mubr.msk.bf16.vlgmr.msra.gmra.mrb[16].mxu1 %vm268_vm2, %v85_v54  ;;  %v1332_v53 = vsel %vm272_vm0, %v227_v49, 0  ;;  %v164_v54 = vld [vmem:[%s4837_s1 + $0xc0] sm:$0xff] }
  0x29   :  { %3535 = vmatpush3.bf16.msra.mxu0 %v734_v55  ;;  %3541 = vmatpush3.bf16.msra.mxu1 %v780_v56  ;;  %v165_v55 = vld [vmem:[%s4837_s1 + $0xc8] sm:$0xff]  ;;  %v34_v56 = vld [vmem:[%s4838_s0 + $0xb0] sm:$0xff]  ;;  %v228_v58 = vpack.c.bf16 %v164_v54, %v164_v54  ;;  %v47_v54 = vld [vmem:[%s4838_s0 + $0x118] sm:$0xff] }
  0x2a   :  { %3536 = vmatprep.mubr.msk.bf16.mxu0 %vm3861_vm1, %v3860_v0  ;;  %3542 = vmatprep.mubr.msk.bf16.mxu1 %vm3861_vm1, %v3860_v0  ;;  %v229_v59 = vpack.c.bf16 %v165_v55, %v165_v55  ;;  %v98_v60 = vpack.c.bf16 %v34_v56, %v34_v56 }
  0x2b   :  { %3546 = vmatprep.subr.bf16.mxu0 %v3860_v0  ;;  %3552 = vmatprep.subr.bf16.mxu1 %v3860_v0  ;;  %v1378_v62 = vsel %vm272_vm0, %v228_v58, 0  ;;  %v111_v58 = vpack.c.bf16 %v47_v54, %v47_v54 }
  0x30   :  { %3537 = vmatmul.mubr.msk.bf16.vlgmr.msra.gmra.mrb[20].mxu0 %vm268_vm2, %v86_v63  ;;  %3543 = vmatmul.mubr.msk.bf16.vlgmr.msra.gmra.mrb[20].mxu1 %vm268_vm2, %v87_v1  ;;  %v1424_v63 = vsel %vm272_vm0, %v229_v59, 0  ;;  %v166_v1 = vld [vmem:[%s4837_s1 + $0xd0] sm:$0xff] }
  0x31   :  { %3547 = vmatpush3.bf16.msra.mxu0 %v826_v2  ;;  %3553 = vmatpush3.bf16.msra.mxu1 %v872_v3  ;;  %v167_v2 = vld [vmem:[%s4837_s1 + $0xd8] sm:$0xff]  ;;  %v36_v3 = vld [vmem:[%s4838_s0 + $0xc0] sm:$0xff]  ;;  %v230_v5 = vpack.c.bf16 %v166_v1, %v166_v1  ;;  %v49_v1 = vld [vmem:[%s4838_s0 + $0x128] sm:$0xff] }
  0x32   :  { %3548 = vmatprep.mubr.msk.bf16.mxu0 %vm3861_vm1, %v3860_v0  ;;  %3554 = vmatprep.mubr.msk.bf16.mxu1 %vm3861_vm1, %v3860_v0  ;;  %v231_v6 = vpack.c.bf16 %v167_v2, %v167_v2  ;;  %v100_v7 = vpack.c.bf16 %v36_v3, %v36_v3 }
  0x33   :  { %3558 = vmatprep.subr.bf16.mxu0 %v3860_v0  ;;  %3564 = vmatprep.subr.bf16.mxu1 %v3860_v0  ;;  %v1470_v9 = vsel %vm272_vm0, %v230_v5, 0  ;;  %v113_v5 = vpack.c.bf16 %v49_v1, %v49_v1 }
  0x38   :  { %3549 = vmatmul.mubr.msk.bf16.vlgmr.msra.gmra.mrb[24].mxu0 %vm268_vm2, %v88_v10  ;;  %3555 = vmatmul.mubr.msk.bf16.vlgmr.msra.gmra.mrb[24].mxu1 %vm268_vm2, %v89_v11  ;;  %v1516_v10 = vsel %vm272_vm0, %v231_v6, 0  ;;  %v168_v11 = vld [vmem:[%s4837_s1 + $0xe0] sm:$0xff] }
  0x39   :  { %3559 = vmatpush3.bf16.msra.mxu0 %v918_v12  ;;  %3565 = vmatpush3.bf16.msra.mxu1 %v964_v13  ;;  %v169_v12 = vld [vmem:[%s4837_s1 + $0xe8] sm:$0xff]  ;;  %v38_v13 = vld [vmem:[%s4838_s0 + $0xd0] sm:$0xff]  ;;  %v232_v15 = vpack.c.bf16 %v168_v11, %v168_v11  ;;  %v51_v11 = vld [vmem:[%s4838_s0 + $0x138] sm:$0xff] }
  0x3a   :  { %3560 = vmatprep.mubr.msk.bf16.mxu0 %vm3861_vm1, %v3860_v0  ;;  %3566 = vmatprep.mubr.msk.bf16.mxu1 %vm3861_vm1, %v3860_v0  ;;  %v233_v16 = vpack.c.bf16 %v169_v12, %v169_v12  ;;  %v102_v17 = vpack.c.bf16 %v38_v13, %v38_v13 }
  0x3b   :  { %3570 = vmatprep.subr.bf16.mxu0 %v3860_v0  ;;  %3576 = vmatprep.subr.bf16.mxu1 %v3860_v0  ;;  %v1562_v19 = vsel %vm272_vm0, %v232_v15, 0  ;;  %v115_v15 = vpack.c.bf16 %v51_v11, %v51_v11 }
  0x40   :  { %3561 = vmatmul.mubr.msk.bf16.vlgmr.msra.gmra.mrb[28].mxu0 %vm268_vm2, %v90_v20  ;;  %3567 = vmatmul.mubr.msk.bf16.vlgmr.msra.gmra.mrb[28].mxu1 %vm268_vm2, %v91_v21  ;;  %v1608_v20 = vsel %vm272_vm0, %v233_v16, 0  ;;  %v170_v21 = vld [vmem:[%s4837_s1 + $0xf0] sm:$0xff] }
  0x41   :  { %3571 = vmatpush3.bf16.msra.mxu0 %v1010_v22  ;;  %3577 = vmatpush3.bf16.msra.mxu1 %v1056_v23  ;;  %v171_v22 = vld [vmem:[%s4837_s1 + $0xf8] sm:$0xff]  ;;  %v40_v23 = vld [vmem:[%s4838_s0 + $0xe0] sm:$0xff]  ;;  %v234_v25 = vpack.c.bf16 %v170_v21, %v170_v21  ;;  %v53_v21 = vld [vmem:[%s4838_s0 + $0x148] sm:$0xff] }
  0x42   :  { %3572 = vmatprep.mubr.msk.bf16.mxu0 %vm3861_vm1, %v3860_v0  ;;  %3578 = vmatprep.mubr.msk.bf16.mxu1 %vm3861_vm1, %v3860_v0  ;;  %v235_v26 = vpack.c.bf16 %v171_v22, %v171_v22  ;;  %v104_v27 = vpack.c.bf16 %v40_v23, %v40_v23 }
  0x43   :  { %3582 = vmatprep.subr.bf16.mxu0 %v3860_v0  ;;  %3588 = vmatprep.subr.bf16.mxu1 %v3860_v0  ;;  %v1654_v29 = vsel %vm272_vm0, %v234_v25, 0  ;;  %v117_v25 = vpack.c.bf16 %v53_v21, %v53_v21 }
  0x48   :  { %3573 = vmatmul.mubr.msk.bf16.vlgmr.msra.gmra.mrb[32].mxu0 %vm268_vm2, %v92_v30  ;;  %3579 = vmatmul.mubr.msk.bf16.vlgmr.msra.gmra.mrb[32].mxu1 %vm268_vm2, %v93_v31  ;;  %v1700_v30 = vsel %vm272_vm0, %v235_v26, 0  ;;  %v172_v31 = vld [vmem:[%s4837_s1 + $0x100] sm:$0xff] }
  0x49   :  { %3583 = vmatpush3.bf16.msra.mxu0 %v1102_v32  ;;  %3589 = vmatpush3.bf16.msra.mxu1 %v1148_v33  ;;  %v173_v32 = vld [vmem:[%s4837_s1 + $0x108] sm:$0xff]  ;;  %v42_v33 = vld [vmem:[%s4838_s0 + $0xf0] sm:$0xff]  ;;  %v236_v35 = vpack.c.bf16 %v172_v31, %v172_v31  ;;  %v55_v31 = vld [vmem:[%s4838_s0 + $0x158] sm:$0xff] }
  0x4a   :  { %3584 = vmatprep.mubr.msk.bf16.mxu0 %vm3861_vm1, %v3860_v0  ;;  %3590 = vmatprep.mubr.msk.bf16.mxu1 %vm3861_vm1, %v3860_v0  ;;  %v237_v36 = vpack.c.bf16 %v173_v32, %v173_v32  ;;  %v106_v37 = vpack.c.bf16 %v42_v33, %v42_v33 }
  0x4b   :  { %3594 = vmatprep.subr.bf16.mxu0 %v3860_v0  ;;  %3600 = vmatprep.subr.bf16.mxu1 %v3860_v0  ;;  %v1746_v39 = vsel %vm272_vm0, %v236_v35, 0  ;;  %v119_v35 = vpack.c.bf16 %v55_v31, %v55_v31 }
  0x50   :  { %3585 = vmatmul.mubr.msk.bf16.vlgmr.msra.gmra.mrb[36].mxu0 %vm268_vm2, %v94_v40  ;;  %3591 = vmatmul.mubr.msk.bf16.vlgmr.msra.gmra.mrb[36].mxu1 %vm268_vm2, %v95_v41  ;;  %v1792_v40 = vsel %vm272_vm0, %v237_v36, 0  ;;  %v174_v41 = vld [vmem:[%s4837_s1 + $0x110] sm:$0xff] }
  0x51   :  { %3595 = vmatpush3.bf16.msra.mxu0 %v1194_v42  ;;  %3601 = vmatpush3.bf16.msra.mxu1 %v1240_v43  ;;  %v175_v42 = vld [vmem:[%s4837_s1 + $0x118] sm:$0xff]  ;;  %v44_v43 = vld [vmem:[%s4838_s0 + $0x100] sm:$0xff]  ;;  %v238_v45 = vpack.c.bf16 %v174_v41, %v174_v41  ;;  %v57_v41 = vld [vmem:[%s4838_s0 + $0x168] sm:$0xff] }
  0x52   :  { %3596 = vmatprep.mubr.msk.bf16.mxu0 %vm3861_vm1, %v3860_v0  ;;  %3602 = vmatprep.mubr.msk.bf16.mxu1 %vm3861_vm1, %v3860_v0  ;;  %v239_v46 = vpack.c.bf16 %v175_v42, %v175_v42  ;;  %v108_v47 = vpack.c.bf16 %v44_v43, %v44_v43 }
  0x53   :  { %3606 = vmatprep.subr.bf16.mxu0 %v3860_v0  ;;  %3612 = vmatprep.subr.bf16.mxu1 %v3860_v0  ;;  %v1838_v49 = vsel %vm272_vm0, %v238_v45, 0  ;;  %v121_v45 = vpack.c.bf16 %v57_v41, %v57_v41 }
  0x58   :  { %3597 = vmatmul.mubr.msk.bf16.vlgmr.msra.gmra.mrb[40].mxu0 %vm268_vm2, %v96_v50  ;;  %3603 = vmatmul.mubr.msk.bf16.vlgmr.msra.gmra.mrb[40].mxu1 %vm268_vm2, %v97_v51  ;;  %v1884_v50 = vsel %vm272_vm0, %v239_v46, 0  ;;  %v176_v51 = vld [vmem:[%s4837_s1 + $0x120] sm:$0xff] }
  0x59   :  { %3607 = vmatpush3.bf16.msra.mxu0 %v1286_v52  ;;  %3613 = vmatpush3.bf16.msra.mxu1 %v1332_v53  ;;  %v177_v52 = vld [vmem:[%s4837_s1 + $0x128] sm:$0xff]  ;;  %v46_v53 = vld [vmem:[%s4838_s0 + $0x110] sm:$0xff]  ;;  %v240_v55 = vpack.c.bf16 %v176_v51, %v176_v51  ;;  %v59_v51 = vld [vmem:[%s4838_s0 + $0x178] sm:$0xff] }
  0x5a   :  { %3608 = vmatprep.mubr.msk.bf16.mxu0 %vm3861_vm1, %v3860_v0  ;;  %3614 = vmatprep.mubr.msk.bf16.mxu1 %vm3861_vm1, %v3860_v0  ;;  %v241_v56 = vpack.c.bf16 %v177_v52, %v177_v52  ;;  %v110_v57 = vpack.c.bf16 %v46_v53, %v46_v53 }
  0x5b   :  { %3618 = vmatprep.subr.bf16.mxu0 %v3860_v0  ;;  %3624 = vmatprep.subr.bf16.mxu1 %v3860_v0  ;;  %v1930_v59 = vsel %vm272_vm0, %v240_v55, 0  ;;  %v123_v55 = vpack.c.bf16 %v59_v51, %v59_v51 }
  0x60   :  { %3609 = vmatmul.mubr.msk.bf16.vlgmr.msra.gmra.mrb[44].mxu0 %vm268_vm2, %v98_v60  ;;  %3615 = vmatmul.mubr.msk.bf16.vlgmr.msra.gmra.mrb[44].mxu1 %vm268_vm2, %v99_v61  ;;  %v1976_v60 = vsel %vm272_vm0, %v241_v56, 0  ;;  %v178_v61 = vld [vmem:[%s4837_s1 + $0x130] sm:$0xff] }
  0x61   :  { %3619 = vmatpush3.bf16.msra.mxu0 %v1378_v62  ;;  %3625 = vmatpush3.bf16.msra.mxu1 %v1424_v63  ;;  %v179_v62 = vld [vmem:[%s4837_s1 + $0x138] sm:$0xff]  ;;  %v48_v63 = vld [vmem:[%s4838_s0 + $0x120] sm:$0xff]  ;;  %v242_v2 = vpack.c.bf16 %v178_v61, %v178_v61  ;;  %v61_v61 = vld [vmem:[%s4838_s0 + $0x188] sm:$0xff] }
  0x62   :  { %3620 = vmatprep.mubr.msk.bf16.mxu0 %vm3861_vm1, %v3860_v0  ;;  %3626 = vmatprep.mubr.msk.bf16.mxu1 %vm3861_vm1, %v3860_v0  ;;  %v243_v3 = vpack.c.bf16 %v179_v62, %v179_v62  ;;  %v112_v4 = vpack.c.bf16 %v48_v63, %v48_v63 }
  0x63   :  { %3630 = vmatprep.subr.bf16.mxu0 %v3860_v0  ;;  %3636 = vmatprep.subr.bf16.mxu1 %v3860_v0  ;;  %v2022_v6 = vsel %vm272_vm0, %v242_v2, 0  ;;  %v125_v2 = vpack.c.bf16 %v61_v61, %v61_v61  ;;  %v200_v61 = vld [vmem:[%s4837_s1 + $0x1e0] sm:$0xff] }
  0x68   :  { %3621 = vmatmul.mubr.msk.bf16.vlgmr.msra.gmra.mrb[48].mxu0 %vm268_vm2, %v100_v7  ;;  %3627 = vmatmul.mubr.msk.bf16.vlgmr.msra.gmra.mrb[48].mxu1 %vm268_vm2, %v101_v8  ;;  %v2068_v7 = vsel %vm272_vm0, %v243_v3, 0  ;;  %v180_v8 = vld [vmem:[%s4837_s1 + $0x140] sm:$0xff] }
  0x69   :  { %3631 = vmatpush3.bf16.msra.mxu0 %v1470_v9  ;;  %3637 = vmatpush3.bf16.msra.mxu1 %v1516_v10  ;;  %v181_v9 = vld [vmem:[%s4837_s1 + $0x148] sm:$0xff]  ;;  %v50_v10 = vld [vmem:[%s4838_s0 + $0x130] sm:$0xff]  ;;  %v244_v12 = vpack.c.bf16 %v180_v8, %v180_v8  ;;  %v63_v8 = vld [vmem:[%s4838_s0 + $0x198] sm:$0xff] }
  0x6a   :  { %3632 = vmatprep.mubr.msk.bf16.mxu0 %vm3861_vm1, %v3860_v0  ;;  %3638 = vmatprep.mubr.msk.bf16.mxu1 %vm3861_vm1, %v3860_v0  ;;  %v245_v13 = vpack.c.bf16 %v181_v9, %v181_v9  ;;  %v114_v14 = vpack.c.bf16 %v50_v10, %v50_v10 }
  0x6b   :  { %3642 = vmatprep.subr.bf16.mxu0 %v3860_v0  ;;  %3648 = vmatprep.subr.bf16.mxu1 %v3860_v0  ;;  %v2114_v16 = vsel %vm272_vm0, %v244_v12, 0  ;;  %v127_v12 = vpack.c.bf16 %v63_v8, %v63_v8 }
  0x70   :  { %3633 = vmatmul.mubr.msk.bf16.vlgmr.msra.gmra.mrb[52].mxu0 %vm268_vm2, %v102_v17  ;;  %3639 = vmatmul.mubr.msk.bf16.vlgmr.msra.gmra.mrb[52].mxu1 %vm268_vm2, %v103_v18  ;;  %v2160_v17 = vsel %vm272_vm0, %v245_v13, 0  ;;  %v182_v18 = vld [vmem:[%s4837_s1 + $0x150] sm:$0xff] }
  0x71   :  { %3643 = vmatpush3.bf16.msra.mxu0 %v1562_v19  ;;  %3649 = vmatpush3.bf16.msra.mxu1 %v1608_v20  ;;  %v183_v19 = vld [vmem:[%s4837_s1 + $0x158] sm:$0xff]  ;;  %v52_v20 = vld [vmem:[%s4838_s0 + $0x140] sm:$0xff]  ;;  %v246_v22 = vpack.c.bf16 %v182_v18, %v182_v18  ;;  %v65_v18 = vld [vmem:[%s4838_s0 + $0x1a8] sm:$0xff] }
  0x72   :  { %3644 = vmatprep.mubr.msk.bf16.mxu0 %vm3861_vm1, %v3860_v0  ;;  %3650 = vmatprep.mubr.msk.bf16.mxu1 %vm3861_vm1, %v3860_v0  ;;  %v247_v23 = vpack.c.bf16 %v183_v19, %v183_v19  ;;  %v116_v24 = vpack.c.bf16 %v52_v20, %v52_v20 }
  0x73   :  { %3654 = vmatprep.subr.bf16.mxu0 %v3860_v0  ;;  %3660 = vmatprep.subr.bf16.mxu1 %v3860_v0  ;;  %v2206_v26 = vsel %vm272_vm0, %v246_v22, 0  ;;  %v129_v22 = vpack.c.bf16 %v65_v18, %v65_v18  ;;  %v72_v18 = vld [vmem:[%s4838_s0 + $0x1e0] sm:$0xff] }
  0x78   :  { %3645 = vmatmul.mubr.msk.bf16.vlgmr.msra.gmra.mrb[56].mxu0 %vm268_vm2, %v104_v27  ;;  %3651 = vmatmul.mubr.msk.bf16.vlgmr.msra.gmra.mrb[56].mxu1 %vm268_vm2, %v105_v28  ;;  %v2252_v27 = vsel %vm272_vm0, %v247_v23, 0  ;;  %v184_v28 = vld [vmem:[%s4837_s1 + $0x160] sm:$0xff] }
  0x79   :  { %3655 = vmatpush3.bf16.msra.mxu0 %v1654_v29  ;;  %3661 = vmatpush3.bf16.msra.mxu1 %v1700_v30  ;;  %v185_v29 = vld [vmem:[%s4837_s1 + $0x168] sm:$0xff]  ;;  %v54_v30 = vld [vmem:[%s4838_s0 + $0x150] sm:$0xff]  ;;  %v248_v32 = vpack.c.bf16 %v184_v28, %v184_v28  ;;  %v67_v28 = vld [vmem:[%s4838_s0 + $0x1b8] sm:$0xff] }
  0x7a   :  { %3656 = vmatprep.mubr.msk.bf16.mxu0 %vm3861_vm1, %v3860_v0  ;;  %3662 = vmatprep.mubr.msk.bf16.mxu1 %vm3861_vm1, %v3860_v0  ;;  %v249_v33 = vpack.c.bf16 %v185_v29, %v185_v29  ;;  %v118_v34 = vpack.c.bf16 %v54_v30, %v54_v30 }
  0x7b   :  { %3666 = vmatprep.subr.bf16.mxu0 %v3860_v0  ;;  %3672 = vmatprep.subr.bf16.mxu1 %v3860_v0  ;;  %v2298_v36 = vsel %vm272_vm0, %v248_v32, 0 }
  0x80   :  { %3657 = vmatmul.mubr.msk.bf16.vlgmr.msra.gmra.mrb[60].mxu0 %vm268_vm2, %v106_v37  ;;  %3663 = vmatmul.mubr.msk.bf16.vlgmr.msra.gmra.mrb[60].mxu1 %vm268_vm2, %v107_v38  ;;  %v2344_v37 = vsel %vm272_vm0, %v249_v33, 0  ;;  %v186_v38 = vld [vmem:[%s4837_s1 + $0x170] sm:$0xff] }
  0x81   :  { %3667 = vmatpush3.bf16.msra.mxu0 %v1746_v39  ;;  %3673 = vmatpush3.bf16.msra.mxu1 %v1792_v40  ;;  %v187_v39 = vld [vmem:[%s4837_s1 + $0x178] sm:$0xff]  ;;  %v56_v40 = vld [vmem:[%s4838_s0 + $0x160] sm:$0xff]  ;;  %v250_v42 = vpack.c.bf16 %v186_v38, %v186_v38 }
  0x82   :  { %3668 = vmatprep.mubr.msk.bf16.mxu0 %vm3861_vm1, %v3860_v0  ;;  %3674 = vmatprep.mubr.msk.bf16.mxu1 %vm3861_vm1, %v3860_v0  ;;  %v251_v43 = vpack.c.bf16 %v187_v39, %v187_v39  ;;  %v120_v44 = vpack.c.bf16 %v56_v40, %v56_v40 }
  0x83   :  { %3678 = vmatprep.subr.bf16.mxu0 %v3860_v0  ;;  %3684 = vmatprep.subr.bf16.mxu1 %v3860_v0  ;;  %v2390_v46 = vsel %vm272_vm0, %v250_v42, 0 }
  0x88   :  { %3669 = vmatmul.mubr.msk.bf16.vlgmr.msra.gmra.mrb[64].mxu0 %vm268_vm2, %v108_v47  ;;  %3675 = vmatmul.mubr.msk.bf16.vlgmr.msra.gmra.mrb[64].mxu1 %vm268_vm2, %v109_v48  ;;  %v2436_v47 = vsel %vm272_vm0, %v251_v43, 0  ;;  %v188_v48 = vld [vmem:[%s4837_s1 + $0x180] sm:$0xff]  ;;  %v198_v43 = vld [vmem:[%s4837_s1 + $0x1d0] sm:$0xff] }
  0x89   :  { %3679 = vmatpush3.bf16.msra.mxu0 %v1838_v49  ;;  %3685 = vmatpush3.bf16.msra.mxu1 %v1884_v50  ;;  %v189_v49 = vld [vmem:[%s4837_s1 + $0x188] sm:$0xff]  ;;  %v58_v50 = vld [vmem:[%s4838_s0 + $0x170] sm:$0xff]  ;;  %v252_v52 = vpack.c.bf16 %v188_v48, %v188_v48 }
  0x8a   :  { %3680 = vmatprep.mubr.msk.bf16.mxu0 %vm3861_vm1, %v3860_v0  ;;  %3686 = vmatprep.mubr.msk.bf16.mxu1 %vm3861_vm1, %v3860_v0  ;;  %v253_v53 = vpack.c.bf16 %v189_v49, %v189_v49  ;;  %v122_v54 = vpack.c.bf16 %v58_v50, %v58_v50 }
  0x8b   :  { %3690 = vmatprep.subr.bf16.mxu0 %v3860_v0  ;;  %3696 = vmatprep.subr.bf16.mxu1 %v3860_v0  ;;  %v2482_v56 = vsel %vm272_vm0, %v252_v52, 0 }
  0x90   :  { %3681 = vmatmul.mubr.msk.bf16.vlgmr.msra.gmra.mrb[68].mxu0 %vm268_vm2, %v110_v57  ;;  %3687 = vmatmul.mubr.msk.bf16.vlgmr.msra.gmra.mrb[68].mxu1 %vm268_vm2, %v111_v58  ;;  %v2528_v57 = vsel %vm272_vm0, %v253_v53, 0  ;;  %v190_v58 = vld [vmem:[%s4837_s1 + $0x190] sm:$0xff] }
  0x91   :  { %3691 = vmatpush3.bf16.msra.mxu0 %v1930_v59  ;;  %3697 = vmatpush3.bf16.msra.mxu1 %v1976_v60  ;;  %v191_v59 = vld [vmem:[%s4837_s1 + $0x198] sm:$0xff]  ;;  %v60_v60 = vld [vmem:[%s4838_s0 + $0x180] sm:$0xff]  ;;  %v254_v62 = vpack.c.bf16 %v190_v58, %v190_v58 }
  0x92   :  { %3692 = vmatprep.mubr.msk.bf16.mxu0 %vm3861_vm1, %v3860_v0  ;;  %3698 = vmatprep.mubr.msk.bf16.mxu1 %vm3861_vm1, %v3860_v0  ;;  %v255_v63 = vpack.c.bf16 %v191_v59, %v191_v59  ;;  %v124_v1 = vpack.c.bf16 %v60_v60, %v60_v60 }
  0x93   :  { %3702 = vmatprep.subr.bf16.mxu0 %v3860_v0  ;;  %3708 = vmatprep.subr.bf16.mxu1 %v3860_v0  ;;  %v2574_v3 = vsel %vm272_vm0, %v254_v62, 0  ;;  %v201_v62 = vld [vmem:[%s4837_s1 + $0x1e8] sm:$0xff] }
  0x98   :  { %3693 = vmatmul.mubr.msk.bf16.vlgmr.msra.gmra.mrb[72].mxu0 %vm268_vm2, %v112_v4  ;;  %3699 = vmatmul.mubr.msk.bf16.vlgmr.msra.gmra.mrb[72].mxu1 %vm268_vm2, %v113_v5  ;;  %v2620_v4 = vsel %vm272_vm0, %v255_v63, 0  ;;  %v192_v5 = vld [vmem:[%s4837_s1 + $0x1a0] sm:$0xff]  ;;  %v70_v63 = vld [vmem:[%s4838_s0 + $0x1d0] sm:$0xff] }
  0x99   :  { %3703 = vmatpush3.bf16.msra.mxu0 %v2022_v6  ;;  %3709 = vmatpush3.bf16.msra.mxu1 %v2068_v7  ;;  %v193_v6 = vld [vmem:[%s4837_s1 + $0x1a8] sm:$0xff]  ;;  %v62_v7 = vld [vmem:[%s4838_s0 + $0x190] sm:$0xff]  ;;  %v256_v9 = vpack.c.bf16 %v192_v5, %v192_v5  ;;  %v134_v8 = vpack.c.bf16 %v70_v63, %v70_v63 }
  0x9a   :  { %3704 = vmatprep.mubr.msk.bf16.mxu0 %vm3861_vm1, %v3860_v0  ;;  %3710 = vmatprep.mubr.msk.bf16.mxu1 %vm3861_vm1, %v3860_v0  ;;  %v257_v10 = vpack.c.bf16 %v193_v6, %v193_v6  ;;  %v126_v11 = vpack.c.bf16 %v62_v7, %v62_v7 }
  0x9b   :  { %3714 = vmatprep.subr.bf16.mxu0 %v3860_v0  ;;  %3720 = vmatprep.subr.bf16.mxu1 %v3860_v0  ;;  %v2666_v13 = vsel %vm272_vm0, %v256_v9, 0 }
  0xa0   :  { %3705 = vmatmul.mubr.msk.bf16.vlgmr.msra.gmra.mrb[76].mxu0 %vm268_vm2, %v114_v14  ;;  %3711 = vmatmul.mubr.msk.bf16.vlgmr.msra.gmra.mrb[76].mxu1 %vm268_vm2, %v115_v15  ;;  %v2712_v14 = vsel %vm272_vm0, %v257_v10, 0  ;;  %v194_v15 = vld [vmem:[%s4837_s1 + $0x1b0] sm:$0xff] }
  0xa1   :  { %3715 = vmatpush3.bf16.msra.mxu0 %v2114_v16  ;;  %3721 = vmatpush3.bf16.msra.mxu1 %v2160_v17  ;;  %v195_v16 = vld [vmem:[%s4837_s1 + $0x1b8] sm:$0xff]  ;;  %v64_v17 = vld [vmem:[%s4838_s0 + $0x1a0] sm:$0xff]  ;;  %v258_v19 = vpack.c.bf16 %v194_v15, %v194_v15 }
  0xa2   :  { %3716 = vmatprep.mubr.msk.bf16.mxu0 %vm3861_vm1, %v3860_v0  ;;  %3722 = vmatprep.mubr.msk.bf16.mxu1 %vm3861_vm1, %v3860_v0  ;;  %v259_v20 = vpack.c.bf16 %v195_v16, %v195_v16  ;;  %v128_v21 = vpack.c.bf16 %v64_v17, %v64_v17  ;;  %v202_v16 = vld [vmem:[%s4837_s1 + $0x1f0] sm:$0xff]  ;;  %v203_v17 = vld [vmem:[%s4837_s1 + $0x1f8] sm:$0xff] }
  0xa3   :  { %3726 = vmatprep.subr.bf16.mxu0 %v3860_v0  ;;  %3732 = vmatprep.subr.bf16.mxu1 %v3860_v0  ;;  %v2758_v23 = vsel %vm272_vm0, %v258_v19, 0  ;;  %v73_v19 = vld [vmem:[%s4838_s0 + $0x1e8] sm:$0xff] }
  0xa8   :  { %3717 = vmatmul.mubr.msk.bf16.vlgmr.msra.gmra.mrb[80].mxu0 %vm268_vm2, %v116_v24  ;;  %3723 = vmatmul.mubr.msk.bf16.vlgmr.msra.gmra.mrb[80].mxu1 %vm268_vm2, %v117_v25  ;;  %v2804_v24 = vsel %vm272_vm0, %v259_v20, 0  ;;  %v196_v25 = vld [vmem:[%s4837_s1 + $0x1c0] sm:$0xff]  ;;  %v266_v20 = vpack.c.bf16 %v202_v16, %v202_v16 }
  0xa9   :  { %3727 = vmatpush3.bf16.msra.mxu0 %v2206_v26  ;;  %3733 = vmatpush3.bf16.msra.mxu1 %v2252_v27  ;;  %v197_v26 = vld [vmem:[%s4837_s1 + $0x1c8] sm:$0xff]  ;;  %v66_v27 = vld [vmem:[%s4838_s0 + $0x1b0] sm:$0xff]  ;;  %v260_v29 = vpack.c.bf16 %v196_v25, %v196_v25 }
  0xaa   :  { %3728 = vmatprep.mubr.msk.bf16.mxu0 %vm3861_vm1, %v3860_v0  ;;  %3734 = vmatprep.mubr.msk.bf16.mxu1 %vm3861_vm1, %v3860_v0  ;;  %v261_v30 = vpack.c.bf16 %v197_v26, %v197_v26  ;;  %v136_v26 = vpack.c.bf16 %v72_v18, %v72_v18 }
  0xab   :  { %3738 = vmatprep.subr.bf16.mxu0 %v3860_v0  ;;  %3744 = vmatprep.subr.bf16.mxu1 %v3860_v0  ;;  %v2850_v41 = vsel %vm272_vm0, %v260_v29, 0 }
  0xac   :  { %v2896_v42 = vsel %vm272_vm0, %v261_v30, 0 }
  0xb0   :  { %3729 = vmatmul.mubr.msk.bf16.vlgmr.msra.gmra.mrb[84].mxu0 %vm268_vm2, %v118_v34  ;;  %3735 = vmatmul.mubr.msk.bf16.vlgmr.msra.gmra.mrb[84].mxu1 %vm268_vm2, %v119_v35  ;;  %v130_v35 = vpack.c.bf16 %v66_v27, %v66_v27  ;;  %v137_v27 = vpack.c.bf16 %v73_v19, %v73_v19 }
  0xb1   :  { %3739 = vmatpush3.bf16.msra.mxu0 %v2298_v36  ;;  %3745 = vmatpush3.bf16.msra.mxu1 %v2344_v37  ;;  %v131_v36 = vpack.c.bf16 %v67_v28, %v67_v28 }
  0xb2   :  { %3740 = vmatprep.mubr.msk.bf16.mxu0 %vm3861_vm1, %v3860_v0  ;;  %3746 = vmatprep.mubr.msk.bf16.mxu1 %vm3861_vm1, %v3860_v0 }
  0xb3   :  { %3750 = vmatprep.subr.bf16.mxu0 %v3860_v0  ;;  %3756 = vmatprep.subr.bf16.mxu1 %v3860_v0 }
  0xb8   :  { %3741 = vmatmul.mubr.msk.bf16.vlgmr.msra.gmra.mrb[88].mxu0 %vm268_vm2, %v120_v44  ;;  %3747 = vmatmul.mubr.msk.bf16.vlgmr.msra.gmra.mrb[88].mxu1 %vm268_vm2, %v121_v45  ;;  %v199_v44 = vld [vmem:[%s4837_s1 + $0x1d8] sm:$0xff]  ;;  %v68_v45 = vld [vmem:[%s4838_s0 + $0x1c0] sm:$0xff] }
  0xb9   :  { %3751 = vmatpush3.bf16.msra.mxu0 %v2390_v46  ;;  %3757 = vmatpush3.bf16.msra.mxu1 %v2436_v47  ;;  %v69_v46 = vld [vmem:[%s4838_s0 + $0x1c8] sm:$0xff]  ;;  %v262_v47 = vpack.c.bf16 %v198_v43, %v198_v43  ;;  %v263_v48 = vpack.c.bf16 %v199_v44, %v199_v44  ;;  %v132_v53 = vpack.c.bf16 %v68_v45, %v68_v45 }
  0xba   :  { %3752 = vmatprep.mubr.msk.bf16.mxu0 %vm3861_vm1, %v3860_v0  ;;  %3758 = vmatprep.mubr.msk.bf16.mxu1 %vm3861_vm1, %v3860_v0 }
  0xbb   :  { %3762 = vmatprep.subr.bf16.mxu0 %v3860_v0  ;;  %3768 = vmatprep.subr.bf16.mxu1 %v3860_v0  ;;  %v2942_v59 = vsel %vm272_vm0, %v262_v47, 0  ;;  %v2988_v60 = vsel %vm272_vm0, %v263_v48, 0 }
  0xc0   :  { %3753 = vmatmul.mubr.msk.bf16.vlgmr.msra.gmra.mrb[92].mxu0 %vm268_vm2, %v122_v54  ;;  %3759 = vmatmul.mubr.msk.bf16.vlgmr.msra.gmra.mrb[92].mxu1 %vm268_vm2, %v123_v55  ;;  %v133_v54 = vpack.c.bf16 %v69_v46, %v69_v46 }
  0xc1   :  { %3763 = vmatpush3.bf16.msra.mxu0 %v2482_v56  ;;  %3769 = vmatpush3.bf16.msra.mxu1 %v2528_v57 }
  0xc2   :  { %3764 = vmatprep.mubr.msk.bf16.mxu0 %vm3861_vm1, %v3860_v0  ;;  %3770 = vmatprep.mubr.msk.bf16.mxu1 %vm3861_vm1, %v3860_v0 }
  0xc3   :  { %3774 = vmatprep.subr.bf16.mxu0 %v3860_v0  ;;  %3780 = vmatprep.subr.bf16.mxu1 %v3860_v0 }
  0xc8   :  { %3765 = vmatmul.mubr.msk.bf16.vlgmr.msra.gmra.mrb[96].mxu0 %vm268_vm2, %v124_v1  ;;  %3771 = vmatmul.mubr.msk.bf16.vlgmr.msra.gmra.mrb[96].mxu1 %vm268_vm2, %v125_v2  ;;  %v71_v1 = vld [vmem:[%s4838_s0 + $0x1d8] sm:$0xff]  ;;  %v264_v2 = vpack.c.bf16 %v200_v61, %v200_v61 }
  0xc9   :  { %3775 = vmatpush3.bf16.msra.mxu0 %v2574_v3  ;;  %3781 = vmatpush3.bf16.msra.mxu1 %v2620_v4  ;;  %v265_v3 = vpack.c.bf16 %v201_v62, %v201_v62  ;;  %v135_v9 = vpack.c.bf16 %v71_v1, %v71_v1 }
  0xca   :  { %3776 = vmatprep.mubr.msk.bf16.mxu0 %vm3861_vm1, %v3860_v0  ;;  %3782 = vmatprep.mubr.msk.bf16.mxu1 %vm3861_vm1, %v3860_v0 }
  0xcb   :  { %3786 = vmatprep.subr.bf16.mxu0 %v3860_v0  ;;  %3792 = vmatprep.subr.bf16.mxu1 %v3860_v0  ;;  %v3080_v15 = vsel %vm272_vm0, %v265_v3, 0 }
  0xd0   :  { %3777 = vmatmul.mubr.msk.bf16.vlgmr.msra.gmra.mrb[100].mxu0 %vm268_vm2, %v126_v11  ;;  %3783 = vmatmul.mubr.msk.bf16.vlgmr.msra.gmra.mrb[100].mxu1 %vm268_vm2, %v127_v12 }
  0xd1   :  { %3787 = vmatpush3.bf16.msra.mxu0 %v2666_v13  ;;  %3793 = vmatpush3.bf16.msra.mxu1 %v2712_v14  ;;  %v3034_v14 = vsel %vm272_vm0, %v264_v2, 0 }
  0xd2   :  { %3788 = vmatprep.mubr.msk.bf16.mxu0 %vm3861_vm1, %v3860_v0  ;;  %3794 = vmatprep.mubr.msk.bf16.mxu1 %vm3861_vm1, %v3860_v0 }
  0xd3   :  { %3798 = vmatprep.subr.bf16.mxu0 %v3860_v0  ;;  %3804 = vmatprep.subr.bf16.mxu1 %v3860_v0 }
  0xd8   :  { %3789 = vmatmul.mubr.msk.bf16.vlgmr.msra.gmra.mrb[104].mxu0 %vm268_vm2, %v128_v21  ;;  %3795 = vmatmul.mubr.msk.bf16.vlgmr.msra.gmra.mrb[104].mxu1 %vm268_vm2, %v129_v22  ;;  %v267_v21 = vpack.c.bf16 %v203_v17, %v203_v17 }
  0xd9   :  { %3799 = vmatpush3.bf16.msra.mxu0 %v2758_v23  ;;  %3805 = vmatpush3.bf16.msra.mxu1 %v2804_v24 }
  0xda   :  { %3800 = vmatprep.mubr.msk.bf16.mxu0 %vm3861_vm1, %v3860_v0  ;;  %3806 = vmatprep.mubr.msk.bf16.mxu1 %vm3861_vm1, %v3860_v0 }
  0xdb   :  { %v310_v31 = vpop.f32.mrb[0].mxu0  ;;  %v356_v32 = vpop.f32.mrb[0].mxu1  ;;  %3810 = vmatprep.subr.bf16.mxu0 %v3860_v0  ;;  %3816 = vmatprep.subr.bf16.mxu1 %v3860_v0 }
  0xdc   :  { %3214 = vst.msk [vmem:[%s4839_s2] sm:$0xff] %vm268_vm2, %v310_v31  ;;  %3215 = vst.msk [vmem:[%s4839_s2 + $0x8] sm:$0xff] %vm268_vm2, %v356_v32  ;;  %v3478_v33 = vpop.f32.mrb[1].mxu0  ;;  %v3484_v34 = vpop.f32.mrb[1].mxu1  ;;  %v3126_v32 = vsel %vm272_vm0, %v266_v20, 0 }
  0xdd   :  { %v313_v37 = vpop.f32.mrb[2].mxu0  ;;  %v359_v38 = vpop.f32.mrb[2].mxu1  ;;  %v3172_v33 = vsel %vm272_vm0, %v267_v21, 0  ;;  %v74_v34 = vld [vmem:[%s4838_s0 + $0x1f0] sm:$0xff] }
  0xde   :  { %v3479_v39 = vpop.f32.mrb[3].mxu0  ;;  %v3485_v40 = vpop.f32.mrb[3].mxu1 }
  0xdf   :  { %v138_v40 = vpack.c.bf16 %v74_v34, %v74_v34 }
  0xe0   :  { %3801 = vmatmul.mubr.msk.bf16.vlgmr.msra.gmra.mrb[108].mxu0 %vm268_vm2, %v130_v35  ;;  %3807 = vmatmul.mubr.msk.bf16.vlgmr.msra.gmra.mrb[108].mxu1 %vm268_vm2, %v131_v36  ;;  %v75_v35 = vld [vmem:[%s4838_s0 + $0x1f8] sm:$0xff] }
  0xe1   :  { %3811 = vmatpush3.bf16.msra.mxu0 %v2850_v41  ;;  %3817 = vmatpush3.bf16.msra.mxu1 %v2896_v42  ;;  %v139_v41 = vpack.c.bf16 %v75_v35, %v75_v35 }
  0xe2   :  { %3812 = vmatprep.mubr.msk.bf16.mxu0 %vm3861_vm1, %v3860_v0  ;;  %3818 = vmatprep.mubr.msk.bf16.mxu1 %vm3861_vm1, %v3860_v0 }
  0xe3   :  { %v402_v49 = vpop.f32.mrb[4].mxu0  ;;  %v448_v50 = vpop.f32.mrb[4].mxu1  ;;  %3822 = vmatprep.subr.bf16.mxu0 %v3860_v0  ;;  %3828 = vmatprep.subr.bf16.mxu1 %v3860_v0 }
  0xe4   :  { %3216 = vst.msk [vmem:[%s4839_s2 + $0x10] sm:$0xff] %vm268_vm2, %v402_v49  ;;  %3217 = vst.msk [vmem:[%s4839_s2 + $0x18] sm:$0xff] %vm268_vm2, %v448_v50  ;;  %v3490_v51 = vpop.f32.mrb[5].mxu0  ;;  %v3496_v52 = vpop.f32.mrb[5].mxu1 }
  0xe5   :  { %v405_v55 = vpop.f32.mrb[6].mxu0  ;;  %v451_v56 = vpop.f32.mrb[6].mxu1 }
  0xe6   :  { %v3491_v57 = vpop.f32.mrb[7].mxu0  ;;  %v3497_v58 = vpop.f32.mrb[7].mxu1 }
  0xe8   :  { %3813 = vmatmul.mubr.msk.bf16.vlgmr.msra.gmra.mrb[112].mxu0 %vm268_vm2, %v132_v53  ;;  %3819 = vmatmul.mubr.msk.bf16.vlgmr.msra.gmra.mrb[112].mxu1 %vm268_vm2, %v133_v54 }
  0xe9   :  { %3823 = vmatpush3.bf16.msra.mxu0 %v2942_v59  ;;  %3829 = vmatpush3.bf16.msra.mxu1 %v2988_v60 }
  0xea   :  { %3824 = vmatprep.mubr.msk.bf16.mxu0 %vm3861_vm1, %v3860_v0  ;;  %3830 = vmatprep.mubr.msk.bf16.mxu1 %vm3861_vm1, %v3860_v0 }
  0xeb   :  { %v494_v4 = vpop.f32.mrb[8].mxu0  ;;  %v540_v5 = vpop.f32.mrb[8].mxu1  ;;  %3834 = vmatprep.subr.bf16.mxu0 %v3860_v0  ;;  %3840 = vmatprep.subr.bf16.mxu1 %v3860_v0 }
  0xec   :  { %3218 = vst.msk [vmem:[%s4839_s2 + $0x20] sm:$0xff] %vm268_vm2, %v494_v4  ;;  %3219 = vst.msk [vmem:[%s4839_s2 + $0x28] sm:$0xff] %vm268_vm2, %v540_v5  ;;  %v3502_v6 = vpop.f32.mrb[9].mxu0  ;;  %v3508_v7 = vpop.f32.mrb[9].mxu1 }
  0xed   :  { %v497_v10 = vpop.f32.mrb[10].mxu0  ;;  %v543_v11 = vpop.f32.mrb[10].mxu1 }
  0xee   :  { %v3503_v12 = vpop.f32.mrb[11].mxu0  ;;  %v3509_v13 = vpop.f32.mrb[11].mxu1 }
  0xf0   :  { %3825 = vmatmul.mubr.msk.bf16.vlgmr.msra.gmra.mrb[116].mxu0 %vm268_vm2, %v134_v8  ;;  %3831 = vmatmul.mubr.msk.bf16.vlgmr.msra.gmra.mrb[116].mxu1 %vm268_vm2, %v135_v9 }
  0xf1   :  { %3835 = vmatpush3.bf16.msra.mxu0 %v3034_v14  ;;  %3841 = vmatpush3.bf16.msra.mxu1 %v3080_v15 }
  0xf2   :  { %3836 = vmatprep.mubr.msk.bf16.mxu0 %vm3861_vm1, %v3860_v0  ;;  %3842 = vmatprep.mubr.msk.bf16.mxu1 %vm3861_vm1, %v3860_v0 }
  0xf3   :  { %v586_v22 = vpop.f32.mrb[12].mxu0  ;;  %v632_v23 = vpop.f32.mrb[12].mxu1  ;;  %3846 = vmatprep.subr.bf16.mxu0 %v3860_v0  ;;  %3852 = vmatprep.subr.bf16.mxu1 %v3860_v0 }
  0xf4   :  { %3220 = vst.msk [vmem:[%s4839_s2 + $0x30] sm:$0xff] %vm268_vm2, %v586_v22  ;;  %3221 = vst.msk [vmem:[%s4839_s2 + $0x38] sm:$0xff] %vm268_vm2, %v632_v23  ;;  %v3514_v24 = vpop.f32.mrb[13].mxu0  ;;  %v3520_v25 = vpop.f32.mrb[13].mxu1 }
  0xf5   :  { %v589_v28 = vpop.f32.mrb[14].mxu0  ;;  %v635_v29 = vpop.f32.mrb[14].mxu1 }
  0xf6   :  { %v3515_v30 = vpop.f32.mrb[15].mxu0  ;;  %v3521_v31 = vpop.f32.mrb[15].mxu1 }
  0xf8   :  { %3837 = vmatmul.mubr.msk.bf16.vlgmr.msra.gmra.mrb[120].mxu0 %vm268_vm2, %v136_v26  ;;  %3843 = vmatmul.mubr.msk.bf16.vlgmr.msra.gmra.mrb[120].mxu1 %vm268_vm2, %v137_v27 }
  0xf9   :  { %3847 = vmatpush3.bf16.msra.mxu0 %v3126_v32  ;;  %3853 = vmatpush3.bf16.msra.mxu1 %v3172_v33 }
  0xfa   :  { %3848 = vmatprep.mubr.msk.bf16.mxu0 %vm3861_vm1, %v3860_v0  ;;  %3854 = vmatprep.mubr.msk.bf16.mxu1 %vm3861_vm1, %v3860_v0 }
  0xfb   :  { %v678_v36 = vpop.f32.mrb[16].mxu0  ;;  %v724_v37 = vpop.f32.mrb[16].mxu1 }
  0xfc   :  { %3222 = vst.msk [vmem:[%s4839_s2 + $0x40] sm:$0xff] %vm268_vm2, %v678_v36  ;;  %3223 = vst.msk [vmem:[%s4839_s2 + $0x48] sm:$0xff] %vm268_vm2, %v724_v37  ;;  %v3526_v38 = vpop.f32.mrb[17].mxu0  ;;  %v3532_v39 = vpop.f32.mrb[17].mxu1 }
  0xfd   :  { %v681_v42 = vpop.f32.mrb[18].mxu0  ;;  %v727_v43 = vpop.f32.mrb[18].mxu1 }
  0xfe   :  { %v3527_v44 = vpop.f32.mrb[19].mxu0  ;;  %v3533_v0 = vpop.f32.mrb[19].mxu1 }
 0x100   :  { %3849 = vmatmul.mubr.msk.bf16.vlgmr.msra.gmra.mrb[124].mxu0 %vm268_vm2, %v138_v40  ;;  %3855 = vmatmul.mubr.msk.bf16.vlgmr.msra.gmra.mrb[124].mxu1 %vm268_vm2, %v139_v41 }
 0x103   :  { %v770_v45 = vpop.f32.mrb[20].mxu0  ;;  %v816_v46 = vpop.f32.mrb[20].mxu1 }
 0x104   :  { %3224 = vst.msk [vmem:[%s4839_s2 + $0x50] sm:$0xff] %vm268_vm2, %v770_v45  ;;  %3225 = vst.msk [vmem:[%s4839_s2 + $0x58] sm:$0xff] %vm268_vm2, %v816_v46  ;;  %v3538_v47 = vpop.f32.mrb[21].mxu0  ;;  %v3544_v48 = vpop.f32.mrb[21].mxu1 }
 0x105   :  { %v773_v49 = vpop.f32.mrb[22].mxu0  ;;  %v819_v50 = vpop.f32.mrb[22].mxu1 }
 0x106   :  { %v3539_v51 = vpop.f32.mrb[23].mxu0  ;;  %v3545_v52 = vpop.f32.mrb[23].mxu1 }
 0x10b   :  { %v862_v53 = vpop.f32.mrb[24].mxu0  ;;  %v908_v54 = vpop.f32.mrb[24].mxu1 }
 0x10c   :  { %3226 = vst.msk [vmem:[%s4839_s2 + $0x60] sm:$0xff] %vm268_vm2, %v862_v53  ;;  %3227 = vst.msk [vmem:[%s4839_s2 + $0x68] sm:$0xff] %vm268_vm2, %v908_v54  ;;  %v3550_v55 = vpop.f32.mrb[25].mxu0  ;;  %v3556_v56 = vpop.f32.mrb[25].mxu1 }
 0x10d   :  { %v865_v57 = vpop.f32.mrb[26].mxu0  ;;  %v911_v58 = vpop.f32.mrb[26].mxu1 }
 0x10e   :  { %v3551_v59 = vpop.f32.mrb[27].mxu0  ;;  %v3557_v60 = vpop.f32.mrb[27].mxu1 }
 0x113   :  { %v954_v61 = vpop.f32.mrb[28].mxu0  ;;  %v1000_v62 = vpop.f32.mrb[28].mxu1 }
 0x114   :  { %3228 = vst.msk [vmem:[%s4839_s2 + $0x70] sm:$0xff] %vm268_vm2, %v954_v61  ;;  %3229 = vst.msk [vmem:[%s4839_s2 + $0x78] sm:$0xff] %vm268_vm2, %v1000_v62  ;;  %v3562_v63 = vpop.f32.mrb[29].mxu0  ;;  %v3568_v1 = vpop.f32.mrb[29].mxu1 }
 0x115   :  { %v957_v2 = vpop.f32.mrb[30].mxu0  ;;  %v1003_v3 = vpop.f32.mrb[30].mxu1 }
 0x116   :  { %v3563_v4 = vpop.f32.mrb[31].mxu0  ;;  %v3569_v5 = vpop.f32.mrb[31].mxu1 }
 0x11b   :  { %v1046_v6 = vpop.f32.mrb[32].mxu0  ;;  %v1092_v7 = vpop.f32.mrb[32].mxu1 }
 0x11c   :  { %3230 = vst.msk [vmem:[%s4839_s2 + $0x80] sm:$0xff] %vm268_vm2, %v1046_v6  ;;  %3231 = vst.msk [vmem:[%s4839_s2 + $0x88] sm:$0xff] %vm268_vm2, %v1092_v7  ;;  %v3574_v8 = vpop.f32.mrb[33].mxu0  ;;  %v3580_v9 = vpop.f32.mrb[33].mxu1 }
 0x11d   :  { %v1049_v10 = vpop.f32.mrb[34].mxu0  ;;  %v1095_v11 = vpop.f32.mrb[34].mxu1 }
 0x11e   :  { %v3575_v12 = vpop.f32.mrb[35].mxu0  ;;  %v3581_v13 = vpop.f32.mrb[35].mxu1 }
 0x123   :  { %v1138_v14 = vpop.f32.mrb[36].mxu0  ;;  %v1184_v15 = vpop.f32.mrb[36].mxu1 }
 0x124   :  { %3232 = vst.msk [vmem:[%s4839_s2 + $0x90] sm:$0xff] %vm268_vm2, %v1138_v14  ;;  %3233 = vst.msk [vmem:[%s4839_s2 + $0x98] sm:$0xff] %vm268_vm2, %v1184_v15  ;;  %v3586_v16 = vpop.f32.mrb[37].mxu0  ;;  %v3592_v17 = vpop.f32.mrb[37].mxu1 }
 0x125   :  { %v1141_v18 = vpop.f32.mrb[38].mxu0  ;;  %v1187_v19 = vpop.f32.mrb[38].mxu1 }
 0x126   :  { %v3587_v20 = vpop.f32.mrb[39].mxu0  ;;  %v3593_v21 = vpop.f32.mrb[39].mxu1 }
 0x12b   :  { %v1230_v22 = vpop.f32.mrb[40].mxu0  ;;  %v1276_v23 = vpop.f32.mrb[40].mxu1 }
 0x12c   :  { %3234 = vst.msk [vmem:[%s4839_s2 + $0xa0] sm:$0xff] %vm268_vm2, %v1230_v22  ;;  %3235 = vst.msk [vmem:[%s4839_s2 + $0xa8] sm:$0xff] %vm268_vm2, %v1276_v23  ;;  %v3598_v24 = vpop.f32.mrb[41].mxu0  ;;  %v3604_v25 = vpop.f32.mrb[41].mxu1 }
 0x12d   :  { %v1233_v26 = vpop.f32.mrb[42].mxu0  ;;  %v1279_v27 = vpop.f32.mrb[42].mxu1 }
 0x12e   :  { %v3599_v28 = vpop.f32.mrb[43].mxu0  ;;  %v3605_v29 = vpop.f32.mrb[43].mxu1 }
 0x133   :  { %v1322_v30 = vpop.f32.mrb[44].mxu0  ;;  %v1368_v31 = vpop.f32.mrb[44].mxu1 }
 0x134   :  { %3236 = vst.msk [vmem:[%s4839_s2 + $0xb0] sm:$0xff] %vm268_vm2, %v1322_v30  ;;  %3237 = vst.msk [vmem:[%s4839_s2 + $0xb8] sm:$0xff] %vm268_vm2, %v1368_v31  ;;  %v3610_v32 = vpop.f32.mrb[45].mxu0  ;;  %v3616_v33 = vpop.f32.mrb[45].mxu1 }
 0x135   :  { %v1325_v34 = vpop.f32.mrb[46].mxu0  ;;  %v1371_v35 = vpop.f32.mrb[46].mxu1 }
 0x136   :  { %v3611_v36 = vpop.f32.mrb[47].mxu0  ;;  %v3617_v37 = vpop.f32.mrb[47].mxu1 }
 0x13b   :  { %v1414_v38 = vpop.f32.mrb[48].mxu0  ;;  %v1460_v39 = vpop.f32.mrb[48].mxu1 }
 0x13c   :  { %3238 = vst.msk [vmem:[%s4839_s2 + $0xc0] sm:$0xff] %vm268_vm2, %v1414_v38  ;;  %3239 = vst.msk [vmem:[%s4839_s2 + $0xc8] sm:$0xff] %vm268_vm2, %v1460_v39  ;;  %v3622_v40 = vpop.f32.mrb[49].mxu0  ;;  %v3628_v41 = vpop.f32.mrb[49].mxu1 }
 0x13d   :  { %v1417_v42 = vpop.f32.mrb[50].mxu0  ;;  %v1463_v43 = vpop.f32.mrb[50].mxu1 }
 0x13e   :  { %v3623_v44 = vpop.f32.mrb[51].mxu0  ;;  %v3629_v0 = vpop.f32.mrb[51].mxu1 }
 0x143   :  { %v1506_v45 = vpop.f32.mrb[52].mxu0  ;;  %v1552_v46 = vpop.f32.mrb[52].mxu1 }
 0x144   :  { %3240 = vst.msk [vmem:[%s4839_s2 + $0xd0] sm:$0xff] %vm268_vm2, %v1506_v45  ;;  %3241 = vst.msk [vmem:[%s4839_s2 + $0xd8] sm:$0xff] %vm268_vm2, %v1552_v46  ;;  %v3634_v47 = vpop.f32.mrb[53].mxu0  ;;  %v3640_v48 = vpop.f32.mrb[53].mxu1 }
 0x145   :  { %v1509_v49 = vpop.f32.mrb[54].mxu0  ;;  %v1555_v50 = vpop.f32.mrb[54].mxu1 }
 0x146   :  { %v3635_v51 = vpop.f32.mrb[55].mxu0  ;;  %v3641_v52 = vpop.f32.mrb[55].mxu1 }
 0x14b   :  { %v1598_v53 = vpop.f32.mrb[56].mxu0  ;;  %v1644_v54 = vpop.f32.mrb[56].mxu1 }
 0x14c   :  { %3242 = vst.msk [vmem:[%s4839_s2 + $0xe0] sm:$0xff] %vm268_vm2, %v1598_v53  ;;  %3243 = vst.msk [vmem:[%s4839_s2 + $0xe8] sm:$0xff] %vm268_vm2, %v1644_v54  ;;  %v3646_v55 = vpop.f32.mrb[57].mxu0  ;;  %v3652_v56 = vpop.f32.mrb[57].mxu1 }
 0x14d   :  { %v1601_v57 = vpop.f32.mrb[58].mxu0  ;;  %v1647_v58 = vpop.f32.mrb[58].mxu1 }
 0x14e   :  { %v3647_v59 = vpop.f32.mrb[59].mxu0  ;;  %v3653_v60 = vpop.f32.mrb[59].mxu1 }
 0x153   :  { %v1690_v61 = vpop.f32.mrb[60].mxu0  ;;  %v1736_v62 = vpop.f32.mrb[60].mxu1 }
 0x154   :  { %3244 = vst.msk [vmem:[%s4839_s2 + $0xf0] sm:$0xff] %vm268_vm2, %v1690_v61  ;;  %3245 = vst.msk [vmem:[%s4839_s2 + $0xf8] sm:$0xff] %vm268_vm2, %v1736_v62  ;;  %v3658_v63 = vpop.f32.mrb[61].mxu0  ;;  %v3664_v1 = vpop.f32.mrb[61].mxu1 }
 0x155   :  { %v1693_v2 = vpop.f32.mrb[62].mxu0  ;;  %v1739_v3 = vpop.f32.mrb[62].mxu1 }
 0x156   :  { %v3659_v4 = vpop.f32.mrb[63].mxu0  ;;  %v3665_v5 = vpop.f32.mrb[63].mxu1 }
 0x15b   :  { %v1782_v6 = vpop.f32.mrb[64].mxu0  ;;  %v1828_v7 = vpop.f32.mrb[64].mxu1 }
 0x15c   :  { %3246 = vst.msk [vmem:[%s4839_s2 + $0x100] sm:$0xff] %vm268_vm2, %v1782_v6  ;;  %3247 = vst.msk [vmem:[%s4839_s2 + $0x108] sm:$0xff] %vm268_vm2, %v1828_v7  ;;  %v3670_v8 = vpop.f32.mrb[65].mxu0  ;;  %v3676_v9 = vpop.f32.mrb[65].mxu1 }
 0x15d   :  { %v1785_v10 = vpop.f32.mrb[66].mxu0  ;;  %v1831_v11 = vpop.f32.mrb[66].mxu1 }
 0x15e   :  { %v3671_v12 = vpop.f32.mrb[67].mxu0  ;;  %v3677_v13 = vpop.f32.mrb[67].mxu1 }
 0x163   :  { %v1874_v14 = vpop.f32.mrb[68].mxu0  ;;  %v1920_v15 = vpop.f32.mrb[68].mxu1 }
 0x164   :  { %3248 = vst.msk [vmem:[%s4839_s2 + $0x110] sm:$0xff] %vm268_vm2, %v1874_v14  ;;  %3249 = vst.msk [vmem:[%s4839_s2 + $0x118] sm:$0xff] %vm268_vm2, %v1920_v15  ;;  %v3682_v16 = vpop.f32.mrb[69].mxu0  ;;  %v3688_v17 = vpop.f32.mrb[69].mxu1 }
 0x165   :  { %v1877_v18 = vpop.f32.mrb[70].mxu0  ;;  %v1923_v19 = vpop.f32.mrb[70].mxu1 }
 0x166   :  { %v3683_v20 = vpop.f32.mrb[71].mxu0  ;;  %v3689_v21 = vpop.f32.mrb[71].mxu1 }
 0x16b   :  { %v1966_v22 = vpop.f32.mrb[72].mxu0  ;;  %v2012_v23 = vpop.f32.mrb[72].mxu1 }
 0x16c   :  { %3250 = vst.msk [vmem:[%s4839_s2 + $0x120] sm:$0xff] %vm268_vm2, %v1966_v22  ;;  %3251 = vst.msk [vmem:[%s4839_s2 + $0x128] sm:$0xff] %vm268_vm2, %v2012_v23  ;;  %v3694_v24 = vpop.f32.mrb[73].mxu0  ;;  %v3700_v25 = vpop.f32.mrb[73].mxu1 }
 0x16d   :  { %v1969_v26 = vpop.f32.mrb[74].mxu0  ;;  %v2015_v27 = vpop.f32.mrb[74].mxu1 }
 0x16e   :  { %v3695_v28 = vpop.f32.mrb[75].mxu0  ;;  %v3701_v29 = vpop.f32.mrb[75].mxu1 }
 0x173   :  { %v2058_v30 = vpop.f32.mrb[76].mxu0  ;;  %v2104_v31 = vpop.f32.mrb[76].mxu1 }
 0x174   :  { %3252 = vst.msk [vmem:[%s4839_s2 + $0x130] sm:$0xff] %vm268_vm2, %v2058_v30  ;;  %3253 = vst.msk [vmem:[%s4839_s2 + $0x138] sm:$0xff] %vm268_vm2, %v2104_v31  ;;  %v3706_v32 = vpop.f32.mrb[77].mxu0  ;;  %v3712_v33 = vpop.f32.mrb[77].mxu1 }
 0x175   :  { %v2061_v34 = vpop.f32.mrb[78].mxu0  ;;  %v2107_v35 = vpop.f32.mrb[78].mxu1 }
 0x176   :  { %v3707_v36 = vpop.f32.mrb[79].mxu0  ;;  %v3713_v37 = vpop.f32.mrb[79].mxu1 }
 0x17b   :  { %v2150_v38 = vpop.f32.mrb[80].mxu0  ;;  %v2196_v39 = vpop.f32.mrb[80].mxu1 }
 0x17c   :  { %3254 = vst.msk [vmem:[%s4839_s2 + $0x140] sm:$0xff] %vm268_vm2, %v2150_v38  ;;  %3255 = vst.msk [vmem:[%s4839_s2 + $0x148] sm:$0xff] %vm268_vm2, %v2196_v39  ;;  %v3718_v40 = vpop.f32.mrb[81].mxu0  ;;  %v3724_v41 = vpop.f32.mrb[81].mxu1 }
 0x17d   :  { %v2153_v42 = vpop.f32.mrb[82].mxu0  ;;  %v2199_v43 = vpop.f32.mrb[82].mxu1 }
 0x17e   :  { %v3719_v44 = vpop.f32.mrb[83].mxu0  ;;  %v3725_v0 = vpop.f32.mrb[83].mxu1 }
 0x183   :  { %v2242_v45 = vpop.f32.mrb[84].mxu0  ;;  %v2288_v46 = vpop.f32.mrb[84].mxu1 }
 0x184   :  { %3256 = vst.msk [vmem:[%s4839_s2 + $0x150] sm:$0xff] %vm268_vm2, %v2242_v45  ;;  %3257 = vst.msk [vmem:[%s4839_s2 + $0x158] sm:$0xff] %vm268_vm2, %v2288_v46  ;;  %v3730_v47 = vpop.f32.mrb[85].mxu0  ;;  %v3736_v48 = vpop.f32.mrb[85].mxu1 }
 0x185   :  { %v2245_v49 = vpop.f32.mrb[86].mxu0  ;;  %v2291_v50 = vpop.f32.mrb[86].mxu1 }
 0x186   :  { %v3731_v51 = vpop.f32.mrb[87].mxu0  ;;  %v3737_v52 = vpop.f32.mrb[87].mxu1 }
 0x18b   :  { %v2334_v53 = vpop.f32.mrb[88].mxu0  ;;  %v2380_v54 = vpop.f32.mrb[88].mxu1 }
 0x18c   :  { %3258 = vst.msk [vmem:[%s4839_s2 + $0x160] sm:$0xff] %vm268_vm2, %v2334_v53  ;;  %3259 = vst.msk [vmem:[%s4839_s2 + $0x168] sm:$0xff] %vm268_vm2, %v2380_v54  ;;  %v3742_v55 = vpop.f32.mrb[89].mxu0  ;;  %v3748_v56 = vpop.f32.mrb[89].mxu1 }
 0x18d   :  { %v2337_v57 = vpop.f32.mrb[90].mxu0  ;;  %v2383_v58 = vpop.f32.mrb[90].mxu1 }
 0x18e   :  { %v3743_v59 = vpop.f32.mrb[91].mxu0  ;;  %v3749_v60 = vpop.f32.mrb[91].mxu1 }
 0x193   :  { %v2426_v61 = vpop.f32.mrb[92].mxu0  ;;  %v2472_v62 = vpop.f32.mrb[92].mxu1 }
 0x194   :  { %3260 = vst.msk [vmem:[%s4839_s2 + $0x170] sm:$0xff] %vm268_vm2, %v2426_v61  ;;  %3261 = vst.msk [vmem:[%s4839_s2 + $0x178] sm:$0xff] %vm268_vm2, %v2472_v62  ;;  %v3754_v63 = vpop.f32.mrb[93].mxu0  ;;  %v3760_v1 = vpop.f32.mrb[93].mxu1 }
 0x195   :  { %v2429_v2 = vpop.f32.mrb[94].mxu0  ;;  %v2475_v3 = vpop.f32.mrb[94].mxu1 }
 0x196   :  { %v3755_v4 = vpop.f32.mrb[95].mxu0  ;;  %v3761_v5 = vpop.f32.mrb[95].mxu1 }
 0x19b   :  { %v2518_v6 = vpop.f32.mrb[96].mxu0  ;;  %v2564_v7 = vpop.f32.mrb[96].mxu1 }
 0x19c   :  { %3262 = vst.msk [vmem:[%s4839_s2 + $0x180] sm:$0xff] %vm268_vm2, %v2518_v6  ;;  %3263 = vst.msk [vmem:[%s4839_s2 + $0x188] sm:$0xff] %vm268_vm2, %v2564_v7  ;;  %v3766_v8 = vpop.f32.mrb[97].mxu0  ;;  %v3772_v9 = vpop.f32.mrb[97].mxu1 }
 0x19d   :  { %v2521_v10 = vpop.f32.mrb[98].mxu0  ;;  %v2567_v11 = vpop.f32.mrb[98].mxu1 }
 0x19e   :  { %v3767_v12 = vpop.f32.mrb[99].mxu0  ;;  %v3773_v13 = vpop.f32.mrb[99].mxu1 }
 0x1a3   :  { %v2610_v14 = vpop.f32.mrb[100].mxu0  ;;  %v2656_v15 = vpop.f32.mrb[100].mxu1 }
 0x1a4   :  { %3264 = vst.msk [vmem:[%s4839_s2 + $0x190] sm:$0xff] %vm268_vm2, %v2610_v14  ;;  %3265 = vst.msk [vmem:[%s4839_s2 + $0x198] sm:$0xff] %vm268_vm2, %v2656_v15  ;;  %v3778_v16 = vpop.f32.mrb[101].mxu0  ;;  %v3784_v17 = vpop.f32.mrb[101].mxu1 }
 0x1a5   :  { %v2613_v18 = vpop.f32.mrb[102].mxu0  ;;  %v2659_v19 = vpop.f32.mrb[102].mxu1 }
 0x1a6   :  { %v3779_v20 = vpop.f32.mrb[103].mxu0  ;;  %v3785_v21 = vpop.f32.mrb[103].mxu1 }
 0x1ab   :  { %v2702_v22 = vpop.f32.mrb[104].mxu0  ;;  %v2748_v23 = vpop.f32.mrb[104].mxu1 }
 0x1ac   :  { %3266 = vst.msk [vmem:[%s4839_s2 + $0x1a0] sm:$0xff] %vm268_vm2, %v2702_v22  ;;  %3267 = vst.msk [vmem:[%s4839_s2 + $0x1a8] sm:$0xff] %vm268_vm2, %v2748_v23  ;;  %v3790_v24 = vpop.f32.mrb[105].mxu0  ;;  %v3796_v25 = vpop.f32.mrb[105].mxu1 }
 0x1ad   :  { %v2705_v26 = vpop.f32.mrb[106].mxu0  ;;  %v2751_v27 = vpop.f32.mrb[106].mxu1 }
 0x1ae   :  { %v3791_v28 = vpop.f32.mrb[107].mxu0  ;;  %v3797_v29 = vpop.f32.mrb[107].mxu1 }
 0x1b3   :  { %v2794_v30 = vpop.f32.mrb[108].mxu0  ;;  %v2840_v31 = vpop.f32.mrb[108].mxu1 }
 0x1b4   :  { %3268 = vst.msk [vmem:[%s4839_s2 + $0x1b0] sm:$0xff] %vm268_vm2, %v2794_v30  ;;  %3269 = vst.msk [vmem:[%s4839_s2 + $0x1b8] sm:$0xff] %vm268_vm2, %v2840_v31  ;;  %v3802_v32 = vpop.f32.mrb[109].mxu0  ;;  %v3808_v33 = vpop.f32.mrb[109].mxu1 }
 0x1b5   :  { %v2797_v34 = vpop.f32.mrb[110].mxu0  ;;  %v2843_v35 = vpop.f32.mrb[110].mxu1 }
 0x1b6   :  { %v3803_v36 = vpop.f32.mrb[111].mxu0  ;;  %v3809_v37 = vpop.f32.mrb[111].mxu1 }
 0x1bb   :  { %v2886_v38 = vpop.f32.mrb[112].mxu0  ;;  %v2932_v39 = vpop.f32.mrb[112].mxu1 }
 0x1bc   :  { %3270 = vst.msk [vmem:[%s4839_s2 + $0x1c0] sm:$0xff] %vm268_vm2, %v2886_v38  ;;  %3271 = vst.msk [vmem:[%s4839_s2 + $0x1c8] sm:$0xff] %vm268_vm2, %v2932_v39  ;;  %v3814_v40 = vpop.f32.mrb[113].mxu0  ;;  %v3820_v41 = vpop.f32.mrb[113].mxu1 }
 0x1bd   :  { %v2889_v42 = vpop.f32.mrb[114].mxu0  ;;  %v2935_v43 = vpop.f32.mrb[114].mxu1 }
 0x1be   :  { %v3815_v44 = vpop.f32.mrb[115].mxu0  ;;  %v3821_v0 = vpop.f32.mrb[115].mxu1 }
 0x1c3   :  { %v2978_v45 = vpop.f32.mrb[116].mxu0  ;;  %v3024_v46 = vpop.f32.mrb[116].mxu1 }
 0x1c4   :  { %3272 = vst.msk [vmem:[%s4839_s2 + $0x1d0] sm:$0xff] %vm268_vm2, %v2978_v45  ;;  %3273 = vst.msk [vmem:[%s4839_s2 + $0x1d8] sm:$0xff] %vm268_vm2, %v3024_v46  ;;  %v3826_v47 = vpop.f32.mrb[117].mxu0  ;;  %v3832_v48 = vpop.f32.mrb[117].mxu1 }
 0x1c5   :  { %v2981_v49 = vpop.f32.mrb[118].mxu0  ;;  %v3027_v50 = vpop.f32.mrb[118].mxu1 }
 0x1c6   :  { %v3827_v51 = vpop.f32.mrb[119].mxu0  ;;  %v3833_v52 = vpop.f32.mrb[119].mxu1 }
 0x1cb   :  { %v3070_v53 = vpop.f32.mrb[120].mxu0  ;;  %v3116_v54 = vpop.f32.mrb[120].mxu1 }
 0x1cc   :  { %3274 = vst.msk [vmem:[%s4839_s2 + $0x1e0] sm:$0xff] %vm268_vm2, %v3070_v53  ;;  %3275 = vst.msk [vmem:[%s4839_s2 + $0x1e8] sm:$0xff] %vm268_vm2, %v3116_v54  ;;  %v3838_v55 = vpop.f32.mrb[121].mxu0  ;;  %v3844_v56 = vpop.f32.mrb[121].mxu1 }
 0x1cd   :  { %v3073_v57 = vpop.f32.mrb[122].mxu0  ;;  %v3119_v58 = vpop.f32.mrb[122].mxu1 }
 0x1ce   :  { %v3839_v59 = vpop.f32.mrb[123].mxu0  ;;  %v3845_v60 = vpop.f32.mrb[123].mxu1 }
 0x1d3   :  { %v3162_v61 = vpop.f32.mrb[124].mxu0  ;;  %v3208_v62 = vpop.f32.mrb[124].mxu1 }
 0x1d4   :  { %3276 = vst.msk [vmem:[%s4839_s2 + $0x1f0] sm:$0xff] %vm268_vm2, %v3162_v61  ;;  %3277 = vst.msk [vmem:[%s4839_s2 + $0x1f8] sm:$0xff] %vm268_vm2, %v3208_v62  ;;  %v3850_v63 = vpop.f32.mrb[125].mxu0  ;;  %v3856_v1 = vpop.f32.mrb[125].mxu1 }
 0x1d5   :  { %v3165_v2 = vpop.f32.mrb[126].mxu0  ;;  %v3211_v3 = vpop.f32.mrb[126].mxu1 }
 0x1d6   :  { %v3851_v4 = vpop.f32.mrb[127].mxu0  ;;  %v3857_v5 = vpop.f32.mrb[127].mxu1 }

// kernel: template_embedding_forward.56
= control target key start
LH: loop header
LB: loop body
LE: loop exit
PB: predicated region body
PF: predicated region fallthrough
CT: control target
= control target key end

     0   :  { %vm33_vm0 = vcmask 523264   ;;  %vm390_vm1 = vcmask 31744   ;;  %s767_s0 = inlined_call_operand.vmem [shape: f32[64,64], index: 0, kind: input, shape index: {}]   ;;  %s768_s3 = inlined_call_operand.vmem [shape: f32[64,260], index: 3, kind: input, shape index: {}]   ;;  %s769_s1 = inlined_call_operand.vmem [shape: f32[1,64], index: 1, kind: input, shape index: {}]   ;;  %s770_s2 = inlined_call_operand.vmem [shape: f32[1,64], index: 2, kind: input, shape index: {}]   ;;  %s771_s4 = inlined_call_operand.vmem [shape: f32[1,260], index: 4, kind: input, shape index: {}]   ;;  %s772_s5 = inlined_call_operand.vmem [shape: f32[64,256], index: 5, kind: output, shape index: {0}]   ;;  %s773_s6 = inlined_call_operand.vmem [shape: f32[64,4], index: 6, kind: output, shape index: {1}]  }
   0x1   :  { %v23_v0 = vld [vmem:[%s767_s0] sm:$0xff]  ;;  %v25_v1 = vld [vmem:[%s767_s0 + $0x10] sm:$0xff]  ;;  %v24_v2 = vld [vmem:[%s767_s0 + $0x8] sm:$0xff] }
   0x2   :  { %v34_v3 = vsel %vm33_vm0, %v23_v0, 0.0  ;;  %v40_v4 = vsel %vm33_vm0, %v25_v1, 0.0  ;;  %v26_v5 = vld [vmem:[%s767_s0 + $0x18] sm:$0xff]  ;;  %v37_v6 = vsel %vm33_vm0, %v24_v2, 0.0  ;;  %v27_v8 = vld [vmem:[%s767_s0 + $0x20] sm:$0xff]  ;;  %v28_v9 = vld [vmem:[%s767_s0 + $0x28] sm:$0xff] }
   0x3   :  { %35 = vadd.xlane.f32.xlu0 %v34_v3  ;;  %41 = vadd.xlane.f32.xlu1 %v40_v4  ;;  %v43_v7 = vsel %vm33_vm0, %v26_v5, 0.0  ;;  %v46_v10 = vsel %vm33_vm0, %v27_v8, 0.0  ;;  %v49_v11 = vsel %vm33_vm0, %v28_v9, 0.0  ;;  %v29_v12 = vld [vmem:[%s767_s0 + $0x30] sm:$0xff]  ;;  %v30_v13 = vld [vmem:[%s767_s0 + $0x38] sm:$0xff]  ;;  %v168_v56 = vld [vmem:[%s768_s3 + $0x8] sm:$0xff] }
   0x4   :  { %v52_v14 = vsel %vm33_vm0, %v29_v12, 0.0  ;;  %v55_v15 = vsel %vm33_vm0, %v30_v13, 0.0  ;;  %v171_v57 = vld [vmem:[%s768_s3 + $0x20] sm:$0xff]  ;;  %v170_v60 = vld [vmem:[%s768_s3 + $0x18] sm:$0xff]  ;;  %v177_v63 = vld [vmem:[%s768_s3 + $0x50] sm:$0xff] }
   0x5   :  { %v196_v58 = vpack.c.bf16 %v171_v57, %v168_v56  ;;  %v167_v59 = vld [vmem:[%s768_s3] sm:$0xff]  ;;  %v174_v62 = vld [vmem:[%s768_s3 + $0x38] sm:$0xff]  ;;  %v173_v3 = vld [vmem:[%s768_s3 + $0x30] sm:$0xff] }
   0x6   :  { %v195_v61 = vpack.c.bf16 %v170_v60, %v167_v59  ;;  %v176_v4 = vld [vmem:[%s768_s3 + $0x48] sm:$0xff] }
   0x7   :  { %38 = vadd.xlane.f32.xlu0 %v37_v6  ;;  %44 = vadd.xlane.f32.xlu1 %v43_v7  ;;  %v198_v6 = vpack.c.bf16 %v176_v4, %v173_v3  ;;  %v180_v7 = vld [vmem:[%s768_s3 + $0x68] sm:$0xff] }
   0x8   :  { %236 = vmatprep.subr.bf16.mxu0 %v196_v58 }
   0x9   :  { %237 = vmatpush1.bf16.msra.mxu0 %v195_v61 }
   0xb   :  { %47 = vadd.xlane.f32.xlu0 %v46_v10  ;;  %50 = vadd.xlane.f32.xlu1 %v49_v11  ;;  %v178_v11 = vld [vmem:[%s768_s3 + $0x58] sm:$0xff] }
   0xf   :  { %53 = vadd.xlane.f32.xlu0 %v52_v14  ;;  %56 = vadd.xlane.f32.xlu1 %v55_v15 }
  0x90   :  { %v36_v16 = vpop.xlane.xlu0 %35  ;;  %v42_v17 = vpop.xlane.xlu1 %41 }
  0x91   :  { %v59_v18 = vmul.f32 0.015625, %v36_v16  ;;  %v61_v19 = vmul.f32 0.015625, %v42_v17  ;;  %v186_v16 = vld [vmem:[%s768_s3 + $0x98] sm:$0xff]  ;;  %v189_v17 = vld [vmem:[%s768_s3 + $0xb0] sm:$0xff] }
  0x93   :  { %v526_v20 = vsub.f32 %v23_v0, %v59_v18  ;;  %v528_v21 = vsub.f32 %v25_v1, %v61_v19  ;;  %v169_v0 = vld [vmem:[%s768_s3 + $0x10] sm:$0xff]  ;;  %v199_v1 = vpack.c.bf16 %v177_v63, %v174_v62  ;;  %v205_v19 = vpack.c.bf16 %v189_v17, %v186_v16  ;;  %v407_v62 = vld [vmem:[%s769_s1] ss:$0 sm:$0xff] }
  0x94   :  { %v39_v22 = vpop.xlane.xlu0 %38  ;;  %v45_v23 = vpop.xlane.xlu1 %44  ;;  %v181_v18 = vld [vmem:[%s768_s3 + $0x70] sm:$0xff] }
  0x95   :  { %v60_v24 = vmul.f32 0.015625, %v39_v22  ;;  %v62_v25 = vmul.f32 0.015625, %v45_v23  ;;  %v75_v26 = vmul.f32 %v526_v20, %v526_v20  ;;  %v77_v27 = vmul.f32 %v528_v21, %v528_v21  ;;  %238 = vmatprep.subr.bf16.mxu0 %v199_v1  ;;  %v184_v22 = vld [vmem:[%s768_s3 + $0x88] sm:$0xff]  ;;  %v185_v23 = vld [vmem:[%s768_s3 + $0x90] sm:$0xff] }
  0x96   :  { %239 = vmatpush1.bf16.msra.mxu0 %v198_v6 }
  0x97   :  { %v534_v28 = vsub.f32 %v24_v2, %v60_v24  ;;  %v536_v29 = vsub.f32 %v26_v5, %v62_v25  ;;  %v83_v30 = vsel %vm33_vm0, %v75_v26, 0.0  ;;  %v89_v33 = vsel %vm33_vm0, %v77_v27, 0.0  ;;  %v172_v2 = vld [vmem:[%s768_s3 + $0x28] sm:$0xff]  ;;  %v187_v27 = vld [vmem:[%s768_s3 + $0xa0] sm:$0xff] }
  0x98   :  { %84 = vadd.xlane.f32.xlu0 %v83_v30  ;;  %v48_v31 = vpop.xlane.xlu0 %47  ;;  %v51_v32 = vpop.xlane.xlu1 %50  ;;  %v197_v5 = vpack.c.bf16 %v172_v2, %v169_v0  ;;  %v188_v24 = vld [vmem:[%s768_s3 + $0xa8] sm:$0xff]  ;;  %v203_v25 = vpack.c.bf16 %v184_v22, %v181_v18  ;;  %v190_v30 = vld [vmem:[%s768_s3 + $0xb8] sm:$0xff] }
  0x99   :  { %v63_v34 = vmul.f32 0.015625, %v48_v31  ;;  %v64_v35 = vmul.f32 0.015625, %v51_v32  ;;  %v76_v36 = vmul.f32 %v534_v28, %v534_v28  ;;  %v78_v37 = vmul.f32 %v536_v29, %v536_v29 }
  0x9a   :  { %425 = vmatprep.subr.bf16.mxu1 %v197_v5  ;;  %v204_v26 = vpack.c.bf16 %v188_v24, %v185_v23  ;;  %v206_v31 = vpack.c.bf16 %v190_v30, %v187_v27  ;;  %v458_v32 = vmov 0  }
  0x9b   :  { %v544_v38 = vsub.f32 %v27_v8, %v63_v34  ;;  %v546_v39 = vsub.f32 %v28_v9, %v64_v35  ;;  %v86_v40 = vsel %vm33_vm0, %v76_v36, 0.0  ;;  %v92_v43 = vsel %vm33_vm0, %v78_v37, 0.0  ;;  %v183_v8 = vld [vmem:[%s768_s3 + $0x80] sm:$0xff]  ;;  %426 = vmatpush3.bf16.msra.mxu1 %v197_v5  ;;  %268 = vmatprep.mubr.bf16.mxu0 %v458_v32 }
  0x9c   :  { %90 = vadd.xlane.f32.xlu0 %v89_v33  ;;  %87 = vadd.xlane.f32.xlu1 %v86_v40  ;;  %v54_v41 = vpop.xlane.xlu0 %53  ;;  %v57_v42 = vpop.xlane.xlu1 %56  ;;  %v175_v9 = vld [vmem:[%s768_s3 + $0x40] sm:$0xff]  ;;  %v202_v10 = vpack.c.bf16 %v183_v8, %v180_v7 }
  0x9d   :  { %v65_v44 = vmul.f32 0.015625, %v54_v41  ;;  %v66_v45 = vmul.f32 0.015625, %v57_v42  ;;  %v79_v46 = vmul.f32 %v544_v38, %v544_v38  ;;  %v80_v47 = vmul.f32 %v546_v39, %v546_v39 }
  0x9e   :  { %v200_v14 = vpack.c.bf16 %v178_v11, %v175_v9  ;;  %240 = vmatprep.subr.bf16.mxu0 %v202_v10 }
  0x9f   :  { %v554_v48 = vsub.f32 %v29_v12, %v65_v44  ;;  %v556_v49 = vsub.f32 %v30_v13, %v66_v45  ;;  %v95_v50 = vsel %vm33_vm0, %v79_v46, 0.0  ;;  %v98_v51 = vsel %vm33_vm0, %v80_v47, 0.0  ;;  %v179_v12 = vld [vmem:[%s768_s3 + $0x60] sm:$0xff]  ;;  %v182_v13 = vld [vmem:[%s768_s3 + $0x78] sm:$0xff] }
  0xa0   :  { %93 = vadd.xlane.f32.xlu1 %v92_v43  ;;  %96 = vadd.xlane.f32.xlu0 %v95_v50  ;;  %v201_v15 = vpack.c.bf16 %v182_v13, %v179_v12 }
  0xa1   :  { %v81_v52 = vmul.f32 %v554_v48, %v554_v48  ;;  %v82_v53 = vmul.f32 %v556_v49, %v556_v49  ;;  %427 = vmatprep.subr.bf16.mxu1 %v200_v14 }
  0xa2   :  { %241 = vmatpush1.bf16.msra.mxu0 %v201_v15  ;;  %428 = vmatpush3.bf16.msra.mxu1 %v200_v14 }
  0xa3   :  { %v101_v54 = vsel %vm33_vm0, %v81_v52, 0.0  ;;  %v104_v55 = vsel %vm33_vm0, %v82_v53, 0.0  ;;  %242 = vmatprep.subr.bf16.mxu0 %v205_v19  ;;  %429 = vmatprep.subr.bf16.mxu1 %v203_v25 }
  0xa4   :  { %99 = vadd.xlane.f32.xlu1 %v98_v51  ;;  %102 = vadd.xlane.f32.xlu0 %v101_v54 }
  0xa6   :  { %243 = vmatpush1.bf16.msra.mxu0 %v204_v26  ;;  %430 = vmatpush3.bf16.msra.mxu1 %v203_v25 }
  0xa7   :  { %431 = vmatprep.subr.bf16.mxu1 %v206_v31 }
  0xa8   :  { %105 = vadd.xlane.f32.xlu1 %v104_v55 }
  0xaa   :  { %432 = vmatpush3.bf16.msra.mxu1 %v206_v31 }
 0x125   :  { %v85_v33 = vpop.xlane.xlu0 %84 }
 0x126   :  { %v107_v34 = vmul.f32 0.015625, %v85_v33 }
 0x128   :  { %v115_v35 = vadd.f32 1e-05, %v107_v34 }
 0x129   :  { %v88_v36 = vpop.xlane.xlu1 %87  ;;  %v91_v37 = vpop.xlane.xlu0 %90 }
 0x12a   :  { %442 = vrsqrt.f32 %v115_v35  ;;  %v108_v40 = vmul.f32 0.015625, %v88_v36  ;;  %v109_v41 = vmul.f32 0.015625, %v91_v37  ;;  %v207_v35 = vld [vmem:[%s771_s4] sm:$0x7] }
 0x12c   :  { %v116_v42 = vadd.f32 1e-05, %v108_v40  ;;  %v117_v43 = vadd.f32 1e-05, %v109_v41 }
 0x12d   :  { %v94_v44 = vpop.xlane.xlu1 %93  ;;  %v97_v45 = vpop.xlane.xlu0 %96 }
 0x12e   :  { %444 = vrsqrt.f32 %v116_v42  ;;  %v110_v46 = vmul.f32 0.015625, %v94_v44  ;;  %v111_v47 = vmul.f32 0.015625, %v97_v45 }
 0x12f   :  { %446 = vrsqrt.f32 %v117_v43 }
 0x130   :  { %v118_v50 = vadd.f32 1e-05, %v110_v46  ;;  %v119_v51 = vadd.f32 1e-05, %v111_v47 }
 0x131   :  { %v100_v52 = vpop.xlane.xlu1 %99  ;;  %v103_v53 = vpop.xlane.xlu0 %102 }
 0x132   :  { %448 = vrsqrt.f32 %v118_v50  ;;  %v112_v54 = vmul.f32 0.015625, %v100_v52  ;;  %v113_v55 = vmul.f32 0.015625, %v103_v53 }
 0x133   :  { %450 = vrsqrt.f32 %v119_v51 }
 0x134   :  { %v443_v56 = vpop.eup %442  ;;  %v120_v57 = vadd.f32 1e-05, %v112_v54  ;;  %v121_v58 = vadd.f32 1e-05, %v113_v55 }
 0x135   :  { %v131_v59 = vmul.f32 %v443_v56, %v526_v20  ;;  %v106_v60 = vpop.xlane.xlu1 %105  ;;  %v408_v20 = vld [vmem:[%s770_s2] ss:$0 sm:$0xff] }
 0x136   :  { %452 = vrsqrt.f32 %v120_v57  ;;  %v114_v61 = vmul.f32 0.015625, %v106_v60 }
 0x137   :  { %454 = vrsqrt.f32 %v121_v58  ;;  %v145_v3 = vmul.f32 %v407_v62, %v131_v59 }
 0x138   :  { %v445_v63 = vpop.eup %444  ;;  %v122_v0 = vadd.f32 1e-05, %v114_v61 }
 0x139   :  { %v447_v1 = vpop.eup %446  ;;  %v132_v2 = vmul.f32 %v445_v63, %v534_v28  ;;  %v159_v10 = vadd.f32 %v408_v20, %v145_v3 }
 0x13a   :  { %v133_v4 = vmul.f32 %v447_v1, %v528_v21  ;;  %456 = vrsqrt.f32 %v122_v0 }
 0x13b   :  { %v146_v5 = vmul.f32 %v407_v62, %v132_v2 }
 0x13c   :  { %v449_v6 = vpop.eup %448  ;;  %v147_v7 = vmul.f32 %v407_v62, %v133_v4 }
 0x13d   :  { %v451_v8 = vpop.eup %450  ;;  %v134_v9 = vmul.f32 %v449_v6, %v536_v29  ;;  %v160_v11 = vadd.f32 %v408_v20, %v146_v5 }
 0x13e   :  { %v135_v12 = vmul.f32 %v451_v8, %v544_v38  ;;  %v161_v15 = vadd.f32 %v408_v20, %v147_v7 }
 0x13f   :  { %v191_v13 = vpack.c.bf16 %v160_v11, %v159_v10  ;;  %v148_v28 = vmul.f32 %v407_v62, %v134_v9 }
 0x140   :  { %v453_v14 = vpop.eup %452  ;;  %v149_v18 = vmul.f32 %v407_v62, %v135_v12 }
 0x141   :  { %v455_v21 = vpop.eup %454  ;;  %v136_v16 = vmul.f32 %v453_v14, %v546_v39  ;;  %409 = vmatmul.mubr.msk.bf16.vlgmr.msra.gmra.mrb[0].mxu0 %vm33_vm0, %v191_v13  ;;  %433 = vmatprep.mubr.msk.bf16.mxu1 %vm33_vm0, %v191_v13  ;;  %v162_v17 = vadd.f32 %v408_v20, %v148_v28 }
 0x142   :  { %v137_v19 = vmul.f32 %v455_v21, %v554_v48  ;;  %278 = vmatprep.mubr.bf16.mxu0 %v458_v32  ;;  %v163_v24 = vadd.f32 %v408_v20, %v149_v18 }
 0x143   :  { %v192_v29 = vpack.c.bf16 %v162_v17, %v161_v15  ;;  %v150_v22 = vmul.f32 %v407_v62, %v136_v16 }
 0x144   :  { %v457_v38 = vpop.eup %456  ;;  %v151_v39 = vmul.f32 %v407_v62, %v137_v19 }
 0x145   :  { %v138_v23 = vmul.f32 %v457_v38, %v556_v49  ;;  %434 = vmatmul.mubr.msk.bf16.vlgmr.msra.gmra.mrb[0].mxu1 %vm33_vm0, %v192_v29  ;;  %v164_v25 = vadd.f32 %v408_v20, %v150_v22  ;;  %v209_v49 = vlaneseq }
 0x146   :  { %v165_v30 = vadd.f32 %v408_v20, %v151_v39 }
 0x147   :  { %v193_v26 = vpack.c.bf16 %v164_v25, %v163_v24  ;;  %v152_v27 = vmul.f32 %v407_v62, %v138_v23  ;;  %v210_v33 = vshrl.u32 %v209_v49, 7 }
 0x149   :  { %410 = vmatmul.mubr.msk.bf16.gmra.mrb[4].mxu0 %vm33_vm0, %v192_v29  ;;  %437 = vmatprep.mubr.msk.bf16.mxu1 %vm33_vm0, %v193_v26  ;;  %v166_v48 = vadd.f32 %v408_v20, %v152_v27  ;;  %v211_v34 = vsub.s32 0, %v210_v33  ;;  %v215_v36 = vsub.s32 1, %v210_v33  ;;  %v219_v40 = vsub.s32 2, %v210_v33 }
 0x14a   :  { %288 = vmatprep.mubr.bf16.mxu0 %v458_v32 }
 0x14b   :  { %v194_v31 = vpack.c.bf16 %v166_v48, %v165_v30  ;;  %v667_v37 = vrot.slane %v207_v35, %v211_v34  ;;  %v669_v41 = vrot.slane %v207_v35, %v215_v36 }
 0x14d   :  { %438 = vmatmul.mubr.msk.bf16.gmra.mrb[4].mxu1 %vm33_vm0, %v194_v31 }
 0x151   :  { %411 = vmatmul.mubr.msk.bf16.gmra.mrb[8].mxu0 %vm33_vm0, %v193_v26 }
 0x152   :  { %298 = vmatprep.mubr.bf16.mxu0 %v458_v32  ;;  %v220_v32 = vrot.slane %v207_v35, %v219_v40 }
 0x159   :  { %412 = vmatmul.mubr.msk.bf16.gmra.mrb[12].mxu0 %vm33_vm0, %v194_v31 }
 0x214   :  { %v270_v42 = vpop.f32.mrb[0].mxu0 }
 0x215   :  { %v271_v43 = vadd.f32 %v270_v42, %v667_v37  ;;  %v272_v44 = vpop.f32.mrb[1].mxu0 }
 0x216   :  { %v273_v45 = vadd.f32 %v272_v44, %v669_v41  ;;  %v274_v46 = vpop.f32.mrb[2].mxu0 }
 0x217   :  { %374 = vst [vmem:[%s772_s5] sm:$0xff] %v271_v43  ;;  %v275_v47 = vadd.f32 %v274_v46, %v667_v37  ;;  %v276_v50 = vpop.f32.mrb[3].mxu0 }
 0x218   :  { %375 = vst [vmem:[%s772_s5 + $0x8] sm:$0xff] %v273_v45  ;;  %v277_v51 = vadd.f32 %v276_v50, %v669_v41  ;;  %v435_v52 = vpop.f32.mrb[0].mxu1 }
 0x219   :  { %376 = vst [vmem:[%s772_s5 + $0x10] sm:$0xff] %v275_v47  ;;  %v352_v53 = vadd.f32 %v435_v52, %v220_v32  ;;  %v343_v54 = vpop.f32.mrb[1].mxu1 }
 0x21a   :  { %377 = vst [vmem:[%s772_s5 + $0x18] sm:$0xff] %v277_v51  ;;  %v344_v55 = vadd.f32 %v343_v54, %v220_v32  ;;  %v436_v56 = vpop.f32.mrb[2].mxu1 }
 0x21b   :  { %393 = vst.msk [vmem:[%s773_s6 + $0x10] sm:$0xff] %vm390_vm1, %v352_v53  ;;  %v355_v57 = vadd.f32 %v436_v56, %v220_v32  ;;  %v346_v58 = vpop.f32.mrb[3].mxu1 }
 0x21c   :  { %391 = vst.msk [vmem:[%s773_s6] sm:$0xff] %vm390_vm1, %v344_v55  ;;  %v347_v59 = vadd.f32 %v346_v58, %v220_v32  ;;  %v280_v60 = vpop.f32.mrb[4].mxu0 }
 0x21d   :  { %394 = vst.msk [vmem:[%s773_s6 + $0x18] sm:$0xff] %vm390_vm1, %v355_v57  ;;  %v281_v61 = vadd.f32 %v280_v60, %v667_v37  ;;  %v282_v62 = vpop.f32.mrb[5].mxu0 }
 0x21e   :  { %392 = vst.msk [vmem:[%s773_s6 + $0x8] sm:$0xff] %vm390_vm1, %v347_v59  ;;  %v283_v63 = vadd.f32 %v282_v62, %v669_v41  ;;  %v284_v0 = vpop.f32.mrb[6].mxu0 }
 0x21f   :  { %378 = vst [vmem:[%s772_s5 + $0x20] sm:$0xff] %v281_v61  ;;  %v285_v1 = vadd.f32 %v284_v0, %v667_v37  ;;  %v286_v2 = vpop.f32.mrb[7].mxu0 }
 0x220   :  { %379 = vst [vmem:[%s772_s5 + $0x28] sm:$0xff] %v283_v63  ;;  %v287_v3 = vadd.f32 %v286_v2, %v669_v41  ;;  %v439_v4 = vpop.f32.mrb[4].mxu1 }
 0x221   :  { %380 = vst [vmem:[%s772_s5 + $0x30] sm:$0xff] %v285_v1  ;;  %v368_v20 = vadd.f32 %v439_v4, %v220_v32  ;;  %v359_v5 = vpop.f32.mrb[5].mxu1 }
 0x222   :  { %381 = vst [vmem:[%s772_s5 + $0x38] sm:$0xff] %v287_v3  ;;  %v360_v6 = vadd.f32 %v359_v5, %v220_v32  ;;  %v440_v7 = vpop.f32.mrb[6].mxu1 }
 0x223   :  { %397 = vst.msk [vmem:[%s773_s6 + $0x30] sm:$0xff] %vm390_vm1, %v368_v20  ;;  %v371_v8 = vadd.f32 %v440_v7, %v220_v32  ;;  %v362_v9 = vpop.f32.mrb[7].mxu1 }
 0x224   :  { %395 = vst.msk [vmem:[%s773_s6 + $0x20] sm:$0xff] %vm390_vm1, %v360_v6  ;;  %v363_v10 = vadd.f32 %v362_v9, %v220_v32  ;;  %v290_v11 = vpop.f32.mrb[8].mxu0 }
 0x225   :  { %398 = vst.msk [vmem:[%s773_s6 + $0x38] sm:$0xff] %vm390_vm1, %v371_v8  ;;  %v291_v12 = vadd.f32 %v290_v11, %v667_v37  ;;  %v292_v13 = vpop.f32.mrb[9].mxu0 }
 0x226   :  { %396 = vst.msk [vmem:[%s773_s6 + $0x28] sm:$0xff] %vm390_vm1, %v363_v10  ;;  %v293_v28 = vadd.f32 %v292_v13, %v669_v41  ;;  %v294_v14 = vpop.f32.mrb[10].mxu0 }
 0x227   :  { %382 = vst [vmem:[%s772_s5 + $0x40] sm:$0xff] %v291_v12  ;;  %v295_v15 = vadd.f32 %v294_v14, %v667_v37  ;;  %v296_v21 = vpop.f32.mrb[11].mxu0 }
 0x228   :  { %383 = vst [vmem:[%s772_s5 + $0x48] sm:$0xff] %v293_v28  ;;  %v297_v16 = vadd.f32 %v296_v21, %v669_v41 }
 0x229   :  { %384 = vst [vmem:[%s772_s5 + $0x50] sm:$0xff] %v295_v15 }
 0x22a   :  { %385 = vst [vmem:[%s772_s5 + $0x58] sm:$0xff] %v297_v16 }
 0x22c   :  { %v300_v17 = vpop.f32.mrb[12].mxu0 }
 0x22d   :  { %v301_v18 = vadd.f32 %v300_v17, %v667_v37  ;;  %v302_v19 = vpop.f32.mrb[13].mxu0 }
 0x22e   :  { %v303_v29 = vadd.f32 %v302_v19, %v669_v41  ;;  %v304_v22 = vpop.f32.mrb[14].mxu0 }
 0x22f   :  { %386 = vst [vmem:[%s772_s5 + $0x60] sm:$0xff] %v301_v18  ;;  %v305_v38 = vadd.f32 %v304_v22, %v667_v37  ;;  %v306_v23 = vpop.f32.mrb[15].mxu0 }
 0x230   :  { %387 = vst [vmem:[%s772_s5 + $0x68] sm:$0xff] %v303_v29  ;;  %v307_v24 = vadd.f32 %v306_v23, %v669_v41 }
 0x231   :  { %388 = vst [vmem:[%s772_s5 + $0x70] sm:$0xff] %v305_v38 }
 0x232   :  { %389 = vst [vmem:[%s772_s5 + $0x78] sm:$0xff] %v307_v24 }

// kernel: template_embedding_forward.60
= control target key start
LH: loop header
LB: loop body
LE: loop exit
PB: predicated region body
PF: predicated region fallthrough
CT: control target
= control target key end

     0   :  { %vm37_vm0 = vcmask 523264   ;;  %s763_s0 = inlined_call_operand.vmem [shape: f32[64,64], index: 0, kind: input, shape index: {}]   ;;  %s764_s3 = inlined_call_operand.vmem [shape: f32[64,128], index: 3, kind: input, shape index: {}]   ;;  %s765_s5 = inlined_call_operand.vmem [shape: f32[128,64], index: 5, kind: input, shape index: {}]   ;;  %s766_s1 = inlined_call_operand.vmem [shape: f32[1,64], index: 1, kind: input, shape index: {}]   ;;  %s767_s2 = inlined_call_operand.vmem [shape: f32[1,64], index: 2, kind: input, shape index: {}]   ;;  %s768_s4 = inlined_call_operand.vmem [shape: f32[1,128], index: 4, kind: input, shape index: {}]   ;;  %s769_s6 = inlined_call_operand.vmem [shape: f32[1,64], index: 6, kind: input, shape index: {}]   ;;  %s770_s7 = inlined_call_operand.vmem [shape: f32[64,64], index: 7, kind: output, shape index: {}]  }
   0x1   :  { %v526_v0 = vld [vmem:[%s763_s0] sm:$0xff]  ;;  %v531_v1 = vld [vmem:[%s763_s0 + $0x10] sm:$0xff]  ;;  %v536_v2 = vld [vmem:[%s763_s0 + $0x8] sm:$0xff] }
   0x2   :  { %v38_v3 = vsel %vm37_vm0, %v526_v0, 0.0  ;;  %v44_v4 = vsel %vm37_vm0, %v531_v1, 0.0  ;;  %v545_v5 = vld [vmem:[%s763_s0 + $0x18] sm:$0xff]  ;;  %v41_v6 = vsel %vm37_vm0, %v536_v2, 0.0  ;;  %v554_v8 = vld [vmem:[%s763_s0 + $0x20] sm:$0xff]  ;;  %v559_v9 = vld [vmem:[%s763_s0 + $0x28] sm:$0xff] }
   0x3   :  { %39 = vadd.xlane.f32.xlu0 %v38_v3  ;;  %45 = vadd.xlane.f32.xlu1 %v44_v4  ;;  %v47_v7 = vsel %vm37_vm0, %v545_v5, 0.0  ;;  %v50_v10 = vsel %vm37_vm0, %v554_v8, 0.0  ;;  %v53_v11 = vsel %vm37_vm0, %v559_v9, 0.0  ;;  %v568_v12 = vld [vmem:[%s763_s0 + $0x30] sm:$0xff]  ;;  %v573_v13 = vld [vmem:[%s763_s0 + $0x38] sm:$0xff]  ;;  %v171_v56 = vld [vmem:[%s764_s3] sm:$0xff] }
   0x4   :  { %v56_v14 = vsel %vm37_vm0, %v568_v12, 0.0  ;;  %v59_v15 = vsel %vm37_vm0, %v573_v13, 0.0  ;;  %v172_v57 = vld [vmem:[%s764_s3 + $0x8] sm:$0xff]  ;;  %v173_v59 = vld [vmem:[%s764_s3 + $0x10] sm:$0xff]  ;;  %v174_v60 = vld [vmem:[%s764_s3 + $0x18] sm:$0xff] }
   0x5   :  { %v183_v58 = vpack.c.bf16 %v172_v57, %v171_v56  ;;  %v184_v61 = vpack.c.bf16 %v174_v60, %v173_v59  ;;  %v175_v62 = vld [vmem:[%s764_s3 + $0x20] sm:$0xff]  ;;  %v176_v63 = vld [vmem:[%s764_s3 + $0x28] sm:$0xff]  ;;  %v177_v4 = vld [vmem:[%s764_s3 + $0x30] sm:$0xff] }
   0x6   :  { %v185_v3 = vpack.c.bf16 %v176_v63, %v175_v62  ;;  %v399_v63 = vld [vmem:[%s766_s1] ss:$0 sm:$0xff] }
   0x7   :  { %42 = vadd.xlane.f32.xlu0 %v41_v6  ;;  %48 = vadd.xlane.f32.xlu1 %v47_v7  ;;  %v178_v6 = vld [vmem:[%s764_s3 + $0x38] sm:$0xff] }
   0x8   :  { %427 = vmatprep.subr.bf16.mxu0 %v183_v58  ;;  %v186_v7 = vpack.c.bf16 %v178_v6, %v177_v4 }
   0x9   :  { %428 = vmatpush3.bf16.msra.mxu0 %v183_v58 }
   0xa   :  { %429 = vmatprep.subr.bf16.mxu0 %v184_v61 }
   0xb   :  { %51 = vadd.xlane.f32.xlu0 %v50_v10  ;;  %54 = vadd.xlane.f32.xlu1 %v53_v11  ;;  %v279_v10 = vld [vmem:[%s765_s5] sm:$0xff]  ;;  %v280_v11 = vld [vmem:[%s765_s5 + $0x8] sm:$0xff] }
   0xd   :  { %430 = vmatpush3.bf16.msra.mxu0 %v184_v61 }
   0xe   :  { %431 = vmatprep.subr.bf16.mxu0 %v185_v3 }
   0xf   :  { %57 = vadd.xlane.f32.xlu0 %v56_v14  ;;  %60 = vadd.xlane.f32.xlu1 %v59_v15  ;;  %v281_v14 = vld [vmem:[%s765_s5 + $0x10] sm:$0xff]  ;;  %v299_v15 = vpack.c.bf16 %v280_v11, %v279_v10 }
  0x11   :  { %432 = vmatpush3.bf16.msra.mxu0 %v185_v3  ;;  %443 = vmatprep.subr.bf16.mxu1 %v299_v15 }
  0x12   :  { %433 = vmatprep.subr.bf16.mxu0 %v186_v7  ;;  %444 = vmatpush3.bf16.msra.mxu1 %v299_v15 }
  0x15   :  { %434 = vmatpush3.bf16.msra.mxu0 %v186_v7 }
  0x90   :  { %v40_v16 = vpop.xlane.xlu0 %39  ;;  %v46_v17 = vpop.xlane.xlu1 %45 }
  0x91   :  { %v63_v18 = vmul.f32 0.015625, %v40_v16  ;;  %v65_v19 = vmul.f32 0.015625, %v46_v17  ;;  %v282_v16 = vld [vmem:[%s765_s5 + $0x18] sm:$0xff] }
  0x92   :  { %v300_v17 = vpack.c.bf16 %v282_v16, %v281_v14 }
  0x93   :  { %v580_v20 = vsub.f32 %v526_v0, %v63_v18  ;;  %v583_v21 = vsub.f32 %v531_v1, %v65_v19  ;;  %v283_v18 = vld [vmem:[%s765_s5 + $0x20] sm:$0xff]  ;;  %v284_v19 = vld [vmem:[%s765_s5 + $0x28] sm:$0xff] }
  0x94   :  { %v43_v22 = vpop.xlane.xlu0 %42  ;;  %v49_v23 = vpop.xlane.xlu1 %48  ;;  %445 = vmatprep.subr.bf16.mxu1 %v300_v17 }
  0x95   :  { %v64_v24 = vmul.f32 0.015625, %v43_v22  ;;  %v66_v25 = vmul.f32 0.015625, %v49_v23  ;;  %v79_v26 = vmul.f32 %v580_v20, %v580_v20  ;;  %v81_v27 = vmul.f32 %v583_v21, %v583_v21  ;;  %v285_v23 = vld [vmem:[%s765_s5 + $0x30] sm:$0xff]  ;;  %446 = vmatpush3.bf16.msra.mxu1 %v300_v17 }
  0x96   :  { %v301_v22 = vpack.c.bf16 %v284_v19, %v283_v18 }
  0x97   :  { %v590_v28 = vsub.f32 %v536_v2, %v64_v24  ;;  %v593_v29 = vsub.f32 %v545_v5, %v66_v25  ;;  %v87_v30 = vsel %vm37_vm0, %v79_v26, 0.0  ;;  %v93_v33 = vsel %vm37_vm0, %v81_v27, 0.0  ;;  %v286_v24 = vld [vmem:[%s765_s5 + $0x38] sm:$0xff]  ;;  %v287_v26 = vld [vmem:[%s765_s5 + $0x40] sm:$0xff]  ;;  %v288_v27 = vld [vmem:[%s765_s5 + $0x48] sm:$0xff] }
  0x98   :  { %88 = vadd.xlane.f32.xlu0 %v87_v30  ;;  %v52_v31 = vpop.xlane.xlu0 %51  ;;  %v55_v32 = vpop.xlane.xlu1 %54  ;;  %447 = vmatprep.subr.bf16.mxu1 %v301_v22  ;;  %v302_v25 = vpack.c.bf16 %v286_v24, %v285_v23  ;;  %v303_v30 = vpack.c.bf16 %v288_v27, %v287_v26 }
  0x99   :  { %v67_v34 = vmul.f32 0.015625, %v52_v31  ;;  %v68_v35 = vmul.f32 0.015625, %v55_v32  ;;  %v80_v36 = vmul.f32 %v590_v28, %v590_v28  ;;  %v82_v37 = vmul.f32 %v593_v29, %v593_v29  ;;  %448 = vmatpush3.bf16.msra.mxu1 %v301_v22  ;;  %v289_v31 = vld [vmem:[%s765_s5 + $0x50] sm:$0xff]  ;;  %v290_v32 = vld [vmem:[%s765_s5 + $0x58] sm:$0xff] }
  0x9a   :  { %449 = vmatprep.subr.bf16.mxu1 %v302_v25 }
  0x9b   :  { %v602_v38 = vsub.f32 %v554_v8, %v67_v34  ;;  %v605_v39 = vsub.f32 %v559_v9, %v68_v35  ;;  %v90_v40 = vsel %vm37_vm0, %v80_v36, 0.0  ;;  %v96_v43 = vsel %vm37_vm0, %v82_v37, 0.0 }
  0x9c   :  { %94 = vadd.xlane.f32.xlu0 %v93_v33  ;;  %91 = vadd.xlane.f32.xlu1 %v90_v40  ;;  %v58_v41 = vpop.xlane.xlu0 %57  ;;  %v61_v42 = vpop.xlane.xlu1 %60  ;;  %v304_v33 = vpack.c.bf16 %v290_v32, %v289_v31 }
  0x9d   :  { %v69_v44 = vmul.f32 0.015625, %v58_v41  ;;  %v70_v45 = vmul.f32 0.015625, %v61_v42  ;;  %v83_v46 = vmul.f32 %v602_v38, %v602_v38  ;;  %v84_v47 = vmul.f32 %v605_v39, %v605_v39  ;;  %450 = vmatpush3.bf16.msra.mxu1 %v302_v25 }
  0x9e   :  { %451 = vmatprep.subr.bf16.mxu1 %v303_v30 }
  0x9f   :  { %v614_v48 = vsub.f32 %v568_v12, %v69_v44  ;;  %v617_v49 = vsub.f32 %v573_v13, %v70_v45  ;;  %v99_v50 = vsel %vm37_vm0, %v83_v46, 0.0  ;;  %v102_v51 = vsel %vm37_vm0, %v84_v47, 0.0 }
  0xa0   :  { %97 = vadd.xlane.f32.xlu1 %v96_v43  ;;  %100 = vadd.xlane.f32.xlu0 %v99_v50 }
  0xa1   :  { %v85_v52 = vmul.f32 %v614_v48, %v614_v48  ;;  %v86_v53 = vmul.f32 %v617_v49, %v617_v49  ;;  %452 = vmatpush3.bf16.msra.mxu1 %v303_v30 }
  0xa2   :  { %453 = vmatprep.subr.bf16.mxu1 %v304_v33 }
  0xa3   :  { %v105_v54 = vsel %vm37_vm0, %v85_v52, 0.0  ;;  %v108_v55 = vsel %vm37_vm0, %v86_v53, 0.0 }
  0xa4   :  { %103 = vadd.xlane.f32.xlu1 %v102_v51  ;;  %106 = vadd.xlane.f32.xlu0 %v105_v54 }
  0xa5   :  { %454 = vmatpush3.bf16.msra.mxu1 %v304_v33 }
  0xa8   :  { %109 = vadd.xlane.f32.xlu1 %v108_v55 }
 0x125   :  { %v89_v34 = vpop.xlane.xlu0 %88 }
 0x126   :  { %v111_v35 = vmul.f32 0.015625, %v89_v34 }
 0x128   :  { %v119_v36 = vadd.f32 1e-05, %v111_v35 }
 0x129   :  { %v92_v37 = vpop.xlane.xlu1 %91  ;;  %v95_v40 = vpop.xlane.xlu0 %94 }
 0x12a   :  { %467 = vrsqrt.f32 %v119_v36  ;;  %v112_v41 = vmul.f32 0.015625, %v92_v37  ;;  %v113_v42 = vmul.f32 0.015625, %v95_v40 }
 0x12c   :  { %v120_v43 = vadd.f32 1e-05, %v112_v41  ;;  %v121_v44 = vadd.f32 1e-05, %v113_v42 }
 0x12d   :  { %v98_v45 = vpop.xlane.xlu1 %97  ;;  %v101_v46 = vpop.xlane.xlu0 %100 }
 0x12e   :  { %469 = vrsqrt.f32 %v120_v43  ;;  %v114_v47 = vmul.f32 0.015625, %v98_v45  ;;  %v115_v50 = vmul.f32 0.015625, %v101_v46  ;;  %v293_v45 = vld [vmem:[%s765_s5 + $0x70] sm:$0xff]  ;;  %v294_v46 = vld [vmem:[%s765_s5 + $0x78] sm:$0xff] }
 0x12f   :  { %471 = vrsqrt.f32 %v121_v44 }
 0x130   :  { %v122_v51 = vadd.f32 1e-05, %v114_v47  ;;  %v123_v52 = vadd.f32 1e-05, %v115_v50  ;;  %v306_v47 = vpack.c.bf16 %v294_v46, %v293_v45  ;;  %v401_v50 = vld [vmem:[%s768_s4] ss:$0 sm:$0xff] }
 0x131   :  { %v104_v53 = vpop.xlane.xlu1 %103  ;;  %v107_v54 = vpop.xlane.xlu0 %106 }
 0x132   :  { %473 = vrsqrt.f32 %v122_v51  ;;  %v116_v55 = vmul.f32 0.015625, %v104_v53  ;;  %v117_v56 = vmul.f32 0.015625, %v107_v54 }
 0x133   :  { %475 = vrsqrt.f32 %v123_v52 }
 0x134   :  { %v468_v57 = vpop.eup %467  ;;  %v124_v58 = vadd.f32 1e-05, %v116_v55  ;;  %v125_v59 = vadd.f32 1e-05, %v117_v56 }
 0x135   :  { %v110_v60 = vpop.xlane.xlu1 %109  ;;  %v135_v61 = vmul.f32 %v468_v57, %v580_v20  ;;  %v400_v20 = vld [vmem:[%s767_s2] ss:$0 sm:$0xff] }
 0x136   :  { %477 = vrsqrt.f32 %v124_v58  ;;  %v118_v62 = vmul.f32 0.015625, %v110_v60 }
 0x137   :  { %479 = vrsqrt.f32 %v125_v59  ;;  %v149_v10 = vmul.f32 %v399_v63, %v135_v61 }
 0x138   :  { %v470_v3 = vpop.eup %469  ;;  %v126_v4 = vadd.f32 1e-05, %v118_v62 }
 0x139   :  { %v472_v6 = vpop.eup %471  ;;  %v136_v7 = vmul.f32 %v470_v3, %v590_v28  ;;  %v163_v18 = vadd.f32 %v400_v20, %v149_v10 }
 0x13a   :  { %v137_v11 = vmul.f32 %v472_v6, %v583_v21  ;;  %481 = vrsqrt.f32 %v126_v4 }
 0x13b   :  { %v150_v14 = vmul.f32 %v399_v63, %v136_v7 }
 0x13c   :  { %v474_v15 = vpop.eup %473  ;;  %v151_v22 = vmul.f32 %v399_v63, %v137_v11 }
 0x13d   :  { %v476_v16 = vpop.eup %475  ;;  %v138_v17 = vmul.f32 %v474_v15, %v593_v29  ;;  %v164_v19 = vadd.f32 %v400_v20, %v150_v14 }
 0x13e   :  { %v139_v23 = vmul.f32 %v476_v16, %v602_v38  ;;  %v165_v27 = vadd.f32 %v400_v20, %v151_v22 }
 0x13f   :  { %v179_v24 = vpack.c.bf16 %v164_v19, %v163_v18  ;;  %v152_v28 = vmul.f32 %v399_v63, %v138_v17 }
 0x140   :  { %v478_v25 = vpop.eup %477  ;;  %v153_v31 = vmul.f32 %v399_v63, %v139_v23 }
 0x141   :  { %v480_v26 = vpop.eup %479  ;;  %v140_v21 = vmul.f32 %v478_v25, %v605_v39  ;;  %435 = vmatprep.mubr.msk.bf16.mxu0 %vm37_vm0, %v179_v24  ;;  %v166_v30 = vadd.f32 %v400_v20, %v152_v28  ;;  %v406_v24 = vld [vmem:[%s769_s6] ss:$0 sm:$0xff] }
 0x142   :  { %v141_v32 = vmul.f32 %v480_v26, %v614_v48  ;;  %v167_v38 = vadd.f32 %v400_v20, %v153_v31  ;;  %v291_v48 = vld [vmem:[%s765_s5 + $0x60] sm:$0xff] }
 0x143   :  { %v180_v33 = vpack.c.bf16 %v166_v30, %v165_v27  ;;  %v154_v29 = vmul.f32 %v399_v63, %v140_v21 }
 0x144   :  { %v482_v34 = vpop.eup %481  ;;  %v155_v37 = vmul.f32 %v399_v63, %v141_v32 }
 0x145   :  { %v142_v35 = vmul.f32 %v482_v34, %v617_v49  ;;  %436 = vmatmul.mubr.msk.bf16.vlgmr.msra.gmra.mrb[0].mxu0 %vm37_vm0, %v180_v33  ;;  %v168_v36 = vadd.f32 %v400_v20, %v154_v29  ;;  %v292_v49 = vld [vmem:[%s765_s5 + $0x68] sm:$0xff] }
 0x146   :  { %v169_v39 = vadd.f32 %v400_v20, %v155_v37  ;;  %v305_v44 = vpack.c.bf16 %v292_v49, %v291_v48 }
 0x147   :  { %v181_v40 = vpack.c.bf16 %v168_v36, %v167_v38  ;;  %v156_v41 = vmul.f32 %v399_v63, %v142_v35 }
 0x148   :  { %455 = vmatprep.subr.bf16.mxu1 %v305_v44 }
 0x149   :  { %439 = vmatprep.mubr.msk.bf16.mxu0 %vm37_vm0, %v181_v40  ;;  %v170_v42 = vadd.f32 %v400_v20, %v156_v41  ;;  %456 = vmatpush3.bf16.msra.mxu1 %v305_v44 }
 0x14a   :  { %457 = vmatprep.subr.bf16.mxu1 %v306_v47 }
 0x14b   :  { %v182_v43 = vpack.c.bf16 %v170_v42, %v169_v39 }
 0x14d   :  { %440 = vmatmul.mubr.msk.bf16.gmra.mrb[4].mxu0 %vm37_vm0, %v182_v43  ;;  %458 = vmatpush3.bf16.msra.mxu1 %v306_v47 }
 0x218   :  { %v437_v51 = vpop.f32.mrb[0].mxu0 }
 0x219   :  { %v249_v52 = vadd.f32 %v437_v51, %v401_v50  ;;  %v240_v53 = vpop.f32.mrb[1].mxu0 }
 0x21a   :  { %v241_v54 = vadd.f32 %v401_v50, %v240_v53  ;;  %v438_v55 = vpop.f32.mrb[2].mxu0 }
 0x21b   :  { %v252_v56 = vadd.f32 %v438_v55, %v401_v50  ;;  %v243_v57 = vpop.f32.mrb[3].mxu0  ;;  %v273_v59 = vmax.f32 %v249_v52, 0.0 }
 0x21c   :  { %v244_v58 = vadd.f32 %v401_v50, %v243_v57  ;;  %v271_v61 = vmax.f32 %v241_v54, 0.0 }
 0x21d   :  { %v274_v60 = vmax.f32 %v252_v56, 0.0 }
 0x21e   :  { %v272_v62 = vmax.f32 %v244_v58, 0.0 }
 0x21f   :  { %v296_v63 = vpack.c.bf16 %v274_v60, %v273_v59 }
 0x220   :  { %v441_v3 = vpop.f32.mrb[4].mxu0  ;;  %v295_v4 = vpack.c.bf16 %v272_v62, %v271_v61 }
 0x221   :  { %v265_v6 = vadd.f32 %v441_v3, %v401_v50  ;;  %v256_v7 = vpop.f32.mrb[5].mxu0 }
 0x222   :  { %v257_v10 = vadd.f32 %v401_v50, %v256_v7  ;;  %v442_v11 = vpop.f32.mrb[6].mxu0  ;;  %459 = vmatprep.mubr.bf16.mxu1 %v295_v4 }
 0x223   :  { %v268_v20 = vadd.f32 %v442_v11, %v401_v50  ;;  %v259_v14 = vpop.f32.mrb[7].mxu0  ;;  %460 = vmatmul.mubr.bf16.vlgmr.msra.gmra.mrb[0].mxu1 %v296_v63  ;;  %v277_v16 = vmax.f32 %v265_v6, 0.0 }
 0x224   :  { %v260_v15 = vadd.f32 %v401_v50, %v259_v14  ;;  %v275_v18 = vmax.f32 %v257_v10, 0.0 }
 0x225   :  { %v278_v17 = vmax.f32 %v268_v20, 0.0 }
 0x226   :  { %v276_v19 = vmax.f32 %v260_v15, 0.0 }
 0x227   :  { %v298_v22 = vpack.c.bf16 %v278_v17, %v277_v16 }
 0x228   :  { %v297_v23 = vpack.c.bf16 %v276_v19, %v275_v18 }
 0x22a   :  { %463 = vmatprep.mubr.bf16.mxu1 %v297_v23 }
 0x22b   :  { %464 = vmatmul.mubr.bf16.gmra.mrb[4].mxu1 %v298_v22 }
 0x2f6   :  { %v461_v28 = vpop.f32.mrb[0].mxu1 }
 0x2f7   :  { %v357_v25 = vadd.f32 %v461_v28, %v406_v24  ;;  %v348_v26 = vpop.f32.mrb[1].mxu1 }
 0x2f8   :  { %v349_v21 = vadd.f32 %v406_v24, %v348_v26  ;;  %v462_v27 = vpop.f32.mrb[2].mxu1 }
 0x2f9   :  { %v381_v30 = vadd.f32 %v357_v25, %v531_v1  ;;  %v360_v31 = vadd.f32 %v462_v27, %v406_v24  ;;  %v351_v32 = vpop.f32.mrb[3].mxu1 }
 0x2fa   :  { %v379_v33 = vadd.f32 %v349_v21, %v526_v0  ;;  %v352_v29 = vadd.f32 %v406_v24, %v351_v32 }
 0x2fb   :  { %389 = vst.msk [vmem:[%s770_s7 + $0x10] sm:$0xff] %vm37_vm0, %v381_v30  ;;  %v382_v34 = vadd.f32 %v360_v31, %v545_v5 }
 0x2fc   :  { %387 = vst.msk [vmem:[%s770_s7] sm:$0xff] %vm37_vm0, %v379_v33  ;;  %v380_v35 = vadd.f32 %v352_v29, %v536_v2 }
 0x2fd   :  { %390 = vst.msk [vmem:[%s770_s7 + $0x18] sm:$0xff] %vm37_vm0, %v382_v34 }
 0x2fe   :  { %388 = vst.msk [vmem:[%s770_s7 + $0x8] sm:$0xff] %vm37_vm0, %v380_v35  ;;  %v465_v0 = vpop.f32.mrb[4].mxu1 }
 0x2ff   :  { %v373_v1 = vadd.f32 %v465_v0, %v406_v24  ;;  %v364_v5 = vpop.f32.mrb[5].mxu1 }
 0x300   :  { %v365_v38 = vadd.f32 %v406_v24, %v364_v5  ;;  %v466_v36 = vpop.f32.mrb[6].mxu1 }
 0x301   :  { %v385_v37 = vadd.f32 %v373_v1, %v568_v12  ;;  %v376_v40 = vadd.f32 %v466_v36, %v406_v24  ;;  %v367_v41 = vpop.f32.mrb[7].mxu1 }
 0x302   :  { %v383_v2 = vadd.f32 %v365_v38, %v554_v8  ;;  %v368_v39 = vadd.f32 %v406_v24, %v367_v41 }
 0x303   :  { %393 = vst.msk [vmem:[%s770_s7 + $0x30] sm:$0xff] %vm37_vm0, %v385_v37  ;;  %v386_v42 = vadd.f32 %v376_v40, %v573_v13 }
 0x304   :  { %391 = vst.msk [vmem:[%s770_s7 + $0x20] sm:$0xff] %vm37_vm0, %v383_v2  ;;  %v384_v43 = vadd.f32 %v368_v39, %v559_v9 }
 0x305   :  { %394 = vst.msk [vmem:[%s770_s7 + $0x38] sm:$0xff] %vm37_vm0, %v386_v42 }
 0x306   :  { %392 = vst.msk [vmem:[%s770_s7 + $0x28] sm:$0xff] %vm37_vm0, %v384_v43 }

// kernel: template_embedding_forward.72
= control target key start
LH: loop header
LB: loop body
LE: loop exit
PB: predicated region body
PF: predicated region fallthrough
CT: control target
= control target key end

     0   :  { %vm35_vm0 = vcmask 523264   ;;  %s374_s0 = inlined_call_operand.vmem [shape: f32[64,64], index: 0, kind: input, shape index: {}]   ;;  %s375_s1 = inlined_call_operand.vmem [shape: f32[1,64], index: 1, kind: input, shape index: {}]   ;;  %s376_s2 = inlined_call_operand.vmem [shape: f32[1,64], index: 2, kind: input, shape index: {}]   ;;  %s377_s3 = inlined_call_operand.vmem [shape: f32[64,64], index: 3, kind: input, shape index: {}, may-alias: {3,4}]   ;;  %s378_s4 = inlined_call_operand.vmem [shape: f32[64,64], index: 4, kind: output, shape index: {}, may-alias: {3,4}]  }
   0x1   :  { %v25_v0 = vld [vmem:[%s374_s0] sm:$0xff]  ;;  %v27_v1 = vld [vmem:[%s374_s0 + $0x10] sm:$0xff]  ;;  %v26_v2 = vld [vmem:[%s374_s0 + $0x8] sm:$0xff] }
   0x2   :  { %v36_v3 = vsel %vm35_vm0, %v25_v0, 0.0  ;;  %v42_v4 = vsel %vm35_vm0, %v27_v1, 0.0  ;;  %v28_v5 = vld [vmem:[%s374_s0 + $0x18] sm:$0xff]  ;;  %v39_v6 = vsel %vm35_vm0, %v26_v2, 0.0  ;;  %v29_v8 = vld [vmem:[%s374_s0 + $0x20] sm:$0xff]  ;;  %v30_v9 = vld [vmem:[%s374_s0 + $0x28] sm:$0xff] }
   0x3   :  { %37 = vadd.xlane.f32.xlu0 %v36_v3  ;;  %43 = vadd.xlane.f32.xlu1 %v42_v4  ;;  %v45_v7 = vsel %vm35_vm0, %v28_v5, 0.0  ;;  %v48_v10 = vsel %vm35_vm0, %v29_v8, 0.0  ;;  %v51_v11 = vsel %vm35_vm0, %v30_v9, 0.0  ;;  %v31_v12 = vld [vmem:[%s374_s0 + $0x30] sm:$0xff]  ;;  %v32_v13 = vld [vmem:[%s374_s0 + $0x38] sm:$0xff] }
   0x4   :  { %v54_v14 = vsel %vm35_vm0, %v31_v12, 0.0  ;;  %v57_v15 = vsel %vm35_vm0, %v32_v13, 0.0 }
   0x7   :  { %40 = vadd.xlane.f32.xlu0 %v39_v6  ;;  %46 = vadd.xlane.f32.xlu1 %v45_v7 }
   0xb   :  { %49 = vadd.xlane.f32.xlu0 %v48_v10  ;;  %52 = vadd.xlane.f32.xlu1 %v51_v11 }
   0xf   :  { %55 = vadd.xlane.f32.xlu0 %v54_v14  ;;  %58 = vadd.xlane.f32.xlu1 %v57_v15 }
  0x90   :  { %v38_v16 = vpop.xlane.xlu0 %37  ;;  %v44_v17 = vpop.xlane.xlu1 %43 }
  0x91   :  { %v61_v18 = vmul.f32 0.015625, %v38_v16  ;;  %v63_v19 = vmul.f32 0.015625, %v44_v17  ;;  %v190_v17 = vld [vmem:[%s376_s2] ss:$0 sm:$0xff] }
  0x93   :  { %v264_v20 = vsub.f32 %v25_v0, %v61_v18  ;;  %v266_v21 = vsub.f32 %v27_v1, %v63_v19 }
  0x94   :  { %v41_v22 = vpop.xlane.xlu0 %40  ;;  %v47_v23 = vpop.xlane.xlu1 %46 }
  0x95   :  { %v62_v24 = vmul.f32 0.015625, %v41_v22  ;;  %v64_v25 = vmul.f32 0.015625, %v47_v23  ;;  %v77_v26 = vmul.f32 %v264_v20, %v264_v20  ;;  %v79_v27 = vmul.f32 %v266_v21, %v266_v21  ;;  %v17_v23 = vld [vmem:[%s377_s3] sm:$0xff] }
  0x97   :  { %v272_v28 = vsub.f32 %v26_v2, %v62_v24  ;;  %v274_v29 = vsub.f32 %v28_v5, %v64_v25  ;;  %v85_v30 = vsel %vm35_vm0, %v77_v26, 0.0  ;;  %v91_v33 = vsel %vm35_vm0, %v79_v27, 0.0 }
  0x98   :  { %86 = vadd.xlane.f32.xlu0 %v85_v30  ;;  %v50_v31 = vpop.xlane.xlu0 %49  ;;  %v53_v32 = vpop.xlane.xlu1 %52 }
  0x99   :  { %v65_v34 = vmul.f32 0.015625, %v50_v31  ;;  %v66_v35 = vmul.f32 0.015625, %v53_v32  ;;  %v78_v36 = vmul.f32 %v272_v28, %v272_v28  ;;  %v80_v37 = vmul.f32 %v274_v29, %v274_v29 }
  0x9b   :  { %v282_v38 = vsub.f32 %v29_v8, %v65_v34  ;;  %v284_v39 = vsub.f32 %v30_v9, %v66_v35  ;;  %v88_v40 = vsel %vm35_vm0, %v78_v36, 0.0  ;;  %v94_v43 = vsel %vm35_vm0, %v80_v37, 0.0 }
  0x9c   :  { %92 = vadd.xlane.f32.xlu0 %v91_v33  ;;  %89 = vadd.xlane.f32.xlu1 %v88_v40  ;;  %v56_v41 = vpop.xlane.xlu0 %55  ;;  %v59_v42 = vpop.xlane.xlu1 %58  ;;  %v18_v33 = vld [vmem:[%s377_s3 + $0x8] sm:$0xff] }
  0x9d   :  { %v67_v44 = vmul.f32 0.015625, %v56_v41  ;;  %v68_v45 = vmul.f32 0.015625, %v59_v42  ;;  %v81_v46 = vmul.f32 %v282_v38, %v282_v38  ;;  %v82_v47 = vmul.f32 %v284_v39, %v284_v39 }
  0x9f   :  { %v292_v48 = vsub.f32 %v31_v12, %v67_v44  ;;  %v294_v49 = vsub.f32 %v32_v13, %v68_v45  ;;  %v97_v50 = vsel %vm35_vm0, %v81_v46, 0.0  ;;  %v100_v51 = vsel %vm35_vm0, %v82_v47, 0.0  ;;  %v189_v12 = vld [vmem:[%s375_s1] ss:$0 sm:$0xff] }
  0xa0   :  { %95 = vadd.xlane.f32.xlu1 %v94_v43  ;;  %98 = vadd.xlane.f32.xlu0 %v97_v50 }
  0xa1   :  { %v83_v52 = vmul.f32 %v292_v48, %v292_v48  ;;  %v84_v53 = vmul.f32 %v294_v49, %v294_v49 }
  0xa3   :  { %v103_v54 = vsel %vm35_vm0, %v83_v52, 0.0  ;;  %v106_v55 = vsel %vm35_vm0, %v84_v53, 0.0 }
  0xa4   :  { %101 = vadd.xlane.f32.xlu1 %v100_v51  ;;  %104 = vadd.xlane.f32.xlu0 %v103_v54 }
  0xa8   :  { %107 = vadd.xlane.f32.xlu1 %v106_v55 }
 0x125   :  { %v87_v56 = vpop.xlane.xlu0 %86 }
 0x126   :  { %v109_v57 = vmul.f32 0.015625, %v87_v56 }
 0x128   :  { %v117_v58 = vadd.f32 1e-05, %v109_v57 }
 0x129   :  { %v90_v59 = vpop.xlane.xlu1 %89  ;;  %v93_v60 = vpop.xlane.xlu0 %92 }
 0x12a   :  { %191 = vrsqrt.f32 %v117_v58  ;;  %v110_v61 = vmul.f32 0.015625, %v90_v59  ;;  %v111_v62 = vmul.f32 0.015625, %v93_v60 }
 0x12c   :  { %v118_v63 = vadd.f32 1e-05, %v110_v61  ;;  %v119_v0 = vadd.f32 1e-05, %v111_v62 }
 0x12d   :  { %v96_v1 = vpop.xlane.xlu1 %95  ;;  %v99_v2 = vpop.xlane.xlu0 %98 }
 0x12e   :  { %193 = vrsqrt.f32 %v118_v63  ;;  %v112_v3 = vmul.f32 0.015625, %v96_v1  ;;  %v113_v4 = vmul.f32 0.015625, %v99_v2 }
 0x12f   :  { %195 = vrsqrt.f32 %v119_v0 }
 0x130   :  { %v120_v5 = vadd.f32 1e-05, %v112_v3  ;;  %v121_v6 = vadd.f32 1e-05, %v113_v4 }
 0x131   :  { %v102_v7 = vpop.xlane.xlu1 %101  ;;  %v105_v8 = vpop.xlane.xlu0 %104 }
 0x132   :  { %197 = vrsqrt.f32 %v120_v5  ;;  %v114_v9 = vmul.f32 0.015625, %v102_v7  ;;  %v115_v10 = vmul.f32 0.015625, %v105_v8 }
 0x133   :  { %199 = vrsqrt.f32 %v121_v6 }
 0x134   :  { %v192_v11 = vpop.eup %191  ;;  %v122_v13 = vadd.f32 1e-05, %v114_v9  ;;  %v123_v14 = vadd.f32 1e-05, %v115_v10 }
 0x135   :  { %v133_v15 = vmul.f32 %v192_v11, %v264_v20  ;;  %v108_v16 = vpop.xlane.xlu1 %107 }
 0x136   :  { %201 = vrsqrt.f32 %v122_v13  ;;  %v116_v18 = vmul.f32 0.015625, %v108_v16 }
 0x137   :  { %v147_v19 = vmul.f32 %v189_v12, %v133_v15  ;;  %203 = vrsqrt.f32 %v123_v14 }
 0x138   :  { %v194_v22 = vpop.eup %193  ;;  %v124_v24 = vadd.f32 1e-05, %v116_v18 }
 0x139   :  { %v196_v25 = vpop.eup %195  ;;  %v161_v26 = vadd.f32 %v190_v17, %v147_v19  ;;  %v134_v27 = vmul.f32 %v194_v22, %v272_v28 }
 0x13a   :  { %v135_v20 = vmul.f32 %v196_v25, %v266_v21  ;;  %205 = vrsqrt.f32 %v124_v24 }
 0x13b   :  { %v169_v30 = vadd.f32 %v161_v26, %v17_v23  ;;  %v148_v31 = vmul.f32 %v189_v12, %v134_v27 }
 0x13c   :  { %v198_v32 = vpop.eup %197  ;;  %v149_v34 = vmul.f32 %v189_v12, %v135_v20 }
 0x13d   :  { %v200_v35 = vpop.eup %199  ;;  %177 = vst.msk [vmem:[%s378_s4] sm:$0xff] %vm35_vm0, %v169_v30  ;;  %v162_v36 = vadd.f32 %v190_v17, %v148_v31  ;;  %v136_v28 = vmul.f32 %v198_v32, %v274_v29 }
 0x13e   :  { %v163_v37 = vadd.f32 %v190_v17, %v149_v34  ;;  %v137_v40 = vmul.f32 %v200_v35, %v282_v38 }
 0x13f   :  { %v170_v41 = vadd.f32 %v162_v36, %v18_v33  ;;  %v150_v42 = vmul.f32 %v189_v12, %v136_v28 }
 0x140   :  { %v202_v43 = vpop.eup %201  ;;  %v151_v46 = vmul.f32 %v189_v12, %v137_v40 }
 0x141   :  { %v204_v47 = vpop.eup %203  ;;  %v164_v50 = vadd.f32 %v190_v17, %v150_v42  ;;  %v138_v38 = vmul.f32 %v202_v43, %v284_v39 }
 0x142   :  { %v165_v51 = vadd.f32 %v190_v17, %v151_v46  ;;  %v139_v52 = vmul.f32 %v204_v47, %v292_v48 }
 0x143   :  { %v152_v54 = vmul.f32 %v189_v12, %v138_v38 }
 0x144   :  { %v19_v21 = vld [vmem:[%s377_s3 + $0x10] sm:$0xff]  ;;  %v20_v45 = vld [vmem:[%s377_s3 + $0x18] sm:$0xff]  ;;  %v206_v55 = vpop.eup %205  ;;  %v153_v58 = vmul.f32 %v189_v12, %v139_v52 }
 0x145   :  { %v171_v44 = vadd.f32 %v163_v37, %v19_v21  ;;  %178 = vst.msk [vmem:[%s378_s4 + $0x8] sm:$0xff] %vm35_vm0, %v170_v41  ;;  %v172_v53 = vadd.f32 %v164_v50, %v20_v45  ;;  %v166_v39 = vadd.f32 %v190_v17, %v152_v54  ;;  %v140_v48 = vmul.f32 %v206_v55, %v294_v49 }
 0x146   :  { %v167_v60 = vadd.f32 %v190_v17, %v153_v58 }
 0x147   :  { %v154_v62 = vmul.f32 %v189_v12, %v140_v48 }
 0x149   :  { %v168_v1 = vadd.f32 %v190_v17, %v154_v62 }
 0x14c   :  { %v21_v29 = vld [vmem:[%s377_s3 + $0x20] sm:$0xff] }
 0x14d   :  { %179 = vst.msk [vmem:[%s378_s4 + $0x10] sm:$0xff] %vm35_vm0, %v171_v44  ;;  %v173_v56 = vadd.f32 %v165_v51, %v21_v29 }
 0x154   :  { %v22_v57 = vld [vmem:[%s377_s3 + $0x28] sm:$0xff] }
 0x155   :  { %180 = vst.msk [vmem:[%s378_s4 + $0x18] sm:$0xff] %vm35_vm0, %v172_v53  ;;  %v174_v61 = vadd.f32 %v166_v39, %v22_v57 }
 0x15c   :  { %v23_v59 = vld [vmem:[%s377_s3 + $0x30] sm:$0xff] }
 0x15d   :  { %181 = vst.msk [vmem:[%s378_s4 + $0x20] sm:$0xff] %vm35_vm0, %v173_v56  ;;  %v175_v63 = vadd.f32 %v167_v60, %v23_v59 }
 0x164   :  { %v24_v0 = vld [vmem:[%s377_s3 + $0x38] sm:$0xff] }
 0x165   :  { %182 = vst.msk [vmem:[%s378_s4 + $0x28] sm:$0xff] %vm35_vm0, %v174_v61  ;;  %183 = vst.msk [vmem:[%s378_s4 + $0x30] sm:$0xff] %vm35_vm0, %v175_v63  ;;  %v176_v49 = vadd.f32 %v168_v1, %v24_v0 }
 0x167   :  { %184 = vst.msk [vmem:[%s378_s4 + $0x38] sm:$0xff] %vm35_vm0, %v176_v49 }

// kernel: template_embedding_forward.97
= control target key start
LH: loop header
LB: loop body
LE: loop exit
PB: predicated region body
PF: predicated region fallthrough
CT: control target
= control target key end

     0   :  { %s311_s0 = inlined_call_operand.vmem [shape: f32[64,64], index: 0, kind: input, shape index: {}]   ;;  %s312_s1 = inlined_call_operand.vmem [shape: f32[64,128], index: 1, kind: input, shape index: {}]   ;;  %s313_s2 = inlined_call_operand.vmem [shape: f32[1,128], index: 2, kind: input, shape index: {}]   ;;  %s314_s3 = inlined_call_operand.hbm [shape: f32[64,128], index: 3, kind: output, shape index: {}]  }
   0x1   :  { %v32_v0 = vld [vmem:[%s312_s1] sm:$0xff]  ;;  %v33_v1 = vld [vmem:[%s312_s1 + $0x8] sm:$0xff]  ;;  %v34_v2 = vld [vmem:[%s312_s1 + $0x10] sm:$0xff] }
   0x2   :  { %v44_v3 = vpack.c.bf16 %v33_v1, %v32_v0  ;;  %v35_v4 = vld [vmem:[%s312_s1 + $0x18] sm:$0xff]  ;;  %v36_v6 = vld [vmem:[%s312_s1 + $0x20] sm:$0xff]  ;;  %v37_v7 = vld [vmem:[%s312_s1 + $0x28] sm:$0xff] }
   0x3   :  { %v45_v5 = vpack.c.bf16 %v35_v4, %v34_v2  ;;  %v16_v8 = vld [vmem:[%s311_s0] sm:$0xff]  ;;  %v17_v9 = vld [vmem:[%s311_s0 + $0x8] sm:$0xff]  ;;  %v46_v16 = vpack.c.bf16 %v37_v7, %v36_v6 }
   0x4   :  { %170 = vmatprep.subr.bf16.mxu0 %v44_v3  ;;  %186 = vmatprep.subr.bf16.mxu1 %v44_v3  ;;  %v24_v10 = vmax.f32 %v16_v8, 0.0  ;;  %v20_v11 = vld [vmem:[%s311_s0 + $0x20] sm:$0xff]  ;;  %v21_v12 = vld [vmem:[%s311_s0 + $0x28] sm:$0xff]  ;;  %v25_v13 = vmax.f32 %v17_v9, 0.0 }
   0x5   :  { %171 = vmatpush3.bf16.msra.mxu0 %v44_v3  ;;  %190 = vmatpush3.bf16.msra.mxu1 %v44_v3  ;;  %v28_v14 = vmax.f32 %v20_v11, 0.0  ;;  %v29_v15 = vmax.f32 %v21_v12, 0.0 }
   0x6   :  { %172 = vmatprep.subr.bf16.mxu0 %v45_v5  ;;  %187 = vmatprep.subr.bf16.mxu1 %v45_v5 }
   0x7   :  { %8 = vsyncpa [#allocation3], 0  ;;  %v38_v17 = vld [vmem:[%s312_s1 + $0x30] sm:$0xff]  ;;  %v39_v18 = vld [vmem:[%s312_s1 + $0x38] sm:$0xff]  ;;  %v40_v19 = vpack.c.bf16 %v25_v13, %v24_v10  ;;  %v42_v20 = vpack.c.bf16 %v29_v15, %v28_v14  ;;  %vm55_vm0 = vcmask 523264   ;;  %s221_s17 = smov [#allocation2]  }
   0x8   :  { %v18_v21 = vld [vmem:[%s311_s0 + $0x10] sm:$0xff]  ;;  %v19_v22 = vld [vmem:[%s311_s0 + $0x18] sm:$0xff]  ;;  %v47_v25 = vpack.c.bf16 %v39_v18, %v38_v17  ;;  %v157_v32 = vld [vmem:[%s313_s2] ss:$0 sm:$0xff]  ;;  %s146_s18 = sshll.u32 %s221_s17, 4  ;;  %s147_s18 = int_to_ptr.vmem [resolvable:$true] %s146_s18 }
   0x9   :  { %173 = vmatpush3.bf16.msra.mxu0 %v45_v5  ;;  %191 = vmatpush3.bf16.msra.mxu1 %v45_v5  ;;  %v22_v23 = vld [vmem:[%s311_s0 + $0x30] sm:$0xff]  ;;  %v23_v24 = vld [vmem:[%s311_s0 + $0x38] sm:$0xff]  ;;  %v26_v26 = vmax.f32 %v18_v21, 0.0  ;;  %v27_v27 = vmax.f32 %v19_v22, 0.0  ;;  %s197_s2 = scalar_lea.vmem %s147_s18, 1024  ;;  %p202_p1 = scmp.lt.s32.totalorder %s147_s18, %s147_s18 }
   0xa   :  { %174 = vmatprep.subr.bf16.mxu0 %v46_v16  ;;  %188 = vmatprep.subr.bf16.mxu1 %v46_v16  ;;  %v30_v28 = vmax.f32 %v22_v23, 0.0  ;;  %v31_v29 = vmax.f32 %v23_v24, 0.0  ;;  %p198_p0 = scmp.ne.s32.totalorder %s147_s18, %s197_s2  ;;  %p203_p2 = scmp.lt.s32.totalorder %s197_s2, %s197_s2 }
   0xb   :  { %178 = vmatprep.mubr.msk.bf16.mxu0 %vm55_vm0, %v40_v19  ;;  %182 = vmatprep.mubr.msk.bf16.mxu1 %vm55_vm0, %v42_v20  ;;  %v41_v30 = vpack.c.bf16 %v27_v27, %v26_v26 }
   0xc   :  { %v43_v31 = vpack.c.bf16 %v31_v29, %v30_v28  ;;  %p204_p3 = por %p203_p2, %p202_p1 }
   0xd   :  { %175 = vmatpush3.bf16.msra.mxu0 %v46_v16  ;;  %192 = vmatpush3.bf16.msra.mxu1 %v46_v16 }
   0xe   :  { %176 = vmatprep.subr.bf16.mxu0 %v47_v25  ;;  %189 = vmatprep.subr.bf16.mxu1 %v47_v25  ;;  %p205_p4 = pnand %p204_p3, %p198_p0 }
  0x11   :  { %177 = vmatpush3.bf16.msra.mxu0 %v47_v25  ;;  %193 = vmatpush3.bf16.msra.mxu1 %v47_v25 }
  0x14   :  { %179 = vmatmul.mubr.msk.bf16.vlgmr.msra.gmra.mrb[0].mxu0 %vm55_vm0, %v41_v30  ;;  %183 = vmatmul.mubr.msk.bf16.vlgmr.msra.gmra.mrb[0].mxu1 %vm55_vm0, %v43_v31 }
  0xe7   :  { %v180_v33 = vpop.f32.mrb[0].mxu0  ;;  %v184_v34 = vpop.f32.mrb[0].mxu1 }
  0xe8   :  { %v111_v35 = vadd.f32 %v180_v33, %v157_v32  ;;  %v127_v36 = vadd.f32 %v184_v34, %v157_v32  ;;  %v102_v37 = vpop.f32.mrb[1].mxu0  ;;  %v118_v38 = vpop.f32.mrb[1].mxu1 }
  0xe9   :  { %v103_v39 = vadd.f32 %v157_v32, %v102_v37  ;;  %v119_v40 = vadd.f32 %v157_v32, %v118_v38  ;;  %v181_v41 = vpop.f32.mrb[2].mxu0  ;;  %v185_v42 = vpop.f32.mrb[2].mxu1 }
  0xea   :  { %135 = vst [vmem:[#allocation2 + $0x10] sm:$0xff] %v111_v35  ;;  %139 = vst [vmem:[#allocation2 + $0x30] sm:$0xff] %v127_v36  ;;  %v114_v43 = vadd.f32 %v181_v41, %v157_v32  ;;  %v130_v44 = vadd.f32 %v185_v42, %v157_v32  ;;  %v105_v45 = vpop.f32.mrb[3].mxu0  ;;  %v121_v46 = vpop.f32.mrb[3].mxu1 }
  0xeb   :  { %133 = vst [vmem:[#allocation2] sm:$0xff] %v103_v39  ;;  %137 = vst [vmem:[#allocation2 + $0x20] sm:$0xff] %v119_v40  ;;  %v106_v47 = vadd.f32 %v157_v32, %v105_v45  ;;  %v122_v48 = vadd.f32 %v157_v32, %v121_v46 }
  0xec   :  { %136 = vst [vmem:[#allocation2 + $0x18] sm:$0xff] %v114_v43  ;;  %140 = vst [vmem:[#allocation2 + $0x38] sm:$0xff] %v130_v44 }
  0xed   :  { %134 = vst [vmem:[#allocation2 + $0x8] sm:$0xff] %v106_v47  ;;  %138 = vst [vmem:[#allocation2 + $0x28] sm:$0xff] %v122_v48 }
  0xee   :  { %208 = shalt.err (!%p205_p4)
}
  0xef   :  { %s209_s21 = scalar_lea.hbm %s314_s3, 1024 }
  0xf0   :  { %p210_p5 = scmp.ne.s32.totalorder %s314_s3, %s209_s21  ;;  %p213_p6 = scmp.lt.u32.totalorder %s209_s21, %s314_s3 }
  0xf2   :  { %p215_p7 = pnand %p213_p6, %p210_p5 }
  0xf4   :  { %218 = shalt.err (!%p215_p7)
}
  0xf5   :  { %s222_s26 = smov 128   ;;  %s223_s27 = smov 8  }
  0xf6   :  { %152 = dma.vmem_to_hbm [thread:$0]  %s147_s18, 1024, %s314_s3, [#allocation3], %s222_s26, %s222_s26, %s223_s27  }
  0xf7   :  { %219 = dma.done.wait [#allocation3], 1024  }
  0xf8   :  { %220 = vsyncadd [#allocation3], 4294966272 }
  0xf9   :  { %156 = vsyncpa [#allocation3], 1 }

// kernel: template_embedding_forward.57
= control target key start
LH: loop header
LB: loop body
LE: loop exit
PB: predicated region body
PF: predicated region fallthrough
CT: control target
= control target key end

     0   :  { %v6358_v3 = vmov 0.0   ;;  %vm5048_vm0 = vmmov 0   ;;  %s5049_s29 = smov 64   ;;  %v5050_v17 = vmov 0   ;;  %vm102_vm1 = vcmask 130048   ;;  %s5051_s12 = smov 48   ;;  %s6351_s0 = inlined_call_operand.vmem [shape: f32[8,8,256], index: 0, kind: input, shape index: {}]   ;;  %s6352_s1 = inlined_call_operand.vmem [shape: f32[8,8,1], index: 1, kind: input, shape index: {}]   ;;  %s6353_s2 = inlined_call_operand.vmem [shape: f32[4,8,8], index: 2, kind: input, shape index: {}]   ;;  %s6354_s4 = inlined_call_operand.vmem [shape: f32[64,64], index: 4, kind: input, shape index: {}]   ;;  %s6355_s5 = inlined_call_operand.vmem [shape: f32[1,64], index: 5, kind: input, shape index: {}]   ;;  %s6356_s3 = inlined_call_operand.vmem [shape: f32[8,8,64], index: 3, kind: input, shape index: {}]   ;;  %s6357_s6 = inlined_call_operand.vmem [shape: f32[8,8,64], index: 6, kind: output, shape index: {}]  }
   0x1   :  { %v24_v0 = vld [vmem:[%s6351_s0] sm:$0xff]  ;;  %v26_v2 = vld [vmem:[%s6351_s0 + $0x10] sm:$0xff]  ;;  %4407 = vmatprep.subr.bf16.mxu1 %v6358_v3  ;;  %4419 = vmatprep.subr.bf16.mxu0 %v6358_v3  ;;  %v41_v19 = vld [vmem:[%s6352_s1 + $0x8] sm:$0xff]  ;;  %v83_v58 = vlaneseq  ;;  %vm605_vm2 = vcmask 64512   ;;  %vm713_vm3 = vcmask 1043456   ;;  %s5052_s13 = smov 112  }
   0x2   :  { %v28_v1 = vld [vmem:[%s6351_s0 + $0x20] sm:$0xff]  ;;  %v5103_v4 = vpack.c.bf16 %v24_v0, %v24_v0  ;;  %v30_v6 = vld [vmem:[%s6351_s0 + $0x30] sm:$0xff]  ;;  %4409 = vmatprep.mubr.msk.bf16.mxu1 %vm5048_vm0, %v6358_v3  ;;  %4421 = vmatprep.mubr.msk.bf16.mxu0 %vm5048_vm0, %v6358_v3  ;;  %v5118_v7 = vpack.c.bf16 %v26_v2, %v26_v2  ;;  %v4187_v22 = vadd.f32 -1.0, %v41_v19  ;;  %v43_v24 = vld [vmem:[%s6352_s1 + $0x18] sm:$0xff]  ;;  %s5053_s28 = smov 32   ;;  %s5054_s30 = smov 96  }
   0x3   :  { %v5105_v5 = vpack.c.bf16 %v28_v1, %v28_v1  ;;  %v5120_v8 = vpack.c.bf16 %v30_v6, %v30_v6  ;;  %v32_v9 = vld [vmem:[%s6351_s0 + $0x40] sm:$0xff]  ;;  %v34_v10 = vld [vmem:[%s6351_s0 + $0x50] sm:$0xff]  ;;  %4817 = vset.pattern.permute.xlu0 %v5050_v17  ;;  %4818 = vset.pattern.permute.xlu1 %v5050_v17  ;;  %v4189_v25 = vadd.f32 -1.0, %v43_v24  ;;  %v45_v27 = vld [vmem:[%s6352_s1 + $0x28] sm:$0xff]  ;;  %v84_v60 = vand.u32 127, %v83_v58  ;;  %s5055_s8 = smov 16  }
   0x4   :  { %77 = vrot.lane.b32.xlu0 %v5103_v4, %s5049_s29  ;;  %v5130_v11 = vpack.c.bf16 %v32_v9, %v32_v9  ;;  %v5134_v12 = vpack.c.bf16 %v34_v10, %v34_v10  ;;  %v36_v13 = vld [vmem:[%s6351_s0 + $0x60] sm:$0xff]  ;;  %v38_v14 = vld [vmem:[%s6351_s0 + $0x70] sm:$0xff]  ;;  %v57_v29 = vmul.f32 1e+09, %v4187_v22  ;;  %v4191_v33 = vadd.f32 -1.0, %v45_v27  ;;  %v47_v35 = vld [vmem:[%s6352_s1 + $0x38] sm:$0xff] }
   0x5   :  { %214 = vrot.lane.b32.xlu1 %v5105_v5, %s5049_s29  ;;  %v5144_v15 = vpack.c.bf16 %v36_v13, %v36_v13  ;;  %v5148_v16 = vpack.c.bf16 %v38_v14, %v38_v14  ;;  %v40_v18 = vld [vmem:[%s6352_s1] sm:$0xff]  ;;  %v42_v20 = vld [vmem:[%s6352_s1 + $0x10] sm:$0xff]  ;;  %v59_v31 = vmul.f32 1e+09, %v4189_v25  ;;  %v4193_v39 = vadd.f32 -1.0, %v47_v35  ;;  %s5056_s9 = smov 80  }
   0x6   :  { %v4186_v21 = vadd.f32 -1.0, %v40_v18  ;;  %v4188_v23 = vadd.f32 -1.0, %v42_v20  ;;  %v44_v26 = vld [vmem:[%s6352_s1 + $0x20] sm:$0xff]  ;;  %v46_v34 = vld [vmem:[%s6352_s1 + $0x30] sm:$0xff]  ;;  %v61_v37 = vmul.f32 1e+09, %v4191_v33 }
   0x7   :  { %v4190_v32 = vadd.f32 -1.0, %v44_v26  ;;  %v4192_v38 = vadd.f32 -1.0, %v46_v34  ;;  %v63_v41 = vmul.f32 1e+09, %v4193_v39  ;;  %v86_v61 = vshrl.u32 %v83_v58, 7  ;;  %v5234_v9 = vld [vmem:[%s6353_s2] sm:$0xff] }
   0x8   :  { %150 = vrot.lane.b32.xlu0 %v5118_v7, %s5049_s29  ;;  %v56_v28 = vmul.f32 1e+09, %v4186_v21  ;;  %v58_v30 = vmul.f32 1e+09, %v4188_v23  ;;  %vm4039_vm4 = vcmask 261120   ;;  %vm4048_vm5 = vcmask 392192  }
   0x9   :  { %278 = vrot.lane.b32.xlu1 %v5120_v8, %s5049_s29  ;;  %v60_v36 = vmul.f32 1e+09, %v4190_v32  ;;  %v62_v40 = vmul.f32 1e+09, %v4192_v38  ;;  %v5226_v62 = vsub.s32 %v84_v60, %v86_v61  ;;  %vm4080_vm6 = vcmask 523264  }
   0xc   :  { %342 = vrot.lane.b32.xlu0 %v5130_v11, %s5049_s29 }
   0xd   :  { %406 = vrot.lane.b32.xlu1 %v5134_v12, %s5049_s29 }
  0x10   :  { %470 = vrot.lane.b32.xlu0 %v5144_v15, %s5049_s29 }
  0x11   :  { %534 = vrot.lane.b32.xlu1 %v5148_v16, %s5049_s29 }
  0x14   :  { %81 = vperm.xlu0 %4817, %v56_v28  }
  0x15   :  { %154 = vperm.xlu1 %4818, %v57_v29  }
  0x18   :  { %282 = vperm.xlu0 %4817, %v59_v31  }
  0x19   :  { %218 = vperm.xlu1 %4818, %v58_v30  }
  0x1c   :  { %410 = vperm.xlu0 %4817, %v61_v37  }
  0x1d   :  { %346 = vperm.xlu1 %4818, %v60_v36  }
  0x20   :  { %538 = vperm.xlu0 %4817, %v63_v41  }
  0x21   :  { %474 = vperm.xlu1 %4818, %v62_v40  }
  0x76   :  { %v78_v42 = vpop.permute.xlu0 %77 }
  0x77   :  { %v215_v43 = vpop.permute.xlu1 %214  ;;  %v107_v44 = vsel %vm102_vm1, %v78_v42, 0 }
  0x78   :  { %v235_v45 = vsel %vm102_vm1, %v215_v43, 0  ;;  %4408 = vmatpush3.bf16.xpose.msra.mxu1 %v107_v44 }
  0x79   :  { %4420 = vmatpush3.bf16.xpose.msra.mxu0 %v235_v45  ;;  %4413 = vmatprep.subr.bf16.mxu1 %v6358_v3 }
  0x7a   :  { %4431 = vmatprep.subr.bf16.mxu0 %v6358_v3  ;;  %v151_v46 = vpop.permute.xlu0 %150 }
  0x7b   :  { %v171_v47 = vsel %vm102_vm1, %v151_v46, 0  ;;  %v279_v50 = vpop.permute.xlu1 %278 }
  0x7c   :  { %v299_v52 = vsel %vm102_vm1, %v279_v50, 0 }
  0x7e   :  { %v343_v48 = vpop.permute.xlu0 %342 }
  0x7f   :  { %4410 = vmatmul.mubr.msk.bf16.vlgmr.msra.gmra.mrb[0].mxu1 %vm102_vm1, %v5103_v4  ;;  %v363_v49 = vsel %vm102_vm1, %v343_v48, 0  ;;  %v407_v54 = vpop.permute.xlu1 %406 }
  0x80   :  { %4422 = vmatmul.mubr.msk.bf16.vlgmr.msra.gmra.mrb[0].mxu0 %vm102_vm1, %v5105_v5  ;;  %4414 = vmatpush3.bf16.xpose.msra.mxu1 %v171_v47  ;;  %v427_v55 = vsel %vm102_vm1, %v407_v54, 0 }
  0x81   :  { %4432 = vmatpush3.bf16.xpose.msra.mxu0 %v363_v49  ;;  %4415 = vmatprep.mubr.msk.bf16.mxu1 %vm5048_vm0, %v6358_v3 }
  0x82   :  { %4425 = vmatprep.subr.bf16.mxu1 %v6358_v3  ;;  %4433 = vmatprep.mubr.msk.bf16.mxu0 %vm5048_vm0, %v6358_v3  ;;  %v471_v51 = vpop.permute.xlu0 %470 }
  0x83   :  { %4443 = vmatprep.subr.bf16.mxu0 %v6358_v3  ;;  %v491_v53 = vsel %vm102_vm1, %v471_v51, 0  ;;  %v535_v56 = vpop.permute.xlu1 %534 }
  0x84   :  { %v555_v57 = vsel %vm102_vm1, %v535_v56, 0 }
  0x87   :  { %4416 = vmatmul.mubr.msk.bf16.vlgmr.msra.gmra.mrb[4].mxu1 %vm102_vm1, %v5118_v7 }
  0x88   :  { %4434 = vmatmul.mubr.msk.bf16.vlgmr.msra.gmra.mrb[4].mxu0 %vm102_vm1, %v5130_v11  ;;  %4426 = vmatpush3.bf16.xpose.msra.mxu1 %v299_v52 }
  0x89   :  { %4444 = vmatpush3.bf16.xpose.msra.mxu0 %v491_v53  ;;  %4427 = vmatprep.mubr.msk.bf16.mxu1 %vm5048_vm0, %v6358_v3 }
  0x8a   :  { %4437 = vmatprep.subr.bf16.mxu1 %v6358_v3  ;;  %4445 = vmatprep.mubr.msk.bf16.mxu0 %vm5048_vm0, %v6358_v3 }
  0x8b   :  { %4455 = vmatprep.subr.bf16.mxu0 %v6358_v3 }
  0x8f   :  { %4428 = vmatmul.mubr.msk.bf16.vlgmr.msra.gmra.mrb[8].mxu1 %vm102_vm1, %v5120_v8 }
  0x90   :  { %4446 = vmatmul.mubr.msk.bf16.vlgmr.msra.gmra.mrb[8].mxu0 %vm102_vm1, %v5144_v15  ;;  %4438 = vmatpush3.bf16.xpose.msra.mxu1 %v427_v55 }
  0x91   :  { %4439 = vmatprep.mubr.msk.bf16.mxu1 %vm5048_vm0, %v6358_v3  ;;  %4449 = vmatprep.subr.bf16.mxu1 %v6358_v3 }
  0x92   :  { %4457 = vmatprep.mubr.msk.bf16.mxu0 %vm5048_vm0, %v6358_v3 }
  0x93   :  { %v82_v0 = vpop.permute.xlu0 %81 }
  0x94   :  { %v155_v59 = vpop.permute.xlu1 %154  ;;  %v5229_v1 = vrot.slane %v82_v0, %v5226_v62 }
  0x95   :  { %v5244_v24 = vrot.slane %v155_v59, %v5226_v62 }
  0x97   :  { %4440 = vmatmul.mubr.msk.bf16.vlgmr.msra.gmra.mrb[12].mxu1 %vm102_vm1, %v5134_v12  ;;  %v283_v41 = vpop.permute.xlu0 %282 }
  0x98   :  { %4450 = vmatpush3.bf16.xpose.msra.mxu1 %v555_v57  ;;  %4451 = vmatprep.mubr.msk.bf16.mxu1 %vm5048_vm0, %v6358_v3  ;;  %v219_v63 = vpop.permute.xlu1 %218  ;;  %v5257_v42 = vrot.slane %v283_v41, %v5226_v62 }
  0x99   :  { %4461 = vmatprep.subr.bf16.mxu1 %v6358_v3  ;;  %v5241_v22 = vrot.slane %v219_v63, %v5226_v62 }
  0x9b   :  { %v411_v61 = vpop.permute.xlu0 %410 }
  0x9c   :  { %v347_v2 = vpop.permute.xlu1 %346  ;;  %v5272_v63 = vrot.slane %v411_v61, %v5226_v62 }
  0x9d   :  { %v5250_v27 = vrot.slane %v347_v2, %v5226_v62 }
  0x9f   :  { %4452 = vmatmul.mubr.msk.bf16.vlgmr.msra.gmra.mrb[16].mxu1 %vm102_vm1, %v5148_v16 }
  0xa0   :  { %4463 = vmatprep.mubr.msk.bf16.mxu1 %vm5048_vm0, %v6358_v3  ;;  %v475_v28 = vpop.permute.xlu1 %474 }
  0xa1   :  { %v5261_v44 = vrot.slane %v475_v28, %v5226_v62 }
 0x152   :  { %v143_v6 = vpop.f32.mrb[0].mxu1 }
 0x153   :  { %v271_v10 = vpop.f32.mrb[0].mxu0  ;;  %v144_v13 = vadd.f32 %v143_v6, %v5229_v1  ;;  %v4411_v14 = vpop.f32.mrb[1].mxu1 }
 0x154   :  { %v4423_v17 = vpop.f32.mrb[1].mxu0  ;;  %v146_v18 = vpop.f32.mrb[2].mxu1  ;;  %v272_v26 = vadd.f32 %v271_v10, %v5241_v22 }
 0x155   :  { %v274_v19 = vpop.f32.mrb[2].mxu0  ;;  %v4412_v20 = vpop.f32.mrb[3].mxu1  ;;  %v5238_v21 = vadd.f32 %v144_v13, %v5234_v9 }
 0x156   :  { %v4424_v23 = vpop.f32.mrb[3].mxu0  ;;  %v599_v40 = vadd.f32 %v272_v26, %v5234_v9  ;;  %v539_v18 = vpop.permute.xlu0 %538 }
 0x157   :  { %v606_v25 = vsel %vm605_vm2, %v5238_v21, -inf  ;;  %v5279_v20 = vrot.slane %v539_v18, %v5226_v62  ;;  %v27_v18 = vld [vmem:[%s6351_s0 + $0x18] sm:$0xff] }
 0x158   :  { %607 = vmax.xlane.f32.xlu1 %v606_v25  ;;  %v612_v45 = vsel %vm605_vm2, %v599_v40, -inf }
 0x15a   :  { %v207_v29 = vpop.f32.mrb[4].mxu1 }
 0x15b   :  { %v399_v30 = vpop.f32.mrb[4].mxu0  ;;  %v208_v31 = vadd.f32 %v207_v29, %v5244_v24  ;;  %v4417_v32 = vpop.f32.mrb[5].mxu1 }
 0x15c   :  { %v4435_v33 = vpop.f32.mrb[5].mxu0  ;;  %v210_v34 = vpop.f32.mrb[6].mxu1  ;;  %v400_v37 = vadd.f32 %v399_v30, %v5250_v27 }
 0x15d   :  { %v402_v35 = vpop.f32.mrb[6].mxu0  ;;  %v4418_v36 = vpop.f32.mrb[7].mxu1  ;;  %v598_v38 = vadd.f32 %v208_v31, %v5234_v9 }
 0x15e   :  { %v4436_v39 = vpop.f32.mrb[7].mxu0  ;;  %v601_v46 = vadd.f32 %v400_v37, %v5234_v9 }
 0x15f   :  { %v609_v43 = vsel %vm605_vm2, %v598_v38, -inf }
 0x160   :  { %610 = vmax.xlane.f32.xlu0 %v609_v43  ;;  %v618_v56 = vsel %vm605_vm2, %v601_v46, -inf }
 0x162   :  { %v335_v47 = vpop.f32.mrb[8].mxu1 }
 0x163   :  { %v527_v48 = vpop.f32.mrb[8].mxu0  ;;  %v336_v49 = vadd.f32 %v335_v47, %v5257_v42  ;;  %v4429_v50 = vpop.f32.mrb[9].mxu1 }
 0x164   :  { %v528_v51 = vadd.f32 %v527_v48, %v5261_v44  ;;  %v4447_v52 = vpop.f32.mrb[9].mxu0  ;;  %613 = vmax.xlane.f32.xlu0 %v612_v45  ;;  %v338_v53 = vpop.f32.mrb[10].mxu1 }
 0x165   :  { %v530_v54 = vpop.f32.mrb[10].mxu0  ;;  %v4430_v55 = vpop.f32.mrb[11].mxu1  ;;  %v600_v57 = vadd.f32 %v336_v49, %v5234_v9 }
 0x166   :  { %v4448_v58 = vpop.f32.mrb[11].mxu0  ;;  %v603_v60 = vadd.f32 %v528_v51, %v5234_v9 }
 0x167   :  { %v615_v59 = vsel %vm605_vm2, %v600_v57, -inf }
 0x168   :  { %619 = vmax.xlane.f32.xlu0 %v618_v56  ;;  %616 = vmax.xlane.f32.xlu1 %v615_v59  ;;  %v624_v10 = vsel %vm605_vm2, %v603_v60, -inf }
 0x16a   :  { %v463_v0 = vpop.f32.mrb[12].mxu1 }
 0x16b   :  { %v464_v2 = vadd.f32 %v463_v0, %v5272_v63  ;;  %v4441_v6 = vpop.f32.mrb[13].mxu1 }
 0x16c   :  { %v466_v13 = vpop.f32.mrb[14].mxu1  ;;  %625 = vmax.xlane.f32.xlu0 %v624_v10 }
 0x16d   :  { %v4442_v14 = vpop.f32.mrb[15].mxu1  ;;  %v602_v17 = vadd.f32 %v464_v2, %v5234_v9  ;;  %v25_v13 = vld [vmem:[%s6351_s0 + $0x8] sm:$0xff] }
 0x16e   :  { %v5319_v14 = vpack.c.bf16 %v25_v13, %v25_v13 }
 0x16f   :  { %v621_v19 = vsel %vm605_vm2, %v602_v17, -inf }
 0x170   :  { %622 = vmax.xlane.f32.xlu1 %v621_v19  ;;  %v5327_v19 = vpack.c.bf16 %v27_v18, %v27_v18 }
 0x172   :  { %v591_v23 = vpop.f32.mrb[16].mxu1 }
 0x173   :  { %v592_v25 = vadd.f32 %v591_v23, %v5279_v20  ;;  %v4453_v26 = vpop.f32.mrb[17].mxu1  ;;  %v761_v23 = vsel %vm713_vm3, %v5327_v19, 0 }
 0x174   :  { %v594_v28 = vpop.f32.mrb[18].mxu1  ;;  %4462 = vmatpush3.bf16.msra.mxu1 %v761_v23  ;;  %v39_v23 = vld [vmem:[%s6351_s0 + $0x78] sm:$0xff] }
 0x175   :  { %v5283_v29 = vadd.f32 %v592_v25, %v5234_v9  ;;  %v4454_v30 = vpop.f32.mrb[19].mxu1  ;;  %4473 = vmatprep.subr.bf16.mxu1 %v6358_v3 }
 0x177   :  { %v627_v31 = vsel %vm605_vm2, %v5283_v29, -inf }
 0x178   :  { %628 = vmax.xlane.f32.xlu1 %v627_v31 }
 0x1e5   :  { %v608_v32 = vpop.xlane.xlu1 %607 }
 0x1e6   :  { %v630_v33 = vsub.f32 %v5238_v21, %v608_v32 }
 0x1e8   :  { %v638_v34 = vmul.f32 1.442695, %v630_v33  ;;  %v29_v33 = vld [vmem:[%s6351_s0 + $0x28] sm:$0xff] }
 0x1ea   :  { %4879 = vpow2.f32 %v638_v34  ;;  %v5383_v34 = vpack.c.bf16 %v29_v33, %v29_v33 }
 0x1ed   :  { %v611_v62 = vpop.xlane.xlu0 %610 }
 0x1ee   :  { %v631_v35 = vsub.f32 %v598_v38, %v611_v62  ;;  %v33_v62 = vld [vmem:[%s6351_s0 + $0x48] sm:$0xff] }
 0x1f0   :  { %v640_v36 = vmul.f32 1.442695, %v631_v35  ;;  %v5390_v35 = vpack.c.bf16 %v33_v62, %v33_v62 }
 0x1f1   :  { %v614_v37 = vpop.xlane.xlu0 %613 }
 0x1f2   :  { %4881 = vpow2.f32 %v640_v36  ;;  %v632_v39 = vsub.f32 %v599_v40, %v614_v37 }
 0x1f4   :  { %v5288_v41 = vpop.eup %4879  ;;  %v642_v9 = vmul.f32 1.442695, %v632_v39 }
 0x1f5   :  { %v617_v43 = vpop.xlane.xlu1 %616  ;;  %v620_v45 = vpop.xlane.xlu0 %619  ;;  %v654_v47 = vsel %vm605_vm2, %v5288_v41, 0.0 }
 0x1f6   :  { %4883 = vpow2.f32 %v642_v9  ;;  %v633_v48 = vsub.f32 %v600_v57, %v617_v43  ;;  %v634_v49 = vsub.f32 %v601_v46, %v620_v45  ;;  %655 = vadd.xlane.f32.xlu0 %v654_v47  ;;  %v807_v47 = vsel %vm713_vm3, %v5383_v34, 0 }
 0x1f8   :  { %v644_v21 = vmul.f32 1.442695, %v633_v48  ;;  %v646_v50 = vmul.f32 1.442695, %v634_v49 }
 0x1f9   :  { %v626_v51 = vpop.xlane.xlu0 %625 }
 0x1fa   :  { %4885 = vpow2.f32 %v644_v21  ;;  %v636_v38 = vsub.f32 %v603_v60, %v626_v51 }
 0x1fb   :  { %4887 = vpow2.f32 %v646_v50 }
 0x1fc   :  { %v5292_v52 = vpop.eup %4881  ;;  %v650_v40 = vmul.f32 1.442695, %v636_v38 }
 0x1fd   :  { %v623_v53 = vpop.xlane.xlu1 %622  ;;  %v657_v54 = vsel %vm605_vm2, %v5292_v52, 0.0 }
 0x1fe   :  { %4889 = vpow2.f32 %v650_v40  ;;  %v635_v55 = vsub.f32 %v602_v17, %v623_v53  ;;  %658 = vadd.xlane.f32.xlu1 %v657_v54  ;;  %v715_v17 = vsel %vm713_vm3, %v5319_v14, 0  ;;  %v35_v53 = vld [vmem:[%s6351_s0 + $0x58] sm:$0xff] }
 0x1ff   :  { %4456 = vmatpush3.bf16.msra.mxu0 %v715_v17 }
 0x200   :  { %v5296_v56 = vpop.eup %4883  ;;  %v648_v46 = vmul.f32 1.442695, %v635_v55  ;;  %4467 = vmatprep.subr.bf16.mxu0 %v6358_v3 }
 0x201   :  { %v660_v57 = vsel %vm605_vm2, %v5296_v56, 0.0 }
 0x202   :  { %4891 = vpow2.f32 %v648_v46  ;;  %661 = vadd.xlane.f32.xlu0 %v660_v57  ;;  %v899_v46 = vsel %vm713_vm3, %v5390_v35, 0  ;;  %v5414_v57 = vpack.c.bf16 %v35_v53, %v35_v53 }
 0x204   :  { %v5300_v58 = vpop.eup %4885  ;;  %v945_v17 = vsel %vm713_vm3, %v5414_v57, 0 }
 0x205   :  { %v5302_v59 = vpop.eup %4887  ;;  %v663_v60 = vsel %vm605_vm2, %v5300_v58, 0.0  ;;  %v629_v25 = vpop.xlane.xlu1 %628 }
 0x206   :  { %664 = vadd.xlane.f32.xlu1 %v663_v60  ;;  %v666_v61 = vsel %vm605_vm2, %v5302_v59, 0.0  ;;  %v637_v26 = vsub.f32 %v5283_v29, %v629_v25  ;;  %v31_v29 = vld [vmem:[%s6351_s0 + $0x38] sm:$0xff] }
 0x207   :  { %667 = vadd.xlane.f32.xlu0 %v666_v61  ;;  %v5360_v32 = vpack.c.bf16 %v31_v29, %v31_v29  ;;  %v37_v61 = vld [vmem:[%s6351_s0 + $0x68] sm:$0xff] }
 0x208   :  { %v5308_v0 = vpop.eup %4889  ;;  %v652_v28 = vmul.f32 1.442695, %v637_v26  ;;  %v5427_v18 = vpack.c.bf16 %v37_v61, %v37_v61  ;;  %v5438_v26 = vpack.c.bf16 %v39_v23, %v39_v23 }
 0x209   :  { %v672_v2 = vsel %vm605_vm2, %v5308_v0, 0.0  ;;  %v853_v38 = vsel %vm713_vm3, %v5360_v32, 0 }
 0x20a   :  { %4893 = vpow2.f32 %v652_v28  ;;  %v1037_v62 = vsel %vm713_vm3, %v5438_v26, 0 }
 0x20b   :  { %673 = vadd.xlane.f32.xlu0 %v672_v2 }
 0x20c   :  { %v5312_v6 = vpop.eup %4891 }
 0x20d   :  { %v669_v10 = vsel %vm605_vm2, %v5312_v6, 0.0 }
 0x20e   :  { %670 = vadd.xlane.f32.xlu1 %v669_v10 }
 0x214   :  { %v5351_v30 = vpop.eup %4893 }
 0x215   :  { %v675_v31 = vsel %vm605_vm2, %v5351_v30, 0.0 }
 0x21f   :  { %1219 = vrot.lane.b32.xlu1 %v5118_v7, %s5051_s12 }
 0x221   :  { %1169 = vrot.lane.b32.xlu0 %v5103_v4, %s5051_s12 }
 0x225   :  { %1217 = vrot.lane.b32.xlu0 %v5118_v7, %s5052_s13 }
 0x229   :  { %1319 = vrot.lane.b32.xlu0 %v5120_v8, %s5051_s12 }
 0x22d   :  { %1317 = vrot.lane.b32.xlu0 %v5120_v8, %s5052_s13 }
 0x231   :  { %1419 = vrot.lane.b32.xlu0 %v5134_v12, %s5051_s12 }
 0x235   :  { %1417 = vrot.lane.b32.xlu0 %v5134_v12, %s5052_s13 }
 0x239   :  { %1519 = vrot.lane.b32.xlu0 %v5148_v16, %s5051_s12 }
 0x23d   :  { %1517 = vrot.lane.b32.xlu0 %v5148_v16, %s5052_s13 }
 0x241   :  { %1672 = vrot.lane.b32.xlu0 %v5319_v14, %s5052_s13 }
 0x243   :  { %676 = vadd.xlane.f32.xlu1 %v675_v31 }
 0x245   :  { %1819 = vrot.lane.b32.xlu0 %v5360_v32, %s5052_s13 }
 0x254   :  { %1167 = vrot.lane.b32.xlu1 %v5103_v4, %s5052_s13 }
 0x258   :  { %1269 = vrot.lane.b32.xlu1 %v5105_v5, %s5051_s12 }
 0x25c   :  { %1267 = vrot.lane.b32.xlu1 %v5105_v5, %s5052_s13 }
 0x260   :  { %1369 = vrot.lane.b32.xlu1 %v5130_v11, %s5051_s12 }
 0x264   :  { %1367 = vrot.lane.b32.xlu1 %v5130_v11, %s5052_s13 }
 0x268   :  { %1469 = vrot.lane.b32.xlu1 %v5144_v15, %s5051_s12 }
 0x26c   :  { %1467 = vrot.lane.b32.xlu1 %v5144_v15, %s5052_s13 }
 0x270   :  { %1721 = vrot.lane.b32.xlu1 %v5327_v19, %s5052_s13 }
 0x274   :  { %1770 = vrot.lane.b32.xlu1 %v5383_v34, %s5052_s13 }
 0x278   :  { %1868 = vrot.lane.b32.xlu1 %v5390_v35, %s5052_s13 }
 0x283   :  { %v656_v36 = vpop.xlane.xlu0 %655 }
 0x284   :  { %4895 = vrcp.f32 %v656_v36 }
 0x28b   :  { %v659_v37 = vpop.xlane.xlu1 %658 }
 0x28c   :  { %4897 = vrcp.f32 %v659_v37 }
 0x28e   :  { %v4896_v39 = vpop.eup %4895 }
 0x28f   :  { %v662_v9 = vpop.xlane.xlu0 %661  ;;  %v679_v43 = vmul.f32 %v4896_v39, %v5288_v41 }
 0x290   :  { %4899 = vrcp.f32 %v662_v9 }
 0x291   :  { %v694_v45 = vpack.c.bf16 %v679_v43, %v679_v43 }
 0x293   :  { %v665_v48 = vpop.xlane.xlu1 %664  ;;  %4458 = vmatmul.mubr.msk.bf16.vlgmr.msra.gmra.mrb[12].mxu0 %vm605_vm2, %v694_v45 }
 0x294   :  { %4901 = vrcp.f32 %v665_v48  ;;  %v668_v49 = vpop.xlane.xlu0 %667  ;;  %4468 = vmatpush3.bf16.msra.mxu0 %v807_v47  ;;  %4469 = vmatprep.mubr.msk.bf16.mxu0 %vm5048_vm0, %v6358_v3 }
 0x295   :  { %4903 = vrcp.f32 %v668_v49  ;;  %4479 = vmatprep.subr.bf16.mxu0 %v6358_v3 }
 0x296   :  { %v4898_v21 = vpop.eup %4897 }
 0x297   :  { %v681_v41 = vmul.f32 %v4898_v21, %v5292_v52 }
 0x298   :  { %v674_v50 = vpop.xlane.xlu0 %673 }
 0x299   :  { %v695_v51 = vpack.c.bf16 %v681_v41, %v681_v41  ;;  %4905 = vrcp.f32 %v674_v50 }
 0x29a   :  { %v4900_v40 = vpop.eup %4899 }
 0x29b   :  { %4464 = vmatmul.mubr.msk.bf16.vlgmr.msra.gmra.mrb[20].mxu1 %vm605_vm2, %v695_v51  ;;  %v671_v54 = vpop.xlane.xlu1 %670  ;;  %v683_v55 = vmul.f32 %v4900_v40, %v5296_v56 }
 0x29c   :  { %4907 = vrcp.f32 %v671_v54  ;;  %4474 = vmatpush3.bf16.msra.mxu1 %v853_v38  ;;  %4475 = vmatprep.mubr.msk.bf16.mxu1 %vm5048_vm0, %v6358_v3  ;;  %v1170_v36 = vpop.permute.xlu0 %1169 }
 0x29d   :  { %v696_v52 = vpack.c.bf16 %v683_v55, %v683_v55  ;;  %4485 = vmatprep.subr.bf16.mxu1 %v6358_v3  ;;  %v1175_v37 = vsel %vm102_vm1, %v1170_v36, 0 }
 0x29e   :  { %v4902_v60 = vpop.eup %4901 }
 0x29f   :  { %v4904_v2 = vpop.eup %4903  ;;  %4470 = vmatmul.mubr.msk.bf16.vlgmr.msra.gmra.mrb[16].mxu0 %vm605_vm2, %v696_v52  ;;  %v685_v56 = vmul.f32 %v4902_v60, %v5300_v58 }
 0x2a0   :  { %4480 = vmatpush3.bf16.msra.mxu0 %v899_v46  ;;  %4481 = vmatprep.mubr.msk.bf16.mxu0 %vm5048_vm0, %v6358_v3  ;;  %v687_v13 = vmul.f32 %v4904_v2, %v5302_v59  ;;  %v991_v59 = vsel %vm713_vm3, %v5427_v18, 0  ;;  %v1218_v43 = vpop.permute.xlu0 %1217 }
 0x2a1   :  { %v697_v10 = vpack.c.bf16 %v685_v56, %v685_v56  ;;  %4491 = vmatprep.subr.bf16.mxu0 %v6358_v3 }
 0x2a2   :  { %v698_v25 = vpack.c.bf16 %v687_v13, %v687_v13 }
 0x2a3   :  { %4476 = vmatmul.mubr.msk.bf16.vlgmr.msra.gmra.mrb[24].mxu1 %vm605_vm2, %v697_v10  ;;  %v4906_v58 = vpop.eup %4905 }
 0x2a4   :  { %4486 = vmatpush3.bf16.msra.mxu1 %v945_v17  ;;  %4487 = vmatprep.mubr.msk.bf16.mxu1 %vm5048_vm0, %v6358_v3  ;;  %v691_v33 = vmul.f32 %v4906_v58, %v5308_v0  ;;  %v1220_v0 = vpop.permute.xlu1 %1219  ;;  %v1320_v49 = vpop.permute.xlu0 %1319 }
 0x2a5   :  { %4497 = vmatprep.subr.bf16.mxu1 %v6358_v3  ;;  %v1225_v51 = vsel %vm102_vm1, %v1220_v0, 0  ;;  %v1325_v54 = vsel %vm102_vm1, %v1320_v49, 0 }
 0x2a6   :  { %v4908_v28 = vpop.eup %4907 }
 0x2a7   :  { %4482 = vmatmul.mubr.msk.bf16.vlgmr.msra.gmra.mrb[20].mxu0 %vm605_vm2, %v698_v25  ;;  %v689_v29 = vmul.f32 %v4908_v28, %v5312_v6  ;;  %v700_v6 = vpack.c.bf16 %v691_v33, %v691_v33 }
 0x2a8   :  { %4492 = vmatpush3.bf16.msra.mxu0 %v991_v59  ;;  %4493 = vmatprep.mubr.msk.bf16.mxu0 %vm5048_vm0, %v6358_v3  ;;  %v1318_v53 = vpop.permute.xlu0 %1317 }
 0x2a9   :  { %v699_v31 = vpack.c.bf16 %v689_v29, %v689_v29  ;;  %4503 = vmatprep.subr.bf16.mxu0 %v6358_v3 }
 0x2ab   :  { %4488 = vmatmul.mubr.msk.bf16.vlgmr.msra.gmra.mrb[28].mxu1 %vm605_vm2, %v699_v31 }
 0x2ac   :  { %4498 = vmatpush3.bf16.msra.mxu1 %v1037_v62  ;;  %4499 = vmatprep.mubr.msk.bf16.mxu1 %vm5048_vm0, %v6358_v3  ;;  %v1420_v55 = vpop.permute.xlu0 %1419 }
 0x2ad   :  { %4509 = vmatprep.subr.bf16.mxu1 %v6358_v3  ;;  %v1425_v61 = vsel %vm102_vm1, %v1420_v55, 0 }
 0x2af   :  { %4494 = vmatmul.mubr.msk.bf16.vlgmr.msra.gmra.mrb[24].mxu0 %vm605_vm2, %v700_v6 }
 0x2b0   :  { %4505 = vmatprep.mubr.msk.bf16.mxu0 %vm5048_vm0, %v6358_v3  ;;  %v1418_v60 = vpop.permute.xlu0 %1417 }
 0x2b1   :  { %4504 = vmatpush3.bf16.xpose.msra.mxu0 %v1175_v37 }
 0x2b2   :  { %4515 = vmatprep.subr.bf16.mxu0 %v6358_v3 }
 0x2b4   :  { %v1520_v56 = vpop.permute.xlu0 %1519 }
 0x2b5   :  { %v1525_v10 = vsel %vm102_vm1, %v1520_v56, 0 }
 0x2b8   :  { %v1518_v13 = vpop.permute.xlu0 %1517 }
 0x2bc   :  { %v1673_v23 = vpop.permute.xlu0 %1672 }
 0x2bd   :  { %v1678_v25 = vsel %vm713_vm3, %v1673_v23, 0 }
 0x2d0   :  { %v677_v39 = vpop.xlane.xlu1 %676 }
 0x2d1   :  { %4909 = vrcp.f32 %v677_v39 }
 0x2d4   :  { %v1168_v9 = vpop.permute.xlu1 %1167 }
 0x2d5   :  { %4506 = vmatmul.mubr.msk.bf16.vlgmr.msra.gmra.mrb[28].mxu0 %vm102_vm1, %v1168_v9 }
 0x2d6   :  { %4517 = vmatprep.mubr.msk.bf16.mxu0 %vm5048_vm0, %v6358_v3 }
 0x2d8   :  { %v1270_v45 = vpop.permute.xlu1 %1269 }
 0x2d9   :  { %v1275_v47 = vsel %vm102_vm1, %v1270_v45, 0 }
 0x2da   :  { %4516 = vmatpush3.bf16.xpose.msra.mxu0 %v1275_v47 }
 0x2db   :  { %v4910_v48 = vpop.eup %4909  ;;  %4527 = vmatprep.subr.bf16.mxu0 %v6358_v3 }
 0x2dc   :  { %v1268_v21 = vpop.permute.xlu1 %1267  ;;  %v693_v41 = vmul.f32 %v4910_v48, %v5351_v30 }
 0x2de   :  { %v701_v50 = vpack.c.bf16 %v693_v41, %v693_v41 }
 0x2e0   :  { %4500 = vmatmul.mubr.msk.bf16.vlgmr.msra.gmra.mrb[32].mxu1 %vm605_vm2, %v701_v50  ;;  %v1370_v38 = vpop.permute.xlu1 %1369 }
 0x2e1   :  { %4510 = vmatpush3.bf16.xpose.msra.mxu1 %v1225_v51  ;;  %v1375_v40 = vsel %vm102_vm1, %v1370_v38, 0  ;;  %4518 = vmatmul.mubr.msk.bf16.vlgmr.msra.gmra.mrb[32].mxu0 %vm102_vm1, %v1268_v21 }
 0x2e2   :  { %4528 = vmatpush3.bf16.xpose.msra.mxu0 %v1375_v40  ;;  %4511 = vmatprep.mubr.msk.bf16.mxu1 %vm5048_vm0, %v6358_v3 }
 0x2e3   :  { %4521 = vmatprep.subr.bf16.mxu1 %v6358_v3  ;;  %4529 = vmatprep.mubr.msk.bf16.mxu0 %vm5048_vm0, %v6358_v3 }
 0x2e4   :  { %v1368_v30 = vpop.permute.xlu1 %1367  ;;  %4539 = vmatprep.subr.bf16.mxu0 %v6358_v3 }
 0x2e8   :  { %v1470_v52 = vpop.permute.xlu1 %1469  ;;  %4512 = vmatmul.mubr.msk.bf16.vlgmr.msra.gmra.mrb[36].mxu1 %vm102_vm1, %v1218_v43 }
 0x2e9   :  { %v1475_v46 = vsel %vm102_vm1, %v1470_v52, 0  ;;  %4522 = vmatpush3.bf16.xpose.msra.mxu1 %v1325_v54  ;;  %4530 = vmatmul.mubr.msk.bf16.vlgmr.msra.gmra.mrb[36].mxu0 %vm102_vm1, %v1368_v30 }
 0x2ea   :  { %4540 = vmatpush3.bf16.xpose.msra.mxu0 %v1475_v46  ;;  %4523 = vmatprep.mubr.msk.bf16.mxu1 %vm5048_vm0, %v6358_v3 }
 0x2eb   :  { %4533 = vmatprep.subr.bf16.mxu1 %v6358_v3  ;;  %4541 = vmatprep.mubr.msk.bf16.mxu0 %vm5048_vm0, %v6358_v3 }
 0x2ec   :  { %4551 = vmatprep.subr.bf16.mxu0 %v6358_v3  ;;  %v1468_v2 = vpop.permute.xlu1 %1467 }
 0x2f0   :  { %4524 = vmatmul.mubr.msk.bf16.vlgmr.msra.gmra.mrb[40].mxu1 %vm102_vm1, %v1318_v53  ;;  %v1722_v17 = vpop.permute.xlu1 %1721 }
 0x2f1   :  { %4534 = vmatpush3.bf16.xpose.msra.mxu1 %v1425_v61  ;;  %4542 = vmatmul.mubr.msk.bf16.vlgmr.msra.gmra.mrb[40].mxu0 %vm102_vm1, %v1468_v2  ;;  %v1727_v58 = vsel %vm713_vm3, %v1722_v17, 0 }
 0x2f2   :  { %4535 = vmatprep.mubr.msk.bf16.mxu1 %vm5048_vm0, %v6358_v3  ;;  %4545 = vmatprep.subr.bf16.mxu1 %v6358_v3 }
 0x2f3   :  { %4553 = vmatprep.mubr.msk.bf16.mxu0 %vm5048_vm0, %v6358_v3  ;;  %4552 = vmatpush3.bf16.msra.mxu0 %v1678_v25 }
 0x2f4   :  { %4563 = vmatprep.subr.bf16.mxu0 %v6358_v3 }
 0x2f8   :  { %4536 = vmatmul.mubr.msk.bf16.vlgmr.msra.gmra.mrb[44].mxu1 %vm102_vm1, %v1418_v60  ;;  %v5520_v60 = vld [vmem:[%s6353_s2 + $0x8] sm:$0xff] }
 0x2f9   :  { %4546 = vmatpush3.bf16.xpose.msra.mxu1 %v1525_v10  ;;  %4547 = vmatprep.mubr.msk.bf16.mxu1 %vm5048_vm0, %v6358_v3 }
 0x2fa   :  { %4557 = vmatprep.subr.bf16.mxu1 %v6358_v3 }
 0x300   :  { %4548 = vmatmul.mubr.msk.bf16.vlgmr.msra.gmra.mrb[48].mxu1 %vm102_vm1, %v1518_v13 }
 0x301   :  { %4559 = vmatprep.mubr.msk.bf16.mxu1 %vm5048_vm0, %v6358_v3  ;;  %4558 = vmatpush3.bf16.msra.mxu1 %v1727_v58 }
 0x302   :  { %4569 = vmatprep.subr.bf16.mxu1 %v6358_v3 }
 0x366   :  { %v5503_v59 = vpop.f32.mrb[12].mxu0 }
 0x367   :  { %v4459_v28 = vpop.f32.mrb[13].mxu0 }
 0x368   :  { %v754_v29 = vpop.f32.mrb[14].mxu0 }
 0x369   :  { %v4460_v31 = vpop.f32.mrb[15].mxu0 }
 0x36e   :  { %v5505_v33 = vpop.f32.mrb[20].mxu1 }
 0x36f   :  { %v4465_v62 = vpop.f32.mrb[21].mxu1 }
 0x370   :  { %v800_v36 = vpop.f32.mrb[22].mxu1 }
 0x371   :  { %v4466_v6 = vpop.f32.mrb[23].mxu1 }
 0x372   :  { %v5507_v37 = vpop.f32.mrb[16].mxu0 }
 0x373   :  { %v4471_v0 = vpop.f32.mrb[17].mxu0 }
 0x374   :  { %v846_v39 = vpop.f32.mrb[18].mxu0 }
 0x375   :  { %v4472_v9 = vpop.f32.mrb[19].mxu0 }
 0x376   :  { %v5509_v43 = vpop.f32.mrb[24].mxu1 }
 0x377   :  { %v4477_v45 = vpop.f32.mrb[25].mxu1 }
 0x378   :  { %v892_v47 = vpop.f32.mrb[26].mxu1 }
 0x379   :  { %v4478_v48 = vpop.f32.mrb[27].mxu1 }
 0x37a   :  { %v5511_v49 = vpop.f32.mrb[20].mxu0 }
 0x37b   :  { %v4483_v21 = vpop.f32.mrb[21].mxu0 }
 0x37c   :  { %v938_v41 = vpop.f32.mrb[22].mxu0 }
 0x37d   :  { %v4484_v50 = vpop.f32.mrb[23].mxu0 }
 0x37e   :  { %v5513_v51 = vpop.f32.mrb[28].mxu1 }
 0x37f   :  { %v4489_v38 = vpop.f32.mrb[29].mxu1 }
 0x380   :  { %v984_v40 = vpop.f32.mrb[30].mxu1 }
 0x381   :  { %v4490_v53 = vpop.f32.mrb[31].mxu1 }
 0x382   :  { %v5515_v30 = vpop.f32.mrb[24].mxu0 }
 0x383   :  { %v4495_v54 = vpop.f32.mrb[25].mxu0 }
 0x384   :  { %v1030_v55 = vpop.f32.mrb[26].mxu0 }
 0x385   :  { %v4496_v52 = vpop.f32.mrb[27].mxu0 }
 0x3a8   :  { %v1211_v46 = vpop.f32.mrb[28].mxu0 }
 0x3a9   :  { %v1212_v61 = vadd.f32 %v1211_v46, %v5229_v1  ;;  %v4507_v2 = vpop.f32.mrb[29].mxu0 }
 0x3aa   :  { %v1214_v56 = vpop.f32.mrb[30].mxu0 }
 0x3ab   :  { %v5524_v10 = vadd.f32 %v1212_v61, %v5520_v60  ;;  %v4508_v13 = vpop.f32.mrb[31].mxu0 }
 0x3ad   :  { %v1575_v17 = vsel %vm605_vm2, %v5524_v10, -inf }
 0x3ae   :  { %1576 = vmax.xlane.f32.xlu1 %v1575_v17 }
 0x3b3   :  { %v5528_v23 = vpop.f32.mrb[32].mxu1 }
 0x3b4   :  { %v4501_v58 = vpop.f32.mrb[33].mxu1  ;;  %v1311_v25 = vpop.f32.mrb[32].mxu0 }
 0x3b5   :  { %v1076_v28 = vpop.f32.mrb[34].mxu1  ;;  %v4519_v29 = vpop.f32.mrb[33].mxu0  ;;  %v1312_v0 = vadd.f32 %v1311_v25, %v5241_v22 }
 0x3b6   :  { %v4502_v31 = vpop.f32.mrb[35].mxu1  ;;  %v1314_v62 = vpop.f32.mrb[34].mxu0 }
 0x3b7   :  { %v4520_v36 = vpop.f32.mrb[35].mxu0  ;;  %v1569_v54 = vadd.f32 %v1312_v0, %v5520_v60 }
 0x3b9   :  { %v1581_v2 = vsel %vm605_vm2, %v1569_v54, -inf }
 0x3bb   :  { %v1261_v6 = vpop.f32.mrb[36].mxu1 }
 0x3bc   :  { %v1262_v39 = vadd.f32 %v1261_v6, %v5244_v24  ;;  %v4513_v9 = vpop.f32.mrb[37].mxu1  ;;  %v1411_v45 = vpop.f32.mrb[36].mxu0 }
 0x3bd   :  { %v1264_v47 = vpop.f32.mrb[38].mxu1  ;;  %v4531_v48 = vpop.f32.mrb[37].mxu0  ;;  %v1412_v40 = vadd.f32 %v1411_v45, %v5250_v27 }
 0x3be   :  { %v4514_v21 = vpop.f32.mrb[39].mxu1  ;;  %v1568_v41 = vadd.f32 %v1262_v39, %v5520_v60  ;;  %v1414_v50 = vpop.f32.mrb[38].mxu0 }
 0x3bf   :  { %v4532_v38 = vpop.f32.mrb[39].mxu0  ;;  %v1571_v56 = vadd.f32 %v1412_v40, %v5520_v60 }
 0x3c0   :  { %v1578_v53 = vsel %vm605_vm2, %v1568_v41, -inf }
 0x3c1   :  { %1579 = vmax.xlane.f32.xlu0 %v1578_v53  ;;  %v1587_v62 = vsel %vm605_vm2, %v1571_v56, -inf }
 0x3c3   :  { %v1361_v55 = vpop.f32.mrb[40].mxu1 }
 0x3c4   :  { %v1362_v52 = vadd.f32 %v1361_v55, %v5257_v42  ;;  %v4525_v46 = vpop.f32.mrb[41].mxu1  ;;  %v1511_v61 = vpop.f32.mrb[40].mxu0 }
 0x3c5   :  { %v1512_v13 = vadd.f32 %v1511_v61, %v5261_v44  ;;  %1582 = vmax.xlane.f32.xlu0 %v1581_v2  ;;  %v1364_v17 = vpop.f32.mrb[42].mxu1  ;;  %v4543_v58 = vpop.f32.mrb[41].mxu0 }
 0x3c6   :  { %v4526_v25 = vpop.f32.mrb[43].mxu1  ;;  %v1570_v28 = vadd.f32 %v1362_v52, %v5520_v60  ;;  %v1514_v29 = vpop.f32.mrb[42].mxu0 }
 0x3c7   :  { %v4544_v31 = vpop.f32.mrb[43].mxu0  ;;  %v5544_v6 = vadd.f32 %v1512_v13, %v5520_v60  ;;  %v5558_v2 = vpop.permute.xlu1 %1770 }
 0x3c8   :  { %v1584_v36 = vsel %vm605_vm2, %v1570_v28, -inf  ;;  %v5565_v29 = vpop.permute.xlu0 %1819 }
 0x3c9   :  { %1588 = vmax.xlane.f32.xlu0 %v1587_v62  ;;  %1585 = vmax.xlane.f32.xlu1 %v1584_v36  ;;  %v1593_v45 = vsel %vm605_vm2, %v5544_v6, -inf }
 0x3cb   :  { %v1461_v0 = vpop.f32.mrb[44].mxu1  ;;  %v5560_v13 = vpop.permute.xlu1 %1868 }
 0x3cc   :  { %v1462_v39 = vadd.f32 %v1461_v0, %v5272_v63  ;;  %v4537_v9 = vpop.f32.mrb[45].mxu1 }
 0x3cd   :  { %1594 = vmax.xlane.f32.xlu0 %v1593_v45  ;;  %v1464_v47 = vpop.f32.mrb[46].mxu1 }
 0x3ce   :  { %v4538_v48 = vpop.f32.mrb[47].mxu1  ;;  %v1572_v21 = vadd.f32 %v1462_v39, %v5520_v60 }
 0x3d0   :  { %v1590_v50 = vsel %vm605_vm2, %v1572_v21, -inf }
 0x3d1   :  { %1591 = vmax.xlane.f32.xlu1 %v1590_v50 }
 0x3d3   :  { %v1561_v38 = vpop.f32.mrb[48].mxu1 }
 0x3d4   :  { %v1562_v40 = vadd.f32 %v1561_v38, %v5279_v20  ;;  %v4549_v53 = vpop.f32.mrb[49].mxu1 }
 0x3d5   :  { %v1564_v55 = vpop.f32.mrb[50].mxu1 }
 0x3d6   :  { %v1574_v52 = vadd.f32 %v1562_v40, %v5520_v60  ;;  %v4550_v46 = vpop.f32.mrb[51].mxu1 }
 0x3d8   :  { %v1596_v61 = vsel %vm605_vm2, %v1574_v52, -inf }
 0x3d9   :  { %1597 = vmax.xlane.f32.xlu1 %v1596_v61 }
 0x3e3   :  { %1917 = vrot.lane.b32.xlu0 %v5414_v57, %s5052_s13 }
 0x3ea   :  { %1966 = vrot.lane.b32.xlu1 %v5427_v18, %s5052_s13 }
 0x43b   :  { %v1577_v17 = vpop.xlane.xlu1 %1576 }
 0x43c   :  { %v1599_v58 = vsub.f32 %v5524_v10, %v1577_v17 }
 0x43e   :  { %v1607_v25 = vmul.f32 1.442695, %v1599_v58 }
 0x440   :  { %4911 = vpow2.f32 %v1607_v25 }
 0x44a   :  { %v5563_v60 = vpop.eup %4911 }
 0x44b   :  { %v1623_v31 = vsel %vm605_vm2, %v5563_v60, 0.0 }
 0x44c   :  { %1624 = vadd.xlane.f32.xlu0 %v1623_v31 }
 0x44e   :  { %v1580_v62 = vpop.xlane.xlu0 %1579 }
 0x44f   :  { %v1600_v36 = vsub.f32 %v1568_v41, %v1580_v62 }
 0x451   :  { %v1609_v0 = vmul.f32 1.442695, %v1600_v36 }
 0x452   :  { %v1583_v39 = vpop.xlane.xlu0 %1582 }
 0x453   :  { %4913 = vpow2.f32 %v1609_v0  ;;  %v1601_v9 = vsub.f32 %v1569_v54, %v1583_v39 }
 0x455   :  { %v1611_v45 = vmul.f32 1.442695, %v1601_v9 }
 0x456   :  { %v1586_v47 = vpop.xlane.xlu1 %1585  ;;  %v1589_v48 = vpop.xlane.xlu0 %1588 }
 0x457   :  { %4915 = vpow2.f32 %v1611_v45  ;;  %v1602_v10 = vsub.f32 %v1570_v28, %v1586_v47  ;;  %v1603_v50 = vsub.f32 %v1571_v56, %v1589_v48 }
 0x459   :  { %v1613_v38 = vmul.f32 1.442695, %v1602_v10  ;;  %v1615_v40 = vmul.f32 1.442695, %v1603_v50 }
 0x45a   :  { %v1595_v62 = vpop.xlane.xlu0 %1594 }
 0x45b   :  { %4917 = vpow2.f32 %v1613_v38  ;;  %v1605_v36 = vsub.f32 %v5544_v6, %v1595_v62 }
 0x45c   :  { %4919 = vpow2.f32 %v1615_v40 }
 0x45d   :  { %v5569_v53 = vpop.eup %4913  ;;  %v1619_v0 = vmul.f32 1.442695, %v1605_v36  ;;  %v1825_v36 = vsel %vm713_vm3, %v5565_v29, 0 }
 0x45e   :  { %v1592_v55 = vpop.xlane.xlu1 %1591  ;;  %v1626_v41 = vsel %vm605_vm2, %v5569_v53, 0.0  ;;  %v1918_v6 = vpop.permute.xlu0 %1917 }
 0x45f   :  { %v1604_v46 = vsub.f32 %v1572_v21, %v1592_v55  ;;  %1627 = vadd.xlane.f32.xlu1 %v1626_v41 }
 0x461   :  { %v5573_v61 = vpop.eup %4915  ;;  %v1617_v54 = vmul.f32 1.442695, %v1604_v46  ;;  %v1776_v46 = vsel %vm713_vm3, %v5558_v2, 0 }
 0x462   :  { %v1629_v17 = vsel %vm605_vm2, %v5573_v61, 0.0 }
 0x463   :  { %4921 = vpow2.f32 %v1617_v54  ;;  %1630 = vadd.xlane.f32.xlu0 %v1629_v17 }
 0x464   :  { %4923 = vpow2.f32 %v1619_v0 }
 0x465   :  { %v5577_v56 = vpop.eup %4917 }
 0x466   :  { %v5579_v28 = vpop.eup %4919  ;;  %v1632_v58 = vsel %vm605_vm2, %v5577_v56, 0.0  ;;  %v1598_v39 = vpop.xlane.xlu1 %1597 }
 0x467   :  { %1633 = vadd.xlane.f32.xlu1 %v1632_v58  ;;  %v1635_v21 = vsel %vm605_vm2, %v5579_v28, 0.0  ;;  %v1606_v9 = vsub.f32 %v1574_v52, %v1598_v39 }
 0x468   :  { %1636 = vadd.xlane.f32.xlu0 %v1635_v21 }
 0x469   :  { %v1621_v45 = vmul.f32 1.442695, %v1606_v9 }
 0x46a   :  { %v1967_v41 = vpop.permute.xlu1 %1966 }
 0x46b   :  { %4925 = vpow2.f32 %v1621_v45 }
 0x46d   :  { %v5585_v25 = vpop.eup %4921 }
 0x46e   :  { %v1638_v31 = vsel %vm605_vm2, %v5585_v25, 0.0  ;;  %v5594_v47 = vpop.eup %4923 }
 0x46f   :  { %1639 = vadd.xlane.f32.xlu1 %v1638_v31  ;;  %v1641_v48 = vsel %vm605_vm2, %v5594_v47, 0.0 }
 0x475   :  { %v5598_v10 = vpop.eup %4925 }
 0x476   :  { %v1644_v50 = vsel %vm605_vm2, %v5598_v10, 0.0 }
 0x47e   :  { %2015 = vrot.lane.b32.xlu0 %v5438_v26, %s5052_s13 }
 0x480   :  { %2097 = vrot.lane.b32.xlu1 %v5103_v4, %s5053_s28 }
 0x49d   :  { %1642 = vadd.xlane.f32.xlu0 %v1641_v48  ;;  %v1874_v48 = vsel %vm713_vm3, %v5560_v13, 0 }
 0x4a4   :  { %1645 = vadd.xlane.f32.xlu1 %v1644_v50 }
 0x4b3   :  { %2147 = vrot.lane.b32.xlu0 %v5118_v7, %s5053_s28 }
 0x4b5   :  { %2095 = vrot.lane.b32.xlu1 %v5103_v4, %s5054_s30 }
 0x4b7   :  { %2145 = vrot.lane.b32.xlu0 %v5118_v7, %s5054_s30 }
 0x4b9   :  { %2197 = vrot.lane.b32.xlu1 %v5105_v5, %s5053_s28 }
 0x4bb   :  { %2247 = vrot.lane.b32.xlu0 %v5120_v8, %s5053_s28 }
 0x4bd   :  { %2195 = vrot.lane.b32.xlu1 %v5105_v5, %s5054_s30 }
 0x4bf   :  { %2245 = vrot.lane.b32.xlu0 %v5120_v8, %s5054_s30 }
 0x4c1   :  { %2297 = vrot.lane.b32.xlu1 %v5130_v11, %s5053_s28 }
 0x4c3   :  { %2347 = vrot.lane.b32.xlu0 %v5134_v12, %s5053_s28 }
 0x4c5   :  { %2295 = vrot.lane.b32.xlu1 %v5130_v11, %s5054_s30 }
 0x4c7   :  { %2345 = vrot.lane.b32.xlu0 %v5134_v12, %s5054_s30 }
 0x4c9   :  { %2397 = vrot.lane.b32.xlu1 %v5144_v15, %s5053_s28 }
 0x4cb   :  { %2447 = vrot.lane.b32.xlu0 %v5148_v16, %s5053_s28 }
 0x4cd   :  { %2395 = vrot.lane.b32.xlu1 %v5144_v15, %s5054_s30 }
 0x4cf   :  { %2445 = vrot.lane.b32.xlu0 %v5148_v16, %s5054_s30 }
 0x4d1   :  { %2647 = vrot.lane.b32.xlu1 %v5327_v19, %s5054_s30 }
 0x4d3   :  { %2599 = vrot.lane.b32.xlu0 %v5319_v14, %s5054_s30 }
 0x4d5   :  { %2695 = vrot.lane.b32.xlu1 %v5383_v34, %s5054_s30 }
 0x4d7   :  { %2743 = vrot.lane.b32.xlu0 %v5360_v32, %s5054_s30 }
 0x4d9   :  { %v1625_v52 = vpop.xlane.xlu0 %1624  ;;  %2791 = vrot.lane.b32.xlu1 %v5390_v35, %s5054_s30 }
 0x4da   :  { %4927 = vrcp.f32 %v1625_v52  ;;  %v1923_v52 = vsel %vm713_vm3, %v1918_v6, 0 }
 0x4e4   :  { %v4928_v38 = vpop.eup %4927 }
 0x4e5   :  { %v1648_v40 = vmul.f32 %v4928_v38, %v5563_v60  ;;  %v1972_v38 = vsel %vm713_vm3, %v1967_v41, 0 }
 0x4e7   :  { %v1663_v55 = vpack.c.bf16 %v1648_v40, %v1648_v40 }
 0x4e9   :  { %4554 = vmatmul.mubr.msk.bf16.vlgmr.msra.gmra.mrb[44].mxu0 %vm605_vm2, %v1663_v55 }
 0x4ea   :  { %4564 = vmatpush3.bf16.msra.mxu0 %v1776_v46  ;;  %4565 = vmatprep.mubr.msk.bf16.mxu0 %vm5048_vm0, %v6358_v3 }
 0x4eb   :  { %4575 = vmatprep.subr.bf16.mxu0 %v6358_v3 }
 0x4ec   :  { %v1628_v54 = vpop.xlane.xlu1 %1627 }
 0x4ed   :  { %4929 = vrcp.f32 %v1628_v54 }
 0x4f0   :  { %v1631_v17 = vpop.xlane.xlu0 %1630 }
 0x4f1   :  { %4931 = vrcp.f32 %v1631_v17 }
 0x4f4   :  { %v1634_v58 = vpop.xlane.xlu1 %1633 }
 0x4f5   :  { %4933 = vrcp.f32 %v1634_v58  ;;  %v1637_v60 = vpop.xlane.xlu0 %1636 }
 0x4f6   :  { %4935 = vrcp.f32 %v1637_v60 }
 0x4f7   :  { %v4930_v21 = vpop.eup %4929 }
 0x4f8   :  { %v1650_v31 = vmul.f32 %v4930_v21, %v5569_v53 }
 0x4f9   :  { %v2016_v55 = vpop.permute.xlu0 %2015 }
 0x4fa   :  { %v1664_v2 = vpack.c.bf16 %v1650_v31, %v1650_v31  ;;  %v2021_v6 = vsel %vm713_vm3, %v2016_v55, 0 }
 0x4fb   :  { %v4932_v62 = vpop.eup %4931 }
 0x4fc   :  { %4560 = vmatmul.mubr.msk.bf16.vlgmr.msra.gmra.mrb[52].mxu1 %vm605_vm2, %v1664_v2  ;;  %v1640_v0 = vpop.xlane.xlu1 %1639  ;;  %v1652_v39 = vmul.f32 %v4932_v62, %v5573_v61 }
 0x4fd   :  { %4570 = vmatpush3.bf16.msra.mxu1 %v1825_v36  ;;  %4937 = vrcp.f32 %v1640_v0  ;;  %4571 = vmatprep.mubr.msk.bf16.mxu1 %vm5048_vm0, %v6358_v3 }
 0x4fe   :  { %v1665_v9 = vpack.c.bf16 %v1652_v39, %v1652_v39  ;;  %4581 = vmatprep.subr.bf16.mxu1 %v6358_v3 }
 0x4ff   :  { %v4934_v45 = vpop.eup %4933 }
 0x500   :  { %v4936_v53 = vpop.eup %4935  ;;  %4566 = vmatmul.mubr.msk.bf16.vlgmr.msra.gmra.mrb[48].mxu0 %vm605_vm2, %v1665_v9  ;;  %v1654_v29 = vmul.f32 %v4934_v45, %v5577_v56 }
 0x501   :  { %4576 = vmatpush3.bf16.msra.mxu0 %v1874_v48  ;;  %4577 = vmatprep.mubr.msk.bf16.mxu0 %vm5048_vm0, %v6358_v3  ;;  %v1656_v50 = vmul.f32 %v4936_v53, %v5579_v28 }
 0x502   :  { %v1666_v61 = vpack.c.bf16 %v1654_v29, %v1654_v29  ;;  %4587 = vmatprep.subr.bf16.mxu0 %v6358_v3 }
 0x503   :  { %v1667_v13 = vpack.c.bf16 %v1656_v50, %v1656_v50 }
 0x504   :  { %4572 = vmatmul.mubr.msk.bf16.vlgmr.msra.gmra.mrb[56].mxu1 %vm605_vm2, %v1666_v61 }
 0x505   :  { %4582 = vmatpush3.bf16.msra.mxu1 %v1923_v52  ;;  %4583 = vmatprep.mubr.msk.bf16.mxu1 %vm5048_vm0, %v6358_v3 }
 0x506   :  { %4593 = vmatprep.subr.bf16.mxu1 %v6358_v3 }
 0x507   :  { %v4938_v56 = vpop.eup %4937 }
 0x508   :  { %4578 = vmatmul.mubr.msk.bf16.vlgmr.msra.gmra.mrb[52].mxu0 %vm605_vm2, %v1667_v13  ;;  %v1658_v40 = vmul.f32 %v4938_v56, %v5585_v25  ;;  %v2098_v25 = vpop.permute.xlu1 %2097 }
 0x509   :  { %4588 = vmatpush3.bf16.msra.mxu0 %v1972_v38  ;;  %4589 = vmatprep.mubr.msk.bf16.mxu0 %vm5048_vm0, %v6358_v3  ;;  %v2103_v62 = vsel %vm102_vm1, %v2098_v25, 0 }
 0x50a   :  { %v1668_v28 = vpack.c.bf16 %v1658_v40, %v1658_v40  ;;  %4599 = vmatprep.subr.bf16.mxu0 %v6358_v3 }
 0x50c   :  { %4584 = vmatmul.mubr.msk.bf16.vlgmr.msra.gmra.mrb[60].mxu1 %vm605_vm2, %v1668_v28 }
 0x50d   :  { %4594 = vmatpush3.bf16.msra.mxu1 %v2021_v6  ;;  %4595 = vmatprep.mubr.msk.bf16.mxu1 %vm5048_vm0, %v6358_v3 }
 0x50e   :  { %4605 = vmatprep.subr.bf16.mxu1 %v6358_v3 }
 0x52a   :  { %v1643_v41 = vpop.xlane.xlu0 %1642 }
 0x52b   :  { %4939 = vrcp.f32 %v1643_v41 }
 0x52e   :  { %v2148_v46 = vpop.permute.xlu0 %2147 }
 0x531   :  { %v1646_v54 = vpop.xlane.xlu1 %1645 }
 0x532   :  { %4941 = vrcp.f32 %v1646_v54  ;;  %v2146_v21 = vpop.permute.xlu0 %2145 }
 0x535   :  { %v4940_v17 = vpop.eup %4939  ;;  %v2096_v58 = vpop.permute.xlu1 %2095 }
 0x536   :  { %v1660_v60 = vmul.f32 %v4940_v17, %v5594_v47  ;;  %v2248_v0 = vpop.permute.xlu0 %2247  ;;  %v2153_v47 = vsel %vm102_vm1, %v2148_v46, 0 }
 0x538   :  { %v1669_v31 = vpack.c.bf16 %v1660_v60, %v1660_v60 }
 0x539   :  { %v2198_v2 = vpop.permute.xlu1 %2197 }
 0x53a   :  { %4590 = vmatmul.mubr.msk.bf16.vlgmr.msra.gmra.mrb[56].mxu0 %vm605_vm2, %v1669_v31  ;;  %v2203_v53 = vsel %vm102_vm1, %v2198_v2, 0  ;;  %v2246_v29 = vpop.permute.xlu0 %2245 }
 0x53b   :  { %4600 = vmatpush3.bf16.xpose.msra.mxu0 %v2103_v62  ;;  %4601 = vmatprep.mubr.msk.bf16.mxu0 %vm5048_vm0, %v6358_v3 }
 0x53c   :  { %v4942_v36 = vpop.eup %4941  ;;  %4611 = vmatprep.subr.bf16.mxu0 %v6358_v3 }
 0x53d   :  { %v1662_v39 = vmul.f32 %v4942_v36, %v5598_v10  ;;  %v2196_v9 = vpop.permute.xlu1 %2195  ;;  %v2253_v10 = vsel %vm102_vm1, %v2248_v0, 0 }
 0x53e   :  { %v2348_v52 = vpop.permute.xlu0 %2347 }
 0x53f   :  { %v1670_v45 = vpack.c.bf16 %v1662_v39, %v1662_v39  ;;  %v2353_v38 = vsel %vm102_vm1, %v2348_v52, 0 }
 0x541   :  { %4596 = vmatmul.mubr.msk.bf16.vlgmr.msra.gmra.mrb[64].mxu1 %vm605_vm2, %v1670_v45  ;;  %v2298_v48 = vpop.permute.xlu1 %2297 }
 0x542   :  { %4602 = vmatmul.mubr.msk.bf16.vlgmr.msra.gmra.mrb[60].mxu0 %vm102_vm1, %v2096_v58  ;;  %4606 = vmatpush3.bf16.xpose.msra.mxu1 %v2153_v47  ;;  %v2303_v50 = vsel %vm102_vm1, %v2298_v48, 0  ;;  %v2346_v56 = vpop.permute.xlu0 %2345 }
 0x543   :  { %4612 = vmatpush3.bf16.xpose.msra.mxu0 %v2203_v53  ;;  %4607 = vmatprep.mubr.msk.bf16.mxu1 %vm5048_vm0, %v6358_v3 }
 0x544   :  { %4613 = vmatprep.mubr.msk.bf16.mxu0 %vm5048_vm0, %v6358_v3  ;;  %4617 = vmatprep.subr.bf16.mxu1 %v6358_v3 }
 0x545   :  { %4623 = vmatprep.subr.bf16.mxu0 %v6358_v3  ;;  %v2296_v61 = vpop.permute.xlu1 %2295 }
 0x546   :  { %v2448_v55 = vpop.permute.xlu0 %2447 }
 0x547   :  { %v2453_v6 = vsel %vm102_vm1, %v2448_v55, 0 }
 0x549   :  { %4608 = vmatmul.mubr.msk.bf16.vlgmr.msra.gmra.mrb[68].mxu1 %vm102_vm1, %v2146_v21  ;;  %v2398_v13 = vpop.permute.xlu1 %2397 }
 0x54a   :  { %4614 = vmatmul.mubr.msk.bf16.vlgmr.msra.gmra.mrb[64].mxu0 %vm102_vm1, %v2196_v9  ;;  %4618 = vmatpush3.bf16.xpose.msra.mxu1 %v2253_v10  ;;  %v2403_v40 = vsel %vm102_vm1, %v2398_v13, 0  ;;  %v2446_v41 = vpop.permute.xlu0 %2445 }
 0x54b   :  { %4624 = vmatpush3.bf16.xpose.msra.mxu0 %v2303_v50  ;;  %4619 = vmatprep.mubr.msk.bf16.mxu1 %vm5048_vm0, %v6358_v3 }
 0x54c   :  { %4625 = vmatprep.mubr.msk.bf16.mxu0 %vm5048_vm0, %v6358_v3  ;;  %4629 = vmatprep.subr.bf16.mxu1 %v6358_v3 }
 0x54d   :  { %4635 = vmatprep.subr.bf16.mxu0 %v6358_v3  ;;  %v2396_v28 = vpop.permute.xlu1 %2395 }
 0x54e   :  { %v2600_v46 = vpop.permute.xlu0 %2599 }
 0x54f   :  { %v2605_v17 = vsel %vm713_vm3, %v2600_v46, 0 }
 0x551   :  { %4620 = vmatmul.mubr.msk.bf16.vlgmr.msra.gmra.mrb[72].mxu1 %vm102_vm1, %v2246_v29  ;;  %v2648_v25 = vpop.permute.xlu1 %2647 }
 0x552   :  { %4626 = vmatmul.mubr.msk.bf16.vlgmr.msra.gmra.mrb[68].mxu0 %vm102_vm1, %v2296_v61  ;;  %4630 = vmatpush3.bf16.xpose.msra.mxu1 %v2353_v38  ;;  %v2653_v54 = vsel %vm713_vm3, %v2648_v25, 0 }
 0x553   :  { %4636 = vmatpush3.bf16.xpose.msra.mxu0 %v2403_v40  ;;  %4631 = vmatprep.mubr.msk.bf16.mxu1 %vm5048_vm0, %v6358_v3 }
 0x554   :  { %4637 = vmatprep.mubr.msk.bf16.mxu0 %vm5048_vm0, %v6358_v3  ;;  %4641 = vmatprep.subr.bf16.mxu1 %v6358_v3 }
 0x555   :  { %4647 = vmatprep.subr.bf16.mxu0 %v6358_v3 }
 0x559   :  { %4632 = vmatmul.mubr.msk.bf16.vlgmr.msra.gmra.mrb[76].mxu1 %vm102_vm1, %v2346_v56 }
 0x55a   :  { %4638 = vmatmul.mubr.msk.bf16.vlgmr.msra.gmra.mrb[72].mxu0 %vm102_vm1, %v2396_v28  ;;  %4642 = vmatpush3.bf16.xpose.msra.mxu1 %v2453_v6 }
 0x55b   :  { %4643 = vmatprep.mubr.msk.bf16.mxu1 %vm5048_vm0, %v6358_v3  ;;  %4653 = vmatprep.subr.bf16.mxu1 %v6358_v3 }
 0x55c   :  { %4649 = vmatprep.mubr.msk.bf16.mxu0 %vm5048_vm0, %v6358_v3  ;;  %4648 = vmatpush3.bf16.msra.mxu0 %v2605_v17 }
 0x55d   :  { %4659 = vmatprep.subr.bf16.mxu0 %v6358_v3 }
 0x561   :  { %4644 = vmatmul.mubr.msk.bf16.vlgmr.msra.gmra.mrb[80].mxu1 %vm102_vm1, %v2446_v41 }
 0x562   :  { %4655 = vmatprep.mubr.msk.bf16.mxu1 %vm5048_vm0, %v6358_v3  ;;  %4654 = vmatpush3.bf16.msra.mxu1 %v2653_v54 }
 0x563   :  { %4665 = vmatprep.subr.bf16.mxu1 %v6358_v3 }
 0x5bc   :  { %v5731_v58 = vpop.f32.mrb[44].mxu0 }
 0x5bd   :  { %v4555_v60 = vpop.f32.mrb[45].mxu0 }
 0x5be   :  { %v1717_v21 = vpop.f32.mrb[46].mxu0  ;;  %v66_v60 = vld [vmem:[%s6353_s2 + $0x10] sm:$0xff] }
 0x5bf   :  { %v4556_v31 = vpop.f32.mrb[47].mxu0 }
 0x5cf   :  { %v5735_v2 = vpop.f32.mrb[52].mxu1 }
 0x5d0   :  { %v4561_v62 = vpop.f32.mrb[53].mxu1 }
 0x5d1   :  { %v1766_v36 = vpop.f32.mrb[54].mxu1 }
 0x5d2   :  { %v4562_v0 = vpop.f32.mrb[55].mxu1 }
 0x5d3   :  { %v5737_v39 = vpop.f32.mrb[48].mxu0 }
 0x5d4   :  { %v4567_v9 = vpop.f32.mrb[49].mxu0 }
 0x5d5   :  { %v1815_v47 = vpop.f32.mrb[50].mxu0 }
 0x5d6   :  { %v4568_v45 = vpop.f32.mrb[51].mxu0 }
 0x5d7   :  { %v5739_v53 = vpop.f32.mrb[56].mxu1 }
 0x5d8   :  { %v4573_v48 = vpop.f32.mrb[57].mxu1 }
 0x5d9   :  { %v1864_v29 = vpop.f32.mrb[58].mxu1 }
 0x5da   :  { %v4574_v10 = vpop.f32.mrb[59].mxu1 }
 0x5db   :  { %v5741_v61 = vpop.f32.mrb[52].mxu0 }
 0x5dc   :  { %v4579_v50 = vpop.f32.mrb[53].mxu0 }
 0x5dd   :  { %v1913_v52 = vpop.f32.mrb[54].mxu0 }
 0x5de   :  { %v4580_v13 = vpop.f32.mrb[55].mxu0 }
 0x5df   :  { %v5743_v56 = vpop.f32.mrb[60].mxu1 }
 0x5e0   :  { %v4585_v38 = vpop.f32.mrb[61].mxu1 }
 0x5e1   :  { %v1962_v40 = vpop.f32.mrb[62].mxu1 }
 0x5e2   :  { %v4586_v55 = vpop.f32.mrb[63].mxu1 }
 0x60d   :  { %v5745_v28 = vpop.f32.mrb[56].mxu0 }
 0x60e   :  { %v4591_v6 = vpop.f32.mrb[57].mxu0 }
 0x60f   :  { %v2011_v41 = vpop.f32.mrb[58].mxu0 }
 0x610   :  { %v4592_v25 = vpop.f32.mrb[59].mxu0 }
 0x614   :  { %v5747_v46 = vpop.f32.mrb[64].mxu1 }
 0x615   :  { %v2139_v54 = vpop.f32.mrb[60].mxu0  ;;  %v4597_v17 = vpop.f32.mrb[65].mxu1 }
 0x616   :  { %v2140_v21 = vadd.f32 %v2139_v54, %v5229_v1  ;;  %v2060_v31 = vpop.f32.mrb[66].mxu1  ;;  %v4603_v62 = vpop.f32.mrb[61].mxu0 }
 0x617   :  { %v4598_v36 = vpop.f32.mrb[67].mxu1  ;;  %v2142_v0 = vpop.f32.mrb[62].mxu0 }
 0x618   :  { %v4604_v9 = vpop.f32.mrb[63].mxu0  ;;  %v5753_v47 = vadd.f32 %v2140_v21, %v66_v60 }
 0x61a   :  { %v2503_v45 = vsel %vm605_vm2, %v5753_v47, -inf }
 0x61b   :  { %2504 = vmax.xlane.f32.xlu1 %v2503_v45 }
 0x61c   :  { %v2189_v48 = vpop.f32.mrb[68].mxu1 }
 0x61d   :  { %v2190_v29 = vadd.f32 %v2189_v48, %v5244_v24  ;;  %v2239_v10 = vpop.f32.mrb[64].mxu0  ;;  %v4609_v50 = vpop.f32.mrb[69].mxu1 }
 0x61e   :  { %v2240_v52 = vadd.f32 %v2239_v10, %v5241_v22  ;;  %v2192_v13 = vpop.f32.mrb[70].mxu1  ;;  %v4615_v38 = vpop.f32.mrb[65].mxu0 }
 0x61f   :  { %v4610_v40 = vpop.f32.mrb[71].mxu1  ;;  %v2242_v55 = vpop.f32.mrb[66].mxu0  ;;  %v2496_v6 = vadd.f32 %v2190_v29, %v66_v60 }
 0x620   :  { %v4616_v41 = vpop.f32.mrb[67].mxu0  ;;  %v2497_v54 = vadd.f32 %v2240_v52, %v66_v60 }
 0x621   :  { %v2506_v25 = vsel %vm605_vm2, %v2496_v6, -inf }
 0x622   :  { %2507 = vmax.xlane.f32.xlu0 %v2506_v25  ;;  %v2509_v36 = vsel %vm605_vm2, %v2497_v54, -inf }
 0x624   :  { %v2289_v17 = vpop.f32.mrb[72].mxu1 }
 0x625   :  { %v2290_v21 = vadd.f32 %v2289_v17, %v5257_v42  ;;  %v2339_v31 = vpop.f32.mrb[68].mxu0  ;;  %v4621_v62 = vpop.f32.mrb[73].mxu1 }
 0x626   :  { %v2340_v0 = vadd.f32 %v2339_v31, %v5250_v27  ;;  %2510 = vmax.xlane.f32.xlu0 %v2509_v36  ;;  %v2292_v9 = vpop.f32.mrb[74].mxu1  ;;  %v4627_v45 = vpop.f32.mrb[69].mxu0 }
 0x627   :  { %v4622_v48 = vpop.f32.mrb[75].mxu1  ;;  %v2342_v10 = vpop.f32.mrb[70].mxu0  ;;  %v2498_v29 = vadd.f32 %v2290_v21, %v66_v60 }
 0x628   :  { %v2499_v50 = vadd.f32 %v2340_v0, %v66_v60  ;;  %v4628_v13 = vpop.f32.mrb[71].mxu0 }
 0x629   :  { %v2512_v52 = vsel %vm605_vm2, %v2498_v29, -inf }
 0x62a   :  { %v2515_v38 = vsel %vm605_vm2, %v2499_v50, -inf  ;;  %2513 = vmax.xlane.f32.xlu1 %v2512_v52 }
 0x62b   :  { %2516 = vmax.xlane.f32.xlu0 %v2515_v38 }
 0x62c   :  { %v2389_v40 = vpop.f32.mrb[76].mxu1 }
 0x62d   :  { %v2390_v55 = vadd.f32 %v2389_v40, %v5272_v63  ;;  %v2439_v41 = vpop.f32.mrb[72].mxu0  ;;  %v4633_v25 = vpop.f32.mrb[77].mxu1 }
 0x62e   :  { %v2440_v17 = vadd.f32 %v2439_v41, %v5261_v44  ;;  %v2392_v31 = vpop.f32.mrb[78].mxu1  ;;  %v4639_v62 = vpop.f32.mrb[73].mxu0 }
 0x62f   :  { %v2500_v36 = vadd.f32 %v2390_v55, %v66_v60  ;;  %v4634_v9 = vpop.f32.mrb[79].mxu1  ;;  %v2442_v21 = vpop.f32.mrb[74].mxu0 }
 0x630   :  { %v5767_v0 = vadd.f32 %v2440_v17, %v66_v60  ;;  %v4640_v45 = vpop.f32.mrb[75].mxu0  ;;  %v5778_v17 = vpop.permute.xlu1 %2695 }
 0x631   :  { %v2518_v48 = vsel %vm605_vm2, %v2500_v36, -inf  ;;  %v5783_v21 = vpop.permute.xlu0 %2743 }
 0x632   :  { %v2521_v10 = vsel %vm605_vm2, %v5767_v0, -inf  ;;  %2519 = vmax.xlane.f32.xlu1 %v2518_v48 }
 0x633   :  { %2522 = vmax.xlane.f32.xlu0 %v2521_v10 }
 0x634   :  { %v2489_v13 = vpop.f32.mrb[80].mxu1  ;;  %v5780_v31 = vpop.permute.xlu1 %2791 }
 0x635   :  { %v2490_v52 = vadd.f32 %v2489_v13, %v5279_v20  ;;  %v4645_v38 = vpop.f32.mrb[81].mxu1 }
 0x636   :  { %v2492_v40 = vpop.f32.mrb[82].mxu1 }
 0x637   :  { %v2502_v41 = vadd.f32 %v2490_v52, %v66_v60  ;;  %v4646_v25 = vpop.f32.mrb[83].mxu1 }
 0x639   :  { %v2524_v55 = vsel %vm605_vm2, %v2502_v41, -inf }
 0x63a   :  { %2525 = vmax.xlane.f32.xlu1 %v2524_v55 }
 0x649   :  { %2839 = vrot.lane.b32.xlu0 %v5414_v57, %s5054_s30 }
 0x64b   :  { %2887 = vrot.lane.b32.xlu1 %v5427_v18, %s5054_s30 }
 0x6a8   :  { %v2505_v62 = vpop.xlane.xlu1 %2504 }
 0x6a9   :  { %v2527_v9 = vsub.f32 %v5753_v47, %v2505_v62 }
 0x6ab   :  { %v2535_v60 = vmul.f32 1.442695, %v2527_v9 }
 0x6ad   :  { %4943 = vpow2.f32 %v2535_v60 }
 0x6af   :  { %v2508_v45 = vpop.xlane.xlu0 %2507 }
 0x6b0   :  { %v2528_v48 = vsub.f32 %v2496_v6, %v2508_v45 }
 0x6b2   :  { %v2537_v10 = vmul.f32 1.442695, %v2528_v48 }
 0x6b3   :  { %v2511_v13 = vpop.xlane.xlu0 %2510 }
 0x6b4   :  { %4945 = vpow2.f32 %v2537_v10  ;;  %v2529_v52 = vsub.f32 %v2497_v54, %v2511_v13 }
 0x6b6   :  { %v2539_v38 = vmul.f32 1.442695, %v2529_v52 }
 0x6b7   :  { %v5785_v40 = vpop.eup %4943  ;;  %v2514_v25 = vpop.xlane.xlu1 %2513 }
 0x6b8   :  { %4947 = vpow2.f32 %v2539_v38  ;;  %v2530_v55 = vsub.f32 %v2498_v29, %v2514_v25  ;;  %v2517_v3 = vpop.xlane.xlu0 %2516  ;;  %v2551_v47 = vsel %vm605_vm2, %v5785_v40, 0.0 }
 0x6b9   :  { %v2531_v62 = vsub.f32 %v2499_v50, %v2517_v3  ;;  %2552 = vadd.xlane.f32.xlu0 %v2551_v47 }
 0x6ba   :  { %v2541_v9 = vmul.f32 1.442695, %v2530_v55 }
 0x6bb   :  { %v2543_v60 = vmul.f32 1.442695, %v2531_v62 }
 0x6bc   :  { %4949 = vpow2.f32 %v2541_v9 }
 0x6bd   :  { %4951 = vpow2.f32 %v2543_v60 }
 0x6be   :  { %v5789_v6 = vpop.eup %4945 }
 0x6bf   :  { %v2520_v45 = vpop.xlane.xlu1 %2519  ;;  %v2554_v54 = vsel %vm605_vm2, %v5789_v6, 0.0 }
 0x6c0   :  { %v2532_v48 = vsub.f32 %v2500_v36, %v2520_v45  ;;  %2555 = vadd.xlane.f32.xlu1 %v2554_v54  ;;  %v2523_v55 = vpop.xlane.xlu0 %2522 }
 0x6c1   :  { %v2533_v47 = vsub.f32 %v5767_v0, %v2523_v55  ;;  %v2749_v55 = vsel %vm713_vm3, %v5783_v21, 0 }
 0x6c2   :  { %v5793_v10 = vpop.eup %4947  ;;  %v2545_v29 = vmul.f32 1.442695, %v2532_v48 }
 0x6c3   :  { %v2557_v13 = vsel %vm605_vm2, %v5793_v10, 0.0  ;;  %v2547_v62 = vmul.f32 1.442695, %v2533_v47 }
 0x6c4   :  { %4953 = vpow2.f32 %v2545_v29  ;;  %2558 = vadd.xlane.f32.xlu0 %v2557_v13 }
 0x6c5   :  { %4955 = vpow2.f32 %v2547_v62 }
 0x6c6   :  { %v5797_v3 = vpop.eup %4949 }
 0x6c7   :  { %v5799_v50 = vpop.eup %4951  ;;  %v2560_v52 = vsel %vm605_vm2, %v5797_v3, 0.0  ;;  %v2526_v9 = vpop.xlane.xlu1 %2525 }
 0x6c8   :  { %2561 = vadd.xlane.f32.xlu1 %v2560_v52  ;;  %v2563_v36 = vsel %vm605_vm2, %v5799_v50, 0.0  ;;  %v2534_v60 = vsub.f32 %v2502_v41, %v2526_v9 }
 0x6c9   :  { %2564 = vadd.xlane.f32.xlu0 %v2563_v36 }
 0x6ca   :  { %v2549_v45 = vmul.f32 1.442695, %v2534_v60  ;;  %v2797_v60 = vsel %vm713_vm3, %v5780_v31, 0 }
 0x6cc   :  { %4957 = vpow2.f32 %v2549_v45 }
 0x6ce   :  { %v5805_v38 = vpop.eup %4953 }
 0x6cf   :  { %v2566_v25 = vsel %vm605_vm2, %v5805_v38, 0.0  ;;  %v5814_v54 = vpop.eup %4955 }
 0x6d0   :  { %2567 = vadd.xlane.f32.xlu1 %v2566_v25  ;;  %v2569_v48 = vsel %vm605_vm2, %v5814_v54, 0.0 }
 0x6d6   :  { %v5818_v29 = vpop.eup %4957 }
 0x6d7   :  { %v2572_v13 = vsel %vm605_vm2, %v5818_v29, 0.0 }
 0x6df   :  { %2935 = vrot.lane.b32.xlu0 %v5438_v26, %s5054_s30 }
 0x6e1   :  { %3017 = vrot.lane.b32.xlu1 %v5103_v4, %s5055_s8 }
 0x6fe   :  { %2570 = vadd.xlane.f32.xlu0 %v2569_v48 }
 0x705   :  { %2573 = vadd.xlane.f32.xlu1 %v2572_v13 }
 0x714   :  { %3067 = vrot.lane.b32.xlu0 %v5118_v7, %s5055_s8 }
 0x716   :  { %3015 = vrot.lane.b32.xlu1 %v5103_v4, %s5056_s9  ;;  %v2840_v4 = vpop.permute.xlu0 %2839 }
 0x717   :  { %v2845_v48 = vsel %vm713_vm3, %v2840_v4, 0 }
 0x718   :  { %3065 = vrot.lane.b32.xlu0 %v5118_v7, %s5056_s9  ;;  %v2888_v7 = vpop.permute.xlu1 %2887 }
 0x719   :  { %v2893_v13 = vsel %vm713_vm3, %v2888_v7, 0 }
 0x71a   :  { %3117 = vrot.lane.b32.xlu1 %v5105_v5, %s5055_s8 }
 0x71c   :  { %3167 = vrot.lane.b32.xlu0 %v5120_v8, %s5055_s8 }
 0x71e   :  { %3115 = vrot.lane.b32.xlu1 %v5105_v5, %s5056_s9 }
 0x720   :  { %3165 = vrot.lane.b32.xlu0 %v5120_v8, %s5056_s9 }
 0x722   :  { %3217 = vrot.lane.b32.xlu1 %v5130_v11, %s5055_s8 }
 0x724   :  { %3267 = vrot.lane.b32.xlu0 %v5134_v12, %s5055_s8 }
 0x726   :  { %3215 = vrot.lane.b32.xlu1 %v5130_v11, %s5056_s9 }
 0x728   :  { %3265 = vrot.lane.b32.xlu0 %v5134_v12, %s5056_s9 }
 0x72a   :  { %3317 = vrot.lane.b32.xlu1 %v5144_v15, %s5055_s8 }
 0x72c   :  { %3367 = vrot.lane.b32.xlu0 %v5148_v16, %s5055_s8 }
 0x72e   :  { %3315 = vrot.lane.b32.xlu1 %v5144_v15, %s5056_s9 }
 0x730   :  { %3365 = vrot.lane.b32.xlu0 %v5148_v16, %s5056_s9  ;;  %v2701_v16 = vsel %vm713_vm3, %v5778_v17, 0 }
 0x732   :  { %3567 = vrot.lane.b32.xlu1 %v5327_v19, %s5056_s9  ;;  %v6360_v19 = vmov 0.0  }
 0x734   :  { %3519 = vrot.lane.b32.xlu0 %v5319_v14, %s5056_s9 }
 0x746   :  { %v2553_v5 = vpop.xlane.xlu0 %2552 }
 0x747   :  { %4959 = vrcp.f32 %v2553_v5 }
 0x74d   :  { %v2556_v8 = vpop.xlane.xlu1 %2555 }
 0x74e   :  { %4961 = vrcp.f32 %v2556_v8 }
 0x751   :  { %v4960_v11 = vpop.eup %4959  ;;  %v2559_v12 = vpop.xlane.xlu0 %2558 }
 0x752   :  { %v2576_v0 = vmul.f32 %v4960_v11, %v5785_v40  ;;  %4963 = vrcp.f32 %v2559_v12 }
 0x754   :  { %v2591_v15 = vpack.c.bf16 %v2576_v0, %v2576_v0 }
 0x755   :  { %v2562_v41 = vpop.xlane.xlu1 %2561 }
 0x756   :  { %4965 = vrcp.f32 %v2562_v41  ;;  %4650 = vmatmul.mubr.msk.bf16.vlgmr.msra.gmra.mrb[76].mxu0 %vm605_vm2, %v2591_v15  ;;  %v2565_v14 = vpop.xlane.xlu0 %2564 }
 0x757   :  { %4660 = vmatpush3.bf16.msra.mxu0 %v2701_v16  ;;  %4967 = vrcp.f32 %v2565_v14  ;;  %4661 = vmatprep.mubr.msk.bf16.mxu0 %vm5048_vm0, %v6360_v19 }
 0x758   :  { %v4962_v52 = vpop.eup %4961  ;;  %4671 = vmatprep.subr.bf16.mxu0 %v6360_v19 }
 0x759   :  { %v2578_v40 = vmul.f32 %v4962_v52, %v5789_v6 }
 0x75b   :  { %v2592_v36 = vpack.c.bf16 %v2578_v40, %v2578_v40 }
 0x75c   :  { %v4964_v25 = vpop.eup %4963 }
 0x75d   :  { %v2580_v17 = vmul.f32 %v4964_v25, %v5793_v10  ;;  %4656 = vmatmul.mubr.msk.bf16.vlgmr.msra.gmra.mrb[84].mxu1 %vm605_vm2, %v2592_v36  ;;  %v2568_v47 = vpop.xlane.xlu1 %2567 }
 0x75e   :  { %4666 = vmatpush3.bf16.msra.mxu1 %v2749_v55  ;;  %4969 = vrcp.f32 %v2568_v47  ;;  %4667 = vmatprep.mubr.msk.bf16.mxu1 %vm5048_vm0, %v6360_v19 }
 0x75f   :  { %v2593_v62 = vpack.c.bf16 %v2580_v17, %v2580_v17  ;;  %4677 = vmatprep.subr.bf16.mxu1 %v6360_v19 }
 0x760   :  { %v4966_v9 = vpop.eup %4965 }
 0x761   :  { %v4968_v6 = vpop.eup %4967  ;;  %v2582_v21 = vmul.f32 %v4966_v9, %v5797_v3  ;;  %4662 = vmatmul.mubr.msk.bf16.vlgmr.msra.gmra.mrb[80].mxu0 %vm605_vm2, %v2593_v62  ;;  %v3018_v7 = vpop.permute.xlu1 %3017 }
 0x762   :  { %4672 = vmatpush3.bf16.msra.mxu0 %v2797_v60  ;;  %4673 = vmatprep.mubr.msk.bf16.mxu0 %vm5048_vm0, %v6360_v19  ;;  %v2584_v10 = vmul.f32 %v4968_v6, %v5799_v50  ;;  %v2936_v50 = vpop.permute.xlu0 %2935  ;;  %v3023_v40 = vsel %vm102_vm1, %v3018_v7, 0 }
 0x763   :  { %v2594_v45 = vpack.c.bf16 %v2582_v21, %v2582_v21  ;;  %4683 = vmatprep.subr.bf16.mxu0 %v6360_v19  ;;  %v2941_v8 = vsel %vm713_vm3, %v2936_v50, 0 }
 0x764   :  { %v2595_v31 = vpack.c.bf16 %v2584_v10, %v2584_v10 }
 0x765   :  { %4668 = vmatmul.mubr.msk.bf16.vlgmr.msra.gmra.mrb[88].mxu1 %vm605_vm2, %v2594_v45 }
 0x766   :  { %4678 = vmatpush3.bf16.msra.mxu1 %v2845_v48  ;;  %4679 = vmatprep.mubr.msk.bf16.mxu1 %vm5048_vm0, %v6360_v19 }
 0x767   :  { %4689 = vmatprep.subr.bf16.mxu1 %v6360_v19 }
 0x768   :  { %v4970_v3 = vpop.eup %4969 }
 0x769   :  { %v2586_v5 = vmul.f32 %v4970_v3, %v5805_v38  ;;  %4674 = vmatmul.mubr.msk.bf16.vlgmr.msra.gmra.mrb[84].mxu0 %vm605_vm2, %v2595_v31 }
 0x76a   :  { %4684 = vmatpush3.bf16.msra.mxu0 %v2893_v13  ;;  %4685 = vmatprep.mubr.msk.bf16.mxu0 %vm5048_vm0, %v6360_v19 }
 0x76b   :  { %v2596_v4 = vpack.c.bf16 %v2586_v5, %v2586_v5  ;;  %4695 = vmatprep.subr.bf16.mxu0 %v6360_v19 }
 0x76d   :  { %4680 = vmatmul.mubr.msk.bf16.vlgmr.msra.gmra.mrb[92].mxu1 %vm605_vm2, %v2596_v4 }
 0x76e   :  { %4690 = vmatpush3.bf16.msra.mxu1 %v2941_v8  ;;  %4691 = vmatprep.mubr.msk.bf16.mxu1 %vm5048_vm0, %v6360_v19 }
 0x76f   :  { %4701 = vmatprep.subr.bf16.mxu1 %v6360_v19 }
 0x78b   :  { %v2571_v38 = vpop.xlane.xlu0 %2570 }
 0x78c   :  { %4971 = vrcp.f32 %v2571_v38 }
 0x78f   :  { %v3068_v11 = vpop.permute.xlu0 %3067 }
 0x792   :  { %v2574_v12 = vpop.xlane.xlu1 %2573 }
 0x793   :  { %4973 = vrcp.f32 %v2574_v12  ;;  %v3066_v16 = vpop.permute.xlu0 %3065 }
 0x796   :  { %v4972_v0 = vpop.eup %4971  ;;  %v3016_v15 = vpop.permute.xlu1 %3015 }
 0x797   :  { %v2588_v41 = vmul.f32 %v4972_v0, %v5814_v54  ;;  %v3168_v25 = vpop.permute.xlu0 %3167  ;;  %v3073_v54 = vsel %vm102_vm1, %v3068_v11, 0 }
 0x799   :  { %v2597_v14 = vpack.c.bf16 %v2588_v41, %v2588_v41 }
 0x79a   :  { %v3118_v52 = vpop.permute.xlu1 %3117 }
 0x79b   :  { %4686 = vmatmul.mubr.msk.bf16.vlgmr.msra.gmra.mrb[88].mxu0 %vm605_vm2, %v2597_v14  ;;  %v3123_v62 = vsel %vm102_vm1, %v3118_v52, 0  ;;  %v3166_v6 = vpop.permute.xlu0 %3165 }
 0x79c   :  { %4696 = vmatpush3.bf16.xpose.msra.mxu0 %v3023_v40  ;;  %4697 = vmatprep.mubr.msk.bf16.mxu0 %vm5048_vm0, %v6360_v19 }
 0x79d   :  { %v4974_v36 = vpop.eup %4973  ;;  %4707 = vmatprep.subr.bf16.mxu0 %v6360_v19 }
 0x79e   :  { %v2590_v55 = vmul.f32 %v4974_v36, %v5818_v29  ;;  %v3116_v17 = vpop.permute.xlu1 %3115  ;;  %v3173_v29 = vsel %vm102_vm1, %v3168_v25, 0 }
 0x79f   :  { %v3268_v10 = vpop.permute.xlu0 %3267 }
 0x7a0   :  { %v2598_v47 = vpack.c.bf16 %v2590_v55, %v2590_v55  ;;  %v3273_v31 = vsel %vm102_vm1, %v3268_v10, 0 }
 0x7a2   :  { %4692 = vmatmul.mubr.msk.bf16.vlgmr.msra.gmra.mrb[96].mxu1 %vm605_vm2, %v2598_v47  ;;  %v3218_v9 = vpop.permute.xlu1 %3217 }
 0x7a3   :  { %4698 = vmatmul.mubr.msk.bf16.vlgmr.msra.gmra.mrb[92].mxu0 %vm102_vm1, %v3016_v15  ;;  %4702 = vmatpush3.bf16.xpose.msra.mxu1 %v3073_v54  ;;  %v3223_v21 = vsel %vm102_vm1, %v3218_v9, 0  ;;  %v3266_v48 = vpop.permute.xlu0 %3265 }
 0x7a4   :  { %4708 = vmatpush3.bf16.xpose.msra.mxu0 %v3123_v62  ;;  %4703 = vmatprep.mubr.msk.bf16.mxu1 %vm5048_vm0, %v6360_v19 }
 0x7a5   :  { %4709 = vmatprep.mubr.msk.bf16.mxu0 %vm5048_vm0, %v6360_v19  ;;  %4713 = vmatprep.subr.bf16.mxu1 %v6360_v19 }
 0x7a6   :  { %4719 = vmatprep.subr.bf16.mxu0 %v6360_v19  ;;  %v3216_v60 = vpop.permute.xlu1 %3215 }
 0x7a7   :  { %v3368_v13 = vpop.permute.xlu0 %3367 }
 0x7a8   :  { %v3373_v50 = vsel %vm102_vm1, %v3368_v13, 0 }
 0x7aa   :  { %4704 = vmatmul.mubr.msk.bf16.vlgmr.msra.gmra.mrb[100].mxu1 %vm102_vm1, %v3066_v16  ;;  %v3318_v45 = vpop.permute.xlu1 %3317 }
 0x7ab   :  { %4710 = vmatmul.mubr.msk.bf16.vlgmr.msra.gmra.mrb[96].mxu0 %vm102_vm1, %v3116_v17  ;;  %4714 = vmatpush3.bf16.xpose.msra.mxu1 %v3173_v29  ;;  %v3323_v3 = vsel %vm102_vm1, %v3318_v45, 0  ;;  %v3366_v4 = vpop.permute.xlu0 %3365 }
 0x7ac   :  { %4720 = vmatpush3.bf16.xpose.msra.mxu0 %v3223_v21  ;;  %4715 = vmatprep.mubr.msk.bf16.mxu1 %vm5048_vm0, %v6360_v19 }
 0x7ad   :  { %4721 = vmatprep.mubr.msk.bf16.mxu0 %vm5048_vm0, %v6360_v19  ;;  %4725 = vmatprep.subr.bf16.mxu1 %v6360_v19 }
 0x7ae   :  { %4731 = vmatprep.subr.bf16.mxu0 %v6360_v19  ;;  %v3316_v5 = vpop.permute.xlu1 %3315 }
 0x7af   :  { %v3520_v38 = vpop.permute.xlu0 %3519 }
 0x7b0   :  { %v3525_v11 = vsel %vm713_vm3, %v3520_v38, 0 }
 0x7b2   :  { %4716 = vmatmul.mubr.msk.bf16.vlgmr.msra.gmra.mrb[104].mxu1 %vm102_vm1, %v3166_v6  ;;  %v3568_v8 = vpop.permute.xlu1 %3567 }
 0x7b3   :  { %4722 = vmatmul.mubr.msk.bf16.vlgmr.msra.gmra.mrb[100].mxu0 %vm102_vm1, %v3216_v60  ;;  %4726 = vmatpush3.bf16.xpose.msra.mxu1 %v3273_v31  ;;  %v3573_v7 = vsel %vm713_vm3, %v3568_v8, 0  ;;  %v5966_v8 = vld [vmem:[%s6353_s2 + $0x18] sm:$0xff] }
 0x7b4   :  { %4732 = vmatpush3.bf16.xpose.msra.mxu0 %v3323_v3  ;;  %4727 = vmatprep.mubr.msk.bf16.mxu1 %vm5048_vm0, %v6360_v19 }
 0x7b5   :  { %4733 = vmatprep.mubr.msk.bf16.mxu0 %vm5048_vm0, %v6360_v19  ;;  %4737 = vmatprep.subr.bf16.mxu1 %v6360_v19 }
 0x7b6   :  { %4743 = vmatprep.subr.bf16.mxu0 %v6360_v19 }
 0x7ba   :  { %4728 = vmatmul.mubr.msk.bf16.vlgmr.msra.gmra.mrb[108].mxu1 %vm102_vm1, %v3266_v48 }
 0x7bb   :  { %4734 = vmatmul.mubr.msk.bf16.vlgmr.msra.gmra.mrb[104].mxu0 %vm102_vm1, %v3316_v5  ;;  %4738 = vmatpush3.bf16.xpose.msra.mxu1 %v3373_v50 }
 0x7bc   :  { %4739 = vmatprep.mubr.msk.bf16.mxu1 %vm5048_vm0, %v6360_v19  ;;  %4749 = vmatprep.subr.bf16.mxu1 %v6360_v19 }
 0x7bd   :  { %4745 = vmatprep.mubr.msk.bf16.mxu0 %vm5048_vm0, %v6360_v19  ;;  %4744 = vmatpush3.bf16.msra.mxu0 %v3525_v11 }
 0x7be   :  { %4755 = vmatprep.subr.bf16.mxu0 %v6360_v19 }
 0x7c2   :  { %4740 = vmatmul.mubr.msk.bf16.vlgmr.msra.gmra.mrb[112].mxu1 %vm102_vm1, %v3366_v4 }
 0x7c3   :  { %4751 = vmatprep.mubr.msk.bf16.mxu1 %vm5048_vm0, %v6360_v19  ;;  %4750 = vmatpush3.bf16.msra.mxu1 %v3573_v7 }
 0x7c4   :  { %4761 = vmatprep.subr.bf16.mxu1 %v6360_v19 }
 0x829   :  { %v5947_v12 = vpop.f32.mrb[76].mxu0 }
 0x82a   :  { %v4651_v0 = vpop.f32.mrb[77].mxu0 }
 0x82b   :  { %v2644_v15 = vpop.f32.mrb[78].mxu0 }
 0x82c   :  { %v4652_v41 = vpop.f32.mrb[79].mxu0 }
 0x830   :  { %v5949_v16 = vpop.f32.mrb[84].mxu1 }
 0x831   :  { %v4657_v14 = vpop.f32.mrb[85].mxu1 }
 0x832   :  { %v2692_v52 = vpop.f32.mrb[86].mxu1 }
 0x833   :  { %v4658_v40 = vpop.f32.mrb[87].mxu1 }
 0x834   :  { %v5951_v36 = vpop.f32.mrb[80].mxu0 }
 0x835   :  { %v4663_v25 = vpop.f32.mrb[81].mxu0 }
 0x836   :  { %v2740_v55 = vpop.f32.mrb[82].mxu0 }
 0x837   :  { %v4664_v17 = vpop.f32.mrb[83].mxu0 }
 0x838   :  { %v5953_v54 = vpop.f32.mrb[88].mxu1 }
 0x839   :  { %v4669_v47 = vpop.f32.mrb[89].mxu1 }
 0x83a   :  { %v2788_v62 = vpop.f32.mrb[90].mxu1 }
 0x83b   :  { %v4670_v9 = vpop.f32.mrb[91].mxu1 }
 0x83c   :  { %v5955_v6 = vpop.f32.mrb[84].mxu0 }
 0x83d   :  { %v4675_v29 = vpop.f32.mrb[85].mxu0 }
 0x83e   :  { %v2836_v60 = vpop.f32.mrb[86].mxu0 }
 0x83f   :  { %v4676_v21 = vpop.f32.mrb[87].mxu0 }
 0x840   :  { %v5957_v10 = vpop.f32.mrb[92].mxu1 }
 0x841   :  { %v4681_v45 = vpop.f32.mrb[93].mxu1 }
 0x842   :  { %v2884_v48 = vpop.f32.mrb[94].mxu1 }
 0x843   :  { %v4682_v31 = vpop.f32.mrb[95].mxu1 }
 0x86e   :  { %v5959_v3 = vpop.f32.mrb[88].mxu0 }
 0x86f   :  { %v4687_v13 = vpop.f32.mrb[89].mxu0 }
 0x870   :  { %v2932_v5 = vpop.f32.mrb[90].mxu0 }
 0x871   :  { %v4688_v50 = vpop.f32.mrb[91].mxu0 }
 0x875   :  { %v5961_v4 = vpop.f32.mrb[96].mxu1 }
 0x876   :  { %v3059_v38 = vpop.f32.mrb[92].mxu0  ;;  %v4693_v7 = vpop.f32.mrb[97].mxu1 }
 0x877   :  { %v3060_v11 = vadd.f32 %v3059_v38, %v5229_v1  ;;  %v2980_v0 = vpop.f32.mrb[98].mxu1  ;;  %v4699_v15 = vpop.f32.mrb[93].mxu0 }
 0x878   :  { %v4694_v41 = vpop.f32.mrb[99].mxu1  ;;  %v3062_v14 = vpop.f32.mrb[94].mxu0 }
 0x879   :  { %v5970_v52 = vadd.f32 %v3060_v11, %v5966_v8  ;;  %v4700_v40 = vpop.f32.mrb[95].mxu0 }
 0x87b   :  { %v3423_v25 = vsel %vm605_vm2, %v5970_v52, -inf }
 0x87c   :  { %3424 = vmax.xlane.f32.xlu1 %v3423_v25 }
 0x87d   :  { %v3109_v55 = vpop.f32.mrb[100].mxu1 }
 0x87e   :  { %v3110_v17 = vadd.f32 %v3109_v55, %v5244_v24  ;;  %v3159_v47 = vpop.f32.mrb[96].mxu0  ;;  %v4705_v62 = vpop.f32.mrb[101].mxu1 }
 0x87f   :  { %v3160_v9 = vadd.f32 %v3159_v47, %v5241_v22  ;;  %v3112_v1 = vpop.f32.mrb[102].mxu1  ;;  %v4711_v29 = vpop.f32.mrb[97].mxu0 }
 0x880   :  { %v3416_v60 = vadd.f32 %v3110_v17, %v5966_v8  ;;  %v4706_v21 = vpop.f32.mrb[103].mxu1  ;;  %v3162_v45 = vpop.f32.mrb[98].mxu0 }
 0x881   :  { %v4712_v48 = vpop.f32.mrb[99].mxu0  ;;  %v3417_v31 = vadd.f32 %v3160_v9, %v5966_v8 }
 0x882   :  { %v3426_v13 = vsel %vm605_vm2, %v3416_v60, -inf }
 0x883   :  { %3427 = vmax.xlane.f32.xlu0 %v3426_v13  ;;  %v3429_v38 = vsel %vm605_vm2, %v3417_v31, -inf }
 0x885   :  { %v3209_v5 = vpop.f32.mrb[104].mxu1 }
 0x886   :  { %v3210_v50 = vadd.f32 %v3209_v5, %v5257_v42  ;;  %v3259_v24 = vpop.f32.mrb[100].mxu0  ;;  %v4717_v7 = vpop.f32.mrb[105].mxu1 }
 0x887   :  { %v3260_v22 = vadd.f32 %v3259_v24, %v5250_v27  ;;  %3430 = vmax.xlane.f32.xlu0 %v3429_v38  ;;  %v4723_v11 = vpop.f32.mrb[101].mxu0  ;;  %v3212_v0 = vpop.f32.mrb[106].mxu1 }
 0x888   :  { %v5983_v15 = vadd.f32 %v3210_v50, %v5966_v8  ;;  %v3262_v41 = vpop.f32.mrb[102].mxu0  ;;  %v4718_v14 = vpop.f32.mrb[107].mxu1 }
 0x889   :  { %v5986_v40 = vadd.f32 %v3260_v22, %v5966_v8  ;;  %v4724_v25 = vpop.f32.mrb[103].mxu0 }
 0x88a   :  { %v3432_v42 = vsel %vm605_vm2, %v5983_v15, -inf }
 0x88b   :  { %v3435_v55 = vsel %vm605_vm2, %v5986_v40, -inf  ;;  %3433 = vmax.xlane.f32.xlu1 %v3432_v42 }
 0x88c   :  { %3436 = vmax.xlane.f32.xlu0 %v3435_v55 }
 0x88d   :  { %v3309_v27 = vpop.f32.mrb[108].mxu1 }
 0x88e   :  { %v3310_v17 = vadd.f32 %v3309_v27, %v5272_v63  ;;  %v3359_v47 = vpop.f32.mrb[104].mxu0  ;;  %v4729_v62 = vpop.f32.mrb[109].mxu1 }
 0x88f   :  { %v3360_v9 = vadd.f32 %v3359_v47, %v5261_v44  ;;  %v3312_v1 = vpop.f32.mrb[110].mxu1  ;;  %v4735_v29 = vpop.f32.mrb[105].mxu0 }
 0x890   :  { %v3420_v21 = vadd.f32 %v3310_v17, %v5966_v8  ;;  %v4730_v45 = vpop.f32.mrb[111].mxu1  ;;  %v3362_v48 = vpop.f32.mrb[106].mxu0 }
 0x891   :  { %v3421_v13 = vadd.f32 %v3360_v9, %v5966_v8  ;;  %v4736_v5 = vpop.f32.mrb[107].mxu0 }
 0x892   :  { %v3438_v50 = vsel %vm605_vm2, %v3420_v21, -inf }
 0x893   :  { %v3441_v24 = vsel %vm605_vm2, %v3421_v13, -inf  ;;  %3439 = vmax.xlane.f32.xlu1 %v3438_v50 }
 0x894   :  { %3442 = vmax.xlane.f32.xlu0 %v3441_v24 }
 0x895   :  { %v3409_v63 = vpop.f32.mrb[112].mxu1 }
 0x896   :  { %v3410_v38 = vadd.f32 %v3409_v63, %v5279_v20  ;;  %v4741_v7 = vpop.f32.mrb[113].mxu1 }
 0x897   :  { %v3412_v44 = vpop.f32.mrb[114].mxu1 }
 0x898   :  { %v3422_v22 = vadd.f32 %v3410_v38, %v5966_v8  ;;  %v4742_v11 = vpop.f32.mrb[115].mxu1 }
 0x89a   :  { %v3444_v0 = vsel %vm605_vm2, %v3422_v22, -inf }
 0x89b   :  { %3445 = vmax.xlane.f32.xlu1 %v3444_v0 }
 0x8aa   :  { %3663 = vrot.lane.b32.xlu0 %v5360_v32, %s5056_s9 }
 0x8ac   :  { %3615 = vrot.lane.b32.xlu1 %v5383_v34, %s5056_s9 }
 0x909   :  { %v3425_v41 = vpop.xlane.xlu1 %3424 }
 0x90a   :  { %v3447_v14 = vsub.f32 %v5970_v52, %v3425_v41 }
 0x90c   :  { %v3455_v25 = vmul.f32 1.442695, %v3447_v14  ;;  %v5041_v14 = vld [vmem:[%s6351_s0 + $0x18] sm:$0xff] }
 0x90e   :  { %4975 = vpow2.f32 %v3455_v25  ;;  %v4211_v25 = vmul.f32 -1.442695, %v5041_v14 }
 0x910   :  { %v3428_v20 = vpop.xlane.xlu0 %3427 }
 0x911   :  { %v3448_v42 = vsub.f32 %v3416_v60, %v3428_v20 }
 0x913   :  { %v3457_v55 = vmul.f32 1.442695, %v3448_v42 }
 0x914   :  { %v3431_v27 = vpop.xlane.xlu0 %3430 }
 0x915   :  { %4977 = vpow2.f32 %v3457_v55  ;;  %v3449_v8 = vsub.f32 %v3417_v31, %v3431_v27 }
 0x917   :  { %v3459_v17 = vmul.f32 1.442695, %v3449_v8  ;;  %v5042_v8 = vld [vmem:[%s6351_s0 + $0x38] sm:$0xff] }
 0x918   :  { %v6006_v47 = vpop.eup %4975  ;;  %v3434_v31 = vpop.xlane.xlu1 %3433 }
 0x919   :  { %4979 = vpow2.f32 %v3459_v17  ;;  %v3471_v32 = vsel %vm605_vm2, %v6006_v47, 0.0  ;;  %v3450_v9 = vsub.f32 %v5983_v15, %v3434_v31  ;;  %v3437_v1 = vpop.xlane.xlu0 %3436  ;;  %v5039_v15 = vld [vmem:[%s6351_s0 + $0x8] sm:$0xff]  ;;  %v4213_v17 = vmul.f32 -1.442695, %v5042_v8 }
 0x91a   :  { %3472 = vadd.xlane.f32.xlu0 %v3471_v32  ;;  %v3451_v45 = vsub.f32 %v5986_v40, %v3437_v1  ;;  %v4210_v40 = vmul.f32 -1.442695, %v5039_v15 }
 0x91b   :  { %v3461_v48 = vmul.f32 1.442695, %v3450_v9 }
 0x91c   :  { %v3463_v63 = vmul.f32 1.442695, %v3451_v45 }
 0x91d   :  { %4981 = vpow2.f32 %v3461_v48 }
 0x91e   :  { %4983 = vpow2.f32 %v3463_v63  ;;  %v5044_v63 = vld [vmem:[%s6351_s0 + $0x68] sm:$0xff] }
 0x91f   :  { %v6010_v34 = vpop.eup %4977 }
 0x920   :  { %v3474_v52 = vsel %vm605_vm2, %v6010_v34, 0.0  ;;  %v3440_v29 = vpop.xlane.xlu1 %3439 }
 0x921   :  { %3475 = vadd.xlane.f32.xlu1 %v3474_v52  ;;  %v3452_v5 = vsub.f32 %v3420_v21, %v3440_v29  ;;  %v3443_v50 = vpop.xlane.xlu0 %3442 }
 0x922   :  { %v3453_v38 = vsub.f32 %v3421_v13, %v3443_v50  ;;  %v5040_v13 = vld [vmem:[%s6351_s0 + $0x28] sm:$0xff] }
 0x923   :  { %v6014_v62 = vpop.eup %4979  ;;  %v3465_v7 = vmul.f32 1.442695, %v3452_v5  ;;  %v5043_v5 = vld [vmem:[%s6351_s0 + $0x48] sm:$0xff] }
 0x924   :  { %v3477_v60 = vsel %vm605_vm2, %v6014_v62, 0.0  ;;  %v4214_v50 = vmul.f32 -1.442695, %v5043_v5 }
 0x925   :  { %3478 = vadd.xlane.f32.xlu0 %v3477_v60  ;;  %4985 = vpow2.f32 %v3465_v7  ;;  %v5045_v7 = vld [vmem:[%s6351_s0 + $0x58] sm:$0xff] }
 0x927   :  { %v6027_v11 = vpop.eup %4981 }
 0x928   :  { %v3446_v24 = vpop.xlane.xlu1 %3445  ;;  %v6029_v21 = vpop.eup %4983  ;;  %v3480_v0 = vsel %vm605_vm2, %v6027_v11, 0.0 }
 0x929   :  { %v3454_v44 = vsub.f32 %v3422_v22, %v3446_v24  ;;  %v4212_v22 = vmul.f32 -1.442695, %v5040_v13  ;;  %v3483_v55 = vsel %vm605_vm2, %v6029_v21, 0.0 }
 0x92f   :  { %v6036_v41 = vpop.eup %4985 }
 0x930   :  { %v3486_v42 = vsel %vm605_vm2, %v6036_v41, 0.0 }
 0x932   :  { %3711 = vrot.lane.b32.xlu1 %v5390_v35, %s5056_s9  ;;  %v3467_v35 = vmul.f32 1.442695, %v3453_v38  ;;  %v4216_v38 = vmul.f32 -1.442695, %v5044_v63 }
 0x934   :  { %4987 = vpow2.f32 %v3467_v35 }
 0x93b   :  { %3759 = vrot.lane.b32.xlu0 %v5414_v57, %s5056_s9  ;;  %v3469_v57 = vmul.f32 1.442695, %v3454_v44  ;;  %v4215_v44 = vmul.f32 -1.442695, %v5045_v7 }
 0x93d   :  { %4989 = vpow2.f32 %v3469_v57  ;;  %v5046_v57 = vld [vmem:[%s6351_s0 + $0x78] sm:$0xff] }
 0x93e   :  { %4991 = vpow2.f32 %v4210_v40  ;;  %v6041_v20 = vpop.eup %4987  ;;  %v4217_v15 = vmul.f32 -1.442695, %v5046_v57 }
 0x93f   :  { %4993 = vpow2.f32 %v4212_v22  ;;  %v3489_v52 = vsel %vm605_vm2, %v6041_v20, 0.0 }
 0x940   :  { %4995 = vpow2.f32 %v4211_v25 }
 0x941   :  { %4997 = vpow2.f32 %v4213_v17 }
 0x947   :  { %v6047_v27 = vpop.eup %4989 }
 0x948   :  { %v3492_v32 = vsel %vm605_vm2, %v6047_v27, 0.0  ;;  %v4992_v60 = vpop.eup %4991 }
 0x949   :  { %v1103_v31 = vadd.f32 1.0, %v4992_v60  ;;  %v4994_v9 = vpop.eup %4993 }
 0x94a   :  { %v4996_v1 = vpop.eup %4995  ;;  %v1105_v29 = vadd.f32 1.0, %v4994_v9 }
 0x94b   :  { %4999 = vrcp.f32 %v1103_v31  ;;  %v1104_v45 = vadd.f32 1.0, %v4996_v1  ;;  %v4998_v48 = vpop.eup %4997  ;;  %v3664_v31 = vpop.permute.xlu0 %3663 }
 0x94c   :  { %5001 = vrcp.f32 %v1105_v29  ;;  %v1106_v24 = vadd.f32 1.0, %v4998_v48  ;;  %v3616_v1 = vpop.permute.xlu1 %3615 }
 0x94d   :  { %5003 = vrcp.f32 %v1104_v45 }
 0x94e   :  { %5005 = vpow2.f32 %v4214_v50 }
 0x94f   :  { %5007 = vrcp.f32 %v1106_v24  ;;  %v3621_v24 = vsel %vm713_vm3, %v3616_v1, 0 }
 0x950   :  { %5009 = vpow2.f32 %v4216_v38 }
 0x951   :  { %5011 = vpow2.f32 %v4215_v44 }
 0x952   :  { %5013 = vpow2.f32 %v4217_v15 }
 0x955   :  { %v5000_v35 = vpop.eup %4999 }
 0x956   :  { %3481 = vadd.xlane.f32.xlu1 %v3480_v0  ;;  %v5002_v40 = vpop.eup %5001 }
 0x957   :  { %v5004_v13 = vpop.eup %5003 }
 0x958   :  { %v5006_v22 = vpop.eup %5005 }
 0x959   :  { %v1107_v0 = vadd.f32 1.0, %v5006_v22 }
 0x95a   :  { %3487 = vadd.xlane.f32.xlu1 %v3486_v42  ;;  %3484 = vadd.xlane.f32.xlu0 %v3483_v55 }
 0x95b   :  { %5015 = vrcp.f32 %v1107_v0 }
 0x95e   :  { %3493 = vadd.xlane.f32.xlu1 %v3492_v32  ;;  %3490 = vadd.xlane.f32.xlu0 %v3489_v52 }
 0x96f   :  { %3807 = vrot.lane.b32.xlu1 %v5427_v18, %s5056_s9  ;;  %v5008_v18 = vpop.eup %5007 }
 0x970   :  { %v5010_v14 = vpop.eup %5009 }
 0x971   :  { %v5012_v25 = vpop.eup %5011  ;;  %v1109_v42 = vadd.f32 1.0, %v5010_v14 }
 0x972   :  { %v1108_v55 = vadd.f32 1.0, %v5012_v25 }
 0x973   :  { %2063 = vrot.lane.b32.xlu1 %v5000_v35, %s5051_s12  ;;  %5017 = vrcp.f32 %v1109_v42 }
 0x974   :  { %3855 = vrot.lane.b32.xlu0 %v5438_v26, %s5056_s9  ;;  %v5014_v26 = vpop.eup %5013  ;;  %5019 = vrcp.f32 %v1108_v55 }
 0x975   :  { %v1110_v8 = vadd.f32 1.0, %v5014_v26  ;;  %v6082_v17 = vpop.eup %5015 }
 0x977   :  { %2067 = vrot.lane.b32.xlu1 %v5002_v40, %s5051_s12  ;;  %5021 = vrcp.f32 %v1110_v8 }
 0x978   :  { %2065 = vrot.lane.b32.xlu0 %v5004_v13, %s5051_s12 }
 0x97b   :  { %2983 = vrot.lane.b32.xlu1 %v5000_v35, %s5053_s28 }
 0x97c   :  { %2069 = vrot.lane.b32.xlu0 %v5008_v18, %s5051_s12 }
 0x97d   :  { %v6087_v32 = vpop.eup %5017 }
 0x97e   :  { %v6090_v52 = vpop.eup %5019 }
 0x97f   :  { %2987 = vrot.lane.b32.xlu1 %v5002_v40, %s5053_s28 }
 0x980   :  { %2985 = vrot.lane.b32.xlu0 %v5004_v13, %s5053_s28 }
 0x981   :  { %v6096_v60 = vpop.eup %5021 }
 0x983   :  { %3903 = vrot.lane.b32.xlu1 %v5000_v35, %s5055_s8 }
 0x984   :  { %2989 = vrot.lane.b32.xlu0 %v5008_v18, %s5053_s28 }
 0x987   :  { %3907 = vrot.lane.b32.xlu1 %v5002_v40, %s5055_s8 }
 0x988   :  { %3905 = vrot.lane.b32.xlu0 %v5004_v13, %s5055_s8 }
 0x98b   :  { %2071 = vrot.lane.b32.xlu1 %v6082_v17, %s5051_s12 }
 0x98c   :  { %3909 = vrot.lane.b32.xlu0 %v5008_v18, %s5055_s8 }
 0x98f   :  { %2075 = vrot.lane.b32.xlu1 %v6087_v32, %s5051_s12 }
 0x990   :  { %2073 = vrot.lane.b32.xlu0 %v6090_v52, %s5051_s12 }
 0x993   :  { %2991 = vrot.lane.b32.xlu1 %v6082_v17, %s5053_s28 }
 0x994   :  { %2077 = vrot.lane.b32.xlu0 %v6096_v60, %s5051_s12 }
 0x997   :  { %2995 = vrot.lane.b32.xlu1 %v6087_v32, %s5053_s28 }
 0x998   :  { %2993 = vrot.lane.b32.xlu0 %v6090_v52, %s5053_s28 }
 0x99b   :  { %3911 = vrot.lane.b32.xlu1 %v6082_v17, %s5055_s8 }
 0x99c   :  { %2997 = vrot.lane.b32.xlu0 %v6096_v60, %s5053_s28 }
 0x99f   :  { %3915 = vrot.lane.b32.xlu1 %v6087_v32, %s5055_s8 }
 0x9a0   :  { %3913 = vrot.lane.b32.xlu0 %v6090_v52, %s5055_s8 }
 0x9a3   :  { %1135 = vrot.lane.b32.xlu1 %v5000_v35, %s5049_s29  ;;  %v3669_v35 = vsel %vm713_vm3, %v3664_v31, 0 }
 0x9a4   :  { %3917 = vrot.lane.b32.xlu0 %v6096_v60, %s5055_s8 }
 0x9a7   :  { %v3473_v9 = vpop.xlane.xlu0 %3472  ;;  %1139 = vrot.lane.b32.xlu1 %v5002_v40, %s5049_s29 }
 0x9a8   :  { %5023 = vrcp.f32 %v3473_v9  ;;  %1137 = vrot.lane.b32.xlu0 %v5004_v13, %s5049_s29 }
 0x9ac   :  { %1141 = vrot.lane.b32.xlu0 %v5008_v18, %s5049_s29 }
 0x9ae   :  { %v3476_v29 = vpop.xlane.xlu1 %3475 }
 0x9af   :  { %5025 = vrcp.f32 %v3476_v29 }
 0x9b2   :  { %v5024_v45 = vpop.eup %5023  ;;  %v3479_v48 = vpop.xlane.xlu0 %3478 }
 0x9b3   :  { %v3496_v5 = vmul.f32 %v5024_v45, %v6006_v47  ;;  %5027 = vrcp.f32 %v3479_v48  ;;  %v3712_v57 = vpop.permute.xlu1 %3711 }
 0x9b4   :  { %v3717_v40 = vsel %vm713_vm3, %v3712_v57, 0 }
 0x9b5   :  { %v3511_v50 = vpack.c.bf16 %v3496_v5, %v3496_v5 }
 0x9b7   :  { %4746 = vmatmul.mubr.msk.bf16.vlgmr.msra.gmra.mrb[108].mxu0 %vm605_vm2, %v3511_v50 }
 0x9b8   :  { %4756 = vmatpush3.bf16.msra.mxu0 %v3621_v24  ;;  %4757 = vmatprep.mubr.msk.bf16.mxu0 %vm5048_vm0, %v6360_v19 }
 0x9b9   :  { %v5026_v63 = vpop.eup %5025  ;;  %4767 = vmatprep.subr.bf16.mxu0 %v6360_v19 }
 0x9ba   :  { %v3498_v38 = vmul.f32 %v5026_v63, %v6010_v34  ;;  %v3760_v34 = vpop.permute.xlu0 %3759 }
 0x9bb   :  { %v3765_v9 = vsel %vm713_vm3, %v3760_v34, 0 }
 0x9bc   :  { %v3512_v7 = vpack.c.bf16 %v3498_v38, %v3498_v38 }
 0x9bd   :  { %v5028_v44 = vpop.eup %5027 }
 0x9be   :  { %v3500_v47 = vmul.f32 %v5028_v44, %v6014_v62  ;;  %4752 = vmatmul.mubr.msk.bf16.vlgmr.msra.gmra.mrb[116].mxu1 %vm605_vm2, %v3512_v7 }
 0x9bf   :  { %4762 = vmatpush3.bf16.msra.mxu1 %v3669_v35  ;;  %4763 = vmatprep.mubr.msk.bf16.mxu1 %vm5048_vm0, %v6360_v19 }
 0x9c0   :  { %v3513_v15 = vpack.c.bf16 %v3500_v47, %v3500_v47  ;;  %4773 = vmatprep.subr.bf16.mxu1 %v6360_v19 }
 0x9c2   :  { %4758 = vmatmul.mubr.msk.bf16.vlgmr.msra.gmra.mrb[112].mxu0 %vm605_vm2, %v3513_v15 }
 0x9c3   :  { %4768 = vmatpush3.bf16.msra.mxu0 %v3717_v40  ;;  %4769 = vmatprep.mubr.msk.bf16.mxu0 %vm5048_vm0, %v6360_v19 }
 0x9c4   :  { %4779 = vmatprep.subr.bf16.mxu0 %v6360_v19 }
 0x9e3   :  { %v3482_v62 = vpop.xlane.xlu1 %3481 }
 0x9e4   :  { %5029 = vrcp.f32 %v3482_v62 }
 0x9e7   :  { %v3488_v13 = vpop.xlane.xlu1 %3487  ;;  %v3485_v22 = vpop.xlane.xlu0 %3484 }
 0x9e8   :  { %5031 = vrcp.f32 %v3488_v13 }
 0x9e9   :  { %5033 = vrcp.f32 %v3485_v22 }
 0x9eb   :  { %v3494_v18 = vpop.xlane.xlu1 %3493  ;;  %v3491_v0 = vpop.xlane.xlu0 %3490 }
 0x9ec   :  { %5035 = vrcp.f32 %v3491_v0 }
 0x9ed   :  { %5037 = vrcp.f32 %v3494_v18 }
 0x9ee   :  { %v5030_v14 = vpop.eup %5029 }
 0x9ef   :  { %v3502_v25 = vmul.f32 %v5030_v14, %v6027_v11  ;;  %v3808_v42 = vpop.permute.xlu1 %3807  ;;  %v3856_v55 = vpop.permute.xlu0 %3855 }
 0x9f0   :  { %v3813_v50 = vsel %vm713_vm3, %v3808_v42, 0 }
 0x9f1   :  { %v3514_v26 = vpack.c.bf16 %v3502_v25, %v3502_v25 }
 0x9f2   :  { %v5032_v8 = vpop.eup %5031 }
 0x9f3   :  { %v5034_v31 = vpop.eup %5033  ;;  %v2064_v1 = vpop.permute.xlu1 %2063  ;;  %4764 = vmatmul.mubr.msk.bf16.vlgmr.msra.gmra.mrb[120].mxu1 %vm605_vm2, %v3514_v26  ;;  %v3506_v11 = vmul.f32 %v5032_v8, %v6036_v41 }
 0x9f4   :  { %v2066_v29 = vpop.permute.xlu0 %2065  ;;  %v3504_v45 = vmul.f32 %v5034_v31, %v6029_v21  ;;  %v2087_v48 = vmul.f32 %v2064_v1, %v5731_v58  ;;  %4774 = vmatpush3.bf16.msra.mxu1 %v3765_v9  ;;  %4775 = vmatprep.mubr.msk.bf16.mxu1 %vm5048_vm0, %v6360_v19 }
 0x9f5   :  { %v2088_v5 = vmul.f32 %v2066_v29, %v5735_v2  ;;  %4785 = vmatprep.subr.bf16.mxu1 %v6360_v19  ;;  %v3861_v2 = vsel %vm713_vm3, %v3856_v55, 0  ;;  %v3516_v41 = vpack.c.bf16 %v3506_v11, %v3506_v11 }
 0x9f6   :  { %v3515_v63 = vpack.c.bf16 %v3504_v45, %v3504_v45  ;;  %v5036_v38 = vpop.eup %5035 }
 0x9f7   :  { %v4819_v24 = vpack.i.bf16 %v2088_v5, %v2087_v48  ;;  %v2068_v7 = vpop.permute.xlu1 %2067  ;;  %v5038_v35 = vpop.eup %5037  ;;  %v3508_v47 = vmul.f32 %v5036_v38, %v6041_v20 }
 0x9f8   :  { %v2070_v44 = vpop.permute.xlu0 %2069  ;;  %v2089_v21 = vmul.f32 %v2068_v7, %v5737_v39  ;;  %4770 = vmatmul.mubr.msk.bf16.vlgmr.msra.gmra.mrb[116].mxu0 %vm605_vm2, %v3515_v63  ;;  %v3510_v34 = vmul.f32 %v5038_v35, %v6047_v27 }
 0x9f9   :  { %v2090_v58 = vmul.f32 %v2070_v44, %v5739_v53  ;;  %4820 = vrot.lane.b32.xlu1 %v4819_v24, %s5055_s8  ;;  %4780 = vmatpush3.bf16.msra.mxu0 %v3813_v50  ;;  %v3517_v13 = vpack.c.bf16 %v3508_v47, %v3508_v47 }
 0x9fa   :  { %4781 = vmatprep.mubr.msk.bf16.mxu0 %vm5048_vm0, %v6360_v19 }
 0x9fb   :  { %v4824_v57 = vpack.i.bf16 %v2090_v58, %v2089_v21  ;;  %v2984_v15 = vpop.permute.xlu1 %2983  ;;  %4776 = vmatmul.mubr.msk.bf16.vlgmr.msra.gmra.mrb[124].mxu1 %vm605_vm2, %v3516_v41  ;;  %v4058_v41 = vld [vmem:[%s6354_s4 + $0x8] sm:$0xff] }
 0x9fc   :  { %v2986_v39 = vpop.permute.xlu0 %2985  ;;  %v3007_v40 = vmul.f32 %v2984_v15, %v5947_v12  ;;  %4786 = vmatpush3.bf16.msra.mxu1 %v3861_v2  ;;  %4787 = vmatprep.mubr.msk.bf16.mxu1 %vm5048_vm0, %v6360_v19  ;;  %v4057_v2 = vld [vmem:[%s6354_s4] sm:$0xff] }
 0x9fd   :  { %v3008_v53 = vmul.f32 %v2986_v39, %v5949_v16  ;;  %4825 = vrot.lane.b32.xlu0 %v4824_v57, %s5055_s8  ;;  %v3518_v16 = vpack.c.bf16 %v3510_v34, %v3510_v34  ;;  %v4069_v47 = vpack.c.bf16 %v4058_v41, %v4057_v2  ;;  %v4062_v34 = vld [vmem:[%s6354_s4 + $0x28] sm:$0xff] }
 0x9ff   :  { %v4829_v62 = vpack.i.bf16 %v3008_v53, %v3007_v40  ;;  %v2988_v20 = vpop.permute.xlu1 %2987  ;;  %v4061_v53 = vld [vmem:[%s6354_s4 + $0x20] sm:$0xff]  ;;  %4791 = vmatprep.subr.bf16.mxu0 %v4069_v47 }
 0xa00   :  { %v2990_v22 = vpop.permute.xlu0 %2989  ;;  %v3009_v18 = vmul.f32 %v2988_v20, %v5951_v36  ;;  %4782 = vmatmul.mubr.msk.bf16.vlgmr.msra.gmra.mrb[120].mxu0 %vm605_vm2, %v3517_v13 }
 0xa01   :  { %v3010_v12 = vmul.f32 %v2990_v22, %v5953_v54  ;;  %4830 = vrot.lane.b32.xlu1 %v4829_v62, %s5053_s28  ;;  %4792 = vmatpush3.bf16.msra.mxu0 %v4069_v47 }
 0xa03   :  { %v4834_v0 = vpack.i.bf16 %v3010_v12, %v3009_v18  ;;  %v3904_v14 = vpop.permute.xlu1 %3903  ;;  %4788 = vmatmul.mubr.msk.bf16.vlgmr.msra.gmra.mrb[128].mxu1 %vm605_vm2, %v3518_v16  ;;  %v4071_v18 = vpack.c.bf16 %v4062_v34, %v4061_v53 }
 0xa04   :  { %v3906_v27 = vpop.permute.xlu0 %3905 }
 0xa05   :  { %1143 = vrot.lane.b32.xlu1 %v6082_v17, %s5049_s29  ;;  %4835 = vrot.lane.b32.xlu0 %v4834_v0, %s5053_s28 }
 0xa07   :  { %v6172_v19 = vpop.permute.xlu1 %3907 }
 0xa08   :  { %v6174_v36 = vpop.permute.xlu0 %3909 }
 0xa09   :  { %1147 = vrot.lane.b32.xlu1 %v6087_v32, %s5049_s29  ;;  %1145 = vrot.lane.b32.xlu0 %v6090_v52, %s5049_s29 }
 0xa0b   :  { %v2072_v54 = vpop.permute.xlu1 %2071 }
 0xa0c   :  { %v2074_v25 = vpop.permute.xlu0 %2073  ;;  %v2091_v42 = vmul.f32 %v2072_v54, %v5741_v61 }
 0xa0d   :  { %v2092_v55 = vmul.f32 %v2074_v25, %v5743_v56  ;;  %1149 = vrot.lane.b32.xlu0 %v6096_v60, %s5049_s29 }
 0xa0f   :  { %v4839_v17 = vpack.i.bf16 %v2092_v55, %v2091_v42  ;;  %v2076_v26 = vpop.permute.xlu1 %2075 }
 0xa10   :  { %v2078_v8 = vpop.permute.xlu0 %2077  ;;  %v2093_v31 = vmul.f32 %v2076_v26, %v5745_v28 }
 0xa11   :  { %v2094_v9 = vmul.f32 %v2078_v8, %v5747_v46  ;;  %4840 = vrot.lane.b32.xlu1 %v4839_v17, %s5055_s8 }
 0xa13   :  { %v4844_v32 = vpack.i.bf16 %v2094_v9, %v2093_v31  ;;  %v2992_v52 = vpop.permute.xlu1 %2991 }
 0xa14   :  { %v2994_v1 = vpop.permute.xlu0 %2993  ;;  %v3011_v29 = vmul.f32 %v2992_v52, %v5955_v6 }
 0xa15   :  { %v3012_v61 = vmul.f32 %v2994_v1, %v5957_v10  ;;  %4845 = vrot.lane.b32.xlu0 %v4844_v32, %s5055_s8 }
 0xa17   :  { %v4854_v56 = vpack.i.bf16 %v3012_v61, %v3011_v29  ;;  %v2996_v60 = vpop.permute.xlu1 %2995 }
 0xa18   :  { %v2998_v45 = vpop.permute.xlu0 %2997  ;;  %v6191_v48 = vmul.f32 %v2996_v60, %v5959_v3 }
 0xa19   :  { %v6194_v28 = vmul.f32 %v2998_v45, %v5961_v4 }
 0xa1b   :  { %v4864_v46 = vpack.i.bf16 %v6194_v28, %v6191_v48  ;;  %v3912_v5 = vpop.permute.xlu1 %3911 }
 0xa1c   :  { %v3914_v52 = vpop.permute.xlu0 %3913 }
 0xa1f   :  { %v6198_v11 = vpop.permute.xlu1 %3915 }
 0xa23   :  { %v6200_v6 = vpop.permute.xlu1 %1135 }
 0xa27   :  { %v6202_v10 = vpop.permute.xlu1 %1139 }
 0xa6b   :  { %v6204_v50 = vpop.permute.xlu1 %4820 }
 0xa73   :  { %v6206_v24 = vpop.permute.xlu1 %4830 }
 0xa77   :  { %v1144_v63 = vpop.permute.xlu1 %1143 }
 0xa78   :  { %v6209_v3 = vmul.f32 %v1144_v63, %v5511_v49  ;;  %v4059_v49 = vld [vmem:[%s6354_s4 + $0x10] sm:$0xff] }
 0xa7b   :  { %v1148_v4 = vpop.permute.xlu1 %1147 }
 0xa7c   :  { %v6212_v38 = vmul.f32 %v1148_v4, %v5515_v30  ;;  %v4060_v30 = vld [vmem:[%s6354_s4 + $0x18] sm:$0xff] }
 0xa7d   :  { %v4070_v40 = vpack.c.bf16 %v4060_v30, %v4059_v49 }
 0xa7f   :  { %4793 = vmatprep.subr.bf16.mxu0 %v4070_v40 }
 0xa80   :  { %4794 = vmatpush3.bf16.msra.mxu0 %v4070_v40 }
 0xa81   :  { %4795 = vmatprep.subr.bf16.mxu0 %v4071_v18 }
 0xa83   :  { %v4841_v28 = vpop.permute.xlu1 %4840 }
 0xa84   :  { %4796 = vmatpush3.bf16.msra.mxu0 %v4071_v18 }
 0xa8a   :  { %v3561_v7 = vpop.f32.mrb[108].mxu0 }
 0xa8b   :  { %v4747_v44 = vpop.f32.mrb[109].mxu0  ;;  %v3927_v57 = vmul.f32 %v3904_v14, %v3561_v7  ;;  %v4063_v14 = vld [vmem:[%s6354_s4 + $0x30] sm:$0xff] }
 0xa8c   :  { %v3564_v21 = vpop.f32.mrb[110].mxu0  ;;  %v3918_v44 = vpop.permute.xlu0 %3917 }
 0xa8d   :  { %v4748_v58 = vpop.f32.mrb[111].mxu0 }
 0xa90   :  { %v1138_v48 = vpop.permute.xlu0 %1137 }
 0xa91   :  { %v3609_v35 = vpop.f32.mrb[116].mxu1  ;;  %v1160_v40 = vmul.f32 %v1138_v48, %v5505_v33 }
 0xa92   :  { %v3928_v15 = vmul.f32 %v3906_v27, %v3609_v35  ;;  %v4753_v39 = vpop.f32.mrb[117].mxu1  ;;  %v4064_v27 = vld [vmem:[%s6354_s4 + $0x38] sm:$0xff] }
 0xa93   :  { %v3612_v62 = vpop.f32.mrb[118].mxu1  ;;  %v4072_v54 = vpack.c.bf16 %v4064_v27, %v4063_v14  ;;  %v4832_v39 = vunpack.i.l.bf16 %v6206_v24 }
 0xa94   :  { %v4849_v13 = vpack.i.bf16 %v3928_v15, %v3927_v57  ;;  %v4754_v20 = vpop.f32.mrb[119].mxu1  ;;  %v4822_v57 = vunpack.i.l.bf16 %v6204_v50  ;;  %v4833_v15 = vunpack.i.h.bf16 %v6206_v24  ;;  %v1142_v33 = vpop.permute.xlu0 %1141 }
 0xa95   :  { %v3657_v22 = vpop.f32.mrb[112].mxu0  ;;  %4797 = vmatprep.subr.bf16.mxu0 %v4072_v54 }
 0xa96   :  { %v4759_v12 = vpop.f32.mrb[113].mxu0  ;;  %4850 = vrot.lane.b32.xlu1 %v4849_v13, %s5051_s12  ;;  %4798 = vmatpush3.bf16.msra.mxu0 %v4072_v54  ;;  %v3929_v42 = vmul.f32 %v6172_v19, %v3657_v22 }
 0xa97   :  { %v3660_v16 = vpop.f32.mrb[114].mxu0 }
 0xa98   :  { %v4760_v0 = vpop.f32.mrb[115].mxu0 }
 0xa9a   :  { %4855 = vrot.lane.b32.xlu1 %v4854_v56, %s5053_s28 }
 0xac6   :  { %v3705_v25 = vpop.f32.mrb[120].mxu1 }
 0xac7   :  { %v3930_v55 = vmul.f32 %v6174_v36, %v3705_v25  ;;  %v4765_v17 = vpop.f32.mrb[121].mxu1 }
 0xac8   :  { %v3708_v26 = vpop.f32.mrb[122].mxu1  ;;  %v1162_v17 = vmul.f32 %v1142_v33, %v5509_v43 }
 0xac9   :  { %v4859_v8 = vpack.i.bf16 %v3930_v55, %v3929_v42  ;;  %v4766_v31 = vpop.f32.mrb[123].mxu1  ;;  %v1161_v55 = vmul.f32 %v6202_v10, %v5507_v37  ;;  %v4843_v37 = vunpack.i.h.bf16 %v4841_v28  ;;  %v4842_v10 = vunpack.i.l.bf16 %v4841_v28 }
 0xacb   :  { %v3753_v9 = vpop.f32.mrb[116].mxu0  ;;  %4860 = vrot.lane.b32.xlu0 %v4859_v8, %s5051_s12 }
 0xacc   :  { %v4771_v32 = vpop.f32.mrb[117].mxu0  ;;  %v3931_v56 = vmul.f32 %v3912_v5, %v3753_v9 }
 0xacd   :  { %v3756_v1 = vpop.f32.mrb[118].mxu0 }
 0xace   :  { %v4772_v29 = vpop.f32.mrb[119].mxu0  ;;  %v3801_v61 = vpop.f32.mrb[124].mxu1 }
 0xacf   :  { %v3932_v60 = vmul.f32 %v3914_v52, %v3801_v61  ;;  %v4777_v45 = vpop.f32.mrb[125].mxu1  ;;  %4865 = vrot.lane.b32.xlu0 %v4864_v46, %s5053_s28  ;;  %v4823_v46 = vunpack.i.h.bf16 %v6204_v50 }
 0xad0   :  { %v3804_v19 = vpop.f32.mrb[126].mxu1 }
 0xad1   :  { %v4869_v36 = vpack.i.bf16 %v3932_v60, %v3931_v56  ;;  %v4778_v63 = vpop.f32.mrb[127].mxu1  ;;  %v4032_v62 = vsel %vm102_vm1, %v1160_v40, %v4823_v46 }
 0xad2   :  { %v4041_v22 = vsel %vm4039_vm4, %v4032_v62, %v4833_v15  ;;  %v4035_v63 = vsel %vm102_vm1, %v6209_v3, %v4842_v10 }
 0xad3   :  { %v3849_v4 = vpop.f32.mrb[120].mxu0  ;;  %4870 = vrot.lane.b32.xlu1 %v4869_v36, %s5051_s12 }
 0xad4   :  { %v4783_v7 = vpop.f32.mrb[121].mxu0  ;;  %v3933_v5 = vmul.f32 %v6198_v11, %v3849_v4  ;;  %v1159_v11 = vmul.f32 %v6200_v6, %v5503_v59  ;;  %v4826_v6 = vpop.permute.xlu0 %4825 }
 0xad5   :  { %v3852_v21 = vpop.f32.mrb[122].mxu0  ;;  %v4828_v27 = vunpack.i.h.bf16 %v4826_v6  ;;  %v4827_v54 = vunpack.i.l.bf16 %v4826_v6 }
 0xad6   :  { %v4784_v58 = vpop.f32.mrb[123].mxu0  ;;  %v3897_v2 = vpop.f32.mrb[128].mxu1  ;;  %v4031_v34 = vsel %vm102_vm1, %v1159_v11, %v4822_v57 }
 0xad7   :  { %v3934_v41 = vmul.f32 %v3918_v44, %v3897_v2  ;;  %v4789_v49 = vpop.f32.mrb[129].mxu1  ;;  %v4040_v50 = vsel %vm4039_vm4, %v4031_v34, %v4832_v39  ;;  %v4034_v8 = vsel %vm102_vm1, %v1162_v17, %v4828_v27  ;;  %v4033_v31 = vsel %vm102_vm1, %v1161_v55, %v4827_v54  ;;  %v4162_v17 = vld [vmem:[%s6356_s3 + $0x20] sm:$0xff] }
 0xad8   :  { %v3900_v35 = vpop.f32.mrb[130].mxu1  ;;  %v4836_v12 = vpop.permute.xlu0 %4835 }
 0xad9   :  { %v4874_v47 = vpack.i.bf16 %v3934_v41, %v3933_v5  ;;  %v4790_v30 = vpop.f32.mrb[131].mxu1  ;;  %v4838_v25 = vunpack.i.h.bf16 %v4836_v12  ;;  %v4837_v42 = vunpack.i.l.bf16 %v4836_v12  ;;  %v4159_v12 = vld [vmem:[%s6356_s3 + $0x8] sm:$0xff] }
 0xadb   :  { %4875 = vrot.lane.b32.xlu0 %v4874_v47, %s5051_s12  ;;  %v4042_v52 = vsel %vm4039_vm4, %v4033_v31, %v4837_v42  ;;  %v4043_v1 = vsel %vm4039_vm4, %v4034_v8, %v4838_v25  ;;  %v4164_v25 = vld [vmem:[%s6356_s3 + $0x30] sm:$0xff]  ;;  %v4165_v31 = vld [vmem:[%s6356_s3 + $0x38] sm:$0xff] }
 0xadc   :  { %v1146_v16 = vpop.permute.xlu0 %1145 }
 0xadd   :  { %v1164_v19 = vmul.f32 %v1146_v16, %v5513_v51 }
 0xadf   :  { %v4036_v4 = vsel %vm102_vm1, %v1164_v19, %v4843_v37 }
 0xae0   :  { %v1150_v0 = vpop.permute.xlu0 %1149 }
 0xae1   :  { %v1166_v3 = vmul.f32 %v1150_v0, %v5528_v23  ;;  %v4266_v23 = vld [vmem:[%s6355_s5] ss:$0 sm:$0xff] }
 0xae4   :  { %v4846_v14 = vpop.permute.xlu0 %4845 }
 0xae5   :  { %v4848_v35 = vunpack.i.h.bf16 %v4846_v14  ;;  %v4847_v51 = vunpack.i.l.bf16 %v4846_v14 }
 0xae7   :  { %v4038_v28 = vsel %vm102_vm1, %v1166_v3, %v4848_v35  ;;  %v4037_v46 = vsel %vm102_vm1, %v6212_v38, %v4847_v51  ;;  %v4160_v38 = vld [vmem:[%s6356_s3 + $0x10] sm:$0xff] }
 0xb08   :  { %v4851_v53 = vpop.permute.xlu1 %4850 }
 0xb09   :  { %v4853_v13 = vunpack.i.h.bf16 %v4851_v53  ;;  %v4852_v20 = vunpack.i.l.bf16 %v4851_v53 }
 0xb0b   :  { %v4049_v24 = vsel %vm4048_vm5, %v4040_v50, %v4852_v20  ;;  %v4050_v18 = vsel %vm4048_vm5, %v4041_v22, %v4853_v13  ;;  %v4158_v50 = vld [vmem:[%s6356_s3] sm:$0xff] }
 0xb0c   :  { %v4065_v59 = vpack.c.bf16 %v4050_v18, %v4049_v24  ;;  %v4856_v29 = vpop.permute.xlu1 %4855  ;;  %v4161_v18 = vld [vmem:[%s6356_s3 + $0x18] sm:$0xff] }
 0xb0d   :  { %v4858_v43 = vunpack.i.h.bf16 %v4856_v29  ;;  %v4857_v45 = vunpack.i.l.bf16 %v4856_v29 }
 0xb0e   :  { %4799 = vmatprep.mubr.msk.bf16.mxu0 %vm4080_vm6, %v4065_v59 }
 0xb0f   :  { %v4044_v21 = vsel %vm4039_vm4, %v4035_v63, %v4857_v45  ;;  %v4045_v58 = vsel %vm4039_vm4, %v4036_v4, %v4858_v43 }
 0xb3d   :  { %v4861_v26 = vpop.permute.xlu0 %4860 }
 0xb3e   :  { %v4863_v9 = vunpack.i.h.bf16 %v4861_v26  ;;  %v4862_v32 = vunpack.i.l.bf16 %v4861_v26 }
 0xb40   :  { %v4051_v61 = vsel %vm4048_vm5, %v4042_v52, %v4862_v32  ;;  %v4052_v56 = vsel %vm4048_vm5, %v4043_v1, %v4863_v9  ;;  %v4163_v1 = vld [vmem:[%s6356_s3 + $0x28] sm:$0xff] }
 0xb41   :  { %v4066_v60 = vpack.c.bf16 %v4052_v56, %v4051_v61  ;;  %v4866_v2 = vpop.permute.xlu0 %4865 }
 0xb42   :  { %v4868_v47 = vunpack.i.h.bf16 %v4866_v2  ;;  %v4867_v30 = vunpack.i.l.bf16 %v4866_v2 }
 0xb43   :  { %4800 = vmatmul.mubr.msk.bf16.vlgmr.msra.gmra.mrb[124].mxu0 %vm4080_vm6, %v4066_v60 }
 0xb44   :  { %v4046_v39 = vsel %vm4039_vm4, %v4037_v46, %v4867_v30  ;;  %v4047_v11 = vsel %vm4039_vm4, %v4038_v28, %v4868_v47 }
 0xb45   :  { %v4871_v36 = vpop.permute.xlu1 %4870 }
 0xb46   :  { %v4873_v7 = vunpack.i.h.bf16 %v4871_v36  ;;  %v4872_v44 = vunpack.i.l.bf16 %v4871_v36 }
 0xb48   :  { %v4053_v5 = vsel %vm4048_vm5, %v4044_v21, %v4872_v44  ;;  %v4054_v41 = vsel %vm4048_vm5, %v4045_v58, %v4873_v7 }
 0xb49   :  { %v4067_v49 = vpack.c.bf16 %v4054_v41, %v4053_v5 }
 0xb4b   :  { %4803 = vmatprep.mubr.msk.bf16.mxu0 %vm4080_vm6, %v4067_v49 }
 0xb4d   :  { %v4876_v48 = vpop.permute.xlu0 %4875 }
 0xb4e   :  { %v4878_v57 = vunpack.i.h.bf16 %v4876_v48  ;;  %v4877_v15 = vunpack.i.l.bf16 %v4876_v48 }
 0xb50   :  { %v4055_v40 = vsel %vm4048_vm5, %v4046_v39, %v4877_v15  ;;  %v4056_v53 = vsel %vm4048_vm5, %v4047_v11, %v4878_v57 }
 0xb51   :  { %v4068_v34 = vpack.c.bf16 %v4056_v53, %v4055_v40 }
 0xb53   :  { %4804 = vmatmul.mubr.msk.bf16.gmra.mrb[128].mxu0 %vm4080_vm6, %v4068_v34 }
 0xc16   :  { %v4801_v62 = vpop.f32.mrb[124].mxu0 }
 0xc17   :  { %v4136_v13 = vadd.f32 %v4801_v62, %v4266_v23  ;;  %v4127_v20 = vpop.f32.mrb[125].mxu0 }
 0xc18   :  { %v4128_v22 = vadd.f32 %v4266_v23, %v4127_v20  ;;  %v4802_v24 = vpop.f32.mrb[126].mxu0 }
 0xc19   :  { %v4168_v59 = vadd.f32 %v4160_v38, %v4136_v13  ;;  %v4139_v33 = vadd.f32 %v4802_v24, %v4266_v23  ;;  %v4130_v6 = vpop.f32.mrb[127].mxu0 }
 0xc1a   :  { %v4166_v16 = vadd.f32 %v4158_v50, %v4128_v22  ;;  %v4131_v0 = vadd.f32 %v4266_v23, %v4130_v6 }
 0xc1b   :  { %4176 = vst.msk [vmem:[%s6357_s6 + $0x10] sm:$0xff] %vm4080_vm6, %v4168_v59  ;;  %v4169_v14 = vadd.f32 %v4161_v18, %v4139_v33 }
 0xc1c   :  { %4174 = vst.msk [vmem:[%s6357_s6] sm:$0xff] %vm4080_vm6, %v4166_v16  ;;  %v4167_v27 = vadd.f32 %v4159_v12, %v4131_v0 }
 0xc1d   :  { %4177 = vst.msk [vmem:[%s6357_s6 + $0x18] sm:$0xff] %vm4080_vm6, %v4169_v14 }
 0xc1e   :  { %4175 = vst.msk [vmem:[%s6357_s6 + $0x8] sm:$0xff] %vm4080_vm6, %v4167_v27 }
 0xc26   :  { %v4805_v54 = vpop.f32.mrb[128].mxu0 }
 0xc27   :  { %v4152_v42 = vadd.f32 %v4805_v54, %v4266_v23  ;;  %v4143_v55 = vpop.f32.mrb[129].mxu0 }
 0xc28   :  { %v4144_v26 = vadd.f32 %v4266_v23, %v4143_v55  ;;  %v4806_v8 = vpop.f32.mrb[130].mxu0 }
 0xc29   :  { %v4172_v9 = vadd.f32 %v4164_v25, %v4152_v42  ;;  %v4155_v32 = vadd.f32 %v4806_v8, %v4266_v23  ;;  %v4146_v52 = vpop.f32.mrb[131].mxu0 }
 0xc2a   :  { %v4170_v29 = vadd.f32 %v4162_v17, %v4144_v26  ;;  %v4147_v61 = vadd.f32 %v4266_v23, %v4146_v52 }
 0xc2b   :  { %4180 = vst.msk [vmem:[%s6357_s6 + $0x30] sm:$0xff] %vm4080_vm6, %v4172_v9  ;;  %v4173_v56 = vadd.f32 %v4165_v31, %v4155_v32 }
 0xc2c   :  { %4178 = vst.msk [vmem:[%s6357_s6 + $0x20] sm:$0xff] %vm4080_vm6, %v4170_v29  ;;  %v4171_v60 = vadd.f32 %v4163_v1, %v4147_v61 }
 0xc2d   :  { %4181 = vst.msk [vmem:[%s6357_s6 + $0x38] sm:$0xff] %vm4080_vm6, %v4173_v56 }
 0xc2e   :  { %4179 = vst.msk [vmem:[%s6357_s6 + $0x28] sm:$0xff] %vm4080_vm6, %v4171_v60 }

</bundles_post_ra>
